<compile_context>
chip_gen: v5e
topology: v5e:2x2
jax: 0.10.0
libtpu: 0.0.40
codegen_flags: <defaults>
</compile_context>

<pallas_src>
import jax
import jax.numpy as jnp
from jax.experimental import pallas as pl
from jax.experimental.pallas import tpu as pltpu

d_model = 512
d_ff = 2048
LN_EPS = 1e-5


def _round_up(v, m):
    return ((v + m - 1) // m) * m


def ffn_kernel(x_ref, w1_ref, w2_ref, o_ref):
    """Grid = (num_token_tiles,). Weights are fully resident in VMEM."""
    x = x_ref[...]                                   # (tm, d_model) f32 (exact residual)
    xb = x.astype(jnp.bfloat16)                      # bf16 operand for the MXU

    # First matmul + ReLU: (tm, d_model) @ (d_model, d_ff) -> f32 accum.
    h = jnp.dot(xb, w1_ref[...], preferred_element_type=jnp.float32)
    h = jnp.maximum(h, 0.0).astype(jnp.bfloat16)     # back to bf16 for the MXU

    # Second matmul: (tm, d_ff) @ (d_ff, d_model) -> f32 accum.
    y = jnp.dot(h, w2_ref[...], preferred_element_type=jnp.float32)

    # Residual add (exact f32) + LayerNorm(d_model), default affine (gamma=1, beta=0).
    y = y + x
    mean = jnp.mean(y, axis=-1, keepdims=True)
    centered = y - mean
    var = jnp.mean(centered * centered, axis=-1, keepdims=True)
    o_ref[...] = (centered * jax.lax.rsqrt(var + LN_EPS)).astype(o_ref.dtype)


def poswise_ffn(x, w1, w2, *, tm=256):
    """x: (B, S, d_model); w1: (d_model, d_ff); w2: (d_ff, d_model)."""
    B, S, D = x.shape
    assert D == d_model
    assert w1.shape == (d_model, d_ff) and w2.shape == (d_ff, d_model)

    M = B * S
    x2d = x.reshape(M, D).astype(jnp.float32)

    # Adapt the token tile to small inputs (avoid computing on padding rows),
    # keeping the (8, 128) sublane/lane divisibility constraint.
    tm_eff = min(tm, _round_up(M, 8))
    M_pad = _round_up(M, tm_eff)
    if M_pad != M:
        # Zero rows LayerNorm to zero (rsqrt(0 + eps) is finite) -> harmless.
        x2d = jnp.pad(x2d, ((0, M_pad - M), (0, 0)))

    # Cast weights once in the wrapper: bf16 weights into HBM (4 MiB total).
    w1b = w1.astype(jnp.bfloat16)
    w2b = w2.astype(jnp.bfloat16)

    out2d = pl.pallas_call(
        ffn_kernel,
        out_shape=jax.ShapeDtypeStruct((M_pad, D), x.dtype),
        grid_spec=pltpu.PrefetchScalarGridSpec(
            num_scalar_prefetch=0,
            grid=(M_pad // tm_eff,),
            in_specs=[
                pl.BlockSpec((tm_eff, D), lambda i: (i, 0)),        # x token tile
                pl.BlockSpec((d_model, d_ff), lambda i: (0, 0)),    # W1 resident
                pl.BlockSpec((d_ff, d_model), lambda i: (0, 0)),    # W2 resident
            ],
            out_specs=pl.BlockSpec((tm_eff, D), lambda i: (i, 0)),
        ),
        compiler_params=pltpu.CompilerParams(
            dimension_semantics=("parallel",),
            vmem_limit_bytes=32 * 1024 * 1024,
        ),
    )(x2d, w1b, w2b)

    return out2d[:M].reshape(B, S, D)


def reference_ffn_f32(x, w1, w2):
    """Pure f32 reference matching the PyTorch module."""
    hp = jax.lax.Precision.HIGHEST
    y = jnp.maximum(jnp.dot(x, w1, precision=hp), 0.0)
    y = jnp.dot(y, w2, precision=hp) + x
    mean = jnp.mean(y, axis=-1, keepdims=True)
    var = jnp.mean((y - mean) ** 2, axis=-1, keepdims=True)
    return (y - mean) * jax.lax.rsqrt(var + LN_EPS)


def reference_ffn_mixed(x, w1, w2):
    """Reference emulating the kernel's bf16-matmul / f32-accumulate numerics."""
    hp = jax.lax.Precision.HIGHEST
    xb = x.astype(jnp.bfloat16).astype(jnp.float32)
    w1b = w1.astype(jnp.bfloat16).astype(jnp.float32)
    w2b = w2.astype(jnp.bfloat16).astype(jnp.float32)
    h = jnp.maximum(jnp.dot(xb, w1b, precision=hp), 0.0)
    h = h.astype(jnp.bfloat16).astype(jnp.float32)
    y = jnp.dot(h, w2b, precision=hp) + x          # residual stays exact f32
    mean = jnp.mean(y, axis=-1, keepdims=True)
    var = jnp.mean((y - mean) ** 2, axis=-1, keepdims=True)
    return (y - mean) * jax.lax.rsqrt(var + LN_EPS)


if __name__ == "__main__":
    key = jax.random.PRNGKey(0)
    kx, k1, k2 = jax.random.split(key, 3)

    B, S = 2, 8  # small batch / seq; d_model=512, d_ff=2048 fixed by the module
    x = jax.random.normal(kx, (B, S, d_model), dtype=jnp.float32)
    # nn.Linear stores (out, in); we use the transposed (in, out) layout here.
    w1 = jax.random.normal(k1, (d_model, d_ff), dtype=jnp.float32) * 0.02
    w2 = jax.random.normal(k2, (d_ff, d_model), dtype=jnp.float32) * 0.02

    out = poswise_ffn(x, w1, w2)
    out = jax.block_until_ready(out)
    assert out.shape == (B, S, d_model)
    assert not jnp.any(jnp.isnan(out))

    # Tight check against a reference that uses the same mixed-precision math.
    ref_mixed = reference_ffn_mixed(x, w1, w2)
    assert jnp.allclose(out, ref_mixed, atol=2e-3, rtol=2e-3), (
        float(jnp.max(jnp.abs(out - ref_mixed))))

    # Looser sanity check against the full-f32 PyTorch-equivalent reference
    # (bf16 matmuls legitimately perturb the result by O(1e-2) after LN).
    ref_f32 = reference_ffn_f32(x, w1, w2)
    assert jnp.allclose(out, ref_f32, atol=5e-2, rtol=5e-2), (
        float(jnp.max(jnp.abs(out - ref_f32))))

    print("KERNEL_OK")
</pallas_src>

<mosaic_0001>
module attributes {stable_mosaic.version = 11 : i64} {
  func.func @ffn_kernel(%arg0: i32, %arg1: memref<16x512xf32, #tpu.memory_space<vmem>>, %arg2: memref<512x2048xbf16, #tpu.memory_space<vmem>>, %arg3: memref<2048x512xbf16, #tpu.memory_space<vmem>>, %arg4: memref<16x512xf32, #tpu.memory_space<vmem>>) attributes {dimension_semantics = [#tpu.dimension_semantics<parallel>], iteration_bounds = array<i64: 1>, scalar_prefetch = 0 : i64, scratch_operands = 0 : i64, tpu.core_type = #tpu.core_type<tc>, window_params = [{transform_indices = @transform_0, window_bounds = array<i64: 16, 512>}, {pipeline_mode = #tpu.pipeline_mode<synchronous>, transform_indices = @transform_1, window_bounds = array<i64: 512, 2048>}, {pipeline_mode = #tpu.pipeline_mode<synchronous>, transform_indices = @transform_2, window_bounds = array<i64: 2048, 512>}, {transform_indices = @transform_3, window_bounds = array<i64: 16, 512>}]} {
    %c0 = arith.constant 0 : index
    %c0_0 = arith.constant 0 : index
    %0 = vector.load %arg1[%c0, %c0_0] : memref<16x512xf32, #tpu.memory_space<vmem>>, vector<16x512xf32>
    %1 = arith.truncf %0 : vector<16x512xf32> to vector<16x512xbf16>
    %c0_1 = arith.constant 0 : index
    %c0_2 = arith.constant 0 : index
    %2 = vector.load %arg2[%c0_1, %c0_2] : memref<512x2048xbf16, #tpu.memory_space<vmem>>, vector<512x2048xbf16>
    %cst = arith.constant dense<0.000000e+00> : vector<16x2048xf32>
    %3 = tpu.matmul %1, %2, %cst {dimension_numbers = #tpu.dot_dimension_numbers<[1], [0], [0], [1], [0, 0, 1, 1], [], []>} : vector<16x512xbf16>, vector<512x2048xbf16>, vector<16x2048xf32> -> vector<16x2048xf32>
    %cst_3 = arith.constant 0.000000e+00 : f32
    %4 = vector.broadcast %cst_3 : f32 to vector<16x2048xf32>
    %5 = arith.maximumf %3, %4 : vector<16x2048xf32>
    %6 = arith.truncf %5 : vector<16x2048xf32> to vector<16x2048xbf16>
    %c0_4 = arith.constant 0 : index
    %c0_5 = arith.constant 0 : index
    %7 = vector.load %arg3[%c0_4, %c0_5] : memref<2048x512xbf16, #tpu.memory_space<vmem>>, vector<2048x512xbf16>
    %cst_6 = arith.constant dense<0.000000e+00> : vector<16x512xf32>
    %8 = tpu.matmul %6, %7, %cst_6 {dimension_numbers = #tpu.dot_dimension_numbers<[1], [0], [0], [1], [0, 0, 1, 1], [], []>} : vector<16x2048xbf16>, vector<2048x512xbf16>, vector<16x512xf32> -> vector<16x512xf32>
    %9 = arith.addf %8, %0 : vector<16x512xf32>
    %cst_7 = arith.constant dense<0.000000e+00> : vector<16xf32>
    %10 = vector.multi_reduction <add>, %9, %cst_7 [1] : vector<16x512xf32> to vector<16xf32>
    %11 = vector.shape_cast %10 : vector<16xf32> to vector<16x1xf32>
    %cst_8 = arith.constant 5.120000e+02 : f32
    %12 = vector.broadcast %cst_8 : f32 to vector<16x1xf32>
    %13 = arith.divf %11, %12 : vector<16x1xf32>
    %14 = vector.broadcast %13 : vector<16x1xf32> to vector<16x512xf32>
    %15 = arith.subf %9, %14 : vector<16x512xf32>
    %16 = arith.mulf %15, %15 : vector<16x512xf32>
    %cst_9 = arith.constant dense<0.000000e+00> : vector<16xf32>
    %17 = vector.multi_reduction <add>, %16, %cst_9 [1] : vector<16x512xf32> to vector<16xf32>
    %18 = vector.shape_cast %17 : vector<16xf32> to vector<16x1xf32>
    %cst_10 = arith.constant 5.120000e+02 : f32
    %19 = vector.broadcast %cst_10 : f32 to vector<16x1xf32>
    %20 = arith.divf %18, %19 : vector<16x1xf32>
    %cst_11 = arith.constant 9.99999974E-6 : f32
    %21 = vector.broadcast %cst_11 : f32 to vector<16x1xf32>
    %22 = arith.addf %20, %21 : vector<16x1xf32>
    %23 = math.rsqrt %22 : vector<16x1xf32>
    %24 = vector.broadcast %23 : vector<16x1xf32> to vector<16x512xf32>
    %25 = arith.mulf %15, %24 : vector<16x512xf32>
    %c0_12 = arith.constant 0 : index
    %c0_13 = arith.constant 0 : index
    %26 = vector.load %arg4[%c0_12, %c0_13] : memref<16x512xf32, #tpu.memory_space<vmem>>, vector<16x512xf32>
    tpu.vector_store %arg4[%c0_12, %c0_13], %25 {strides = array<i32>} : memref<16x512xf32, #tpu.memory_space<vmem>>, vector<16x512xf32>,
    return
  }
  func.func @transform_0(%arg0: i32) -> (i32, i32) {
    %c0_i32 = arith.constant 0 : i32
    %c0_i32_0 = arith.constant 0 : i32
    return %arg0, %c0_i32 : i32, i32
  }
  func.func @transform_1(%arg0: i32) -> (i32, i32) {
    %c0_i32 = arith.constant 0 : i32
    %c0_i32_0 = arith.constant 0 : i32
    %c0_i32_1 = arith.constant 0 : i32
    return %c0_i32, %c0_i32_0 : i32, i32
  }
  func.func @transform_2(%arg0: i32) -> (i32, i32) {
    %c0_i32 = arith.constant 0 : i32
    %c0_i32_0 = arith.constant 0 : i32
    %c0_i32_1 = arith.constant 0 : i32
    return %c0_i32, %c0_i32_0 : i32, i32
  }
  func.func @transform_3(%arg0: i32) -> (i32, i32) {
    %c0_i32 = arith.constant 0 : i32
    %c0_i32_0 = arith.constant 0 : i32
    return %arg0, %c0_i32 : i32, i32
  }
}

</mosaic_0001>

<bundles_post_ra>
// kernel: tpu_custom_call.1
= control target key start
LH: loop header
LB: loop body
LE: loop exit
PB: predicated region body
PF: predicated region fallthrough
CT: control target
= control target key end

     0   :  { %8 = vsyncpa [#allocation3], 0  ;;  %s14058_s0 = inlined_call_operand.hbm [shape: f32[16,512], index: 0, kind: input, shape index: {}]   ;;  %s14059_s1 = inlined_call_operand.hbm [shape: bf16[512,2048], index: 1, kind: input, shape index: {}]   ;;  %s14060_s2 = inlined_call_operand.hbm [shape: bf16[2048,512], index: 2, kind: input, shape index: {}]   ;;  %s14061_s3 = inlined_call_operand.hbm [shape: f32[16,512], index: 3, kind: output, shape index: {}]  }
   0x1   :  { %9 = vsyncpa [#allocation6], 0  ;;  %s28_s14 = sshll.u32 %s14059_s1, 4  ;;  %s29_s14 = int_to_ptr.hbm [resolvable:$true] %s28_s14 }
   0x2   :  { %10 = vsyncpa [#allocation4], 0  ;;  %s13410_s15 = smov [#allocation5]   ;;  %s15_s19 = sshll.u32 %s14058_s0, 4  ;;  %s16_s19 = int_to_ptr.hbm [resolvable:$true] %s15_s19 }
   0x3   :  { %s30_s16 = sshll.u32 %s13410_s15, 4  ;;  %s13411_s20 = smov 1024   ;;  %s31_s16 = int_to_ptr.vmem [resolvable:$true] %s30_s16 }
   0x4   :  { %s13412_s21 = smov 64   ;;  %s13413_s22 = smov [#allocation2]  }
   0x5   :  { %36 = dma.hbm_to_vmem [thread:$0]  %s29_s14, 65536, %s31_s16, [#allocation6], %s13411_s20, %s13411_s20, %s13412_s21  }
   0x6   :  { %s17_s23 = sshll.u32 %s13413_s22, 4  ;;  %s13414_s24 = smov 512   ;;  %s18_s23 = int_to_ptr.vmem [resolvable:$true] %s17_s23 }
   0x7   :  { %s13415_s25 = smov 32   ;;  %s41_s27 = sshll.u32 %s14060_s2, 4  ;;  %s42_s27 = int_to_ptr.hbm [resolvable:$true] %s41_s27 }
   0x8   :  { %23 = dma.hbm_to_vmem [thread:$0]  %s16_s19, 1024, %s18_s23, [#allocation3], %s13414_s24, %s13414_s24, %s13415_s25  }
   0x9   :  { %s13416_s28 = smov [#allocation7]   ;;  %s13417_s29 = smov 256  }
   0xa   :  { %s43_s0 = sshll.u32 %s13416_s28, 4  ;;  %s13418_s30 = smov 16   ;;  %s44_s0 = int_to_ptr.vmem [resolvable:$true] %s43_s0 }
   0xb   :  { %49 = dma.hbm_to_vmem [thread:$0]  %s42_s27, 65536, %s44_s0, [#allocation6], %s13417_s29, %s13417_s29, %s13418_s30  }
   0xc   :  { %13404 = dma.done.wait [#allocation3], 1024  }
   0xd   :  { %13405 = vsyncadd [#allocation3], 4294966272 }
   0xe   :  { %13406 = dma.done.wait [#allocation6], 131072  }
   0xf   :  { %13407 = vsyncadd [#allocation6], 4294836224  ;;  %v8613_v0 = vld [vmem:[#allocation5 + $0x380] sm:$0xf]  ;;  %s13420_s2 = smov [#allocation8]   ;;  %s8149_s7 = sshll.u32 %s14061_s3, 4  ;;  %s8150_s7 = int_to_ptr.hbm [resolvable:$true] %s8149_s7 }
  0x10   :  { %v12379_v1 = vld [vmem:[#allocation5 + $0x3bc] sm:$0xf0]  ;;  %s8147_s4 = sshll.u32 %s13420_s2, 4  ;;  %s8148_s4 = int_to_ptr.vmem [resolvable:$true] %s8147_s4 }
  0x11   :  { %v9125_v2 = vld [vmem:[#allocation5 + $0x780] sm:$0xf]  ;;  %v8614_v3 = vor.u32 %v12379_v1, %v8613_v0 }
  0x12   :  { %v12507_v4 = vld [vmem:[#allocation5 + $0x7bc] sm:$0xf0] }
  0x13   :  { %v9637_v5 = vld [vmem:[#allocation5 + $0xb80] sm:$0xf]  ;;  %v9126_v7 = vor.u32 %v12507_v4, %v9125_v2  ;;  %3146 = vmatpush.bf16.msra.mxu0 %v8614_v3 }
  0x14   :  { %v12635_v6 = vld [vmem:[#allocation5 + $0xbbc] sm:$0xf0] }
  0x15   :  { %v9638_v8 = vor.u32 %v12635_v6, %v9637_v5  ;;  %v10149_v9 = vld [vmem:[#allocation5 + $0xf80] sm:$0xf]  ;;  %3160 = vmatpush.bf16.msra.mxu1 %v9126_v7 }
  0x16   :  { %v12763_v10 = vld [vmem:[#allocation5 + $0xfbc] sm:$0xf0] }
  0x17   :  { %v8549_v11 = vld [vmem:[#allocation5 + $0x300] sm:$0xf]  ;;  %v10150_v12 = vor.u32 %v12763_v10, %v10149_v9  ;;  %3174 = vmatpush.bf16.msra.mxu2 %v9638_v8 }
  0x18   :  { %v12363_v13 = vld [vmem:[#allocation5 + $0x33c] sm:$0xf0] }
  0x19   :  { %v9061_v14 = vld [vmem:[#allocation5 + $0x700] sm:$0xf]  ;;  %v8550_v16 = vor.u32 %v12363_v13, %v8549_v11  ;;  %3188 = vmatpush.bf16.msra.mxu3 %v10150_v12 }
  0x1a   :  { %v12491_v15 = vld [vmem:[#allocation5 + $0x73c] sm:$0xf0] }
  0x1b   :  { %v9062_v17 = vor.u32 %v12491_v15, %v9061_v14  ;;  %v9573_v18 = vld [vmem:[#allocation5 + $0xb00] sm:$0xf]  ;;  %3147 = vmatpush.bf16.msra.mxu0 %v8550_v16 }
  0x1c   :  { %v12619_v19 = vld [vmem:[#allocation5 + $0xb3c] sm:$0xf0] }
  0x1d   :  { %v10085_v20 = vld [vmem:[#allocation5 + $0xf00] sm:$0xf]  ;;  %v9574_v21 = vor.u32 %v12619_v19, %v9573_v18  ;;  %3161 = vmatpush.bf16.msra.mxu1 %v9062_v17 }
  0x1e   :  { %v12747_v22 = vld [vmem:[#allocation5 + $0xf3c] sm:$0xf0] }
  0x1f   :  { %v8485_v23 = vld [vmem:[#allocation5 + $0x280] sm:$0xf]  ;;  %v10086_v25 = vor.u32 %v12747_v22, %v10085_v20  ;;  %3175 = vmatpush.bf16.msra.mxu2 %v9574_v21 }
  0x20   :  { %v12347_v24 = vld [vmem:[#allocation5 + $0x2bc] sm:$0xf0] }
  0x21   :  { %v8997_v26 = vld [vmem:[#allocation5 + $0x680] sm:$0xf]  ;;  %v8486_v29 = vor.u32 %v12347_v24, %v8485_v23  ;;  %3189 = vmatpush.bf16.msra.mxu3 %v10086_v25 }
  0x22   :  { %v12475_v27 = vld [vmem:[#allocation5 + $0x6bc] sm:$0xf0] }
  0x23   :  { %v9509_v28 = vld [vmem:[#allocation5 + $0xa80] sm:$0xf]  ;;  %v8998_v33 = vor.u32 %v12475_v27, %v8997_v26  ;;  %3148 = vmatpush.bf16.msra.mxu0 %v8486_v29  ;;  %v8615_v29 = vld [vmem:[#allocation5 + $0x3c0] sm:$0xf0] }
  0x24   :  { %v12603_v30 = vld [vmem:[#allocation5 + $0xabc] sm:$0xf0] }
  0x25   :  { %v10021_v31 = vld [vmem:[#allocation5 + $0xe80] sm:$0xf]  ;;  %v9510_v34 = vor.u32 %v12603_v30, %v9509_v28  ;;  %3162 = vmatpush.bf16.msra.mxu1 %v8998_v33  ;;  %v12371_v28 = vld [vmem:[#allocation5 + $0x384] sm:$0xf] }
  0x26   :  { %v12731_v32 = vld [vmem:[#allocation5 + $0xebc] sm:$0xf0]  ;;  %v12499_v30 = vld [vmem:[#allocation5 + $0x784] sm:$0xf] }
  0x27   :  { %v8421_v35 = vld [vmem:[#allocation5 + $0x200] sm:$0xf]  ;;  %v10022_v38 = vor.u32 %v12731_v32, %v10021_v31  ;;  %3176 = vmatpush.bf16.msra.mxu2 %v9510_v34  ;;  %v9127_v32 = vld [vmem:[#allocation5 + $0x7c0] sm:$0xf0] }
  0x28   :  { %v12331_v36 = vld [vmem:[#allocation5 + $0x23c] sm:$0xf0]  ;;  %v12627_v33 = vld [vmem:[#allocation5 + $0xb84] sm:$0xf] }
  0x29   :  { %v8933_v37 = vld [vmem:[#allocation5 + $0x600] sm:$0xf]  ;;  %v8422_v44 = vor.u32 %v12331_v36, %v8421_v35  ;;  %3190 = vmatpush.bf16.msra.mxu3 %v10022_v38  ;;  %v9639_v34 = vld [vmem:[#allocation5 + $0xbc0] sm:$0xf0] }
  0x2a   :  { %v12459_v39 = vld [vmem:[#allocation5 + $0x63c] sm:$0xf0]  ;;  %v10151_v38 = vld [vmem:[#allocation5 + $0xfc0] sm:$0xf0] }
  0x2b   :  { %v9445_v40 = vld [vmem:[#allocation5 + $0xa00] sm:$0xf]  ;;  %v8934_v45 = vor.u32 %v12459_v39, %v8933_v37  ;;  %3149 = vmatpush.bf16.msra.mxu0 %v8422_v44  ;;  %v12755_v37 = vld [vmem:[#allocation5 + $0xf84] sm:$0xf] }
  0x2c   :  { %v12587_v41 = vld [vmem:[#allocation5 + $0xa3c] sm:$0xf0]  ;;  %v8551_v44 = vld [vmem:[#allocation5 + $0x340] sm:$0xf0] }
  0x2d   :  { %v9957_v42 = vld [vmem:[#allocation5 + $0xe00] sm:$0xf]  ;;  %v9446_v46 = vor.u32 %v12587_v41, %v9445_v40  ;;  %3163 = vmatpush.bf16.msra.mxu1 %v8934_v45  ;;  %v8618_v40 = vor.u32 %v12371_v28, %v8615_v29  ;;  %v9130_v41 = vor.u32 %v12499_v30, %v9127_v32  ;;  %v12483_v45 = vld [vmem:[#allocation5 + $0x704] sm:$0xf]  ;;  %v67_v28 = vld [vmem:[#allocation2 + $0x28] sm:$0xff] }
  0x2e   :  { %v12715_v43 = vld [vmem:[#allocation5 + $0xe3c] sm:$0xf0]  ;;  %v8871_v30 = vld [vmem:[#allocation5 + $0x5c0] sm:$0xf0] }
  0x2f   :  { %v8357_v47 = vld [vmem:[#allocation5 + $0x180] sm:$0xf]  ;;  %v9958_v50 = vor.u32 %v12715_v43, %v9957_v42  ;;  %3177 = vmatpush.bf16.msra.mxu2 %v9446_v46  ;;  %v9642_v42 = vor.u32 %v12627_v33, %v9639_v34  ;;  %v12355_v43 = vld [vmem:[#allocation5 + $0x304] sm:$0xf]  ;;  %v10154_v46 = vor.u32 %v12755_v37, %v10151_v38 }
  0x30   :  { %v12315_v48 = vld [vmem:[#allocation5 + $0x1bc] sm:$0xf0]  ;;  %v9383_v32 = vld [vmem:[#allocation5 + $0x9c0] sm:$0xf0] }
  0x31   :  { %v8869_v49 = vld [vmem:[#allocation5 + $0x580] sm:$0xf]  ;;  %v8358_v56 = vor.u32 %v12315_v48, %v8357_v47  ;;  %3191 = vmatpush.bf16.msra.mxu3 %v9958_v50  ;;  %v9063_v47 = vld [vmem:[#allocation5 + $0x740] sm:$0xf0] }
  0x32   :  { %v12443_v51 = vld [vmem:[#allocation5 + $0x5bc] sm:$0xf0]  ;;  %v12611_v48 = vld [vmem:[#allocation5 + $0xb04] sm:$0xf] }
  0x33   :  { %v9381_v52 = vld [vmem:[#allocation5 + $0x980] sm:$0xf]  ;;  %v8870_v57 = vor.u32 %v12443_v51, %v8869_v49  ;;  %3150 = vmatpush.bf16.msra.mxu0 %v8358_v56  ;;  %v9575_v49 = vld [vmem:[#allocation5 + $0xb40] sm:$0xf0] }
  0x34   :  { %v12571_v53 = vld [vmem:[#allocation5 + $0x9bc] sm:$0xf0]  ;;  %v12739_v50 = vld [vmem:[#allocation5 + $0xf04] sm:$0xf] }
  0x35   :  { %v9893_v54 = vld [vmem:[#allocation5 + $0xd80] sm:$0xf]  ;;  %v9382_v58 = vor.u32 %v12571_v53, %v9381_v52  ;;  %3164 = vmatpush.bf16.msra.mxu1 %v8870_v57  ;;  %v10087_v51 = vld [vmem:[#allocation5 + $0xf40] sm:$0xf0]  ;;  %v8554_v52 = vor.u32 %v12355_v43, %v8551_v44  ;;  %v9066_v53 = vor.u32 %v12483_v45, %v9063_v47 }
  0x36   :  { %v12699_v55 = vld [vmem:[#allocation5 + $0xdbc] sm:$0xf0]  ;;  %v8487_v56 = vld [vmem:[#allocation5 + $0x2c0] sm:$0xf0] }
  0x37   :  { %v8293_v59 = vld [vmem:[#allocation5 + $0x100] sm:$0xf]  ;;  %v9894_v62 = vor.u32 %v12699_v55, %v9893_v54  ;;  %3178 = vmatpush.bf16.msra.mxu2 %v9382_v58  ;;  %v9578_v54 = vor.u32 %v12611_v48, %v9575_v49  ;;  %v12339_v55 = vld [vmem:[#allocation5 + $0x284] sm:$0xf]  ;;  %v10090_v58 = vor.u32 %v12739_v50, %v10087_v51 }
  0x38   :  { %v12299_v60 = vld [vmem:[#allocation5 + $0x13c] sm:$0xf0]  ;;  %v12467_v57 = vld [vmem:[#allocation5 + $0x684] sm:$0xf] }
  0x39   :  { %v8805_v61 = vld [vmem:[#allocation5 + $0x500] sm:$0xf]  ;;  %v8294_v4 = vor.u32 %v12299_v60, %v8293_v59  ;;  %3192 = vmatpush.bf16.msra.mxu3 %v9894_v62  ;;  %v8999_v59 = vld [vmem:[#allocation5 + $0x6c0] sm:$0xf0] }
  0x3a   :  { %v12427_v63 = vld [vmem:[#allocation5 + $0x53c] sm:$0xf0]  ;;  %v12595_v60 = vld [vmem:[#allocation5 + $0xa84] sm:$0xf] }
  0x3b   :  { %v9317_v0 = vld [vmem:[#allocation5 + $0x900] sm:$0xf]  ;;  %v8806_v5 = vor.u32 %v12427_v63, %v8805_v61  ;;  %3151 = vmatpush.bf16.msra.mxu0 %v8294_v4  ;;  %v9511_v61 = vld [vmem:[#allocation5 + $0xac0] sm:$0xf0]  ;;  %v68_v4 = vld [vmem:[#allocation2 + $0x30] sm:$0xff] }
  0x3c   :  { %v12555_v1 = vld [vmem:[#allocation5 + $0x93c] sm:$0xf0]  ;;  %v12723_v62 = vld [vmem:[#allocation5 + $0xe84] sm:$0xf] }
  0x3d   :  { %v9829_v2 = vld [vmem:[#allocation5 + $0xd00] sm:$0xf]  ;;  %v9318_v6 = vor.u32 %v12555_v1, %v9317_v0  ;;  %3165 = vmatpush.bf16.msra.mxu1 %v8806_v5  ;;  %v10023_v63 = vld [vmem:[#allocation5 + $0xec0] sm:$0xf0]  ;;  %v8490_v1 = vor.u32 %v12339_v55, %v8487_v56  ;;  %v9002_v5 = vor.u32 %v12467_v57, %v8999_v59 }
  0x3e   :  { %v12683_v3 = vld [vmem:[#allocation5 + $0xd3c] sm:$0xf0]  ;;  %v12323_v0 = vld [vmem:[#allocation5 + $0x204] sm:$0xf] }
  0x3f   :  { %v8229_v7 = vld [vmem:[#allocation5 + $0x80] sm:$0xf]  ;;  %v9830_v10 = vor.u32 %v12683_v3, %v9829_v2  ;;  %3179 = vmatpush.bf16.msra.mxu2 %v9318_v6  ;;  %v8423_v2 = vld [vmem:[#allocation5 + $0x240] sm:$0xf0]  ;;  %v64_v3 = vld [vmem:[#allocation2 + $0x10] sm:$0xff]  ;;  %v9514_v6 = vor.u32 %v12595_v60, %v9511_v61 }
  0x40   :  { %v12283_v8 = vld [vmem:[#allocation5 + $0xbc] sm:$0xf0]  ;;  %v12691_v34 = vld [vmem:[#allocation5 + $0xd84] sm:$0xf] }
  0x41   :  { %v8741_v9 = vld [vmem:[#allocation5 + $0x480] sm:$0xf]  ;;  %v8230_v16 = vor.u32 %v12283_v8, %v8229_v7  ;;  %3193 = vmatpush.bf16.msra.mxu3 %v9830_v10  ;;  %v12451_v7 = vld [vmem:[#allocation5 + $0x604] sm:$0xf]  ;;  %v13453_v8 = vpack.c.bf16 %v68_v4, %v64_v3  ;;  %v69_v10 = vld [vmem:[#allocation2 + $0x38] sm:$0xff] }
  0x42   :  { %v12411_v11 = vld [vmem:[#allocation5 + $0x4bc] sm:$0xf0]  ;;  %v8807_v43 = vld [vmem:[#allocation5 + $0x540] sm:$0xf0] }
  0x43   :  { %v9253_v12 = vld [vmem:[#allocation5 + $0x880] sm:$0xf]  ;;  %v8742_v19 = vor.u32 %v12411_v11, %v8741_v9  ;;  %3152 = vmatpush.bf16.msra.mxu0 %v8230_v16  ;;  %v65_v9 = vld [vmem:[#allocation2 + $0x18] sm:$0xff]  ;;  %v10026_v11 = vor.u32 %v12723_v62, %v10023_v63  ;;  %v12707_v16 = vld [vmem:[#allocation5 + $0xe04] sm:$0xf] }
  0x44   :  { %v12539_v13 = vld [vmem:[#allocation5 + $0x8bc] sm:$0xf0]  ;;  %v12547_v44 = vld [vmem:[#allocation5 + $0x904] sm:$0xf] }
  0x45   :  { %v9765_v14 = vld [vmem:[#allocation5 + $0xc80] sm:$0xf]  ;;  %v9254_v20 = vor.u32 %v12539_v13, %v9253_v12  ;;  %3166 = vmatpush.bf16.msra.mxu1 %v8742_v19  ;;  %v8935_v12 = vld [vmem:[#allocation5 + $0x640] sm:$0xf0]  ;;  %v8426_v19 = vor.u32 %v12323_v0, %v8423_v2 }
  0x46   :  { %v12667_v15 = vld [vmem:[#allocation5 + $0xcbc] sm:$0xf0]  ;;  %v12579_v13 = vld [vmem:[#allocation5 + $0xa04] sm:$0xf] }
  0x47   :  { %v8165_v17 = vld [vmem:[#allocation5] sm:$0xf]  ;;  %v9766_v24 = vor.u32 %v12667_v15, %v9765_v14  ;;  %3180 = vmatpush.bf16.msra.mxu2 %v9254_v20  ;;  %v9447_v14 = vld [vmem:[#allocation5 + $0xa40] sm:$0xf0]  ;;  %v13455_v15 = vpack.c.bf16 %v69_v10, %v65_v9  ;;  %v8621_v9 = vld [vmem:[#allocation5 + $0x388] sm:$0xf] }
  0x48   :  { %v12267_v18 = vld [vmem:[#allocation5 + $0x3c] sm:$0xf0]  ;;  %v8359_v20 = vld [vmem:[#allocation5 + $0x1c0] sm:$0xf0]  ;;  %v12380_v10 = vld [vmem:[#allocation5 + $0x3c4] sm:$0xf0] }
  0x49   :  { %v8677_v21 = vld [vmem:[#allocation5 + $0x400] sm:$0xf]  ;;  %v8166_v31 = vor.u32 %v12267_v18, %v8165_v17  ;;  %3194 = vmatpush.bf16.msra.mxu3 %v9766_v24  ;;  %v9959_v17 = vld [vmem:[#allocation5 + $0xe40] sm:$0xf0]  ;;  %v9450_v24 = vor.u32 %v12579_v13, %v9447_v14  ;;  %v12508_v13 = vld [vmem:[#allocation5 + $0x7c4] sm:$0xf0] }
  0x4a   :  { %v12395_v22 = vld [vmem:[#allocation5 + $0x43c] sm:$0xf0]  ;;  %v12307_v18 = vld [vmem:[#allocation5 + $0x184] sm:$0xf]  ;;  %v9962_v29 = vor.u32 %v12707_v16, %v9959_v17  ;;  %v9645_v14 = vld [vmem:[#allocation5 + $0xb88] sm:$0xf] }
  0x4b   :  { %v9189_v23 = vld [vmem:[#allocation5 + $0x800] sm:$0xf]  ;;  %v8678_v35 = vor.u32 %v12395_v22, %v8677_v21  ;;  %3153 = vmatpush.bf16.msra.mxu0 %v8166_v31  ;;  %v12563_v31 = vld [vmem:[#allocation5 + $0x984] sm:$0xf]  ;;  %v12636_v16 = vld [vmem:[#allocation5 + $0xbc4] sm:$0xf0] }
  0x4c   :  { %v12523_v25 = vld [vmem:[#allocation5 + $0x83c] sm:$0xf0]  ;;  %v9386_v38 = vor.u32 %v12563_v31, %v9383_v32  ;;  %v9319_v45 = vld [vmem:[#allocation5 + $0x940] sm:$0xf0]  ;;  %v9581_v31 = vld [vmem:[#allocation5 + $0xb08] sm:$0xf] }
  0x4d   :  { %v9701_v26 = vld [vmem:[#allocation5 + $0xc00] sm:$0xf]  ;;  %v9190_v36 = vor.u32 %v12523_v25, %v9189_v23  ;;  %3167 = vmatpush.bf16.msra.mxu1 %v8678_v35  ;;  %v8938_v23 = vor.u32 %v12451_v7, %v8935_v12  ;;  %v12435_v25 = vld [vmem:[#allocation5 + $0x584] sm:$0xf]  ;;  %v9322_v50 = vor.u32 %v12547_v44, %v9319_v45  ;;  %v12620_v32 = vld [vmem:[#allocation5 + $0xb44] sm:$0xf0] }
  0x4e   :  { %v12651_v27 = vld [vmem:[#allocation5 + $0xc3c] sm:$0xf0]  ;;  %v9895_v35 = vld [vmem:[#allocation5 + $0xdc0] sm:$0xf0]  ;;  %v8874_v37 = vor.u32 %v12435_v25, %v8871_v30  ;;  %v8557_v25 = vld [vmem:[#allocation5 + $0x308] sm:$0xf] }
  0x4f   :  { %v9702_v39 = vor.u32 %v12651_v27, %v9701_v26  ;;  %3181 = vmatpush.bf16.msra.mxu2 %v9190_v36  ;;  %3202 = vmatpush.bf16.msrb.mxu0 %v8618_v40  ;;  %v62_v21 = vld [vmem:[#allocation2] sm:$0xff]  ;;  %v63_v27 = vld [vmem:[#allocation2 + $0x8] sm:$0xff]  ;;  %v8362_v36 = vor.u32 %v12307_v18, %v8359_v20 }
  0x50   :  { %v66_v22 = vld [vmem:[#allocation2 + $0x20] sm:$0xff]  ;;  %v13461_v33 = vpack.c.bf16 %v67_v28, %v63_v27  ;;  %v12764_v20 = vld [vmem:[#allocation5 + $0xfc4] sm:$0xf0] }
  0x51   :  { %3195 = vmatpush.bf16.msra.mxu3 %v9702_v39  ;;  %3216 = vmatpush.bf16.msrb.mxu1 %v9130_v41  ;;  %v13459_v26 = vpack.c.bf16 %v66_v22, %v62_v21  ;;  %v12291_v39 = vld [vmem:[#allocation5 + $0x104] sm:$0xf]  ;;  %v8622_v22 = vor.u32 %v12380_v10, %v8621_v9  ;;  %v12364_v27 = vld [vmem:[#allocation5 + $0x344] sm:$0xf0] }
  0x52   :  { %3182 = vmatmul.bf16.vlgmr.msra.gmra.mxu2 %v13453_v8  ;;  %3168 = vmatmul.bf16.vlgmr.msra.gmra.mxu1 %v13461_v33  ;;  %v8295_v40 = vld [vmem:[#allocation5 + $0x140] sm:$0xf0]  ;;  %v9069_v28 = vld [vmem:[#allocation5 + $0x708] sm:$0xf] }
  0x53   :  { %3230 = vmatpush.bf16.msrb.mxu2 %v9642_v42  ;;  %3203 = vmatpush.bf16.msrb.mxu0 %v8554_v52  ;;  %v12419_v41 = vld [vmem:[#allocation5 + $0x504] sm:$0xf]  ;;  %v9898_v42 = vor.u32 %v12691_v34, %v9895_v35  ;;  %v8298_v48 = vor.u32 %v12291_v39, %v8295_v40  ;;  %v12492_v30 = vld [vmem:[#allocation5 + $0x744] sm:$0xf0] }
  0x54   :  { %3196 = vmatmul.bf16.vlgmr.msra.gmra.mxu3 %v13455_v15  ;;  %3154 = vmatmul.bf16.vlgmr.msra.gmra.mxu0 %v13459_v26  ;;  %v9831_v47 = vld [vmem:[#allocation5 + $0xd40] sm:$0xf0]  ;;  %v8810_v49 = vor.u32 %v12419_v41, %v8807_v43  ;;  %v10093_v34 = vld [vmem:[#allocation5 + $0xf08] sm:$0xf] }
  0x55   :  { %3244 = vmatpush.bf16.msrb.mxu3 %v10154_v46  ;;  %3217 = vmatpush.bf16.msrb.mxu1 %v9066_v53  ;;  %v12675_v46 = vld [vmem:[#allocation5 + $0xd04] sm:$0xf]  ;;  %v12748_v35 = vld [vmem:[#allocation5 + $0xf44] sm:$0xf0] }
  0x56   :  { %v12275_v51 = vld [vmem:[#allocation5 + $0x84] sm:$0xf]  ;;  %v8493_v39 = vld [vmem:[#allocation5 + $0x288] sm:$0xf] }
  0x57   :  { %3231 = vmatpush.bf16.msrb.mxu2 %v9578_v54  ;;  %3204 = vmatpush.bf16.msrb.mxu0 %v8490_v1  ;;  %v8231_v52 = vld [vmem:[#allocation5 + $0xc0] sm:$0xf0]  ;;  %v9834_v54 = vor.u32 %v12675_v46, %v9831_v47  ;;  %v12348_v40 = vld [vmem:[#allocation5 + $0x2c4] sm:$0xf0] }
  0x58   :  { %v12403_v53 = vld [vmem:[#allocation5 + $0x484] sm:$0xf]  ;;  %v8234_v60 = vor.u32 %v12275_v51, %v8231_v52  ;;  %v9005_v41 = vld [vmem:[#allocation5 + $0x688] sm:$0xf] }
  0x59   :  { %3245 = vmatpush.bf16.msrb.mxu3 %v10090_v58  ;;  %3218 = vmatpush.bf16.msrb.mxu1 %v9002_v5  ;;  %v8743_v55 = vld [vmem:[#allocation5 + $0x4c0] sm:$0xf0]  ;;  %v12476_v43 = vld [vmem:[#allocation5 + $0x6c4] sm:$0xf0] }
  0x5a   :  { %v12531_v56 = vld [vmem:[#allocation5 + $0x884] sm:$0xf]  ;;  %v8746_v63 = vor.u32 %v12403_v53, %v8743_v55  ;;  %v9517_v44 = vld [vmem:[#allocation5 + $0xa88] sm:$0xf] }
  0x5b   :  { %3232 = vmatpush.bf16.msrb.mxu2 %v9514_v6  ;;  %3205 = vmatpush.bf16.msrb.mxu0 %v8426_v19  ;;  %v9255_v57 = vld [vmem:[#allocation5 + $0x8c0] sm:$0xf0]  ;;  %v10157_v19 = vld [vmem:[#allocation5 + $0xf88] sm:$0xf] }
  0x5c   :  { %v12659_v58 = vld [vmem:[#allocation5 + $0xc84] sm:$0xf]  ;;  %v9258_v0 = vor.u32 %v12531_v56, %v9255_v57  ;;  %v12604_v45 = vld [vmem:[#allocation5 + $0xac4] sm:$0xf0] }
  0x5d   :  { %3246 = vmatpush.bf16.msrb.mxu3 %v10026_v11  ;;  %3219 = vmatpush.bf16.msrb.mxu1 %v8938_v23  ;;  %v9767_v59 = vld [vmem:[#allocation5 + $0xcc0] sm:$0xf0]  ;;  %v9133_v11 = vld [vmem:[#allocation5 + $0x788] sm:$0xf] }
  0x5e   :  { %v12259_v61 = vld [vmem:[#allocation5 + $0x4] sm:$0xf]  ;;  %v9770_v4 = vor.u32 %v12659_v58, %v9767_v59  ;;  %v9134_v23 = vor.u32 %v12508_v13, %v9133_v11  ;;  %v10029_v46 = vld [vmem:[#allocation5 + $0xe88] sm:$0xf] }
  0x5f   :  { %3233 = vmatpush.bf16.msrb.mxu2 %v9450_v24  ;;  %3206 = vmatpush.bf16.msrb.mxu0 %v8362_v36  ;;  %v8167_v62 = vld [vmem:[#allocation5 + $0x40] sm:$0xf0]  ;;  %v9646_v24 = vor.u32 %v12636_v16, %v9645_v14  ;;  %v8558_v36 = vor.u32 %v12364_v27, %v8557_v25  ;;  %v12732_v47 = vld [vmem:[#allocation5 + $0xec4] sm:$0xf0] }
  0x60   :  { %v12387_v1 = vld [vmem:[#allocation5 + $0x404] sm:$0xf]  ;;  %v8170_v12 = vor.u32 %v12259_v61, %v8167_v62  ;;  %v8429_v51 = vld [vmem:[#allocation5 + $0x208] sm:$0xf] }
  0x61   :  { %3247 = vmatpush.bf16.msrb.mxu3 %v9962_v29  ;;  %3220 = vmatpush.bf16.msrb.mxu1 %v8874_v37  ;;  %v8679_v2 = vld [vmem:[#allocation5 + $0x440] sm:$0xf0]  ;;  %v10158_v29 = vor.u32 %v12764_v20, %v10157_v19  ;;  %v9070_v37 = vor.u32 %v12492_v30, %v9069_v28  ;;  %v12332_v52 = vld [vmem:[#allocation5 + $0x244] sm:$0xf0] }
  0x62   :  { %v12515_v3 = vld [vmem:[#allocation5 + $0x804] sm:$0xf]  ;;  %v8682_v17 = vor.u32 %v12387_v1, %v8679_v2  ;;  %v8941_v53 = vld [vmem:[#allocation5 + $0x608] sm:$0xf] }
  0x63   :  { %3234 = vmatpush.bf16.msrb.mxu2 %v9386_v38  ;;  %3207 = vmatpush.bf16.msrb.mxu0 %v8298_v48  ;;  %v9191_v5 = vld [vmem:[#allocation5 + $0x840] sm:$0xf0]  ;;  %v9582_v38 = vor.u32 %v12620_v32, %v9581_v31  ;;  %v8494_v48 = vor.u32 %v12348_v40, %v8493_v39  ;;  %v12460_v55 = vld [vmem:[#allocation5 + $0x644] sm:$0xf0] }
  0x64   :  { %v12643_v6 = vld [vmem:[#allocation5 + $0xc04] sm:$0xf]  ;;  %v9194_v18 = vor.u32 %v12515_v3, %v9191_v5  ;;  %v9453_v56 = vld [vmem:[#allocation5 + $0xa08] sm:$0xf]  ;;  %v8942_v61 = vor.u32 %v12460_v55, %v8941_v53  ;;  %v12628_v53 = vld [vmem:[#allocation5 + $0xb8c] sm:$0xf] }
  0x65   :  { %3248 = vmatpush.bf16.msrb.mxu3 %v9898_v42  ;;  %3221 = vmatpush.bf16.msrb.mxu1 %v8810_v49  ;;  %v9703_v7 = vld [vmem:[#allocation5 + $0xc40] sm:$0xf0]  ;;  %v10094_v42 = vor.u32 %v12748_v35, %v10093_v34  ;;  %v9006_v49 = vor.u32 %v12476_v43, %v9005_v41  ;;  %v12588_v57 = vld [vmem:[#allocation5 + $0xa44] sm:$0xf0] }
  0x66   :  { %v9706_v21 = vor.u32 %v12643_v6, %v9703_v7  ;;  %v9965_v58 = vld [vmem:[#allocation5 + $0xe08] sm:$0xf]  ;;  %v9454_v62 = vor.u32 %v12588_v57, %v9453_v56  ;;  %v12756_v57 = vld [vmem:[#allocation5 + $0xf8c] sm:$0xf] }
  0x67   :  { %3235 = vmatpush.bf16.msrb.mxu2 %v9322_v50  ;;  %3208 = vmatpush.bf16.msrb.mxu0 %v8234_v60  ;;  %v9518_v50 = vor.u32 %v12604_v45, %v9517_v44  ;;  %v12716_v59 = vld [vmem:[#allocation5 + $0xe44] sm:$0xf0]  ;;  %v8430_v60 = vor.u32 %v12332_v52, %v8429_v51  ;;  %v9135_v52 = vld [vmem:[#allocation5 + $0x7c8] sm:$0xf0] }
  0x68   :  { %v8877_v1 = vld [vmem:[#allocation5 + $0x588] sm:$0xf]  ;;  %v9966_v2 = vor.u32 %v12716_v59, %v9965_v58  ;;  %v10159_v58 = vld [vmem:[#allocation5 + $0xfc8] sm:$0xf0] }
  0x69   :  { %3249 = vmatpush.bf16.msrb.mxu3 %v9834_v54  ;;  %3222 = vmatpush.bf16.msrb.mxu1 %v8746_v63  ;;  %v10030_v54 = vor.u32 %v12732_v47, %v10029_v46  ;;  %v8365_v63 = vld [vmem:[#allocation5 + $0x188] sm:$0xf] }
  0x6a   :  { %v12444_v3 = vld [vmem:[#allocation5 + $0x5c4] sm:$0xf0] }
  0x6b   :  { %3236 = vmatpush.bf16.msrb.mxu2 %v9258_v0  ;;  %3209 = vmatpush.bf16.msrb.mxu0 %v8170_v12  ;;  %v12316_v0 = vld [vmem:[#allocation5 + $0x1c4] sm:$0xf0]  ;;  %v8878_v10 = vor.u32 %v12444_v3, %v8877_v1  ;;  %v12484_v1 = vld [vmem:[#allocation5 + $0x70c] sm:$0xf] }
  0x6c   :  { %v12572_v5 = vld [vmem:[#allocation5 + $0x9c4] sm:$0xf0]  ;;  %v8366_v9 = vor.u32 %v12316_v0, %v8365_v63  ;;  %v12356_v63 = vld [vmem:[#allocation5 + $0x30c] sm:$0xf] }
  0x6d   :  { %3250 = vmatpush.bf16.msrb.mxu3 %v9770_v4  ;;  %3223 = vmatpush.bf16.msrb.mxu1 %v8682_v17  ;;  %v9389_v4 = vld [vmem:[#allocation5 + $0x988] sm:$0xf]  ;;  %v8559_v0 = vld [vmem:[#allocation5 + $0x348] sm:$0xf0] }
  0x6e   :  { %3210 = vmatmul.bf16.vlgmr.msrb.gmra.mxu0 %v13459_v26  ;;  %v9901_v6 = vld [vmem:[#allocation5 + $0xd88] sm:$0xf]  ;;  %v9390_v11 = vor.u32 %v12572_v5, %v9389_v4  ;;  %v9071_v3 = vld [vmem:[#allocation5 + $0x748] sm:$0xf0] }
  0x6f   :  { %3237 = vmatpush.bf16.msrb.mxu2 %v9194_v18  ;;  %3258 = vmatpush.bf16.msra.mxu0 %v8622_v22  ;;  %v12700_v7 = vld [vmem:[#allocation5 + $0xdc4] sm:$0xf0]  ;;  %v12612_v4 = vld [vmem:[#allocation5 + $0xb0c] sm:$0xf] }
  0x70   :  { %3224 = vmatmul.bf16.vlgmr.msrb.gmra.mxu1 %v13461_v33  ;;  %v8301_v12 = vld [vmem:[#allocation5 + $0x108] sm:$0xf]  ;;  %v9902_v16 = vor.u32 %v12700_v7, %v9901_v6  ;;  %v9583_v5 = vld [vmem:[#allocation5 + $0xb48] sm:$0xf0] }
  0x71   :  { %3251 = vmatpush.bf16.msrb.mxu3 %v9706_v21  ;;  %3272 = vmatpush.bf16.msra.mxu1 %v9134_v23  ;;  %v12300_v13 = vld [vmem:[#allocation5 + $0x144] sm:$0xf0]  ;;  %v12740_v6 = vld [vmem:[#allocation5 + $0xf0c] sm:$0xf] }
  0x72   :  { %3238 = vmatmul.bf16.vlgmr.msrb.gmra.mxu2 %v13453_v8  ;;  %v8813_v14 = vld [vmem:[#allocation5 + $0x508] sm:$0xf]  ;;  %v8302_v22 = vor.u32 %v12300_v13, %v8301_v12  ;;  %v10095_v7 = vld [vmem:[#allocation5 + $0xf48] sm:$0xf0] }
  0x73   :  { %3286 = vmatpush.bf16.msra.mxu2 %v9646_v24  ;;  %3259 = vmatpush.bf16.msra.mxu0 %v8558_v36  ;;  %v12428_v17 = vld [vmem:[#allocation5 + $0x544] sm:$0xf0]  ;;  %v12340_v12 = vld [vmem:[#allocation5 + $0x28c] sm:$0xf] }
  0x74   :  { %3252 = vmatmul.bf16.vlgmr.msrb.gmra.mxu3 %v13455_v15  ;;  %v9325_v18 = vld [vmem:[#allocation5 + $0x908] sm:$0xf]  ;;  %v8814_v23 = vor.u32 %v12428_v17, %v8813_v14  ;;  %v8495_v13 = vld [vmem:[#allocation5 + $0x2c8] sm:$0xf0] }
  0x75   :  { %3300 = vmatpush.bf16.msra.mxu3 %v10158_v29  ;;  %3273 = vmatpush.bf16.msra.mxu1 %v9070_v37  ;;  %v12556_v19 = vld [vmem:[#allocation5 + $0x944] sm:$0xf0]  ;;  %v12468_v14 = vld [vmem:[#allocation5 + $0x68c] sm:$0xf] }
  0x76   :  { %v9837_v20 = vld [vmem:[#allocation5 + $0xd08] sm:$0xf]  ;;  %v9326_v24 = vor.u32 %v12556_v19, %v9325_v18  ;;  %v9007_v17 = vld [vmem:[#allocation5 + $0x6c8] sm:$0xf0] }
  0x77   :  { %3287 = vmatpush.bf16.msra.mxu2 %v9582_v38  ;;  %3260 = vmatpush.bf16.msra.mxu0 %v8494_v48  ;;  %v12684_v21 = vld [vmem:[#allocation5 + $0xd44] sm:$0xf0]  ;;  %v12372_v48 = vld [vmem:[#allocation5 + $0x38c] sm:$0xf] }
  0x78   :  { %v8237_v25 = vld [vmem:[#allocation5 + $0x88] sm:$0xf]  ;;  %v9838_v29 = vor.u32 %v12684_v21, %v9837_v20  ;;  %v12596_v18 = vld [vmem:[#allocation5 + $0xa8c] sm:$0xf] }
  0x79   :  { %3301 = vmatpush.bf16.msra.mxu3 %v10094_v42  ;;  %3274 = vmatpush.bf16.msra.mxu1 %v9006_v49  ;;  %v12284_v27 = vld [vmem:[#allocation5 + $0xc4] sm:$0xf0]  ;;  %v8623_v49 = vld [vmem:[#allocation5 + $0x3c8] sm:$0xf0] }
  0x7a   :  { %v8749_v28 = vld [vmem:[#allocation5 + $0x488] sm:$0xf]  ;;  %v8238_v36 = vor.u32 %v12284_v27, %v8237_v25  ;;  %v9519_v19 = vld [vmem:[#allocation5 + $0xac8] sm:$0xf0] }
  0x7b   :  { %3288 = vmatpush.bf16.msra.mxu2 %v9518_v50  ;;  %3261 = vmatpush.bf16.msra.mxu0 %v8430_v60  ;;  %v12412_v30 = vld [vmem:[#allocation5 + $0x4c4] sm:$0xf0]  ;;  %v12500_v50 = vld [vmem:[#allocation5 + $0x78c] sm:$0xf]  ;;  %v8626_v60 = vor.u32 %v12372_v48, %v8623_v49 }
  0x7c   :  { %v9261_v31 = vld [vmem:[#allocation5 + $0x888] sm:$0xf]  ;;  %v8750_v39 = vor.u32 %v12412_v30, %v8749_v28  ;;  %v12724_v20 = vld [vmem:[#allocation5 + $0xe8c] sm:$0xf] }
  0x7d   :  { %3302 = vmatpush.bf16.msra.mxu3 %v10030_v54  ;;  %3275 = vmatpush.bf16.msra.mxu1 %v8942_v61  ;;  %v12540_v32 = vld [vmem:[#allocation5 + $0x8c4] sm:$0xf0]  ;;  %v9647_v54 = vld [vmem:[#allocation5 + $0xbc8] sm:$0xf0]  ;;  %v9138_v61 = vor.u32 %v12500_v50, %v9135_v52 }
  0x7e   :  { %v9773_v34 = vld [vmem:[#allocation5 + $0xc88] sm:$0xf]  ;;  %v9262_v40 = vor.u32 %v12540_v32, %v9261_v31  ;;  %v10031_v21 = vld [vmem:[#allocation5 + $0xec8] sm:$0xf0] }
  0x7f   :  { %3289 = vmatpush.bf16.msra.mxu2 %v9454_v62  ;;  %3262 = vmatpush.bf16.msra.mxu0 %v8366_v9  ;;  %v12668_v35 = vld [vmem:[#allocation5 + $0xcc4] sm:$0xf0]  ;;  %v9650_v62 = vor.u32 %v12628_v53, %v9647_v54  ;;  %v8562_v9 = vor.u32 %v12356_v63, %v8559_v0  ;;  %v12324_v25 = vld [vmem:[#allocation5 + $0x20c] sm:$0xf] }
  0x80   :  { %v8173_v37 = vld [vmem:[#allocation5 + $0x8] sm:$0xf]  ;;  %v9774_v44 = vor.u32 %v12668_v35, %v9773_v34  ;;  %v8431_v27 = vld [vmem:[#allocation5 + $0x248] sm:$0xf0] }
  0x81   :  { %3303 = vmatpush.bf16.msra.mxu3 %v9966_v2  ;;  %3276 = vmatpush.bf16.msra.mxu1 %v8878_v10  ;;  %v12268_v38 = vld [vmem:[#allocation5 + $0x44] sm:$0xf0]  ;;  %v10162_v2 = vor.u32 %v12756_v57, %v10159_v58  ;;  %v9074_v10 = vor.u32 %v12484_v1, %v9071_v3  ;;  %v12452_v28 = vld [vmem:[#allocation5 + $0x60c] sm:$0xf] }
  0x82   :  { %v8685_v41 = vld [vmem:[#allocation5 + $0x408] sm:$0xf]  ;;  %v8174_v51 = vor.u32 %v12268_v38, %v8173_v37  ;;  %v8943_v30 = vld [vmem:[#allocation5 + $0x648] sm:$0xf0] }
  0x83   :  { %3290 = vmatpush.bf16.msra.mxu2 %v9390_v11  ;;  %3263 = vmatpush.bf16.msra.mxu0 %v8302_v22  ;;  %v12396_v42 = vld [vmem:[#allocation5 + $0x444] sm:$0xf0]  ;;  %v9586_v11 = vor.u32 %v12612_v4, %v9583_v5  ;;  %v8498_v22 = vor.u32 %v12340_v12, %v8495_v13  ;;  %v12580_v31 = vld [vmem:[#allocation5 + $0xa0c] sm:$0xf]  ;;  %v8946_v37 = vor.u32 %v12452_v28, %v8943_v30  ;;  %v9653_v28 = vld [vmem:[#allocation5 + $0xb90] sm:$0xf] }
  0x84   :  { %v9197_v43 = vld [vmem:[#allocation5 + $0x808] sm:$0xf]  ;;  %v8686_v55 = vor.u32 %v12396_v42, %v8685_v41  ;;  %v9455_v32 = vld [vmem:[#allocation5 + $0xa48] sm:$0xf0] }
  0x85   :  { %3304 = vmatpush.bf16.msra.mxu3 %v9902_v16  ;;  %3277 = vmatpush.bf16.msra.mxu1 %v8814_v23  ;;  %v12524_v45 = vld [vmem:[#allocation5 + $0x844] sm:$0xf0]  ;;  %v10098_v16 = vor.u32 %v12740_v6, %v10095_v7  ;;  %v9010_v23 = vor.u32 %v12468_v14, %v9007_v17  ;;  %v12708_v34 = vld [vmem:[#allocation5 + $0xe0c] sm:$0xf]  ;;  %v9458_v38 = vor.u32 %v12580_v31, %v9455_v32  ;;  %v10165_v32 = vld [vmem:[#allocation5 + $0xf90] sm:$0xf] }
  0x86   :  { %v9709_v46 = vld [vmem:[#allocation5 + $0xc08] sm:$0xf]  ;;  %v9198_v56 = vor.u32 %v12524_v45, %v9197_v43  ;;  %v9967_v35 = vld [vmem:[#allocation5 + $0xe48] sm:$0xf0] }
  0x87   :  { %3291 = vmatpush.bf16.msra.mxu2 %v9326_v24  ;;  %v12652_v47 = vld [vmem:[#allocation5 + $0xc44] sm:$0xf0]  ;;  %3264 = vmatpush.bf16.msra.mxu0 %v8238_v36  ;;  %v9522_v24 = vor.u32 %v12596_v18, %v9519_v19  ;;  %v8434_v36 = vor.u32 %v12324_v25, %v8431_v27  ;;  %v12436_v41 = vld [vmem:[#allocation5 + $0x58c] sm:$0xf]  ;;  %v9970_v42 = vor.u32 %v12708_v34, %v9967_v35  ;;  %v12509_v27 = vld [vmem:[#allocation5 + $0x7cc] sm:$0xf0] }
  0x88   :  { %v9710_v59 = vor.u32 %v12652_v47, %v9709_v46  ;;  %v8879_v43 = vld [vmem:[#allocation5 + $0x5c8] sm:$0xf0]  ;;  %v12765_v34 = vld [vmem:[#allocation5 + $0xfcc] sm:$0xf0] }
  0x89   :  { %3305 = vmatpush.bf16.msra.mxu3 %v9838_v29  ;;  %3278 = vmatpush.bf16.msra.mxu1 %v8750_v39  ;;  %v10034_v29 = vor.u32 %v12724_v20, %v10031_v21  ;;  %v12308_v39 = vld [vmem:[#allocation5 + $0x18c] sm:$0xf]  ;;  %v8882_v49 = vor.u32 %v12436_v41, %v8879_v43  ;;  %v9077_v41 = vld [vmem:[#allocation5 + $0x710] sm:$0xf] }
  0x8a   :  { %v9391_v45 = vld [vmem:[#allocation5 + $0x9c8] sm:$0xf0]  ;;  %v12493_v43 = vld [vmem:[#allocation5 + $0x74c] sm:$0xf0] }
  0x8b   :  { %3292 = vmatpush.bf16.msra.mxu2 %v9262_v40  ;;  %3265 = vmatpush.bf16.msra.mxu0 %v8174_v51  ;;  %v8367_v40 = vld [vmem:[#allocation5 + $0x1c8] sm:$0xf0] }
  0x8c   :  { %v12692_v46 = vld [vmem:[#allocation5 + $0xd8c] sm:$0xf]  ;;  %v8370_v48 = vor.u32 %v12308_v39, %v8367_v40  ;;  %v8565_v39 = vld [vmem:[#allocation5 + $0x310] sm:$0xf] }
  0x8d   :  { %3306 = vmatpush.bf16.msra.mxu3 %v9774_v44  ;;  %3279 = vmatpush.bf16.msra.mxu1 %v8686_v55  ;;  %v12564_v44 = vld [vmem:[#allocation5 + $0x98c] sm:$0xf]  ;;  %v12365_v40 = vld [vmem:[#allocation5 + $0x34c] sm:$0xf0] }
  0x8e   :  { %3266 = vmatmul.bf16.vlgmr.msra.gmra.mxu0 %v13459_v26  ;;  %v9903_v47 = vld [vmem:[#allocation5 + $0xdc8] sm:$0xf0]  ;;  %v9394_v50 = vor.u32 %v12564_v44, %v9391_v45  ;;  %v9589_v44 = vld [vmem:[#allocation5 + $0xb10] sm:$0xf] }
  0x8f   :  { %3293 = vmatpush.bf16.msra.mxu2 %v9198_v56  ;;  %3314 = vmatpush.bf16.msrb.mxu0 %v8626_v60  ;;  %v12292_v51 = vld [vmem:[#allocation5 + $0x10c] sm:$0xf]  ;;  %v9906_v54 = vor.u32 %v12692_v46, %v9903_v47  ;;  %v12621_v45 = vld [vmem:[#allocation5 + $0xb4c] sm:$0xf0] }
  0x90   :  { %3280 = vmatmul.bf16.vlgmr.msra.gmra.mxu1 %v13461_v33  ;;  %v8303_v52 = vld [vmem:[#allocation5 + $0x148] sm:$0xf0]  ;;  %v10101_v46 = vld [vmem:[#allocation5 + $0xf10] sm:$0xf] }
  0x91   :  { %3307 = vmatpush.bf16.msra.mxu3 %v9710_v59  ;;  %3328 = vmatpush.bf16.msrb.mxu1 %v9138_v61  ;;  %v12420_v53 = vld [vmem:[#allocation5 + $0x50c] sm:$0xf]  ;;  %v8306_v60 = vor.u32 %v12292_v51, %v8303_v52  ;;  %v12749_v47 = vld [vmem:[#allocation5 + $0xf4c] sm:$0xf0] }
  0x92   :  { %3294 = vmatmul.bf16.vlgmr.msra.gmra.mxu2 %v13453_v8  ;;  %v8815_v55 = vld [vmem:[#allocation5 + $0x548] sm:$0xf0]  ;;  %v8501_v51 = vld [vmem:[#allocation5 + $0x290] sm:$0xf] }
  0x93   :  { %3342 = vmatpush.bf16.msrb.mxu2 %v9650_v62  ;;  %3315 = vmatpush.bf16.msrb.mxu0 %v8562_v9  ;;  %v12548_v56 = vld [vmem:[#allocation5 + $0x90c] sm:$0xf]  ;;  %v8818_v61 = vor.u32 %v12420_v53, %v8815_v55  ;;  %v12349_v52 = vld [vmem:[#allocation5 + $0x2cc] sm:$0xf0] }
  0x94   :  { %3308 = vmatmul.bf16.vlgmr.msra.gmra.mxu3 %v13455_v15  ;;  %v9327_v57 = vld [vmem:[#allocation5 + $0x948] sm:$0xf0]  ;;  %v9013_v53 = vld [vmem:[#allocation5 + $0x690] sm:$0xf] }
  0x95   :  { %3356 = vmatpush.bf16.msrb.mxu3 %v10162_v2  ;;  %3329 = vmatpush.bf16.msrb.mxu1 %v9074_v10  ;;  %v12676_v58 = vld [vmem:[#allocation5 + $0xd0c] sm:$0xf]  ;;  %v9330_v62 = vor.u32 %v12548_v56, %v9327_v57  ;;  %v12477_v55 = vld [vmem:[#allocation5 + $0x6cc] sm:$0xf0] }
  0x96   :  { %v9839_v59 = vld [vmem:[#allocation5 + $0xd48] sm:$0xf0]  ;;  %v9525_v56 = vld [vmem:[#allocation5 + $0xa90] sm:$0xf] }
  0x97   :  { %3343 = vmatpush.bf16.msrb.mxu2 %v9586_v11  ;;  %3316 = vmatpush.bf16.msrb.mxu0 %v8498_v22  ;;  %v12276_v63 = vld [vmem:[#allocation5 + $0x8c] sm:$0xf]  ;;  %v9842_v2 = vor.u32 %v12676_v58, %v9839_v59  ;;  %v8629_v22 = vld [vmem:[#allocation5 + $0x390] sm:$0xf] }
  0x98   :  { %v8239_v0 = vld [vmem:[#allocation5 + $0xc8] sm:$0xf0]  ;;  %v12605_v57 = vld [vmem:[#allocation5 + $0xacc] sm:$0xf0] }
  0x99   :  { %3357 = vmatpush.bf16.msrb.mxu3 %v10098_v16  ;;  %3330 = vmatpush.bf16.msrb.mxu1 %v9010_v23  ;;  %v12404_v1 = vld [vmem:[#allocation5 + $0x48c] sm:$0xf]  ;;  %v8242_v9 = vor.u32 %v12276_v63, %v8239_v0  ;;  %v12381_v23 = vld [vmem:[#allocation5 + $0x3cc] sm:$0xf0] }
  0x9a   :  { %v8751_v3 = vld [vmem:[#allocation5 + $0x4c8] sm:$0xf0]  ;;  %v10037_v58 = vld [vmem:[#allocation5 + $0xe90] sm:$0xf] }
  0x9b   :  { %3344 = vmatpush.bf16.msrb.mxu2 %v9522_v24  ;;  %3317 = vmatpush.bf16.msrb.mxu0 %v8434_v36  ;;  %v12532_v4 = vld [vmem:[#allocation5 + $0x88c] sm:$0xf]  ;;  %v8754_v12 = vor.u32 %v12404_v1, %v8751_v3  ;;  %v9141_v24 = vld [vmem:[#allocation5 + $0x790] sm:$0xf]  ;;  %v8630_v36 = vor.u32 %v12381_v23, %v8629_v22 }
  0x9c   :  { %v9263_v5 = vld [vmem:[#allocation5 + $0x8c8] sm:$0xf0]  ;;  %v12733_v59 = vld [vmem:[#allocation5 + $0xecc] sm:$0xf0] }
  0x9d   :  { %3358 = vmatpush.bf16.msrb.mxu3 %v10034_v29  ;;  %3331 = vmatpush.bf16.msrb.mxu1 %v8946_v37  ;;  %v12660_v6 = vld [vmem:[#allocation5 + $0xc8c] sm:$0xf]  ;;  %v9266_v13 = vor.u32 %v12532_v4, %v9263_v5  ;;  %v12637_v29 = vld [vmem:[#allocation5 + $0xbcc] sm:$0xf0]  ;;  %v9142_v37 = vor.u32 %v12509_v27, %v9141_v24 }
  0x9e   :  { %v9775_v7 = vld [vmem:[#allocation5 + $0xcc8] sm:$0xf0]  ;;  %v8437_v63 = vld [vmem:[#allocation5 + $0x210] sm:$0xf] }
  0x9f   :  { %3345 = vmatpush.bf16.msrb.mxu2 %v9458_v38  ;;  %3318 = vmatpush.bf16.msrb.mxu0 %v8370_v48  ;;  %v12260_v10 = vld [vmem:[#allocation5 + $0xc] sm:$0xf]  ;;  %v9778_v18 = vor.u32 %v12660_v6, %v9775_v7  ;;  %v9654_v38 = vor.u32 %v12637_v29, %v9653_v28  ;;  %v8566_v48 = vor.u32 %v12365_v40, %v8565_v39  ;;  %v12333_v0 = vld [vmem:[#allocation5 + $0x24c] sm:$0xf0] }
  0xa0   :  { %v8175_v11 = vld [vmem:[#allocation5 + $0x48] sm:$0xf0]  ;;  %v8949_v1 = vld [vmem:[#allocation5 + $0x610] sm:$0xf] }
  0xa1   :  { %3359 = vmatpush.bf16.msrb.mxu3 %v9970_v42  ;;  %3332 = vmatpush.bf16.msrb.mxu1 %v8882_v49  ;;  %v12388_v14 = vld [vmem:[#allocation5 + $0x40c] sm:$0xf]  ;;  %v8178_v25 = vor.u32 %v12260_v10, %v8175_v11  ;;  %v10166_v42 = vor.u32 %v12765_v34, %v10165_v32  ;;  %v9078_v49 = vor.u32 %v12493_v43, %v9077_v41  ;;  %v12461_v3 = vld [vmem:[#allocation5 + $0x64c] sm:$0xf0] }
  0xa2   :  { %v8687_v16 = vld [vmem:[#allocation5 + $0x448] sm:$0xf0]  ;;  %v9461_v4 = vld [vmem:[#allocation5 + $0xa10] sm:$0xf]  ;;  %v8950_v10 = vor.u32 %v12461_v3, %v8949_v1  ;;  %v12629_v1 = vld [vmem:[#allocation5 + $0xb94] sm:$0xf] }
  0xa3   :  { %3346 = vmatpush.bf16.msrb.mxu2 %v9394_v50  ;;  %3319 = vmatpush.bf16.msrb.mxu0 %v8306_v60  ;;  %v12516_v17 = vld [vmem:[#allocation5 + $0x80c] sm:$0xf]  ;;  %v8690_v30 = vor.u32 %v12388_v14, %v8687_v16  ;;  %v9590_v50 = vor.u32 %v12621_v45, %v9589_v44  ;;  %v8502_v60 = vor.u32 %v12349_v52, %v8501_v51  ;;  %v12589_v5 = vld [vmem:[#allocation5 + $0xa4c] sm:$0xf0] }
  0xa4   :  { %v9199_v19 = vld [vmem:[#allocation5 + $0x848] sm:$0xf0]  ;;  %v9973_v6 = vld [vmem:[#allocation5 + $0xe10] sm:$0xf]  ;;  %v9462_v11 = vor.u32 %v12589_v5, %v9461_v4  ;;  %v12757_v5 = vld [vmem:[#allocation5 + $0xf94] sm:$0xf] }
  0xa5   :  { %3360 = vmatpush.bf16.msrb.mxu3 %v9906_v54  ;;  %3333 = vmatpush.bf16.msrb.mxu1 %v8818_v61  ;;  %v12644_v20 = vld [vmem:[#allocation5 + $0xc0c] sm:$0xf]  ;;  %v9202_v31 = vor.u32 %v12516_v17, %v9199_v19  ;;  %v10102_v54 = vor.u32 %v12749_v47, %v10101_v46  ;;  %v9014_v61 = vor.u32 %v12477_v55, %v9013_v53  ;;  %v12717_v7 = vld [vmem:[#allocation5 + $0xe4c] sm:$0xf0] }
  0xa6   :  { %v9711_v21 = vld [vmem:[#allocation5 + $0xc48] sm:$0xf0]  ;;  %v8885_v14 = vld [vmem:[#allocation5 + $0x590] sm:$0xf]  ;;  %v9974_v16 = vor.u32 %v12717_v7, %v9973_v6  ;;  %v10167_v6 = vld [vmem:[#allocation5 + $0xfd0] sm:$0xf0] }
  0xa7   :  { %3347 = vmatpush.bf16.msrb.mxu2 %v9330_v62  ;;  %3320 = vmatpush.bf16.msrb.mxu0 %v8242_v9  ;;  %v9714_v35 = vor.u32 %v12644_v20, %v9711_v21  ;;  %v9526_v62 = vor.u32 %v12605_v57, %v9525_v56  ;;  %v8438_v9 = vor.u32 %v12333_v0, %v8437_v63  ;;  %v12445_v17 = vld [vmem:[#allocation5 + $0x5cc] sm:$0xf0]  ;;  %v9143_v0 = vld [vmem:[#allocation5 + $0x7d0] sm:$0xf0] }
  0xa8   :  { %v12573_v19 = vld [vmem:[#allocation5 + $0x9cc] sm:$0xf0]  ;;  %v8886_v23 = vor.u32 %v12445_v17, %v8885_v14  ;;  %v12485_v14 = vld [vmem:[#allocation5 + $0x714] sm:$0xf] }
  0xa9   :  { %3361 = vmatpush.bf16.msrb.mxu3 %v9842_v2  ;;  %3334 = vmatpush.bf16.msrb.mxu1 %v8754_v12  ;;  %v10038_v2 = vor.u32 %v12733_v59, %v10037_v58  ;;  %v8373_v12 = vld [vmem:[#allocation5 + $0x190] sm:$0xf]  ;;  %v9079_v17 = vld [vmem:[#allocation5 + $0x750] sm:$0xf0] }
  0xaa   :  { %v9909_v20 = vld [vmem:[#allocation5 + $0xd90] sm:$0xf] }
  0xab   :  { %3348 = vmatpush.bf16.msrb.mxu2 %v9266_v13  ;;  %3321 = vmatpush.bf16.msrb.mxu0 %v8178_v25  ;;  %v12317_v13 = vld [vmem:[#allocation5 + $0x1cc] sm:$0xf0] }
  0xac   :  { %v12701_v21 = vld [vmem:[#allocation5 + $0xdcc] sm:$0xf0]  ;;  %v8374_v22 = vor.u32 %v12317_v13, %v8373_v12  ;;  %v12357_v12 = vld [vmem:[#allocation5 + $0x314] sm:$0xf] }
  0xad   :  { %3362 = vmatpush.bf16.msrb.mxu3 %v9778_v18  ;;  %3335 = vmatpush.bf16.msrb.mxu1 %v8690_v30  ;;  %v9397_v18 = vld [vmem:[#allocation5 + $0x990] sm:$0xf]  ;;  %v9910_v29 = vor.u32 %v12701_v21, %v9909_v20  ;;  %v8567_v13 = vld [vmem:[#allocation5 + $0x350] sm:$0xf0] }
  0xae   :  { %3322 = vmatmul.bf16.vlgmr.msrb.gmra.mxu0 %v13459_v26  ;;  %v9398_v24 = vor.u32 %v12573_v19, %v9397_v18  ;;  %v8309_v25 = vld [vmem:[#allocation5 + $0x110] sm:$0xf]  ;;  %v12613_v18 = vld [vmem:[#allocation5 + $0xb14] sm:$0xf] }
  0xaf   :  { %3349 = vmatpush.bf16.msrb.mxu2 %v9202_v31  ;;  %3370 = vmatpush.bf16.msra.mxu0 %v8630_v36  ;;  %v12301_v27 = vld [vmem:[#allocation5 + $0x14c] sm:$0xf0]  ;;  %v9591_v19 = vld [vmem:[#allocation5 + $0xb50] sm:$0xf0] }
  0xb0   :  { %3336 = vmatmul.bf16.vlgmr.msrb.gmra.mxu1 %v13461_v33  ;;  %v8821_v28 = vld [vmem:[#allocation5 + $0x510] sm:$0xf]  ;;  %v8310_v36 = vor.u32 %v12301_v27, %v8309_v25  ;;  %v12741_v20 = vld [vmem:[#allocation5 + $0xf14] sm:$0xf] }
  0xb1   :  { %3363 = vmatpush.bf16.msrb.mxu3 %v9714_v35  ;;  %3384 = vmatpush.bf16.msra.mxu1 %v9142_v37  ;;  %v12429_v30 = vld [vmem:[#allocation5 + $0x54c] sm:$0xf0]  ;;  %v10103_v21 = vld [vmem:[#allocation5 + $0xf50] sm:$0xf0] }
  0xb2   :  { %3350 = vmatmul.bf16.vlgmr.msrb.gmra.mxu2 %v13453_v8  ;;  %v9333_v31 = vld [vmem:[#allocation5 + $0x910] sm:$0xf]  ;;  %v8822_v37 = vor.u32 %v12429_v30, %v8821_v28  ;;  %v12341_v25 = vld [vmem:[#allocation5 + $0x294] sm:$0xf] }
  0xb3   :  { %3398 = vmatpush.bf16.msra.mxu2 %v9654_v38  ;;  %3371 = vmatpush.bf16.msra.mxu0 %v8566_v48  ;;  %v12557_v32 = vld [vmem:[#allocation5 + $0x94c] sm:$0xf0]  ;;  %v8503_v27 = vld [vmem:[#allocation5 + $0x2d0] sm:$0xf0] }
  0xb4   :  { %3364 = vmatmul.bf16.vlgmr.msrb.gmra.mxu3 %v13455_v15  ;;  %v9845_v34 = vld [vmem:[#allocation5 + $0xd10] sm:$0xf]  ;;  %v9334_v38 = vor.u32 %v12557_v32, %v9333_v31  ;;  %v12469_v28 = vld [vmem:[#allocation5 + $0x694] sm:$0xf] }
  0xb5   :  { %3412 = vmatpush.bf16.msra.mxu3 %v10166_v42  ;;  %3385 = vmatpush.bf16.msra.mxu1 %v9078_v49  ;;  %v12685_v35 = vld [vmem:[#allocation5 + $0xd4c] sm:$0xf0]  ;;  %v9015_v30 = vld [vmem:[#allocation5 + $0x6d0] sm:$0xf0] }
  0xb6   :  { %v8245_v39 = vld [vmem:[#allocation5 + $0x90] sm:$0xf]  ;;  %v9846_v42 = vor.u32 %v12685_v35, %v9845_v34  ;;  %v12597_v31 = vld [vmem:[#allocation5 + $0xa94] sm:$0xf] }
  0xb7   :  { %3399 = vmatpush.bf16.msra.mxu2 %v9590_v50  ;;  %3372 = vmatpush.bf16.msra.mxu0 %v8502_v60  ;;  %v12285_v40 = vld [vmem:[#allocation5 + $0xcc] sm:$0xf0]  ;;  %v12373_v60 = vld [vmem:[#allocation5 + $0x394] sm:$0xf] }
  0xb8   :  { %v8757_v41 = vld [vmem:[#allocation5 + $0x490] sm:$0xf]  ;;  %v8246_v48 = vor.u32 %v12285_v40, %v8245_v39  ;;  %v9527_v32 = vld [vmem:[#allocation5 + $0xad0] sm:$0xf0] }
  0xb9   :  { %3413 = vmatpush.bf16.msra.mxu3 %v10102_v54  ;;  %3386 = vmatpush.bf16.msra.mxu1 %v9014_v61  ;;  %v12413_v43 = vld [vmem:[#allocation5 + $0x4cc] sm:$0xf0]  ;;  %v8631_v61 = vld [vmem:[#allocation5 + $0x3d0] sm:$0xf0] }
  0xba   :  { %v9269_v44 = vld [vmem:[#allocation5 + $0x890] sm:$0xf]  ;;  %v8758_v51 = vor.u32 %v12413_v43, %v8757_v41  ;;  %v12725_v34 = vld [vmem:[#allocation5 + $0xe94] sm:$0xf] }
  0xbb   :  { %3400 = vmatpush.bf16.msra.mxu2 %v9526_v62  ;;  %3373 = vmatpush.bf16.msra.mxu0 %v8438_v9  ;;  %v12541_v45 = vld [vmem:[#allocation5 + $0x8cc] sm:$0xf0]  ;;  %v12501_v62 = vld [vmem:[#allocation5 + $0x794] sm:$0xf]  ;;  %v8634_v9 = vor.u32 %v12373_v60, %v8631_v61 }
  0xbc   :  { %v9781_v46 = vld [vmem:[#allocation5 + $0xc90] sm:$0xf]  ;;  %v9270_v52 = vor.u32 %v12541_v45, %v9269_v44  ;;  %v10039_v35 = vld [vmem:[#allocation5 + $0xed0] sm:$0xf0] }
  0xbd   :  { %3414 = vmatpush.bf16.msra.mxu3 %v10038_v2  ;;  %3387 = vmatpush.bf16.msra.mxu1 %v8950_v10  ;;  %v12669_v47 = vld [vmem:[#allocation5 + $0xccc] sm:$0xf0]  ;;  %v9655_v2 = vld [vmem:[#allocation5 + $0xbd0] sm:$0xf0]  ;;  %v9146_v10 = vor.u32 %v12501_v62, %v9143_v0 }
  0xbe   :  { %v8181_v49 = vld [vmem:[#allocation5 + $0x10] sm:$0xf]  ;;  %v9782_v56 = vor.u32 %v12669_v47, %v9781_v46  ;;  %v12325_v39 = vld [vmem:[#allocation5 + $0x214] sm:$0xf] }
  0xbf   :  { %3401 = vmatpush.bf16.msra.mxu2 %v9462_v11  ;;  %3374 = vmatpush.bf16.msra.mxu0 %v8374_v22  ;;  %v12269_v50 = vld [vmem:[#allocation5 + $0x4c] sm:$0xf0]  ;;  %v9658_v11 = vor.u32 %v12629_v1, %v9655_v2  ;;  %v8570_v22 = vor.u32 %v12357_v12, %v8567_v13  ;;  %v8439_v40 = vld [vmem:[#allocation5 + $0x250] sm:$0xf0] }
  0xc0   :  { %v8693_v53 = vld [vmem:[#allocation5 + $0x410] sm:$0xf]  ;;  %v8182_v63 = vor.u32 %v12269_v50, %v8181_v49  ;;  %v12453_v41 = vld [vmem:[#allocation5 + $0x614] sm:$0xf] }
  0xc1   :  { %3415 = vmatpush.bf16.msra.mxu3 %v9974_v16  ;;  %3388 = vmatpush.bf16.msra.mxu1 %v8886_v23  ;;  %v12397_v54 = vld [vmem:[#allocation5 + $0x44c] sm:$0xf0]  ;;  %v10170_v16 = vor.u32 %v12757_v5, %v10167_v6  ;;  %v9082_v23 = vor.u32 %v12485_v14, %v9079_v17  ;;  %v8951_v43 = vld [vmem:[#allocation5 + $0x650] sm:$0xf0] }
  0xc2   :  { %v9205_v55 = vld [vmem:[#allocation5 + $0x810] sm:$0xf]  ;;  %v8694_v3 = vor.u32 %v12397_v54, %v8693_v53  ;;  %v12581_v44 = vld [vmem:[#allocation5 + $0xa14] sm:$0xf]  ;;  %v8954_v49 = vor.u32 %v12453_v41, %v8951_v43  ;;  %v8637_v43 = vld [vmem:[#allocation5 + $0x398] sm:$0xf] }
  0xc3   :  { %3402 = vmatpush.bf16.msra.mxu2 %v9398_v24  ;;  %3375 = vmatpush.bf16.msra.mxu0 %v8310_v36  ;;  %v12525_v57 = vld [vmem:[#allocation5 + $0x84c] sm:$0xf0]  ;;  %v9594_v24 = vor.u32 %v12613_v18, %v9591_v19  ;;  %v8506_v36 = vor.u32 %v12341_v25, %v8503_v27  ;;  %v9463_v45 = vld [vmem:[#allocation5 + $0xa50] sm:$0xf0] }
  0xc4   :  { %v9717_v58 = vld [vmem:[#allocation5 + $0xc10] sm:$0xf]  ;;  %v9206_v4 = vor.u32 %v12525_v57, %v9205_v55  ;;  %v12709_v46 = vld [vmem:[#allocation5 + $0xe14] sm:$0xf]  ;;  %v9466_v50 = vor.u32 %v12581_v44, %v9463_v45  ;;  %v12382_v44 = vld [vmem:[#allocation5 + $0x3d4] sm:$0xf0] }
  0xc5   :  { %3416 = vmatpush.bf16.msra.mxu3 %v9910_v29  ;;  %3389 = vmatpush.bf16.msra.mxu1 %v8822_v37  ;;  %v12653_v59 = vld [vmem:[#allocation5 + $0xc4c] sm:$0xf0]  ;;  %v10106_v29 = vor.u32 %v12741_v20, %v10103_v21  ;;  %v9018_v37 = vor.u32 %v12469_v28, %v9015_v30  ;;  %v9975_v47 = vld [vmem:[#allocation5 + $0xe50] sm:$0xf0]  ;;  %v9149_v45 = vld [vmem:[#allocation5 + $0x798] sm:$0xf] }
  0xc6   :  { %v9718_v7 = vor.u32 %v12653_v59, %v9717_v58  ;;  %v12437_v53 = vld [vmem:[#allocation5 + $0x594] sm:$0xf]  ;;  %v9978_v54 = vor.u32 %v12709_v46, %v9975_v47  ;;  %v12510_v47 = vld [vmem:[#allocation5 + $0x7d4] sm:$0xf0] }
  0xc7   :  { %3403 = vmatpush.bf16.msra.mxu2 %v9334_v38  ;;  %3376 = vmatpush.bf16.msra.mxu0 %v8246_v48  ;;  %v9530_v38 = vor.u32 %v12597_v31, %v9527_v32  ;;  %v8442_v48 = vor.u32 %v12325_v39, %v8439_v40  ;;  %v8887_v55 = vld [vmem:[#allocation5 + $0x5d0] sm:$0xf0] }
  0xc8   :  { %v9399_v57 = vld [vmem:[#allocation5 + $0x9d0] sm:$0xf0]  ;;  %v8890_v61 = vor.u32 %v12437_v53, %v8887_v55  ;;  %v12766_v53 = vld [vmem:[#allocation5 + $0xfd4] sm:$0xf0]  ;;  %v8638_v55 = vor.u32 %v12382_v44, %v8637_v43 }
  0xc9   :  { %3417 = vmatpush.bf16.msra.mxu3 %v9846_v42  ;;  %3390 = vmatpush.bf16.msra.mxu1 %v8758_v51  ;;  %v10042_v42 = vor.u32 %v12725_v34, %v10039_v35  ;;  %v12309_v51 = vld [vmem:[#allocation5 + $0x194] sm:$0xf] }
  0xca   :  { %v12693_v58 = vld [vmem:[#allocation5 + $0xd94] sm:$0xf] }
  0xcb   :  { %3404 = vmatpush.bf16.msra.mxu2 %v9270_v52  ;;  %3377 = vmatpush.bf16.msra.mxu0 %v8182_v63  ;;  %v8375_v52 = vld [vmem:[#allocation5 + $0x1d0] sm:$0xf0] }
  0xcc   :  { %v9911_v59 = vld [vmem:[#allocation5 + $0xdd0] sm:$0xf0]  ;;  %v8378_v60 = vor.u32 %v12309_v51, %v8375_v52  ;;  %v10173_v52 = vld [vmem:[#allocation5 + $0xf98] sm:$0xf] }
  0xcd   :  { %3418 = vmatpush.bf16.msra.mxu3 %v9782_v56  ;;  %3391 = vmatpush.bf16.msra.mxu1 %v8694_v3  ;;  %v12565_v56 = vld [vmem:[#allocation5 + $0x994] sm:$0xf]  ;;  %v9914_v2 = vor.u32 %v12693_v58, %v9911_v59  ;;  %v8573_v58 = vld [vmem:[#allocation5 + $0x318] sm:$0xf] }
  0xce   :  { %3378 = vmatmul.bf16.vlgmr.msra.gmra.mxu0 %v13459_v26  ;;  %v9402_v62 = vor.u32 %v12565_v56, %v9399_v57  ;;  %v12293_v63 = vld [vmem:[#allocation5 + $0x114] sm:$0xf]  ;;  %v9150_v56 = vor.u32 %v12510_v47, %v9149_v45  ;;  %v12366_v59 = vld [vmem:[#allocation5 + $0x354] sm:$0xf0] }
  0xcf   :  { %3405 = vmatpush.bf16.msra.mxu2 %v9206_v4  ;;  %3426 = vmatpush.bf16.msrb.mxu0 %v8634_v9  ;;  %v8311_v0 = vld [vmem:[#allocation5 + $0x150] sm:$0xf0]  ;;  %v3169_v17 = vpop.f32.mrf.mxu1  ;;  %v12446_v45 = vld [vmem:[#allocation5 + $0x5d4] sm:$0xf0] }
  0xd0   :  { %3392 = vmatmul.bf16.vlgmr.msra.gmra.mxu1 %v13461_v33  ;;  %v12421_v1 = vld [vmem:[#allocation5 + $0x514] sm:$0xf]  ;;  %v8314_v9 = vor.u32 %v12293_v63, %v8311_v0  ;;  %v9597_v63 = vld [vmem:[#allocation5 + $0xb18] sm:$0xf] }
  0xd1   :  { %3419 = vmatpush.bf16.msra.mxu3 %v9718_v7  ;;  %3440 = vmatpush.bf16.msrb.mxu1 %v9146_v10  ;;  %v8823_v3 = vld [vmem:[#allocation5 + $0x550] sm:$0xf0]  ;;  %v12622_v0 = vld [vmem:[#allocation5 + $0xb54] sm:$0xf0] }
  0xd2   :  { %3406 = vmatmul.bf16.vlgmr.msra.gmra.mxu2 %v13453_v8  ;;  %v12549_v4 = vld [vmem:[#allocation5 + $0x914] sm:$0xf]  ;;  %v8826_v10 = vor.u32 %v12421_v1, %v8823_v3  ;;  %v10109_v1 = vld [vmem:[#allocation5 + $0xf18] sm:$0xf]  ;;  %v8574_v3 = vor.u32 %v12366_v59, %v8573_v58 }
  0xd3   :  { %3454 = vmatpush.bf16.msrb.mxu2 %v9658_v11  ;;  %3427 = vmatpush.bf16.msrb.mxu0 %v8570_v22  ;;  %v9335_v5 = vld [vmem:[#allocation5 + $0x950] sm:$0xf0]  ;;  %v12574_v47 = vld [vmem:[#allocation5 + $0x9d4] sm:$0xf0] }
  0xd4   :  { %3420 = vmatmul.bf16.vlgmr.msra.gmra.mxu3 %v13455_v15  ;;  %v12677_v6 = vld [vmem:[#allocation5 + $0xd14] sm:$0xf]  ;;  %v9338_v11 = vor.u32 %v12549_v4, %v9335_v5  ;;  %v9598_v5 = vor.u32 %v12622_v0, %v9597_v63  ;;  %v12430_v59 = vld [vmem:[#allocation5 + $0x554] sm:$0xf0] }
  0xd5   :  { %3468 = vmatpush.bf16.msrb.mxu3 %v10170_v16  ;;  %3441 = vmatpush.bf16.msrb.mxu1 %v9082_v23  ;;  %v9847_v7 = vld [vmem:[#allocation5 + $0xd50] sm:$0xf0]  ;;  %v3155_v16 = vpop.f32.mrf.mxu0  ;;  %v3183_v25 = vpop.f32.mrf.mxu2  ;;  %v9853_v63 = vld [vmem:[#allocation5 + $0xd18] sm:$0xf] }
  0xd6   :  { %v12277_v12 = vld [vmem:[#allocation5 + $0x94] sm:$0xf]  ;;  %v9850_v18 = vor.u32 %v12677_v6, %v9847_v7  ;;  %v3170_v22 = vadd.f32 %v3169_v17, %v3155_v16  ;;  %v8509_v6 = vld [vmem:[#allocation5 + $0x298] sm:$0xf] }
  0xd7   :  { %3455 = vmatpush.bf16.msrb.mxu2 %v9594_v24  ;;  %3428 = vmatpush.bf16.msrb.mxu0 %v8506_v36  ;;  %v8247_v13 = vld [vmem:[#allocation5 + $0xd0] sm:$0xf0]  ;;  %v12350_v7 = vld [vmem:[#allocation5 + $0x2d4] sm:$0xf0] }
  0xd8   :  { %v12405_v14 = vld [vmem:[#allocation5 + $0x494] sm:$0xf]  ;;  %v8250_v27 = vor.u32 %v12277_v12, %v8247_v13  ;;  %v3184_v30 = vadd.f32 %v3183_v25, %v3170_v22  ;;  %v12478_v13 = vld [vmem:[#allocation5 + $0x6d4] sm:$0xf0] }
  0xd9   :  { %3469 = vmatpush.bf16.msrb.mxu3 %v10106_v29  ;;  %3442 = vmatpush.bf16.msrb.mxu1 %v9018_v37  ;;  %v8759_v19 = vld [vmem:[#allocation5 + $0x4d0] sm:$0xf0]  ;;  %v3197_v37 = vpop.f32.mrf.mxu3  ;;  %v12606_v16 = vld [vmem:[#allocation5 + $0xad4] sm:$0xf0] }
  0xda   :  { %v12533_v20 = vld [vmem:[#allocation5 + $0x894] sm:$0xf]  ;;  %v8762_v31 = vor.u32 %v12405_v14, %v8759_v19  ;;  %v9533_v14 = vld [vmem:[#allocation5 + $0xa98] sm:$0xf]  ;;  %v8510_v19 = vor.u32 %v12350_v7, %v8509_v6 }
  0xdb   :  { %3456 = vmatpush.bf16.msrb.mxu2 %v9530_v38  ;;  %3429 = vmatpush.bf16.msrb.mxu0 %v8442_v48  ;;  %v9271_v21 = vld [vmem:[#allocation5 + $0x8d0] sm:$0xf0]  ;;  %v9661_v48 = vld [vmem:[#allocation5 + $0xb98] sm:$0xf] }
  0xdc   :  { %v12661_v23 = vld [vmem:[#allocation5 + $0xc94] sm:$0xf]  ;;  %v9274_v32 = vor.u32 %v12533_v20, %v9271_v21  ;;  %v10045_v17 = vld [vmem:[#allocation5 + $0xe98] sm:$0xf]  ;;  %v9534_v21 = vor.u32 %v12606_v16, %v9533_v14 }
  0xdd   :  { %3470 = vmatpush.bf16.msrb.mxu3 %v10042_v42  ;;  %3443 = vmatpush.bf16.msrb.mxu1 %v8954_v49  ;;  %v9783_v24 = vld [vmem:[#allocation5 + $0xcd0] sm:$0xf0]  ;;  %v13481_v42 = vadd.f32 %v3197_v37, %v3184_v30  ;;  %v12638_v49 = vld [vmem:[#allocation5 + $0xbd4] sm:$0xf0]  ;;  %v13491_v25 = vpop.f32.mrf.mxu2 }
  0xde   :  { %v12261_v28 = vld [vmem:[#allocation5 + $0x14] sm:$0xf]  ;;  %v9786_v38 = vor.u32 %v12661_v23, %v9783_v24  ;;  %v9662_v57 = vor.u32 %v12638_v49, %v9661_v48  ;;  %v8445_v22 = vld [vmem:[#allocation5 + $0x218] sm:$0xf] }
  0xdf   :  { %3457 = vmatpush.bf16.msrb.mxu2 %v9466_v50  ;;  %3430 = vmatpush.bf16.msrb.mxu0 %v8378_v60  ;;  %v8183_v29 = vld [vmem:[#allocation5 + $0x50] sm:$0xf0]  ;;  %v9085_v60 = vld [vmem:[#allocation5 + $0x718] sm:$0xf] }
  0xe0   :  { %v12389_v34 = vld [vmem:[#allocation5 + $0x414] sm:$0xf]  ;;  %v8186_v46 = vor.u32 %v12261_v28, %v8183_v29  ;;  %v12334_v23 = vld [vmem:[#allocation5 + $0x254] sm:$0xf0] }
  0xe1   :  { %3471 = vmatpush.bf16.msrb.mxu3 %v9978_v54  ;;  %3444 = vmatpush.bf16.msrb.mxu1 %v8890_v61  ;;  %v8695_v35 = vld [vmem:[#allocation5 + $0x450] sm:$0xf0]  ;;  %v10174_v61 = vor.u32 %v12766_v53, %v10173_v52  ;;  %v8957_v24 = vld [vmem:[#allocation5 + $0x618] sm:$0xf] }
  0xe2   :  { %v12517_v36 = vld [vmem:[#allocation5 + $0x814] sm:$0xf]  ;;  %v8698_v50 = vor.u32 %v12389_v34, %v8695_v35  ;;  %v12462_v28 = vld [vmem:[#allocation5 + $0x654] sm:$0xf0]  ;;  %v13493_v34 = vpop.f32.mrf.mxu3  ;;  %v8446_v35 = vor.u32 %v12334_v23, %v8445_v22 }
  0xe3   :  { %3458 = vmatpush.bf16.msrb.mxu2 %v9402_v62  ;;  %3431 = vmatpush.bf16.msrb.mxu0 %v8314_v9  ;;  %v9207_v39 = vld [vmem:[#allocation5 + $0x850] sm:$0xf0]  ;;  %v12494_v62 = vld [vmem:[#allocation5 + $0x754] sm:$0xf0] }
  0xe4   :  { %v12645_v40 = vld [vmem:[#allocation5 + $0xc14] sm:$0xf]  ;;  %v9210_v51 = vor.u32 %v12517_v36, %v9207_v39  ;;  %v9086_v4 = vor.u32 %v12494_v62, %v9085_v60  ;;  %v9021_v9 = vld [vmem:[#allocation5 + $0x698] sm:$0xf]  ;;  %v8958_v36 = vor.u32 %v12462_v28, %v8957_v24 }
  0xe5   :  { %3472 = vmatpush.bf16.msrb.mxu3 %v9914_v2  ;;  %3445 = vmatpush.bf16.msrb.mxu1 %v8826_v10  ;;  %v9719_v41 = vld [vmem:[#allocation5 + $0xc50] sm:$0xf0]  ;;  %v12750_v2 = vld [vmem:[#allocation5 + $0xf54] sm:$0xf0]  ;;  %v13483_v10 = vpop.f32.mrf.mxu0  ;;  %v9022_v20 = vor.u32 %v12478_v13, %v9021_v9 }
  0xe6   :  { %v9722_v54 = vor.u32 %v12645_v40, %v9719_v41  ;;  %v10110_v12 = vor.u32 %v12750_v2, %v10109_v1  ;;  %v9469_v29 = vld [vmem:[#allocation5 + $0xa18] sm:$0xf] }
  0xe7   :  { %3459 = vmatpush.bf16.msrb.mxu2 %v9338_v11  ;;  %3432 = vmatpush.bf16.msrb.mxu0 %v8250_v27  ;;  %v13485_v11 = vpop.f32.mrf.mxu1  ;;  %v12590_v30 = vld [vmem:[#allocation5 + $0xa54] sm:$0xf0] }
  0xe8   :  { %v9470_v37 = vor.u32 %v12590_v30, %v9469_v29  ;;  %v12318_v39 = vld [vmem:[#allocation5 + $0x1d4] sm:$0xf0] }
  0xe9   :  { %3473 = vmatpush.bf16.msrb.mxu3 %v9850_v18  ;;  %3446 = vmatpush.bf16.msrb.mxu1 %v8762_v31  ;;  %v12734_v18 = vld [vmem:[#allocation5 + $0xed4] sm:$0xf0] }
  0xea   :  { %v10046_v27 = vor.u32 %v12734_v18, %v10045_v17  ;;  %v9981_v31 = vld [vmem:[#allocation5 + $0xe18] sm:$0xf] }
  0xeb   :  { %3460 = vmatpush.bf16.msrb.mxu2 %v9274_v32  ;;  %3433 = vmatpush.bf16.msrb.mxu0 %v8186_v46  ;;  %v12718_v32 = vld [vmem:[#allocation5 + $0xe54] sm:$0xf0] }
  0xec   :  { %v8893_v40 = vld [vmem:[#allocation5 + $0x598] sm:$0xf]  ;;  %v9982_v44 = vor.u32 %v12718_v32, %v9981_v31 }
  0xed   :  { %3474 = vmatpush.bf16.msrb.mxu3 %v9786_v38  ;;  %3447 = vmatpush.bf16.msrb.mxu1 %v8698_v50  ;;  %v8381_v38 = vld [vmem:[#allocation5 + $0x198] sm:$0xf]  ;;  %v3211_v41 = vpop.f32.mrf.mxu0  ;;  %v8894_v52 = vor.u32 %v12446_v45, %v8893_v40  ;;  %v12630_v40 = vld [vmem:[#allocation5 + $0xb9c] sm:$0xf] }
  0xee   :  { %3434 = vmatmul.bf16.vlgmr.msrb.gmra.mxu0 %v13459_v26  ;;  %v9405_v46 = vld [vmem:[#allocation5 + $0x998] sm:$0xf]  ;;  %v12758_v45 = vld [vmem:[#allocation5 + $0xf9c] sm:$0xf] }
  0xef   :  { %3461 = vmatpush.bf16.msrb.mxu2 %v9210_v51  ;;  %3482 = vmatpush.bf16.msra.mxu0 %v8638_v55  ;;  %v3225_v43 = vpop.f32.mrf.mxu1  ;;  %v9917_v49 = vld [vmem:[#allocation5 + $0xd98] sm:$0xf]  ;;  %v8382_v51 = vor.u32 %v12318_v39, %v8381_v38  ;;  %v9406_v53 = vor.u32 %v12574_v47, %v9405_v46  ;;  %v9151_v39 = vld [vmem:[#allocation5 + $0x7d8] sm:$0xf0] }
  0xf0   :  { %3448 = vmatmul.bf16.vlgmr.msrb.gmra.mxu1 %v13461_v33  ;;  %v3226_v48 = vadd.f32 %v3225_v43, %v3211_v41  ;;  %v12702_v50 = vld [vmem:[#allocation5 + $0xdd4] sm:$0xf0]  ;;  %v9663_v41 = vld [vmem:[#allocation5 + $0xbd8] sm:$0xf0] }
  0xf1   :  { %3475 = vmatpush.bf16.msrb.mxu3 %v9722_v54  ;;  %3496 = vmatpush.bf16.msra.mxu1 %v9150_v56  ;;  %v8317_v54 = vld [vmem:[#allocation5 + $0x118] sm:$0xf]  ;;  %v9918_v58 = vor.u32 %v12702_v50, %v9917_v49  ;;  %v10175_v46 = vld [vmem:[#allocation5 + $0xfd8] sm:$0xf0]  ;;  %v9666_v50 = vor.u32 %v12630_v40, %v9663_v41 }
  0xf2   :  { %3462 = vmatmul.bf16.vlgmr.msrb.gmra.mxu2 %v13453_v8  ;;  %v12302_v55 = vld [vmem:[#allocation5 + $0x154] sm:$0xf0] }
  0xf3   :  { %3510 = vmatpush.bf16.msra.mxu2 %v9662_v57  ;;  %3483 = vmatpush.bf16.msra.mxu0 %v8574_v3  ;;  %v8829_v56 = vld [vmem:[#allocation5 + $0x518] sm:$0xf]  ;;  %v8318_v2 = vor.u32 %v12302_v55, %v8317_v54  ;;  %v10178_v54 = vor.u32 %v12758_v45, %v10175_v46  ;;  %v9087_v55 = vld [vmem:[#allocation5 + $0x758] sm:$0xf0] }
  0xf4   :  { %3476 = vmatmul.bf16.vlgmr.msrb.gmra.mxu3 %v13455_v15  ;;  %v9341_v60 = vld [vmem:[#allocation5 + $0x918] sm:$0xf]  ;;  %v9407_v45 = vld [vmem:[#allocation5 + $0x9d8] sm:$0xf0] }
  0xf5   :  { %3524 = vmatpush.bf16.msra.mxu3 %v10174_v61  ;;  %3497 = vmatpush.bf16.msra.mxu1 %v9086_v4  ;;  %v3239_v57 = vpop.f32.mrf.mxu2  ;;  %v12558_v61 = vld [vmem:[#allocation5 + $0x954] sm:$0xf0]  ;;  %v8830_v4 = vor.u32 %v12430_v59, %v8829_v56  ;;  %v12614_v56 = vld [vmem:[#allocation5 + $0xb1c] sm:$0xf] }
  0xf6   :  { %v3240_v62 = vadd.f32 %v3239_v57, %v3226_v48  ;;  %v12686_v0 = vld [vmem:[#allocation5 + $0xd54] sm:$0xf0]  ;;  %v9599_v57 = vld [vmem:[#allocation5 + $0xb58] sm:$0xf0] }
  0xf7   :  { %3511 = vmatpush.bf16.msra.mxu2 %v9598_v5  ;;  %3484 = vmatpush.bf16.msra.mxu0 %v8510_v19  ;;  %v3253_v1 = vpop.f32.mrf.mxu3  ;;  %v9342_v5 = vor.u32 %v12558_v61, %v9341_v60  ;;  %v8253_v6 = vld [vmem:[#allocation5 + $0x98] sm:$0xf]  ;;  %v10111_v59 = vld [vmem:[#allocation5 + $0xf58] sm:$0xf0] }
  0xf8   :  { %v13495_v3 = vadd.f32 %v3253_v1, %v3240_v62  ;;  %v12286_v7 = vld [vmem:[#allocation5 + $0xd4] sm:$0xf0]  ;;  %v9602_v62 = vor.u32 %v12614_v56, %v9599_v57  ;;  %v12470_v1 = vld [vmem:[#allocation5 + $0x69c] sm:$0xf] }
  0xf9   :  { %3525 = vmatpush.bf16.msra.mxu3 %v10110_v12  ;;  %3498 = vmatpush.bf16.msra.mxu1 %v9022_v20  ;;  %v8765_v9 = vld [vmem:[#allocation5 + $0x498] sm:$0xf]  ;;  %v9854_v12 = vor.u32 %v12686_v0, %v9853_v63  ;;  %v8254_v19 = vor.u32 %v12286_v7, %v8253_v6  ;;  %v12342_v63 = vld [vmem:[#allocation5 + $0x29c] sm:$0xf] }
  0xfa   :  { %v12414_v13 = vld [vmem:[#allocation5 + $0x4d4] sm:$0xf0]  ;;  %v8511_v0 = vld [vmem:[#allocation5 + $0x2d8] sm:$0xf0] }
  0xfb   :  { %3512 = vmatpush.bf16.msra.mxu2 %v9534_v21  ;;  %3485 = vmatpush.bf16.msra.mxu0 %v8446_v35  ;;  %v9277_v14 = vld [vmem:[#allocation5 + $0x898] sm:$0xf]  ;;  %v8766_v22 = vor.u32 %v12414_v13, %v8765_v9  ;;  %v12374_v35 = vld [vmem:[#allocation5 + $0x39c] sm:$0xf] }
  0xfc   :  { %v12542_v16 = vld [vmem:[#allocation5 + $0x8d4] sm:$0xf0]  ;;  %v9023_v6 = vld [vmem:[#allocation5 + $0x6d8] sm:$0xf0] }
  0xfd   :  { %3526 = vmatpush.bf16.msra.mxu3 %v10046_v27  ;;  %3499 = vmatpush.bf16.msra.mxu1 %v8958_v36  ;;  %v9789_v17 = vld [vmem:[#allocation5 + $0xc98] sm:$0xf]  ;;  %v9278_v23 = vor.u32 %v12542_v16, %v9277_v14  ;;  %v8639_v36 = vld [vmem:[#allocation5 + $0x3d8] sm:$0xf0]  ;;  %v8514_v14 = vor.u32 %v12342_v63, %v8511_v0  ;;  %v9026_v16 = vor.u32 %v12470_v1, %v9023_v6 }
  0xfe   :  { %v12670_v18 = vld [vmem:[#allocation5 + $0xcd4] sm:$0xf0]  ;;  %v8642_v48 = vor.u32 %v12374_v35, %v8639_v36  ;;  %v12598_v7 = vld [vmem:[#allocation5 + $0xa9c] sm:$0xf] }
  0xff   :  { %3513 = vmatpush.bf16.msra.mxu2 %v9470_v37  ;;  %3486 = vmatpush.bf16.msra.mxu0 %v8382_v51  ;;  %v8189_v20 = vld [vmem:[#allocation5 + $0x18] sm:$0xf]  ;;  %v9790_v29 = vor.u32 %v12670_v18, %v9789_v17  ;;  %v12502_v37 = vld [vmem:[#allocation5 + $0x79c] sm:$0xf] }
 0x100   :  { %v12270_v21 = vld [vmem:[#allocation5 + $0x54] sm:$0xf0]  ;;  %v9154_v49 = vor.u32 %v12502_v37, %v9151_v39  ;;  %v12358_v51 = vld [vmem:[#allocation5 + $0x31c] sm:$0xf] }
 0x101   :  { %3527 = vmatpush.bf16.msra.mxu3 %v9982_v44  ;;  %3500 = vmatpush.bf16.msra.mxu1 %v8894_v52  ;;  %v8701_v24 = vld [vmem:[#allocation5 + $0x418] sm:$0xf]  ;;  %v8190_v38 = vor.u32 %v12270_v21, %v8189_v20  ;;  %v8575_v52 = vld [vmem:[#allocation5 + $0x358] sm:$0xf0]  ;;  %v13505_v21 = vpop.f32.mrf.mxu2 }
 0x102   :  { %v12398_v27 = vld [vmem:[#allocation5 + $0x454] sm:$0xf0]  ;;  %v8578_v60 = vor.u32 %v12358_v51, %v8575_v52  ;;  %v9535_v9 = vld [vmem:[#allocation5 + $0xad8] sm:$0xf0] }
 0x103   :  { %3514 = vmatpush.bf16.msra.mxu2 %v9406_v53  ;;  %3487 = vmatpush.bf16.msra.mxu0 %v8318_v2  ;;  %v9213_v28 = vld [vmem:[#allocation5 + $0x818] sm:$0xf]  ;;  %v8702_v43 = vor.u32 %v12398_v27, %v8701_v24  ;;  %v12486_v53 = vld [vmem:[#allocation5 + $0x71c] sm:$0xf]  ;;  %v13497_v2 = vpop.f32.mrf.mxu0  ;;  %v9538_v17 = vor.u32 %v12598_v7, %v9535_v9 }
 0x104   :  { %v12526_v30 = vld [vmem:[#allocation5 + $0x854] sm:$0xf0]  ;;  %v9090_v61 = vor.u32 %v12486_v53, %v9087_v55  ;;  %v10047_v13 = vld [vmem:[#allocation5 + $0xed8] sm:$0xf0] }
 0x105   :  { %3528 = vmatpush.bf16.msra.mxu3 %v9918_v58  ;;  %3501 = vmatpush.bf16.msra.mxu1 %v8830_v4  ;;  %v9725_v31 = vld [vmem:[#allocation5 + $0xc18] sm:$0xf]  ;;  %v9214_v44 = vor.u32 %v12526_v30, %v9213_v28  ;;  %v12742_v58 = vld [vmem:[#allocation5 + $0xf1c] sm:$0xf]  ;;  %v13499_v4 = vpop.f32.mrf.mxu1  ;;  %v13507_v30 = vpop.f32.mrf.mxu3 }
 0x106   :  { %v12654_v32 = vld [vmem:[#allocation5 + $0xc54] sm:$0xf0]  ;;  %v12326_v18 = vld [vmem:[#allocation5 + $0x21c] sm:$0xf] }
 0x107   :  { %3515 = vmatpush.bf16.msra.mxu2 %v9342_v5  ;;  %3488 = vmatpush.bf16.msra.mxu0 %v8254_v19  ;;  %v9726_v47 = vor.u32 %v12654_v32, %v9725_v31  ;;  %v10114_v5 = vor.u32 %v12742_v58, %v10111_v59  ;;  %v8447_v19 = vld [vmem:[#allocation5 + $0x258] sm:$0xf0] }
 0x108   :  { %v12454_v20 = vld [vmem:[#allocation5 + $0x61c] sm:$0xf]  ;;  %v8450_v31 = vor.u32 %v12326_v18, %v8447_v19 }
 0x109   :  { %3529 = vmatpush.bf16.msra.mxu3 %v9854_v12  ;;  %3502 = vmatpush.bf16.msra.mxu1 %v8766_v22  ;;  %v12726_v12 = vld [vmem:[#allocation5 + $0xe9c] sm:$0xf] }
 0x10a   :  { %v10050_v22 = vor.u32 %v12726_v12, %v10047_v13  ;;  %v12582_v24 = vld [vmem:[#allocation5 + $0xa1c] sm:$0xf] }
 0x10b   :  { %3516 = vmatpush.bf16.msra.mxu2 %v9278_v23  ;;  %3489 = vmatpush.bf16.msra.mxu0 %v8190_v38  ;;  %v8959_v23 = vld [vmem:[#allocation5 + $0x658] sm:$0xf0]  ;;  %v3267_v39 = vpop.f32.mrf.mxu0 }
 0x10c   :  { %v9471_v27 = vld [vmem:[#allocation5 + $0xa58] sm:$0xf0]  ;;  %v8962_v32 = vor.u32 %v12454_v20, %v8959_v23 }
 0x10d   :  { %3530 = vmatpush.bf16.msra.mxu3 %v9790_v29  ;;  %3503 = vmatpush.bf16.msra.mxu1 %v8702_v43  ;;  %v12710_v28 = vld [vmem:[#allocation5 + $0xe1c] sm:$0xf]  ;;  %v9474_v35 = vor.u32 %v12582_v24, %v9471_v27  ;;  %v3281_v40 = vpop.f32.mrf.mxu1 }
 0x10e   :  { %3490 = vmatmul.bf16.vlgmr.msra.gmra.mxu0 %v13459_v26  ;;  %v9983_v29 = vld [vmem:[#allocation5 + $0xe58] sm:$0xf0]  ;;  %v3282_v46 = vadd.f32 %v3281_v40, %v3267_v39  ;;  %v12383_v39 = vld [vmem:[#allocation5 + $0x3dc] sm:$0xf0] }
 0x10f   :  { %3517 = vmatpush.bf16.msra.mxu2 %v9214_v44  ;;  %3538 = vmatpush.bf16.msrb.mxu0 %v8642_v48  ;;  %v12310_v36 = vld [vmem:[#allocation5 + $0x19c] sm:$0xf]  ;;  %v9986_v41 = vor.u32 %v12710_v28, %v9983_v29  ;;  %v9157_v40 = vld [vmem:[#allocation5 + $0x7a0] sm:$0xf] }
 0x110   :  { %3504 = vmatmul.bf16.vlgmr.msra.gmra.mxu1 %v13461_v33  ;;  %v8383_v37 = vld [vmem:[#allocation5 + $0x1d8] sm:$0xf0] }
 0x111   :  { %3531 = vmatpush.bf16.msra.mxu3 %v9726_v47  ;;  %3552 = vmatpush.bf16.msrb.mxu1 %v9154_v49  ;;  %v12438_v38 = vld [vmem:[#allocation5 + $0x59c] sm:$0xf]  ;;  %v8386_v49 = vor.u32 %v12310_v36, %v8383_v37 }
 0x112   :  { %3518 = vmatmul.bf16.vlgmr.msra.gmra.mxu2 %v13453_v8  ;;  %v8895_v43 = vld [vmem:[#allocation5 + $0x5d8] sm:$0xf0] }
 0x113   :  { %3566 = vmatpush.bf16.msrb.mxu2 %v9666_v50  ;;  %3539 = vmatpush.bf16.msrb.mxu0 %v8578_v60  ;;  %v12566_v44 = vld [vmem:[#allocation5 + $0x99c] sm:$0xf]  ;;  %v8898_v50 = vor.u32 %v12438_v38, %v8895_v43  ;;  %v8645_v38 = vld [vmem:[#allocation5 + $0x3a0] sm:$0xf] }
 0x114   :  { %3532 = vmatmul.bf16.vlgmr.msra.gmra.mxu3 %v13455_v15  ;;  %v12694_v47 = vld [vmem:[#allocation5 + $0xd9c] sm:$0xf]  ;;  %v9410_v51 = vor.u32 %v12566_v44, %v9407_v45  ;;  %v12511_v43 = vld [vmem:[#allocation5 + $0x7dc] sm:$0xf0] }
 0x115   :  { %3580 = vmatpush.bf16.msrb.mxu3 %v10178_v54  ;;  %3553 = vmatpush.bf16.msrb.mxu1 %v9090_v61  ;;  %v9919_v48 = vld [vmem:[#allocation5 + $0xdd8] sm:$0xf0]  ;;  %v3295_v55 = vpop.f32.mrf.mxu2  ;;  %v9669_v44 = vld [vmem:[#allocation5 + $0xba0] sm:$0xf] }
 0x116   :  { %v12294_v52 = vld [vmem:[#allocation5 + $0x11c] sm:$0xf]  ;;  %v9922_v56 = vor.u32 %v12694_v47, %v9919_v48  ;;  %v3296_v60 = vadd.f32 %v3295_v55, %v3282_v46  ;;  %v12639_v45 = vld [vmem:[#allocation5 + $0xbdc] sm:$0xf0] }
 0x117   :  { %3567 = vmatpush.bf16.msrb.mxu2 %v9602_v62  ;;  %3540 = vmatpush.bf16.msrb.mxu0 %v8514_v14  ;;  %v8319_v53 = vld [vmem:[#allocation5 + $0x158] sm:$0xf0]  ;;  %v3309_v63 = vpop.f32.mrf.mxu3  ;;  %v10181_v48 = vld [vmem:[#allocation5 + $0xfa0] sm:$0xf] }
 0x118   :  { %v12422_v54 = vld [vmem:[#allocation5 + $0x51c] sm:$0xf]  ;;  %v8322_v0 = vor.u32 %v12294_v52, %v8319_v53  ;;  %v13509_v1 = vadd.f32 %v3309_v63, %v3296_v60  ;;  %v9158_v52 = vor.u32 %v12511_v43, %v9157_v40  ;;  %v9670_v53 = vor.u32 %v12639_v45, %v9669_v44  ;;  %v12367_v55 = vld [vmem:[#allocation5 + $0x35c] sm:$0xf0] }
 0x119   :  { %3581 = vmatpush.bf16.msrb.mxu3 %v10114_v5  ;;  %3554 = vmatpush.bf16.msrb.mxu1 %v9026_v16  ;;  %v8831_v57 = vld [vmem:[#allocation5 + $0x558] sm:$0xf0]  ;;  %v12623_v60 = vld [vmem:[#allocation5 + $0xb5c] sm:$0xf0] }
 0x11a   :  { %v12550_v58 = vld [vmem:[#allocation5 + $0x91c] sm:$0xf]  ;;  %v8834_v5 = vor.u32 %v12422_v54, %v8831_v57  ;;  %v8581_v54 = vld [vmem:[#allocation5 + $0x320] sm:$0xf] }
 0x11b   :  { %3568 = vmatpush.bf16.msrb.mxu2 %v9538_v17  ;;  %3541 = vmatpush.bf16.msrb.mxu0 %v8450_v31  ;;  %v9343_v59 = vld [vmem:[#allocation5 + $0x958] sm:$0xf0]  ;;  %v8582_v63 = vor.u32 %v12367_v55, %v8581_v54  ;;  %v8389_v45 = vld [vmem:[#allocation5 + $0x1a0] sm:$0xf] }
 0x11c   :  { %v12678_v61 = vld [vmem:[#allocation5 + $0xd1c] sm:$0xf]  ;;  %v9346_v6 = vor.u32 %v12550_v58, %v9343_v59  ;;  %v12495_v58 = vld [vmem:[#allocation5 + $0x75c] sm:$0xf0] }
 0x11d   :  { %3582 = vmatpush.bf16.msrb.mxu3 %v10050_v22  ;;  %3555 = vmatpush.bf16.msrb.mxu1 %v8962_v32  ;;  %v9855_v62 = vld [vmem:[#allocation5 + $0xd58] sm:$0xf0]  ;;  %v9605_v59 = vld [vmem:[#allocation5 + $0xb20] sm:$0xf] }
 0x11e   :  { %v12278_v7 = vld [vmem:[#allocation5 + $0x9c] sm:$0xf]  ;;  %v9858_v13 = vor.u32 %v12678_v61, %v9855_v62  ;;  %v10117_v61 = vld [vmem:[#allocation5 + $0xf20] sm:$0xf] }
 0x11f   :  { %3569 = vmatpush.bf16.msrb.mxu2 %v9474_v35  ;;  %3542 = vmatpush.bf16.msrb.mxu0 %v8386_v49  ;;  %v8255_v9 = vld [vmem:[#allocation5 + $0xd8] sm:$0xf0]  ;;  %v12767_v49 = vld [vmem:[#allocation5 + $0xfdc] sm:$0xf0]  ;;  %v13521_v40 = vpop.f32.mrf.mxu3 }
 0x120   :  { %v12406_v12 = vld [vmem:[#allocation5 + $0x49c] sm:$0xf]  ;;  %v8258_v20 = vor.u32 %v12278_v7, %v8255_v9  ;;  %v10182_v57 = vor.u32 %v12767_v49, %v10181_v48  ;;  %v12751_v62 = vld [vmem:[#allocation5 + $0xf5c] sm:$0xf0] }
 0x121   :  { %3583 = vmatpush.bf16.msrb.mxu3 %v9986_v41  ;;  %3556 = vmatpush.bf16.msrb.mxu1 %v8898_v50  ;;  %v8767_v14 = vld [vmem:[#allocation5 + $0x4d8] sm:$0xf0]  ;;  %v12351_v7 = vld [vmem:[#allocation5 + $0x2dc] sm:$0xf0] }
 0x122   :  { %v12534_v16 = vld [vmem:[#allocation5 + $0x89c] sm:$0xf]  ;;  %v8770_v24 = vor.u32 %v12406_v12, %v8767_v14  ;;  %v9029_v9 = vld [vmem:[#allocation5 + $0x6a0] sm:$0xf]  ;;  %v13511_v12 = vpop.f32.mrf.mxu0  ;;  %v10118_v14 = vor.u32 %v12751_v62, %v10117_v61 }
 0x123   :  { %3570 = vmatpush.bf16.msrb.mxu2 %v9410_v51  ;;  %v9279_v17 = vld [vmem:[#allocation5 + $0x8d8] sm:$0xf0]  ;;  %3543 = vmatpush.bf16.msrb.mxu0 %v8322_v0  ;;  %v8646_v51 = vor.u32 %v12383_v39, %v8645_v38  ;;  %v9989_v38 = vld [vmem:[#allocation5 + $0xe20] sm:$0xf] }
 0x124   :  { %v12662_v18 = vld [vmem:[#allocation5 + $0xc9c] sm:$0xf]  ;;  %v9282_v27 = vor.u32 %v12534_v16, %v9279_v17  ;;  %v12479_v16 = vld [vmem:[#allocation5 + $0x6dc] sm:$0xf0] }
 0x125   :  { %3584 = vmatpush.bf16.msrb.mxu3 %v9922_v56  ;;  %v9791_v19 = vld [vmem:[#allocation5 + $0xcd8] sm:$0xf0]  ;;  %3557 = vmatpush.bf16.msrb.mxu1 %v8834_v5  ;;  %v9093_v56 = vld [vmem:[#allocation5 + $0x720] sm:$0xf]  ;;  %v9606_v5 = vor.u32 %v12623_v60, %v9605_v59 }
 0x126   :  { %v12262_v22 = vld [vmem:[#allocation5 + $0x1c] sm:$0xf]  ;;  %v9794_v32 = vor.u32 %v12662_v18, %v9791_v19  ;;  %v9094_v0 = vor.u32 %v12495_v58, %v9093_v56  ;;  %v9541_v17 = vld [vmem:[#allocation5 + $0xaa0] sm:$0xf] }
 0x127   :  { %v8191_v23 = vld [vmem:[#allocation5 + $0x58] sm:$0xf0]  ;;  %3571 = vmatpush.bf16.msrb.mxu2 %v9346_v6  ;;  %3544 = vmatpush.bf16.msrb.mxu0 %v8258_v20  ;;  %v8517_v6 = vld [vmem:[#allocation5 + $0x2a0] sm:$0xf] }
 0x128   :  { %v12390_v28 = vld [vmem:[#allocation5 + $0x41c] sm:$0xf]  ;;  %v8194_v41 = vor.u32 %v12262_v22, %v8191_v23  ;;  %v12607_v18 = vld [vmem:[#allocation5 + $0xadc] sm:$0xf0]  ;;  %v8518_v22 = vor.u32 %v12351_v7, %v8517_v6  ;;  %v9030_v23 = vor.u32 %v12479_v16, %v9029_v9 }
 0x129   :  { %v8703_v29 = vld [vmem:[#allocation5 + $0x458] sm:$0xf0]  ;;  %3585 = vmatpush.bf16.msrb.mxu3 %v9858_v13  ;;  %3558 = vmatpush.bf16.msrb.mxu1 %v8770_v24  ;;  %v13513_v13 = vpop.f32.mrf.mxu1  ;;  %v10053_v19 = vld [vmem:[#allocation5 + $0xea0] sm:$0xf]  ;;  %v9542_v24 = vor.u32 %v12607_v18, %v9541_v17 }
 0x12a   :  { %v12518_v31 = vld [vmem:[#allocation5 + $0x81c] sm:$0xf]  ;;  %v8706_v46 = vor.u32 %v12390_v28, %v8703_v29  ;;  %v12735_v20 = vld [vmem:[#allocation5 + $0xedc] sm:$0xf0] }
 0x12b   :  { %v9215_v35 = vld [vmem:[#allocation5 + $0x858] sm:$0xf0]  ;;  %3572 = vmatpush.bf16.msrb.mxu2 %v9282_v27  ;;  %3545 = vmatpush.bf16.msrb.mxu0 %v8194_v41  ;;  %v8453_v27 = vld [vmem:[#allocation5 + $0x220] sm:$0xf]  ;;  %v3323_v48 = vpop.f32.mrf.mxu0 }
 0x12c   :  { %v12646_v36 = vld [vmem:[#allocation5 + $0xc1c] sm:$0xf]  ;;  %v9218_v47 = vor.u32 %v12518_v31, %v9215_v35  ;;  %v12335_v28 = vld [vmem:[#allocation5 + $0x25c] sm:$0xf0]  ;;  %v13519_v31 = vpop.f32.mrf.mxu2 }
 0x12d   :  { %v9727_v37 = vld [vmem:[#allocation5 + $0xc58] sm:$0xf0]  ;;  %3586 = vmatpush.bf16.msrb.mxu3 %v9794_v32  ;;  %3559 = vmatpush.bf16.msrb.mxu1 %v8706_v46  ;;  %v8965_v29 = vld [vmem:[#allocation5 + $0x620] sm:$0xf]  ;;  %v10054_v32 = vor.u32 %v12735_v20, %v10053_v19  ;;  %v8454_v41 = vor.u32 %v12335_v28, %v8453_v27 }
 0x12e   :  { %v9730_v50 = vor.u32 %v12646_v36, %v9727_v37  ;;  %3546 = vmatmul.bf16.vlgmr.msrb.gmra.mxu0 %v13459_v26  ;;  %v12463_v35 = vld [vmem:[#allocation5 + $0x65c] sm:$0xf0] }
 0x12f   :  { %3573 = vmatpush.bf16.msrb.mxu2 %v9218_v47  ;;  %3594 = vmatpush.bf16.msra.mxu0 %v8646_v51  ;;  %v9477_v36 = vld [vmem:[#allocation5 + $0xa20] sm:$0xf]  ;;  %v8966_v43 = vor.u32 %v12463_v35, %v8965_v29 }
 0x130   :  { %3560 = vmatmul.bf16.vlgmr.msrb.gmra.mxu1 %v13461_v33  ;;  %v12591_v37 = vld [vmem:[#allocation5 + $0xa5c] sm:$0xf0] }
 0x131   :  { %3587 = vmatpush.bf16.msrb.mxu3 %v9730_v50  ;;  %3608 = vmatpush.bf16.msra.mxu1 %v9158_v52  ;;  %v12719_v39 = vld [vmem:[#allocation5 + $0xe5c] sm:$0xf0]  ;;  %v9478_v44 = vor.u32 %v12591_v37, %v9477_v36  ;;  %v3337_v49 = vpop.f32.mrf.mxu1 }
 0x132   :  { %3574 = vmatmul.bf16.vlgmr.msrb.gmra.mxu2 %v13453_v8  ;;  %v12319_v46 = vld [vmem:[#allocation5 + $0x1dc] sm:$0xf0]  ;;  %v9990_v50 = vor.u32 %v12719_v39, %v9989_v38  ;;  %v3338_v54 = vadd.f32 %v3337_v49, %v3323_v48 }
 0x133   :  { %3622 = vmatpush.bf16.msra.mxu2 %v9670_v53  ;;  %3595 = vmatpush.bf16.msra.mxu0 %v8582_v63  ;;  %v8901_v47 = vld [vmem:[#allocation5 + $0x5a0] sm:$0xf] }
 0x134   :  { %3588 = vmatmul.bf16.vlgmr.msrb.gmra.mxu3 %v13455_v15  ;;  %v12447_v51 = vld [vmem:[#allocation5 + $0x5dc] sm:$0xf0] }
 0x135   :  { %3636 = vmatpush.bf16.msra.mxu3 %v10182_v57  ;;  %3609 = vmatpush.bf16.msra.mxu1 %v9094_v0  ;;  %v9413_v52 = vld [vmem:[#allocation5 + $0x9a0] sm:$0xf]  ;;  %v8390_v57 = vor.u32 %v12319_v46, %v8389_v45  ;;  %v8902_v58 = vor.u32 %v12447_v51, %v8901_v47  ;;  %v3351_v63 = vpop.f32.mrf.mxu2 }
 0x136   :  { %v12575_v53 = vld [vmem:[#allocation5 + $0x9dc] sm:$0xf0]  ;;  %v3352_v9 = vadd.f32 %v3351_v63, %v3338_v54  ;;  %v12503_v54 = vld [vmem:[#allocation5 + $0x7a4] sm:$0xf] }
 0x137   :  { %3623 = vmatpush.bf16.msra.mxu2 %v9606_v5  ;;  %3596 = vmatpush.bf16.msra.mxu0 %v8518_v22  ;;  %v9925_v55 = vld [vmem:[#allocation5 + $0xda0] sm:$0xf]  ;;  %v9414_v59 = vor.u32 %v12575_v53, %v9413_v52  ;;  %v3365_v17 = vpop.f32.mrf.mxu3  ;;  %v12375_v52 = vld [vmem:[#allocation5 + $0x3a4] sm:$0xf] }
 0x138   :  { %v12703_v56 = vld [vmem:[#allocation5 + $0xddc] sm:$0xf0]  ;;  %v13523_v19 = vadd.f32 %v3365_v17, %v3352_v9  ;;  %v8647_v53 = vld [vmem:[#allocation5 + $0x3e0] sm:$0xf0] }
 0x139   :  { %3637 = vmatpush.bf16.msra.mxu3 %v10118_v14  ;;  %3610 = vmatpush.bf16.msra.mxu1 %v9030_v23  ;;  %v8325_v60 = vld [vmem:[#allocation5 + $0x120] sm:$0xf]  ;;  %v9926_v0 = vor.u32 %v12703_v56, %v9925_v55  ;;  %v9159_v56 = vld [vmem:[#allocation5 + $0x7e0] sm:$0xf0] }
 0x13a   :  { %v12303_v61 = vld [vmem:[#allocation5 + $0x15c] sm:$0xf0]  ;;  %v8583_v9 = vld [vmem:[#allocation5 + $0x360] sm:$0xf0] }
 0x13b   :  { %3624 = vmatpush.bf16.msra.mxu2 %v9542_v24  ;;  %3597 = vmatpush.bf16.msra.mxu0 %v8454_v41  ;;  %v8837_v62 = vld [vmem:[#allocation5 + $0x520] sm:$0xf]  ;;  %v8326_v18 = vor.u32 %v12303_v61, %v8325_v60  ;;  %v12759_v61 = vld [vmem:[#allocation5 + $0xfa4] sm:$0xf] }
 0x13c   :  { %v12431_v5 = vld [vmem:[#allocation5 + $0x55c] sm:$0xf0]  ;;  %v9095_v17 = vld [vmem:[#allocation5 + $0x760] sm:$0xf0] }
 0x13d   :  { %3638 = vmatpush.bf16.msra.mxu3 %v10054_v32  ;;  %3611 = vmatpush.bf16.msra.mxu1 %v8966_v43  ;;  %v9349_v6 = vld [vmem:[#allocation5 + $0x920] sm:$0xf]  ;;  %v8838_v20 = vor.u32 %v12431_v5, %v8837_v62  ;;  %v10183_v62 = vld [vmem:[#allocation5 + $0xfe0] sm:$0xf0]  ;;  %v9162_v5 = vor.u32 %v12503_v54, %v9159_v56 }
 0x13e   :  { %v12559_v7 = vld [vmem:[#allocation5 + $0x95c] sm:$0xf0]  ;;  %v8967_v54 = vld [vmem:[#allocation5 + $0x660] sm:$0xf0] }
 0x13f   :  { %3625 = vmatpush.bf16.msra.mxu2 %v9478_v44  ;;  %v9861_v14 = vld [vmem:[#allocation5 + $0xd20] sm:$0xf]  ;;  %3598 = vmatpush.bf16.msra.mxu0 %v8390_v57  ;;  %v9350_v22 = vor.u32 %v12559_v7, %v9349_v6  ;;  %v12631_v57 = vld [vmem:[#allocation5 + $0xba4] sm:$0xf] }
 0x140   :  { %v12687_v16 = vld [vmem:[#allocation5 + $0xd5c] sm:$0xf0]  ;;  %v12359_v7 = vld [vmem:[#allocation5 + $0x324] sm:$0xf] }
 0x141   :  { %3639 = vmatpush.bf16.msra.mxu3 %v9990_v50  ;;  %3612 = vmatpush.bf16.msra.mxu1 %v8902_v58  ;;  %v8261_v23 = vld [vmem:[#allocation5 + $0xa0] sm:$0xf]  ;;  %v9862_v28 = vor.u32 %v12687_v16, %v9861_v14  ;;  %v9671_v58 = vld [vmem:[#allocation5 + $0xbe0] sm:$0xf0]  ;;  %v10186_v16 = vor.u32 %v12759_v61, %v10183_v62 }
 0x142   :  { %v12287_v24 = vld [vmem:[#allocation5 + $0xdc] sm:$0xf0]  ;;  %v9674_v6 = vor.u32 %v12631_v57, %v9671_v58  ;;  %v12487_v14 = vld [vmem:[#allocation5 + $0x724] sm:$0xf] }
 0x143   :  { %3626 = vmatpush.bf16.msra.mxu2 %v9414_v59  ;;  %v8773_v27 = vld [vmem:[#allocation5 + $0x4a0] sm:$0xf]  ;;  %3599 = vmatpush.bf16.msra.mxu0 %v8326_v18  ;;  %v8262_v38 = vor.u32 %v12287_v24, %v8261_v23  ;;  %v12615_v18 = vld [vmem:[#allocation5 + $0xb24] sm:$0xf]  ;;  %v8586_v24 = vor.u32 %v12359_v7, %v8583_v9 }
 0x144   :  { %v12415_v29 = vld [vmem:[#allocation5 + $0x4dc] sm:$0xf0]  ;;  %v10119_v23 = vld [vmem:[#allocation5 + $0xf60] sm:$0xf0] }
 0x145   :  { %3640 = vmatpush.bf16.msra.mxu3 %v9926_v0  ;;  %v9285_v32 = vld [vmem:[#allocation5 + $0x8a0] sm:$0xf]  ;;  %3613 = vmatpush.bf16.msra.mxu1 %v8838_v20  ;;  %v8774_v43 = vor.u32 %v12415_v29, %v8773_v27  ;;  %v8650_v0 = vor.u32 %v12375_v52, %v8647_v53  ;;  %v9607_v20 = vld [vmem:[#allocation5 + $0xb60] sm:$0xf0]  ;;  %v9098_v27 = vor.u32 %v12487_v14, %v9095_v17  ;;  %v13533_v52 = vpop.f32.mrf.mxu2 }
 0x146   :  { %v12543_v35 = vld [vmem:[#allocation5 + $0x8dc] sm:$0xf0]  ;;  %v12343_v29 = vld [vmem:[#allocation5 + $0x2a4] sm:$0xf] }
 0x147   :  { %v9797_v36 = vld [vmem:[#allocation5 + $0xca0] sm:$0xf]  ;;  %3627 = vmatpush.bf16.msra.mxu2 %v9350_v22  ;;  %v9286_v44 = vor.u32 %v12543_v35, %v9285_v32  ;;  %3600 = vmatpush.bf16.msra.mxu0 %v8262_v38  ;;  %v12743_v22 = vld [vmem:[#allocation5 + $0xf24] sm:$0xf] }
 0x148   :  { %v12671_v37 = vld [vmem:[#allocation5 + $0xcdc] sm:$0xf0]  ;;  %v8519_v32 = vld [vmem:[#allocation5 + $0x2e0] sm:$0xf0]  ;;  %v10122_v38 = vor.u32 %v12743_v22, %v10119_v23 }
 0x149   :  { %v8197_v39 = vld [vmem:[#allocation5 + $0x20] sm:$0xf]  ;;  %3641 = vmatpush.bf16.msra.mxu3 %v9862_v28  ;;  %v9798_v48 = vor.u32 %v12671_v37, %v9797_v36  ;;  %3614 = vmatpush.bf16.msra.mxu1 %v8774_v43  ;;  %v9610_v28 = vor.u32 %v12615_v18, %v9607_v20  ;;  %v12471_v35 = vld [vmem:[#allocation5 + $0x6a4] sm:$0xf]  ;;  %v13525_v36 = vpop.f32.mrf.mxu0  ;;  %v13527_v37 = vpop.f32.mrf.mxu1 }
 0x14a   :  { %v12271_v41 = vld [vmem:[#allocation5 + $0x5c] sm:$0xf0]  ;;  %v9543_v43 = vld [vmem:[#allocation5 + $0xae0] sm:$0xf0] }
 0x14b   :  { %v8709_v45 = vld [vmem:[#allocation5 + $0x420] sm:$0xf]  ;;  %v8198_v55 = vor.u32 %v12271_v41, %v8197_v39  ;;  %3628 = vmatpush.bf16.msra.mxu2 %v9286_v44  ;;  %v9031_v39 = vld [vmem:[#allocation5 + $0x6e0] sm:$0xf0] }
 0x14c   :  { %v12399_v46 = vld [vmem:[#allocation5 + $0x45c] sm:$0xf0]  ;;  %v12599_v41 = vld [vmem:[#allocation5 + $0xaa4] sm:$0xf] }
 0x14d   :  { %v9221_v47 = vld [vmem:[#allocation5 + $0x820] sm:$0xf]  ;;  %v8710_v59 = vor.u32 %v12399_v46, %v8709_v45  ;;  %3642 = vmatpush.bf16.msra.mxu3 %v9798_v48  ;;  %3601 = vmatpush.bf16.msra.mxu0 %v8198_v55  ;;  %v12727_v44 = vld [vmem:[#allocation5 + $0xea4] sm:$0xf]  ;;  %v8522_v46 = vor.u32 %v12343_v29, %v8519_v32  ;;  %v9546_v48 = vor.u32 %v12599_v41, %v9543_v43 }
 0x14e   :  { %v12527_v49 = vld [vmem:[#allocation5 + $0x85c] sm:$0xf0]  ;;  %v10055_v45 = vld [vmem:[#allocation5 + $0xee0] sm:$0xf0] }
 0x14f   :  { %v9733_v50 = vld [vmem:[#allocation5 + $0xc20] sm:$0xf]  ;;  %v9222_v60 = vor.u32 %v12527_v49, %v9221_v47  ;;  %3615 = vmatpush.bf16.msra.mxu1 %v8710_v59  ;;  %v9034_v47 = vor.u32 %v12471_v35, %v9031_v39  ;;  %v12327_v49 = vld [vmem:[#allocation5 + $0x224] sm:$0xf]  ;;  %v10058_v53 = vor.u32 %v12727_v44, %v10055_v45  ;;  %v13535_v59 = vpop.f32.mrf.mxu3 }
 0x150   :  { %v12655_v51 = vld [vmem:[#allocation5 + $0xc5c] sm:$0xf0]  ;;  %3602 = vmatmul.bf16.vlgmr.msra.gmra.mxu0 %v13459_v26  ;;  %v12583_v55 = vld [vmem:[#allocation5 + $0xa24] sm:$0xf] }
 0x151   :  { %v9734_v63 = vor.u32 %v12655_v51, %v9733_v50  ;;  %3629 = vmatpush.bf16.msra.mxu2 %v9222_v60  ;;  %3650 = vmatpush.bf16.msrb.mxu0 %v8650_v0  ;;  %v8455_v50 = vld [vmem:[#allocation5 + $0x260] sm:$0xf0]  ;;  %v3393_v7 = vpop.f32.mrf.mxu1 }
 0x152   :  { %3616 = vmatmul.bf16.vlgmr.msra.gmra.mxu1 %v13461_v33  ;;  %v12455_v51 = vld [vmem:[#allocation5 + $0x624] sm:$0xf]  ;;  %v8458_v60 = vor.u32 %v12327_v49, %v8455_v50 }
 0x153   :  { %3643 = vmatpush.bf16.msra.mxu3 %v9734_v63  ;;  %3664 = vmatpush.bf16.msrb.mxu1 %v9162_v5  ;;  %v9479_v56 = vld [vmem:[#allocation5 + $0xa60] sm:$0xf0]  ;;  %v8970_v61 = vor.u32 %v12455_v51, %v8967_v54 }
 0x154   :  { %3630 = vmatmul.bf16.vlgmr.msra.gmra.mxu2 %v13453_v8  ;;  %v12711_v57 = vld [vmem:[#allocation5 + $0xe24] sm:$0xf]  ;;  %v9482_v62 = vor.u32 %v12583_v55, %v9479_v56 }
 0x155   :  { %3678 = vmatpush.bf16.msrb.mxu2 %v9674_v6  ;;  %3651 = vmatpush.bf16.msrb.mxu0 %v8586_v24  ;;  %v9991_v58 = vld [vmem:[#allocation5 + $0xe60] sm:$0xf0]  ;;  %v3379_v6 = vpop.f32.mrf.mxu0  ;;  %v3407_v35 = vpop.f32.mrf.mxu2 }
 0x156   :  { %3644 = vmatmul.bf16.vlgmr.msra.gmra.mxu3 %v13455_v15  ;;  %v12311_v63 = vld [vmem:[#allocation5 + $0x1a4] sm:$0xf]  ;;  %v9994_v9 = vor.u32 %v12711_v57, %v9991_v58  ;;  %v3394_v18 = vadd.f32 %v3393_v7, %v3379_v6 }
 0x157   :  { %3692 = vmatpush.bf16.msrb.mxu3 %v10186_v16  ;;  %3665 = vmatpush.bf16.msrb.mxu1 %v9098_v27  ;;  %v8391_v0 = vld [vmem:[#allocation5 + $0x1e0] sm:$0xf0] }
 0x158   :  { %v12439_v5 = vld [vmem:[#allocation5 + $0x5a4] sm:$0xf]  ;;  %v8394_v23 = vor.u32 %v12311_v63, %v8391_v0  ;;  %v3408_v44 = vadd.f32 %v3407_v35, %v3394_v18  ;;  %v12640_v35 = vld [vmem:[#allocation5 + $0xbe4] sm:$0xf0] }
 0x159   :  { %3679 = vmatpush.bf16.msrb.mxu2 %v9610_v28  ;;  %3652 = vmatpush.bf16.msrb.mxu0 %v8522_v46  ;;  %v8903_v14 = vld [vmem:[#allocation5 + $0x5e0] sm:$0xf0] }
 0x15a   :  { %v12567_v16 = vld [vmem:[#allocation5 + $0x9a4] sm:$0xf]  ;;  %v8906_v24 = vor.u32 %v12439_v5, %v8903_v14 }
 0x15b   :  { %3693 = vmatpush.bf16.msrb.mxu3 %v10122_v38  ;;  %3666 = vmatpush.bf16.msrb.mxu1 %v9034_v47  ;;  %v9415_v17 = vld [vmem:[#allocation5 + $0x9e0] sm:$0xf0]  ;;  %v3421_v47 = vpop.f32.mrf.mxu3 }
 0x15c   :  { %v12695_v20 = vld [vmem:[#allocation5 + $0xda4] sm:$0xf]  ;;  %v9418_v27 = vor.u32 %v12567_v16, %v9415_v17  ;;  %v13537_v49 = vadd.f32 %v3421_v47, %v3408_v44 }
 0x15d   :  { %3680 = vmatpush.bf16.msrb.mxu2 %v9546_v48  ;;  %v9927_v22 = vld [vmem:[#allocation5 + $0xde0] sm:$0xf0]  ;;  %3653 = vmatpush.bf16.msrb.mxu0 %v8458_v60 }
 0x15e   :  { %v12295_v28 = vld [vmem:[#allocation5 + $0x124] sm:$0xf]  ;;  %v9930_v38 = vor.u32 %v12695_v20, %v9927_v22  ;;  %14071 = vst [vmem:[#allocation12_spill] sm:$0xff] %v13537_v49 }
 0x15f   :  { %3694 = vmatpush.bf16.msrb.mxu3 %v10058_v53  ;;  %3667 = vmatpush.bf16.msrb.mxu1 %v8970_v61  ;;  %v8327_v29 = vld [vmem:[#allocation5 + $0x160] sm:$0xf0] }
 0x160   :  { %v12423_v32 = vld [vmem:[#allocation5 + $0x524] sm:$0xf]  ;;  %v8330_v48 = vor.u32 %v12295_v28, %v8327_v29  ;;  %v12512_v29 = vld [vmem:[#allocation5 + $0x7e4] sm:$0xf0] }
 0x161   :  { %3681 = vmatpush.bf16.msrb.mxu2 %v9482_v62  ;;  %v8839_v39 = vld [vmem:[#allocation5 + $0x560] sm:$0xf0]  ;;  %3654 = vmatpush.bf16.msrb.mxu0 %v8394_v23  ;;  %v8653_v23 = vld [vmem:[#allocation5 + $0x3a8] sm:$0xf] }
 0x162   :  { %v12551_v41 = vld [vmem:[#allocation5 + $0x924] sm:$0xf]  ;;  %v8842_v50 = vor.u32 %v12423_v32, %v8839_v39  ;;  %v9677_v32 = vld [vmem:[#allocation5 + $0xba8] sm:$0xf] }
 0x163   :  { %3695 = vmatpush.bf16.msrb.mxu3 %v9994_v9  ;;  %v9351_v43 = vld [vmem:[#allocation5 + $0x960] sm:$0xf0]  ;;  %3668 = vmatpush.bf16.msrb.mxu1 %v8906_v24  ;;  %v12384_v24 = vld [vmem:[#allocation5 + $0x3e4] sm:$0xf0]  ;;  %v9678_v47 = vor.u32 %v12640_v35, %v9677_v32  ;;  %v13547_v32 = vpop.f32.mrf.mxu2 }
 0x164   :  { %v12679_v45 = vld [vmem:[#allocation5 + $0xd24] sm:$0xf]  ;;  %v9354_v51 = vor.u32 %v12551_v41, %v9351_v43  ;;  %v10189_v41 = vld [vmem:[#allocation5 + $0xfa8] sm:$0xf] }
 0x165   :  { %v9863_v46 = vld [vmem:[#allocation5 + $0xd60] sm:$0xf0]  ;;  %3682 = vmatpush.bf16.msrb.mxu2 %v9418_v27  ;;  %3655 = vmatpush.bf16.msrb.mxu0 %v8330_v48  ;;  %v9165_v27 = vld [vmem:[#allocation5 + $0x7a8] sm:$0xf] }
 0x166   :  { %v12279_v53 = vld [vmem:[#allocation5 + $0xa4] sm:$0xf]  ;;  %v9866_v56 = vor.u32 %v12679_v45, %v9863_v46  ;;  %v12768_v43 = vld [vmem:[#allocation5 + $0xfe4] sm:$0xf0]  ;;  %v8654_v45 = vor.u32 %v12384_v24, %v8653_v23  ;;  %v9166_v46 = vor.u32 %v12512_v29, %v9165_v27 }
 0x167   :  { %v8263_v54 = vld [vmem:[#allocation5 + $0xe0] sm:$0xf0]  ;;  %3696 = vmatpush.bf16.msrb.mxu3 %v9930_v38  ;;  %3669 = vmatpush.bf16.msrb.mxu1 %v8842_v50  ;;  %v8589_v48 = vld [vmem:[#allocation5 + $0x328] sm:$0xf] }
 0x168   :  { %v12407_v55 = vld [vmem:[#allocation5 + $0x4a4] sm:$0xf]  ;;  %v8266_v63 = vor.u32 %v12279_v53, %v8263_v54  ;;  %v12368_v50 = vld [vmem:[#allocation5 + $0x364] sm:$0xf0]  ;;  %v10190_v53 = vor.u32 %v12768_v43, %v10189_v41 }
 0x169   :  { %v8775_v57 = vld [vmem:[#allocation5 + $0x4e0] sm:$0xf0]  ;;  %3683 = vmatpush.bf16.msrb.mxu2 %v9354_v51  ;;  %v9101_v51 = vld [vmem:[#allocation5 + $0x728] sm:$0xf] }
 0x16a   :  { %v12535_v58 = vld [vmem:[#allocation5 + $0x8a4] sm:$0xf]  ;;  %v8778_v6 = vor.u32 %v12407_v55, %v8775_v57  ;;  %3656 = vmatpush.bf16.msrb.mxu0 %v8266_v63  ;;  %v12496_v54 = vld [vmem:[#allocation5 + $0x764] sm:$0xf0] }
 0x16b   :  { %v9287_v60 = vld [vmem:[#allocation5 + $0x8e0] sm:$0xf0]  ;;  %3697 = vmatpush.bf16.msrb.mxu3 %v9866_v56  ;;  %v9613_v55 = vld [vmem:[#allocation5 + $0xb28] sm:$0xf] }
 0x16c   :  { %v12663_v61 = vld [vmem:[#allocation5 + $0xca4] sm:$0xf]  ;;  %v9290_v7 = vor.u32 %v12535_v58, %v9287_v60  ;;  %3670 = vmatpush.bf16.msrb.mxu1 %v8778_v6  ;;  %v12624_v56 = vld [vmem:[#allocation5 + $0xb64] sm:$0xf0]  ;;  %v8590_v60 = vor.u32 %v12368_v50, %v8589_v48  ;;  %v13539_v6 = vpop.f32.mrf.mxu0 }
 0x16d   :  { %v9799_v62 = vld [vmem:[#allocation5 + $0xce0] sm:$0xf0]  ;;  %v10125_v57 = vld [vmem:[#allocation5 + $0xf28] sm:$0xf] }
 0x16e   :  { %v12263_v0 = vld [vmem:[#allocation5 + $0x24] sm:$0xf]  ;;  %v9802_v17 = vor.u32 %v12663_v61, %v9799_v62  ;;  %3684 = vmatpush.bf16.msrb.mxu2 %v9290_v7  ;;  %v12752_v58 = vld [vmem:[#allocation5 + $0xf64] sm:$0xf0]  ;;  %v9102_v61 = vor.u32 %v12496_v54, %v9101_v51  ;;  %v9614_v62 = vor.u32 %v12624_v56, %v9613_v55  ;;  %v13541_v7 = vpop.f32.mrf.mxu1 }
 0x16f   :  { %v8199_v5 = vld [vmem:[#allocation5 + $0x60] sm:$0xf0]  ;;  %v8525_v63 = vld [vmem:[#allocation5 + $0x2a8] sm:$0xf] }
 0x170   :  { %v12391_v9 = vld [vmem:[#allocation5 + $0x424] sm:$0xf]  ;;  %v8202_v28 = vor.u32 %v12263_v0, %v8199_v5  ;;  %3698 = vmatpush.bf16.msrb.mxu3 %v9802_v17  ;;  %v12352_v0 = vld [vmem:[#allocation5 + $0x2e4] sm:$0xf0] }
 0x171   :  { %v8711_v14 = vld [vmem:[#allocation5 + $0x460] sm:$0xf0]  ;;  %v9037_v5 = vld [vmem:[#allocation5 + $0x6a8] sm:$0xf] }
 0x172   :  { %v12519_v16 = vld [vmem:[#allocation5 + $0x824] sm:$0xf]  ;;  %v8714_v38 = vor.u32 %v12391_v9, %v8711_v14  ;;  %3657 = vmatpush.bf16.msrb.mxu0 %v8202_v28  ;;  %v10126_v9 = vor.u32 %v12752_v58, %v10125_v57  ;;  %v12480_v14 = vld [vmem:[#allocation5 + $0x6e4] sm:$0xf0] }
 0x173   :  { %v9223_v18 = vld [vmem:[#allocation5 + $0x860] sm:$0xf0]  ;;  %v12608_v17 = vld [vmem:[#allocation5 + $0xae4] sm:$0xf0]  ;;  %v9038_v23 = vor.u32 %v12480_v14, %v9037_v5 }
 0x174   :  { %v12647_v20 = vld [vmem:[#allocation5 + $0xc24] sm:$0xf]  ;;  %v9226_v39 = vor.u32 %v12519_v16, %v9223_v18  ;;  %3671 = vmatpush.bf16.msrb.mxu1 %v8714_v38  ;;  %v9549_v16 = vld [vmem:[#allocation5 + $0xaa8] sm:$0xf]  ;;  %v3435_v54 = vpop.f32.mrf.mxu0 }
 0x175   :  { %v9735_v22 = vld [vmem:[#allocation5 + $0xc60] sm:$0xf0]  ;;  %v10061_v18 = vld [vmem:[#allocation5 + $0xea8] sm:$0xf]  ;;  %3658 = vmatmul.bf16.vlgmr.msrb.gmra.mxu0 %v13459_v26  ;;  %v9550_v24 = vor.u32 %v12608_v17, %v9549_v16 }
 0x176   :  { %v9738_v44 = vor.u32 %v12647_v20, %v9735_v22  ;;  %3685 = vmatpush.bf16.msrb.mxu2 %v9226_v39  ;;  %3706 = vmatpush.bf16.msra.mxu0 %v8654_v45  ;;  %v12736_v20 = vld [vmem:[#allocation5 + $0xee4] sm:$0xf0]  ;;  %v8526_v22 = vor.u32 %v12352_v0, %v8525_v63  ;;  %v13549_v45 = vpop.f32.mrf.mxu3  ;;  %v3449_v55 = vpop.f32.mrf.mxu1 }
 0x177   :  { %3672 = vmatmul.bf16.vlgmr.msrb.gmra.mxu1 %v13461_v33  ;;  %v8461_v27 = vld [vmem:[#allocation5 + $0x228] sm:$0xf]  ;;  %v10062_v35 = vor.u32 %v12736_v20, %v10061_v18  ;;  %14072 = vst [vmem:[#allocation13_spill] sm:$0xff] %v13549_v45  ;;  %v3463_v18 = vpop.f32.mrf.mxu2  ;;  %v8599_v45 = vld [vmem:[#allocation5 + $0x370] sm:$0xf0] }
 0x178   :  { %3699 = vmatpush.bf16.msrb.mxu3 %v9738_v44  ;;  %3720 = vmatpush.bf16.msra.mxu1 %v9166_v46  ;;  %v12336_v28 = vld [vmem:[#allocation5 + $0x264] sm:$0xf0] }
 0x179   :  { %3686 = vmatmul.bf16.vlgmr.msrb.gmra.mxu2 %v13453_v8  ;;  %v8973_v29 = vld [vmem:[#allocation5 + $0x628] sm:$0xf]  ;;  %v8462_v46 = vor.u32 %v12336_v28, %v8461_v27 }
 0x17a   :  { %3734 = vmatpush.bf16.msra.mxu2 %v9678_v47  ;;  %3707 = vmatpush.bf16.msra.mxu0 %v8590_v60  ;;  %v12464_v38 = vld [vmem:[#allocation5 + $0x664] sm:$0xf0] }
 0x17b   :  { %3700 = vmatmul.bf16.vlgmr.msrb.gmra.mxu3 %v13455_v15  ;;  %v9485_v39 = vld [vmem:[#allocation5 + $0xa28] sm:$0xf]  ;;  %v8974_v47 = vor.u32 %v12464_v38, %v8973_v29 }
 0x17c   :  { %3748 = vmatpush.bf16.msra.mxu3 %v10190_v53  ;;  %3721 = vmatpush.bf16.msra.mxu1 %v9102_v61  ;;  %v12592_v41 = vld [vmem:[#allocation5 + $0xa64] sm:$0xf0]  ;;  %v3450_v61 = vadd.f32 %v3449_v55, %v3435_v54 }
 0x17d   :  { %v9997_v43 = vld [vmem:[#allocation5 + $0xe28] sm:$0xf]  ;;  %v9486_v48 = vor.u32 %v12592_v41, %v9485_v39 }
 0x17e   :  { %3735 = vmatpush.bf16.msra.mxu2 %v9614_v62  ;;  %v12720_v44 = vld [vmem:[#allocation5 + $0xe64] sm:$0xf0]  ;;  %3708 = vmatpush.bf16.msra.mxu0 %v8526_v22  ;;  %v3464_v27 = vadd.f32 %v3463_v18, %v3450_v61  ;;  %v8655_v18 = vld [vmem:[#allocation5 + $0x3e8] sm:$0xf0] }
 0x17f   :  { %v8397_v50 = vld [vmem:[#allocation5 + $0x1a8] sm:$0xf]  ;;  %v9998_v56 = vor.u32 %v12720_v44, %v9997_v43 }
 0x180   :  { %3749 = vmatpush.bf16.msra.mxu3 %v10126_v9  ;;  %3722 = vmatpush.bf16.msra.mxu1 %v9038_v23  ;;  %v12320_v51 = vld [vmem:[#allocation5 + $0x1e4] sm:$0xf0] }
 0x181   :  { %v8909_v53 = vld [vmem:[#allocation5 + $0x5a8] sm:$0xf]  ;;  %v8398_v0 = vor.u32 %v12320_v51, %v8397_v50 }
 0x182   :  { %3736 = vmatpush.bf16.msra.mxu2 %v9550_v24  ;;  %v12448_v57 = vld [vmem:[#allocation5 + $0x5e4] sm:$0xf0]  ;;  %3709 = vmatpush.bf16.msra.mxu0 %v8462_v46 }
 0x183   :  { %v9421_v58 = vld [vmem:[#allocation5 + $0x9a8] sm:$0xf]  ;;  %v8910_v5 = vor.u32 %v12448_v57, %v8909_v53 }
 0x184   :  { %3750 = vmatpush.bf16.msra.mxu3 %v10062_v35  ;;  %v12576_v60 = vld [vmem:[#allocation5 + $0x9e4] sm:$0xf0]  ;;  %3723 = vmatpush.bf16.msra.mxu1 %v8974_v47  ;;  %v3477_v35 = vpop.f32.mrf.mxu3 }
 0x185   :  { %v9933_v62 = vld [vmem:[#allocation5 + $0xda8] sm:$0xf]  ;;  %v9422_v9 = vor.u32 %v12576_v60, %v9421_v58  ;;  %v13551_v39 = vadd.f32 %v3477_v35, %v3464_v27  ;;  %v9679_v27 = vld [vmem:[#allocation5 + $0xbe8] sm:$0xf0] }
 0x186   :  { %v12704_v63 = vld [vmem:[#allocation5 + $0xde4] sm:$0xf0]  ;;  %3737 = vmatpush.bf16.msra.mxu2 %v9486_v48  ;;  %3710 = vmatpush.bf16.msra.mxu0 %v8398_v0  ;;  %v12760_v35 = vld [vmem:[#allocation5 + $0xfac] sm:$0xf] }
 0x187   :  { %v8333_v14 = vld [vmem:[#allocation5 + $0x128] sm:$0xf]  ;;  %v9934_v20 = vor.u32 %v12704_v63, %v9933_v62  ;;  %14073 = vst [vmem:[#allocation14_spill] sm:$0xff] %v13551_v39  ;;  %v12625_v39 = vld [vmem:[#allocation5 + $0xb6c] sm:$0xf0] }
 0x188   :  { %v12304_v16 = vld [vmem:[#allocation5 + $0x164] sm:$0xf0]  ;;  %3751 = vmatpush.bf16.msra.mxu3 %v9998_v56  ;;  %3724 = vmatpush.bf16.msra.mxu1 %v8910_v5 }
 0x189   :  { %v8845_v17 = vld [vmem:[#allocation5 + $0x528] sm:$0xf]  ;;  %v8334_v38 = vor.u32 %v12304_v16, %v8333_v14 }
 0x18a   :  { %v12432_v22 = vld [vmem:[#allocation5 + $0x564] sm:$0xf0]  ;;  %3738 = vmatpush.bf16.msra.mxu2 %v9422_v9 }
 0x18b   :  { %v9357_v23 = vld [vmem:[#allocation5 + $0x928] sm:$0xf]  ;;  %v8846_v41 = vor.u32 %v12432_v22, %v8845_v17  ;;  %3711 = vmatpush.bf16.msra.mxu0 %v8334_v38  ;;  %v12376_v17 = vld [vmem:[#allocation5 + $0x3ac] sm:$0xf] }
 0x18c   :  { %v12560_v24 = vld [vmem:[#allocation5 + $0x964] sm:$0xf0]  ;;  %3752 = vmatpush.bf16.msra.mxu3 %v9934_v20  ;;  %v12504_v20 = vld [vmem:[#allocation5 + $0x7ac] sm:$0xf] }
 0x18d   :  { %v9869_v28 = vld [vmem:[#allocation5 + $0xd28] sm:$0xf]  ;;  %v9358_v43 = vor.u32 %v12560_v24, %v9357_v23  ;;  %3725 = vmatpush.bf16.msra.mxu1 %v8846_v41  ;;  %v9167_v23 = vld [vmem:[#allocation5 + $0x7e8] sm:$0xf0] }
 0x18e   :  { %v12688_v29 = vld [vmem:[#allocation5 + $0xd64] sm:$0xf0]  ;;  %v12632_v24 = vld [vmem:[#allocation5 + $0xbac] sm:$0xf] }
 0x18f   :  { %v8269_v44 = vld [vmem:[#allocation5 + $0xa8] sm:$0xf]  ;;  %v9870_v48 = vor.u32 %v12688_v29, %v9869_v28  ;;  %3739 = vmatpush.bf16.msra.mxu2 %v9358_v43  ;;  %v10191_v38 = vld [vmem:[#allocation5 + $0xfe8] sm:$0xf0]  ;;  %v8658_v43 = vor.u32 %v12376_v17, %v8655_v18 }
 0x190   :  { %v12288_v46 = vld [vmem:[#allocation5 + $0xe4] sm:$0xf0]  ;;  %v12600_v17 = vld [vmem:[#allocation5 + $0xaac] sm:$0xf] }
 0x191   :  { %v8781_v47 = vld [vmem:[#allocation5 + $0x4a8] sm:$0xf]  ;;  %v8270_v56 = vor.u32 %v12288_v46, %v8269_v44  ;;  %3753 = vmatpush.bf16.msra.mxu3 %v9870_v48  ;;  %v9170_v44 = vor.u32 %v12504_v20, %v9167_v23  ;;  %v9682_v46 = vor.u32 %v12632_v24, %v9679_v27  ;;  %v8591_v48 = vld [vmem:[#allocation5 + $0x368] sm:$0xf0] }
 0x192   :  { %v12416_v50 = vld [vmem:[#allocation5 + $0x4e4] sm:$0xf0]  ;;  %v9551_v18 = vld [vmem:[#allocation5 + $0xae8] sm:$0xf0] }
 0x193   :  { %v9293_v51 = vld [vmem:[#allocation5 + $0x8a8] sm:$0xf]  ;;  %v8782_v60 = vor.u32 %v12416_v50, %v8781_v47  ;;  %3712 = vmatpush.bf16.msra.mxu0 %v8270_v56  ;;  %v12360_v47 = vld [vmem:[#allocation5 + $0x32c] sm:$0xf]  ;;  %v9554_v27 = vor.u32 %v12600_v17, %v9551_v18 }
 0x194   :  { %v12544_v53 = vld [vmem:[#allocation5 + $0x8e4] sm:$0xf0]  ;;  %v12488_v50 = vld [vmem:[#allocation5 + $0x72c] sm:$0xf] }
 0x195   :  { %v9805_v54 = vld [vmem:[#allocation5 + $0xca8] sm:$0xf]  ;;  %v9294_v61 = vor.u32 %v12544_v53, %v9293_v51  ;;  %3726 = vmatpush.bf16.msra.mxu1 %v8782_v60  ;;  %v10194_v51 = vor.u32 %v12760_v35, %v10191_v38  ;;  %v9103_v53 = vld [vmem:[#allocation5 + $0x768] sm:$0xf0]  ;;  %v13561_v38 = vpop.f32.mrf.mxu2 }
 0x196   :  { %v12672_v55 = vld [vmem:[#allocation5 + $0xce4] sm:$0xf0]  ;;  %v12744_v56 = vld [vmem:[#allocation5 + $0xf2c] sm:$0xf]  ;;  %v9106_v60 = vor.u32 %v12488_v50, %v9103_v53  ;;  %v13563_v50 = vpop.f32.mrf.mxu3 }
 0x197   :  { %v8205_v57 = vld [vmem:[#allocation5 + $0x28] sm:$0xf]  ;;  %v9806_v5 = vor.u32 %v12672_v55, %v9805_v54  ;;  %3740 = vmatpush.bf16.msra.mxu2 %v9294_v61  ;;  %v12616_v54 = vld [vmem:[#allocation5 + $0xb2c] sm:$0xf]  ;;  %14074 = vst [vmem:[#allocation15_spill] sm:$0xff] %v13563_v50 }
 0x198   :  { %v12272_v58 = vld [vmem:[#allocation5 + $0x64] sm:$0xf0]  ;;  %v9615_v55 = vld [vmem:[#allocation5 + $0xb68] sm:$0xf0]  ;;  %v12361_v50 = vld [vmem:[#allocation5 + $0x334] sm:$0xf] }
 0x199   :  { %v8717_v62 = vld [vmem:[#allocation5 + $0x428] sm:$0xf]  ;;  %v8206_v22 = vor.u32 %v12272_v58, %v8205_v57  ;;  %3754 = vmatpush.bf16.msra.mxu3 %v9806_v5  ;;  %v10127_v57 = vld [vmem:[#allocation5 + $0xf68] sm:$0xf0]  ;;  %v8594_v58 = vor.u32 %v12360_v47, %v8591_v48  ;;  %v9618_v61 = vor.u32 %v12616_v54, %v9615_v55  ;;  %v13553_v5 = vpop.f32.mrf.mxu0 }
 0x19a   :  { %v12400_v63 = vld [vmem:[#allocation5 + $0x464] sm:$0xf0]  ;;  %v12728_v20 = vld [vmem:[#allocation5 + $0xeac] sm:$0xf] }
 0x19b   :  { %v9229_v0 = vld [vmem:[#allocation5 + $0x828] sm:$0xf]  ;;  %v8718_v28 = vor.u32 %v12400_v63, %v8717_v62  ;;  %3713 = vmatpush.bf16.msra.mxu0 %v8206_v22  ;;  %v12344_v62 = vld [vmem:[#allocation5 + $0x2ac] sm:$0xf] }
 0x19c   :  { %v12528_v9 = vld [vmem:[#allocation5 + $0x864] sm:$0xf0]  ;;  %v8527_v63 = vld [vmem:[#allocation5 + $0x2e8] sm:$0xf0] }
 0x19d   :  { %v9741_v14 = vld [vmem:[#allocation5 + $0xc28] sm:$0xf]  ;;  %v9230_v29 = vor.u32 %v12528_v9, %v9229_v0  ;;  %3727 = vmatpush.bf16.msra.mxu1 %v8718_v28  ;;  %v12472_v0 = vld [vmem:[#allocation5 + $0x6ac] sm:$0xf]  ;;  %v13555_v9 = vpop.f32.mrf.mxu1  ;;  %v8530_v23 = vor.u32 %v12344_v62, %v8527_v63 }
 0x19e   :  { %v12656_v16 = vld [vmem:[#allocation5 + $0xc64] sm:$0xf0]  ;;  %v10063_v22 = vld [vmem:[#allocation5 + $0xee8] sm:$0xf0]  ;;  %3714 = vmatmul.bf16.vlgmr.msra.gmra.mxu0 %v13459_v26 }
 0x19f   :  { %v9742_v41 = vor.u32 %v12656_v16, %v9741_v14  ;;  %3741 = vmatpush.bf16.msra.mxu2 %v9230_v29  ;;  %3762 = vmatpush.bf16.msrb.mxu0 %v8658_v43  ;;  %v10130_v14 = vor.u32 %v12744_v56, %v10127_v57  ;;  %v9039_v16 = vld [vmem:[#allocation5 + $0x6e8] sm:$0xf0] }
 0x1a0   :  { %3728 = vmatmul.bf16.vlgmr.msra.gmra.mxu1 %v13461_v33  ;;  %v9042_v24 = vor.u32 %v12472_v0, %v9039_v16  ;;  %v12328_v28 = vld [vmem:[#allocation5 + $0x22c] sm:$0xf] }
 0x1a1   :  { %3755 = vmatpush.bf16.msra.mxu3 %v9742_v41  ;;  %3776 = vmatpush.bf16.msrb.mxu1 %v9170_v44  ;;  %v8463_v29 = vld [vmem:[#allocation5 + $0x268] sm:$0xf0]  ;;  %v10066_v41 = vor.u32 %v12728_v20, %v10063_v22 }
 0x1a2   :  { %3742 = vmatmul.bf16.vlgmr.msra.gmra.mxu2 %v13453_v8  ;;  %v12456_v35 = vld [vmem:[#allocation5 + $0x62c] sm:$0xf] }
 0x1a3   :  { %3790 = vmatpush.bf16.msrb.mxu2 %v9682_v46  ;;  %3763 = vmatpush.bf16.msrb.mxu0 %v8594_v58  ;;  %v8975_v43 = vld [vmem:[#allocation5 + $0x668] sm:$0xf0]  ;;  %v3491_v58 = vpop.f32.mrf.mxu0 }
 0x1a4   :  { %3756 = vmatmul.bf16.vlgmr.msra.gmra.mxu3 %v13455_v15  ;;  %v12584_v44 = vld [vmem:[#allocation5 + $0xa2c] sm:$0xf]  ;;  %v8978_v53 = vor.u32 %v12456_v35, %v8975_v43 }
 0x1a5   :  { %3804 = vmatpush.bf16.msrb.mxu3 %v10194_v51  ;;  %3777 = vmatpush.bf16.msrb.mxu1 %v9106_v60  ;;  %v9487_v46 = vld [vmem:[#allocation5 + $0xa68] sm:$0xf0]  ;;  %v8466_v51 = vor.u32 %v12328_v28, %v8463_v29  ;;  %v3505_v60 = vpop.f32.mrf.mxu1  ;;  %v3519_v28 = vpop.f32.mrf.mxu2 }
 0x1a6   :  { %v12712_v47 = vld [vmem:[#allocation5 + $0xe2c] sm:$0xf]  ;;  %v9490_v54 = vor.u32 %v12584_v44, %v9487_v46 }
 0x1a7   :  { %3791 = vmatpush.bf16.msrb.mxu2 %v9618_v61  ;;  %v9999_v48 = vld [vmem:[#allocation5 + $0xe68] sm:$0xf0]  ;;  %3764 = vmatpush.bf16.msrb.mxu0 %v8530_v23 }
 0x1a8   :  { %v12312_v55 = vld [vmem:[#allocation5 + $0x1ac] sm:$0xf]  ;;  %v10002_v61 = vor.u32 %v12712_v47, %v9999_v48  ;;  %v3533_v48 = vpop.f32.mrf.mxu3 }
 0x1a9   :  { %3805 = vmatpush.bf16.msrb.mxu3 %v10130_v14  ;;  %3778 = vmatpush.bf16.msrb.mxu1 %v9042_v24  ;;  %v8399_v56 = vld [vmem:[#allocation5 + $0x1e8] sm:$0xf0]  ;;  %v3506_v14 = vadd.f32 %v3505_v60, %v3491_v58 }
 0x1aa   :  { %v12440_v57 = vld [vmem:[#allocation5 + $0x5ac] sm:$0xf]  ;;  %v8402_v18 = vor.u32 %v12312_v55, %v8399_v56 }
 0x1ab   :  { %3792 = vmatpush.bf16.msrb.mxu2 %v9554_v27  ;;  %v8911_v62 = vld [vmem:[#allocation5 + $0x5e8] sm:$0xf0]  ;;  %3765 = vmatpush.bf16.msrb.mxu0 %v8466_v51  ;;  %v3520_v44 = vadd.f32 %v3519_v28, %v3506_v14 }
 0x1ac   :  { %v12568_v63 = vld [vmem:[#allocation5 + $0x9ac] sm:$0xf]  ;;  %v8914_v20 = vor.u32 %v12440_v57, %v8911_v62 }
 0x1ad   :  { %3806 = vmatpush.bf16.msrb.mxu3 %v10066_v41  ;;  %v9423_v0 = vld [vmem:[#allocation5 + $0x9e8] sm:$0xf0]  ;;  %3779 = vmatpush.bf16.msrb.mxu1 %v8978_v53  ;;  %v13565_v55 = vadd.f32 %v3533_v48, %v3520_v44  ;;  %v12385_v44 = vld [vmem:[#allocation5 + $0x3ec] sm:$0xf0] }
 0x1ae   :  { %v12696_v16 = vld [vmem:[#allocation5 + $0xdac] sm:$0xf]  ;;  %v9426_v22 = vor.u32 %v12568_v63, %v9423_v0  ;;  %v12513_v48 = vld [vmem:[#allocation5 + $0x7ec] sm:$0xf0] }
 0x1af   :  { %v9935_v17 = vld [vmem:[#allocation5 + $0xde8] sm:$0xf0]  ;;  %3793 = vmatpush.bf16.msrb.mxu2 %v9490_v54  ;;  %3766 = vmatpush.bf16.msrb.mxu0 %v8402_v18  ;;  %14075 = vst [vmem:[#allocation16_spill] sm:$0xff] %v13565_v55  ;;  %v9109_v55 = vld [vmem:[#allocation5 + $0x730] sm:$0xf] }
 0x1b0   :  { %v12296_v23 = vld [vmem:[#allocation5 + $0x12c] sm:$0xf]  ;;  %v9938_v29 = vor.u32 %v12696_v16, %v9935_v17 }
 0x1b1   :  { %v8335_v24 = vld [vmem:[#allocation5 + $0x168] sm:$0xf0]  ;;  %3807 = vmatpush.bf16.msrb.mxu3 %v10002_v61  ;;  %3780 = vmatpush.bf16.msrb.mxu1 %v8914_v20 }
 0x1b2   :  { %v12424_v27 = vld [vmem:[#allocation5 + $0x52c] sm:$0xf]  ;;  %v8338_v51 = vor.u32 %v12296_v23, %v8335_v24 }
 0x1b3   :  { %v8847_v35 = vld [vmem:[#allocation5 + $0x568] sm:$0xf0]  ;;  %3794 = vmatpush.bf16.msrb.mxu2 %v9426_v22 }
 0x1b4   :  { %v12552_v41 = vld [vmem:[#allocation5 + $0x92c] sm:$0xf]  ;;  %v8850_v53 = vor.u32 %v12424_v27, %v8847_v35  ;;  %3767 = vmatpush.bf16.msrb.mxu0 %v8338_v51  ;;  %v9685_v51 = vld [vmem:[#allocation5 + $0xbb0] sm:$0xf] }
 0x1b5   :  { %v9359_v43 = vld [vmem:[#allocation5 + $0x968] sm:$0xf0]  ;;  %3808 = vmatpush.bf16.msrb.mxu3 %v9938_v29 }
 0x1b6   :  { %v12680_v46 = vld [vmem:[#allocation5 + $0xd2c] sm:$0xf]  ;;  %v9362_v54 = vor.u32 %v12552_v41, %v9359_v43  ;;  %3781 = vmatpush.bf16.msrb.mxu1 %v8850_v53  ;;  %v8661_v43 = vld [vmem:[#allocation5 + $0x3b0] sm:$0xf] }
 0x1b7   :  { %v9871_v47 = vld [vmem:[#allocation5 + $0xd68] sm:$0xf0] }
 0x1b8   :  { %v12280_v56 = vld [vmem:[#allocation5 + $0xac] sm:$0xf]  ;;  %v9874_v60 = vor.u32 %v12680_v46, %v9871_v47  ;;  %3795 = vmatpush.bf16.msrb.mxu2 %v9362_v54  ;;  %v9173_v46 = vld [vmem:[#allocation5 + $0x7b0] sm:$0xf] }
 0x1b9   :  { %v8271_v57 = vld [vmem:[#allocation5 + $0xe8] sm:$0xf0] }
 0x1ba   :  { %v12408_v58 = vld [vmem:[#allocation5 + $0x4ac] sm:$0xf]  ;;  %v8274_v16 = vor.u32 %v12280_v56, %v8271_v57  ;;  %3809 = vmatpush.bf16.msrb.mxu3 %v9874_v60  ;;  %v12641_v56 = vld [vmem:[#allocation5 + $0xbec] sm:$0xf0] }
 0x1bb   :  { %v8783_v61 = vld [vmem:[#allocation5 + $0x4e8] sm:$0xf0]  ;;  %v10197_v57 = vld [vmem:[#allocation5 + $0xfb0] sm:$0xf] }
 0x1bc   :  { %v12536_v62 = vld [vmem:[#allocation5 + $0x8ac] sm:$0xf]  ;;  %v8786_v20 = vor.u32 %v12408_v58, %v8783_v61  ;;  %3768 = vmatpush.bf16.msrb.mxu0 %v8274_v16  ;;  %v12769_v58 = vld [vmem:[#allocation5 + $0xfec] sm:$0xf0]  ;;  %v8662_v61 = vor.u32 %v12385_v44, %v8661_v43 }
 0x1bd   :  { %v9295_v63 = vld [vmem:[#allocation5 + $0x8e8] sm:$0xf0]  ;;  %v10198_v16 = vor.u32 %v12769_v58, %v10197_v57  ;;  %v12481_v43 = vld [vmem:[#allocation5 + $0x6ec] sm:$0xf0] }
 0x1be   :  { %v12664_v0 = vld [vmem:[#allocation5 + $0xcac] sm:$0xf]  ;;  %v9298_v22 = vor.u32 %v12536_v62, %v9295_v63  ;;  %3782 = vmatpush.bf16.msrb.mxu1 %v8786_v20  ;;  %v9174_v62 = vor.u32 %v12513_v48, %v9173_v46  ;;  %v9686_v63 = vor.u32 %v12641_v56, %v9685_v51  ;;  %v10133_v20 = vld [vmem:[#allocation5 + $0xf30] sm:$0xf] }
 0x1bf   :  { %v9807_v14 = vld [vmem:[#allocation5 + $0xce8] sm:$0xf0]  ;;  %v9557_v44 = vld [vmem:[#allocation5 + $0xab0] sm:$0xf] }
 0x1c0   :  { %v12264_v17 = vld [vmem:[#allocation5 + $0x2c] sm:$0xf]  ;;  %v9810_v28 = vor.u32 %v12664_v0, %v9807_v14  ;;  %3796 = vmatpush.bf16.msrb.mxu2 %v9298_v22  ;;  %v8597_v0 = vld [vmem:[#allocation5 + $0x330] sm:$0xf] }
 0x1c1   :  { %v8207_v18 = vld [vmem:[#allocation5 + $0x68] sm:$0xf0]  ;;  %v12369_v14 = vld [vmem:[#allocation5 + $0x36c] sm:$0xf0] }
 0x1c2   :  { %v12392_v23 = vld [vmem:[#allocation5 + $0x42c] sm:$0xf]  ;;  %v8210_v47 = vor.u32 %v12264_v17, %v8207_v18  ;;  %3810 = vmatpush.bf16.msrb.mxu3 %v9810_v28  ;;  %v12497_v17 = vld [vmem:[#allocation5 + $0x76c] sm:$0xf0] }
 0x1c3   :  { %v8719_v24 = vld [vmem:[#allocation5 + $0x468] sm:$0xf0]  ;;  %v9621_v18 = vld [vmem:[#allocation5 + $0xb30] sm:$0xf] }
 0x1c4   :  { %v12520_v27 = vld [vmem:[#allocation5 + $0x82c] sm:$0xf]  ;;  %v8722_v53 = vor.u32 %v12392_v23, %v8719_v24  ;;  %3769 = vmatpush.bf16.msrb.mxu0 %v8210_v47  ;;  %v12753_v22 = vld [vmem:[#allocation5 + $0xf6c] sm:$0xf0]  ;;  %v8598_v23 = vor.u32 %v12369_v14, %v8597_v0  ;;  %v9110_v24 = vor.u32 %v12497_v17, %v9109_v55 }
 0x1c5   :  { %v9231_v29 = vld [vmem:[#allocation5 + $0x868] sm:$0xf0]  ;;  %v8533_v28 = vld [vmem:[#allocation5 + $0x2b0] sm:$0xf] }
 0x1c6   :  { %v12648_v35 = vld [vmem:[#allocation5 + $0xc2c] sm:$0xf]  ;;  %v9234_v54 = vor.u32 %v12520_v27, %v9231_v29  ;;  %3783 = vmatpush.bf16.msrb.mxu1 %v8722_v53  ;;  %v9622_v27 = vor.u32 %v12625_v39, %v9621_v18  ;;  %v12353_v29 = vld [vmem:[#allocation5 + $0x2ec] sm:$0xf0] }
 0x1c7   :  { %v9743_v41 = vld [vmem:[#allocation5 + $0xc68] sm:$0xf0]  ;;  %v12609_v46 = vld [vmem:[#allocation5 + $0xaec] sm:$0xf0]  ;;  %3770 = vmatmul.bf16.vlgmr.msrb.gmra.mxu0 %v13459_v26  ;;  %v8534_v51 = vor.u32 %v12353_v29, %v8533_v28 }
 0x1c8   :  { %v9746_v60 = vor.u32 %v12648_v35, %v9743_v41  ;;  %3797 = vmatpush.bf16.msrb.mxu2 %v9234_v54  ;;  %3818 = vmatpush.bf16.msra.mxu0 %v8662_v61  ;;  %v9045_v35 = vld [vmem:[#allocation5 + $0x6b0] sm:$0xf]  ;;  %v10134_v41 = vor.u32 %v12753_v22, %v10133_v20  ;;  %v9558_v55 = vor.u32 %v12609_v46, %v9557_v44 }
 0x1c9   :  { %v10069_v47 = vld [vmem:[#allocation5 + $0xeb0] sm:$0xf]  ;;  %3784 = vmatmul.bf16.vlgmr.msrb.gmra.mxu1 %v13461_v33  ;;  %v9046_v39 = vor.u32 %v12481_v43, %v9045_v35  ;;  %v13573_v43 = vpop.f32.mrf.mxu1 }
 0x1ca   :  { %3811 = vmatpush.bf16.msrb.mxu3 %v9746_v60  ;;  %3832 = vmatpush.bf16.msra.mxu1 %v9174_v62  ;;  %v12737_v48 = vld [vmem:[#allocation5 + $0xeec] sm:$0xf0] }
 0x1cb   :  { %3798 = vmatmul.bf16.vlgmr.msrb.gmra.mxu2 %v13453_v8  ;;  %v8469_v56 = vld [vmem:[#allocation5 + $0x230] sm:$0xf]  ;;  %v10070_v57 = vor.u32 %v12737_v48, %v10069_v47 }
 0x1cc   :  { %3846 = vmatpush.bf16.msra.mxu2 %v9686_v63  ;;  %3819 = vmatpush.bf16.msra.mxu0 %v8598_v23  ;;  %v12337_v53 = vld [vmem:[#allocation5 + $0x26c] sm:$0xf0] }
 0x1cd   :  { %3812 = vmatmul.bf16.vlgmr.msrb.gmra.mxu3 %v13455_v15  ;;  %v8981_v54 = vld [vmem:[#allocation5 + $0x630] sm:$0xf]  ;;  %v8470_v0 = vor.u32 %v12337_v53, %v8469_v56 }
 0x1ce   :  { %3860 = vmatpush.bf16.msra.mxu3 %v10198_v16  ;;  %3833 = vmatpush.bf16.msra.mxu1 %v9110_v24  ;;  %v12465_v58 = vld [vmem:[#allocation5 + $0x66c] sm:$0xf0] }
 0x1cf   :  { %v9493_v60 = vld [vmem:[#allocation5 + $0xa30] sm:$0xf]  ;;  %v8982_v14 = vor.u32 %v12465_v58, %v8981_v54 }
 0x1d0   :  { %3847 = vmatpush.bf16.msra.mxu2 %v9622_v27  ;;  %v12593_v61 = vld [vmem:[#allocation5 + $0xa6c] sm:$0xf0]  ;;  %3820 = vmatpush.bf16.msra.mxu0 %v8534_v51 }
 0x1d1   :  { %v10005_v62 = vld [vmem:[#allocation5 + $0xe30] sm:$0xf]  ;;  %v9494_v16 = vor.u32 %v12593_v61, %v9493_v60  ;;  %v13575_v60 = vpop.f32.mrf.mxu2 }
 0x1d2   :  { %3861 = vmatpush.bf16.msra.mxu3 %v10134_v41  ;;  %v12721_v63 = vld [vmem:[#allocation5 + $0xe6c] sm:$0xf0]  ;;  %3834 = vmatpush.bf16.msra.mxu1 %v9046_v39  ;;  %v13571_v41 = vpop.f32.mrf.mxu0  ;;  %14076 = vst [vmem:[#allocation17_spill] sm:$0xff] %v13575_v60 }
 0x1d3   :  { %v8405_v17 = vld [vmem:[#allocation5 + $0x1b0] sm:$0xf]  ;;  %v10006_v22 = vor.u32 %v12721_v63, %v10005_v62 }
 0x1d4   :  { %3848 = vmatpush.bf16.msra.mxu2 %v9558_v55  ;;  %v12321_v18 = vld [vmem:[#allocation5 + $0x1ec] sm:$0xf0]  ;;  %3821 = vmatpush.bf16.msra.mxu0 %v8470_v0 }
 0x1d5   :  { %v8917_v20 = vld [vmem:[#allocation5 + $0x5b0] sm:$0xf]  ;;  %v8406_v35 = vor.u32 %v12321_v18, %v8405_v17 }
 0x1d6   :  { %3862 = vmatpush.bf16.msra.mxu3 %v10070_v57  ;;  %v12449_v23 = vld [vmem:[#allocation5 + $0x5ec] sm:$0xf0]  ;;  %3835 = vmatpush.bf16.msra.mxu1 %v8982_v14 }
 0x1d7   :  { %v9429_v24 = vld [vmem:[#allocation5 + $0x9b0] sm:$0xf]  ;;  %v8918_v44 = vor.u32 %v12449_v23, %v8917_v20 }
 0x1d8   :  { %v12577_v27 = vld [vmem:[#allocation5 + $0x9ec] sm:$0xf0]  ;;  %3849 = vmatpush.bf16.msra.mxu2 %v9494_v16  ;;  %3822 = vmatpush.bf16.msra.mxu0 %v8406_v35 }
 0x1d9   :  { %v9941_v28 = vld [vmem:[#allocation5 + $0xdb0] sm:$0xf]  ;;  %v9430_v46 = vor.u32 %v12577_v27, %v9429_v24  ;;  %v13583_v49 = vpop.f32.mrf.mxu2 }
 0x1da   :  { %v12705_v29 = vld [vmem:[#allocation5 + $0xdec] sm:$0xf0]  ;;  %3863 = vmatpush.bf16.msra.mxu3 %v10006_v22  ;;  %3836 = vmatpush.bf16.msra.mxu1 %v8918_v44  ;;  %v13577_v22 = vpop.f32.mrf.mxu3  ;;  %14079 = vst [vmem:[#allocation20_spill] sm:$0xff] %v13583_v49  ;;  %v9943_v49 = vld [vmem:[#allocation5 + $0xdf0] sm:$0xf0] }
 0x1db   :  { %v8341_v47 = vld [vmem:[#allocation5 + $0x130] sm:$0xf]  ;;  %v9942_v39 = vor.u32 %v12705_v29, %v9941_v28  ;;  %14077 = vst [vmem:[#allocation18_spill] sm:$0xff] %v13577_v22  ;;  %v10199_v22 = vld [vmem:[#allocation5 + $0xff0] sm:$0xf0] }
 0x1dc   :  { %v12305_v48 = vld [vmem:[#allocation5 + $0x16c] sm:$0xf0]  ;;  %3850 = vmatpush.bf16.msra.mxu2 %v9430_v46 }
 0x1dd   :  { %v8853_v51 = vld [vmem:[#allocation5 + $0x530] sm:$0xf]  ;;  %v8342_v58 = vor.u32 %v12305_v48, %v8341_v47 }
 0x1de   :  { %v12433_v55 = vld [vmem:[#allocation5 + $0x56c] sm:$0xf0]  ;;  %3864 = vmatpush.bf16.msra.mxu3 %v9942_v39  ;;  %v13581_v39 = vpop.f32.mrf.mxu1 }
 0x1df   :  { %v9365_v56 = vld [vmem:[#allocation5 + $0x930] sm:$0xf]  ;;  %v8854_v61 = vor.u32 %v12433_v55, %v8853_v51  ;;  %3823 = vmatpush.bf16.msra.mxu0 %v8342_v58  ;;  %v13579_v51 = vpop.f32.mrf.mxu0  ;;  %14078 = vst [vmem:[#allocation19_spill] sm:$0xff] %v13581_v39  ;;  %v8663_v58 = vld [vmem:[#allocation5 + $0x3f0] sm:$0xf0] }
 0x1e0   :  { %v12561_v53 = vld [vmem:[#allocation5 + $0x96c] sm:$0xf0]  ;;  %v12626_v39 = vld [vmem:[#allocation5 + $0xb74] sm:$0xf0] }
 0x1e1   :  { %v9877_v54 = vld [vmem:[#allocation5 + $0xd30] sm:$0xf]  ;;  %v9366_v62 = vor.u32 %v12561_v53, %v9365_v56  ;;  %3837 = vmatpush.bf16.msra.mxu1 %v8854_v61 }
 0x1e2   :  { %v12689_v57 = vld [vmem:[#allocation5 + $0xd6c] sm:$0xf0] }
 0x1e3   :  { %v8277_v63 = vld [vmem:[#allocation5 + $0xb0] sm:$0xf]  ;;  %v9878_v16 = vor.u32 %v12689_v57, %v9877_v54  ;;  %3851 = vmatpush.bf16.msra.mxu2 %v9366_v62  ;;  %v12377_v57 = vld [vmem:[#allocation5 + $0x3b4] sm:$0xf] }
 0x1e4   :  { %v12289_v0 = vld [vmem:[#allocation5 + $0xec] sm:$0xf0]  ;;  %v9175_v62 = vld [vmem:[#allocation5 + $0x7f0] sm:$0xf0] }
 0x1e5   :  { %v8789_v14 = vld [vmem:[#allocation5 + $0x4b0] sm:$0xf]  ;;  %v8278_v27 = vor.u32 %v12289_v0, %v8277_v63  ;;  %3865 = vmatpush.bf16.msra.mxu3 %v9878_v16  ;;  %v12505_v63 = vld [vmem:[#allocation5 + $0x7b4] sm:$0xf] }
 0x1e6   :  { %v12417_v17 = vld [vmem:[#allocation5 + $0x4ec] sm:$0xf0]  ;;  %v12633_v0 = vld [vmem:[#allocation5 + $0xbb4] sm:$0xf] }
 0x1e7   :  { %v9301_v18 = vld [vmem:[#allocation5 + $0x8b0] sm:$0xf]  ;;  %v8790_v35 = vor.u32 %v12417_v17, %v8789_v14  ;;  %3824 = vmatpush.bf16.msra.mxu0 %v8278_v27  ;;  %v9687_v14 = vld [vmem:[#allocation5 + $0xbf0] sm:$0xf0] }
 0x1e8   :  { %v12545_v20 = vld [vmem:[#allocation5 + $0x8ec] sm:$0xf0]  ;;  %v9690_v60 = vor.u32 %v12633_v0, %v9687_v14  ;;  %v12489_v27 = vld [vmem:[#allocation5 + $0x734] sm:$0xf] }
 0x1e9   :  { %v9813_v23 = vld [vmem:[#allocation5 + $0xcb0] sm:$0xf]  ;;  %v9302_v44 = vor.u32 %v12545_v20, %v9301_v18  ;;  %3838 = vmatpush.bf16.msra.mxu1 %v8790_v35  ;;  %v12761_v20 = vld [vmem:[#allocation5 + $0xfb4] sm:$0xf] }
 0x1ea   :  { %v12673_v24 = vld [vmem:[#allocation5 + $0xcec] sm:$0xf0]  ;;  %v9111_v35 = vld [vmem:[#allocation5 + $0x770] sm:$0xf0] }
 0x1eb   :  { %v8213_v28 = vld [vmem:[#allocation5 + $0x30] sm:$0xf]  ;;  %v9814_v55 = vor.u32 %v12673_v24, %v9813_v23  ;;  %3852 = vmatpush.bf16.msra.mxu2 %v9302_v44  ;;  %v8666_v23 = vor.u32 %v12377_v57, %v8663_v58  ;;  %v9178_v24 = vor.u32 %v12505_v63, %v9175_v62  ;;  %v12617_v44 = vld [vmem:[#allocation5 + $0xb34] sm:$0xf]  ;;  %v13587_v63 = vpop.f32.mrf.mxu0 }
 0x1ec   :  { %v12273_v29 = vld [vmem:[#allocation5 + $0x6c] sm:$0xf0]  ;;  %v8535_v57 = vld [vmem:[#allocation5 + $0x2f0] sm:$0xf0]  ;;  %14081 = vst [vmem:[#allocation22_spill] sm:$0xff] %v13587_v63 }
 0x1ed   :  { %v8725_v46 = vld [vmem:[#allocation5 + $0x430] sm:$0xf]  ;;  %v8214_v61 = vor.u32 %v12273_v29, %v8213_v28  ;;  %3866 = vmatpush.bf16.msra.mxu3 %v9814_v55  ;;  %v13585_v28 = vpop.f32.mrf.mxu3  ;;  %v10202_v29 = vor.u32 %v12761_v20, %v10199_v22  ;;  %v8602_v55 = vor.u32 %v12361_v50, %v8599_v45  ;;  %v12473_v58 = vld [vmem:[#allocation5 + $0x6b4] sm:$0xf]  ;;  %v13589_v22 = vpop.f32.mrf.mxu1  ;;  %v9117_v63 = vld [vmem:[#allocation5 + $0x738] sm:$0xf] }
 0x1ee   :  { %v12401_v47 = vld [vmem:[#allocation5 + $0x46c] sm:$0xf0]  ;;  %14080 = vst [vmem:[#allocation21_spill] sm:$0xff] %v13585_v28  ;;  %v9047_v62 = vld [vmem:[#allocation5 + $0x6f0] sm:$0xf0] }
 0x1ef   :  { %v9237_v48 = vld [vmem:[#allocation5 + $0x830] sm:$0xf]  ;;  %v8726_v17 = vor.u32 %v12401_v47, %v8725_v46  ;;  %3825 = vmatpush.bf16.msra.mxu0 %v8214_v61  ;;  %v9623_v46 = vld [vmem:[#allocation5 + $0xb70] sm:$0xf0]  ;;  %14082 = vst [vmem:[#allocation23_spill] sm:$0xff] %v13589_v22 }
 0x1f0   :  { %v12529_v56 = vld [vmem:[#allocation5 + $0x86c] sm:$0xf0]  ;;  %v12745_v47 = vld [vmem:[#allocation5 + $0xf34] sm:$0xf]  ;;  %v12370_v22 = vld [vmem:[#allocation5 + $0x374] sm:$0xf0] }
 0x1f1   :  { %v9749_v53 = vld [vmem:[#allocation5 + $0xc30] sm:$0xf]  ;;  %v9238_v18 = vor.u32 %v12529_v56, %v9237_v48  ;;  %3839 = vmatpush.bf16.msra.mxu1 %v8726_v17  ;;  %v10135_v48 = vld [vmem:[#allocation5 + $0xf70] sm:$0xf0]  ;;  %v9114_v56 = vor.u32 %v12489_v27, %v9111_v35 }
 0x1f2   :  { %v12657_v54 = vld [vmem:[#allocation5 + $0xc6c] sm:$0xf0]  ;;  %v10138_v61 = vor.u32 %v12745_v47, %v10135_v48  ;;  %v12601_v0 = vld [vmem:[#allocation5 + $0xab4] sm:$0xf]  ;;  %3826 = vmatmul.bf16.vlgmr.msra.gmra.mxu0 %v13459_v26 }
 0x1f3   :  { %v9750_v16 = vor.u32 %v12657_v54, %v9749_v53  ;;  %3853 = vmatpush.bf16.msra.mxu2 %v9238_v18  ;;  %3874 = vmatpush.bf16.msrb.mxu0 %v8666_v23  ;;  %v9626_v53 = vor.u32 %v12617_v44, %v9623_v46  ;;  %v12345_v54 = vld [vmem:[#allocation5 + $0x2b4] sm:$0xf] }
 0x1f4   :  { %v9559_v14 = vld [vmem:[#allocation5 + $0xaf0] sm:$0xf0]  ;;  %v8538_v50 = vor.u32 %v12345_v54, %v8535_v57  ;;  %3840 = vmatmul.bf16.vlgmr.msra.gmra.mxu1 %v13461_v33 }
 0x1f5   :  { %3867 = vmatpush.bf16.msra.mxu3 %v9750_v16  ;;  %3888 = vmatpush.bf16.msrb.mxu1 %v9178_v24  ;;  %v12729_v17 = vld [vmem:[#allocation5 + $0xeb4] sm:$0xf]  ;;  %v9562_v18 = vor.u32 %v12601_v0, %v9559_v14  ;;  %v13595_v24 = vpop.f32.mrf.mxu2  ;;  %v13597_v48 = vpop.f32.mrf.mxu3 }
 0x1f6   :  { %3854 = vmatmul.bf16.vlgmr.msra.gmra.mxu2 %v13453_v8  ;;  %v10071_v45 = vld [vmem:[#allocation5 + $0xef0] sm:$0xf0]  ;;  %14083 = vst [vmem:[#allocation24_spill] sm:$0xff] %v13595_v24  ;;  %v3617_v0 = vpop.f32.mrf.mxu1 }
 0x1f7   :  { %3902 = vmatpush.bf16.msrb.mxu2 %v9690_v60  ;;  %3875 = vmatpush.bf16.msrb.mxu0 %v8602_v55  ;;  %v9050_v60 = vor.u32 %v12473_v58, %v9047_v62  ;;  %v12329_v20 = vld [vmem:[#allocation5 + $0x234] sm:$0xf]  ;;  %v10074_v27 = vor.u32 %v12729_v17, %v10071_v45  ;;  %14084 = vst [vmem:[#allocation25_spill] sm:$0xff] %v13597_v48  ;;  %v3603_v62 = vpop.f32.mrf.mxu0 }
 0x1f8   :  { %3868 = vmatmul.bf16.vlgmr.msra.gmra.mxu3 %v13455_v15  ;;  %v8471_v16 = vld [vmem:[#allocation5 + $0x270] sm:$0xf0]  ;;  %v3618_v28 = vadd.f32 %v3617_v0, %v3603_v62 }
 0x1f9   :  { %3916 = vmatpush.bf16.msrb.mxu3 %v10202_v29  ;;  %3889 = vmatpush.bf16.msrb.mxu1 %v9114_v56  ;;  %v12457_v23 = vld [vmem:[#allocation5 + $0x634] sm:$0xf]  ;;  %v8474_v55 = vor.u32 %v12329_v20, %v8471_v16 }
 0x1fa   :  { %v8983_v29 = vld [vmem:[#allocation5 + $0x670] sm:$0xf0] }
 0x1fb   :  { %3903 = vmatpush.bf16.msrb.mxu2 %v9626_v53  ;;  %v12585_v35 = vld [vmem:[#allocation5 + $0xa34] sm:$0xf]  ;;  %3876 = vmatpush.bf16.msrb.mxu0 %v8538_v50  ;;  %v8986_v56 = vor.u32 %v12457_v23, %v8983_v29 }
 0x1fc   :  { %v9495_v44 = vld [vmem:[#allocation5 + $0xa70] sm:$0xf0] }
 0x1fd   :  { %3917 = vmatpush.bf16.msrb.mxu3 %v10138_v61  ;;  %v12713_v46 = vld [vmem:[#allocation5 + $0xe34] sm:$0xf]  ;;  %3890 = vmatpush.bf16.msrb.mxu1 %v9050_v60  ;;  %v9498_v53 = vor.u32 %v12585_v35, %v9495_v44  ;;  %v3631_v29 = vpop.f32.mrf.mxu2  ;;  %v3645_v0 = vpop.f32.mrf.mxu3 }
 0x1fe   :  { %v10007_v47 = vld [vmem:[#allocation5 + $0xe70] sm:$0xf0] }
 0x1ff   :  { %3904 = vmatpush.bf16.msrb.mxu2 %v9562_v18  ;;  %v12313_v54 = vld [vmem:[#allocation5 + $0x1b4] sm:$0xf]  ;;  %v10010_v61 = vor.u32 %v12713_v46, %v10007_v47  ;;  %3877 = vmatpush.bf16.msrb.mxu0 %v8474_v55  ;;  %v3632_v47 = vadd.f32 %v3631_v29, %v3618_v28 }
 0x200   :  { %v8407_v57 = vld [vmem:[#allocation5 + $0x1f0] sm:$0xf0] }
 0x201   :  { %v12441_v58 = vld [vmem:[#allocation5 + $0x5b4] sm:$0xf]  ;;  %3918 = vmatpush.bf16.msrb.mxu3 %v10074_v27  ;;  %v8410_v50 = vor.u32 %v12313_v54, %v8407_v57  ;;  %3891 = vmatpush.bf16.msrb.mxu1 %v8986_v56  ;;  %v13599_v54 = vadd.f32 %v3645_v0, %v3632_v47  ;;  %v8669_v47 = vld [vmem:[#allocation5 + $0x3b8] sm:$0xf] }
 0x202   :  { %v8919_v14 = vld [vmem:[#allocation5 + $0x5f0] sm:$0xf0]  ;;  %v9181_v0 = vld [vmem:[#allocation5 + $0x7b8] sm:$0xf] }
 0x203   :  { %v12569_v17 = vld [vmem:[#allocation5 + $0x9b4] sm:$0xf]  ;;  %3905 = vmatpush.bf16.msrb.mxu2 %v9498_v53  ;;  %v8922_v60 = vor.u32 %v12441_v58, %v8919_v14  ;;  %3878 = vmatpush.bf16.msrb.mxu0 %v8410_v50  ;;  %14085 = vst [vmem:[#allocation26_spill] sm:$0xff] %v13599_v54  ;;  %v12642_v54 = vld [vmem:[#allocation5 + $0xbf4] sm:$0xf0] }
 0x204   :  { %v9431_v45 = vld [vmem:[#allocation5 + $0x9f0] sm:$0xf0] }
 0x205   :  { %v12697_v24 = vld [vmem:[#allocation5 + $0xdb4] sm:$0xf]  ;;  %v9434_v18 = vor.u32 %v12569_v17, %v9431_v45  ;;  %3919 = vmatpush.bf16.msrb.mxu3 %v10010_v61  ;;  %3892 = vmatpush.bf16.msrb.mxu1 %v8922_v60 }
 0x206   :  { %v12297_v20 = vld [vmem:[#allocation5 + $0x134] sm:$0xf]  ;;  %v9946_v35 = vor.u32 %v12697_v24, %v9943_v49 }
 0x207   :  { %v8343_v16 = vld [vmem:[#allocation5 + $0x170] sm:$0xf0]  ;;  %3906 = vmatpush.bf16.msrb.mxu2 %v9434_v18 }
 0x208   :  { %v12425_v23 = vld [vmem:[#allocation5 + $0x534] sm:$0xf]  ;;  %v8346_v55 = vor.u32 %v12297_v20, %v8343_v16 }
 0x209   :  { %v8855_v27 = vld [vmem:[#allocation5 + $0x570] sm:$0xf0]  ;;  %3920 = vmatpush.bf16.msrb.mxu3 %v9946_v35 }
 0x20a   :  { %v12553_v44 = vld [vmem:[#allocation5 + $0x934] sm:$0xf]  ;;  %v8858_v56 = vor.u32 %v12425_v23, %v8855_v27  ;;  %3879 = vmatpush.bf16.msrb.mxu0 %v8346_v55 }
 0x20b   :  { %v9367_v46 = vld [vmem:[#allocation5 + $0x970] sm:$0xf0] }
 0x20c   :  { %v12681_v48 = vld [vmem:[#allocation5 + $0xd34] sm:$0xf]  ;;  %v9370_v53 = vor.u32 %v12553_v44, %v9367_v46  ;;  %3893 = vmatpush.bf16.msrb.mxu1 %v8858_v56 }
 0x20d   :  { %v9879_v62 = vld [vmem:[#allocation5 + $0xd70] sm:$0xf0] }
 0x20e   :  { %v12281_v57 = vld [vmem:[#allocation5 + $0xb4] sm:$0xf]  ;;  %v9882_v49 = vor.u32 %v12681_v48, %v9879_v62  ;;  %3907 = vmatpush.bf16.msrb.mxu2 %v9370_v53  ;;  %v12386_v62 = vld [vmem:[#allocation5 + $0x3f4] sm:$0xf0] }
 0x20f   :  { %v8279_v58 = vld [vmem:[#allocation5 + $0xf0] sm:$0xf0] }
 0x210   :  { %v12409_v14 = vld [vmem:[#allocation5 + $0x4b4] sm:$0xf]  ;;  %v8282_v29 = vor.u32 %v12281_v57, %v8279_v58  ;;  %3921 = vmatpush.bf16.msrb.mxu3 %v9882_v49  ;;  %v12514_v57 = vld [vmem:[#allocation5 + $0x7f4] sm:$0xf0] }
 0x211   :  { %v8791_v24 = vld [vmem:[#allocation5 + $0x4f0] sm:$0xf0]  ;;  %v9693_v58 = vld [vmem:[#allocation5 + $0xbb8] sm:$0xf] }
 0x212   :  { %v12537_v61 = vld [vmem:[#allocation5 + $0x8b4] sm:$0xf]  ;;  %v8794_v60 = vor.u32 %v12409_v14, %v8791_v24  ;;  %3880 = vmatpush.bf16.msrb.mxu0 %v8282_v29  ;;  %v10205_v14 = vld [vmem:[#allocation5 + $0xfb8] sm:$0xf] }
 0x213   :  { %v9303_v17 = vld [vmem:[#allocation5 + $0x8f0] sm:$0xf0]  ;;  %v12770_v24 = vld [vmem:[#allocation5 + $0xff4] sm:$0xf0] }
 0x214   :  { %v12665_v28 = vld [vmem:[#allocation5 + $0xcb4] sm:$0xf]  ;;  %v9306_v18 = vor.u32 %v12537_v61, %v9303_v17  ;;  %3894 = vmatpush.bf16.msrb.mxu1 %v8794_v60  ;;  %v8670_v61 = vor.u32 %v12386_v62, %v8669_v47  ;;  %v9182_v17 = vor.u32 %v12514_v57, %v9181_v0  ;;  %v10206_v29 = vor.u32 %v12770_v24, %v10205_v14  ;;  %v10141_v60 = vld [vmem:[#allocation5 + $0xf38] sm:$0xf] }
 0x215   :  { %v9815_v45 = vld [vmem:[#allocation5 + $0xcf0] sm:$0xf0]  ;;  %v9565_v47 = vld [vmem:[#allocation5 + $0xab8] sm:$0xf] }
 0x216   :  { %v12265_v50 = vld [vmem:[#allocation5 + $0x34] sm:$0xf]  ;;  %v9818_v44 = vor.u32 %v12665_v28, %v9815_v45  ;;  %3908 = vmatpush.bf16.msrb.mxu2 %v9306_v18  ;;  %v9694_v28 = vor.u32 %v12642_v54, %v9693_v58  ;;  %v8605_v45 = vld [vmem:[#allocation5 + $0x338] sm:$0xf] }
 0x217   :  { %v8215_v20 = vld [vmem:[#allocation5 + $0x70] sm:$0xf0]  ;;  %v12754_v18 = vld [vmem:[#allocation5 + $0xf74] sm:$0xf0] }
 0x218   :  { %v12393_v16 = vld [vmem:[#allocation5 + $0x434] sm:$0xf]  ;;  %v8218_v55 = vor.u32 %v12265_v50, %v8215_v20  ;;  %3922 = vmatpush.bf16.msrb.mxu3 %v9818_v44  ;;  %v12498_v50 = vld [vmem:[#allocation5 + $0x774] sm:$0xf0] }
 0x219   :  { %v8727_v23 = vld [vmem:[#allocation5 + $0x470] sm:$0xf0]  ;;  %v9629_v20 = vld [vmem:[#allocation5 + $0xb38] sm:$0xf] }
 0x21a   :  { %v12521_v27 = vld [vmem:[#allocation5 + $0x834] sm:$0xf]  ;;  %v8730_v56 = vor.u32 %v12393_v16, %v8727_v23  ;;  %3881 = vmatpush.bf16.msrb.mxu0 %v8218_v55  ;;  %v8606_v16 = vor.u32 %v12370_v22, %v8605_v45  ;;  %v9118_v23 = vor.u32 %v12498_v50, %v9117_v63  ;;  %v8541_v54 = vld [vmem:[#allocation5 + $0x2b8] sm:$0xf] }
 0x21b   :  { %v9239_v35 = vld [vmem:[#allocation5 + $0x870] sm:$0xf0]  ;;  %v12354_v44 = vld [vmem:[#allocation5 + $0x2f4] sm:$0xf0] }
 0x21c   :  { %v12649_v48 = vld [vmem:[#allocation5 + $0xc34] sm:$0xf]  ;;  %v9242_v53 = vor.u32 %v12521_v27, %v9239_v35  ;;  %3895 = vmatpush.bf16.msrb.mxu1 %v8730_v56  ;;  %v9630_v27 = vor.u32 %v12626_v39, %v9629_v20  ;;  %v9053_v35 = vld [vmem:[#allocation5 + $0x6b8] sm:$0xf]  ;;  %v8542_v22 = vor.u32 %v12354_v44, %v8541_v54 }
 0x21d   :  { %v9751_v46 = vld [vmem:[#allocation5 + $0xc70] sm:$0xf0]  ;;  %v12610_v62 = vld [vmem:[#allocation5 + $0xaf4] sm:$0xf0]  ;;  %3882 = vmatmul.bf16.vlgmr.msrb.gmra.mxu0 %v13459_v26 }
 0x21e   :  { %v9754_v49 = vor.u32 %v12649_v48, %v9751_v46  ;;  %3909 = vmatpush.bf16.msrb.mxu2 %v9242_v53  ;;  %3930 = vmatpush.bf16.msra.mxu0 %v8670_v61  ;;  %v10142_v48 = vor.u32 %v12754_v18, %v10141_v60  ;;  %v12482_v46 = vld [vmem:[#allocation5 + $0x6f4] sm:$0xf0]  ;;  %v9566_v63 = vor.u32 %v12610_v62, %v9565_v47 }
 0x21f   :  { %v10077_v0 = vld [vmem:[#allocation5 + $0xeb8] sm:$0xf]  ;;  %3896 = vmatmul.bf16.vlgmr.msrb.gmra.mxu1 %v13461_v33  ;;  %v9054_v39 = vor.u32 %v12482_v46, %v9053_v35 }
 0x220   :  { %3923 = vmatpush.bf16.msrb.mxu3 %v9754_v49  ;;  %3944 = vmatpush.bf16.msra.mxu1 %v9182_v17  ;;  %v12738_v55 = vld [vmem:[#allocation5 + $0xef4] sm:$0xf0] }
 0x221   :  { %3910 = vmatmul.bf16.vlgmr.msrb.gmra.mxu2 %v13453_v8  ;;  %v8477_v57 = vld [vmem:[#allocation5 + $0x238] sm:$0xf]  ;;  %v10078_v53 = vor.u32 %v12738_v55, %v10077_v0 }
 0x222   :  { %3958 = vmatpush.bf16.msra.mxu2 %v9694_v28  ;;  %3931 = vmatpush.bf16.msra.mxu0 %v8606_v16  ;;  %v12338_v58 = vld [vmem:[#allocation5 + $0x274] sm:$0xf0] }
 0x223   :  { %3924 = vmatmul.bf16.vlgmr.msrb.gmra.mxu3 %v13455_v15  ;;  %v8989_v56 = vld [vmem:[#allocation5 + $0x638] sm:$0xf]  ;;  %v8478_v28 = vor.u32 %v12338_v58, %v8477_v57 }
 0x224   :  { %3972 = vmatpush.bf16.msra.mxu3 %v10206_v29  ;;  %3945 = vmatpush.bf16.msra.mxu1 %v9118_v23  ;;  %v12466_v14 = vld [vmem:[#allocation5 + $0x674] sm:$0xf0] }
 0x225   :  { %v9501_v24 = vld [vmem:[#allocation5 + $0xa38] sm:$0xf]  ;;  %v8990_v45 = vor.u32 %v12466_v14, %v8989_v56 }
 0x226   :  { %3959 = vmatpush.bf16.msra.mxu2 %v9630_v27  ;;  %v12594_v49 = vld [vmem:[#allocation5 + $0xa74] sm:$0xf0]  ;;  %3932 = vmatpush.bf16.msra.mxu0 %v8542_v22 }
 0x227   :  { %v10013_v61 = vld [vmem:[#allocation5 + $0xe38] sm:$0xf]  ;;  %v9502_v29 = vor.u32 %v12594_v49, %v9501_v24 }
 0x228   :  { %3973 = vmatpush.bf16.msra.mxu3 %v10142_v48  ;;  %v12722_v17 = vld [vmem:[#allocation5 + $0xe74] sm:$0xf0]  ;;  %3946 = vmatpush.bf16.msra.mxu1 %v9054_v39 }
 0x229   :  { %v8413_v50 = vld [vmem:[#allocation5 + $0x1b8] sm:$0xf]  ;;  %v10014_v18 = vor.u32 %v12722_v17, %v10013_v61 }
 0x22a   :  { %3960 = vmatpush.bf16.msra.mxu2 %v9566_v63  ;;  %v12322_v20 = vld [vmem:[#allocation5 + $0x1f4] sm:$0xf0]  ;;  %3933 = vmatpush.bf16.msra.mxu0 %v8478_v28 }
 0x22b   :  { %v8925_v60 = vld [vmem:[#allocation5 + $0x5b8] sm:$0xf]  ;;  %v8414_v35 = vor.u32 %v12322_v20, %v8413_v50 }
 0x22c   :  { %3974 = vmatpush.bf16.msra.mxu3 %v10078_v53  ;;  %v12450_v16 = vld [vmem:[#allocation5 + $0x5f4] sm:$0xf0]  ;;  %3947 = vmatpush.bf16.msra.mxu1 %v8990_v45 }
 0x22d   :  { %v9437_v23 = vld [vmem:[#allocation5 + $0x9b8] sm:$0xf]  ;;  %v8926_v48 = vor.u32 %v12450_v16, %v8925_v60 }
 0x22e   :  { %v12578_v27 = vld [vmem:[#allocation5 + $0x9f4] sm:$0xf0]  ;;  %3961 = vmatpush.bf16.msra.mxu2 %v9502_v29  ;;  %3934 = vmatpush.bf16.msra.mxu0 %v8414_v35 }
 0x22f   :  { %v9949_v54 = vld [vmem:[#allocation5 + $0xdb8] sm:$0xf]  ;;  %v9438_v46 = vor.u32 %v12578_v27, %v9437_v23 }
 0x230   :  { %v12706_v44 = vld [vmem:[#allocation5 + $0xdf4] sm:$0xf0]  ;;  %3975 = vmatpush.bf16.msra.mxu3 %v10014_v18  ;;  %3948 = vmatpush.bf16.msra.mxu1 %v8926_v48 }
 0x231   :  { %v8349_v47 = vld [vmem:[#allocation5 + $0x138] sm:$0xf]  ;;  %v9950_v55 = vor.u32 %v12706_v44, %v9949_v54 }
 0x232   :  { %v12306_v62 = vld [vmem:[#allocation5 + $0x174] sm:$0xf0]  ;;  %3962 = vmatpush.bf16.msra.mxu2 %v9438_v46 }
 0x233   :  { %v8861_v0 = vld [vmem:[#allocation5 + $0x538] sm:$0xf]  ;;  %v8350_v56 = vor.u32 %v12306_v62, %v8349_v47 }
 0x234   :  { %v12434_v22 = vld [vmem:[#allocation5 + $0x574] sm:$0xf0]  ;;  %3976 = vmatpush.bf16.msra.mxu3 %v9950_v55  ;;  %v8671_v55 = vld [vmem:[#allocation5 + $0x3f8] sm:$0xf0] }
 0x235   :  { %v9373_v39 = vld [vmem:[#allocation5 + $0x938] sm:$0xf]  ;;  %v8862_v53 = vor.u32 %v12434_v22, %v8861_v0  ;;  %3935 = vmatpush.bf16.msra.mxu0 %v8350_v56  ;;  %v12378_v0 = vld [vmem:[#allocation5 + $0x3bc] sm:$0xf] }
 0x236   :  { %v12562_v63 = vld [vmem:[#allocation5 + $0x974] sm:$0xf0]  ;;  %v12506_v22 = vld [vmem:[#allocation5 + $0x7bc] sm:$0xf] }
 0x237   :  { %v9885_v57 = vld [vmem:[#allocation5 + $0xd38] sm:$0xf]  ;;  %v9374_v14 = vor.u32 %v12562_v63, %v9373_v39  ;;  %3949 = vmatpush.bf16.msra.mxu1 %v8862_v53  ;;  %v9183_v63 = vld [vmem:[#allocation5 + $0x7f8] sm:$0xf0] }
 0x238   :  { %v12690_v58 = vld [vmem:[#allocation5 + $0xd74] sm:$0xf0] }
 0x239   :  { %v8285_v24 = vld [vmem:[#allocation5 + $0xb8] sm:$0xf]  ;;  %v9886_v17 = vor.u32 %v12690_v58, %v9885_v57  ;;  %3963 = vmatpush.bf16.msra.mxu2 %v9374_v14  ;;  %v12634_v57 = vld [vmem:[#allocation5 + $0xbbc] sm:$0xf] }
 0x23a   :  { %v12290_v49 = vld [vmem:[#allocation5 + $0xf4] sm:$0xf0]  ;;  %v9695_v58 = vld [vmem:[#allocation5 + $0xbf8] sm:$0xf0] }
 0x23b   :  { %v8797_v61 = vld [vmem:[#allocation5 + $0x4b8] sm:$0xf]  ;;  %v8286_v60 = vor.u32 %v12290_v49, %v8285_v24  ;;  %3977 = vmatpush.bf16.msra.mxu3 %v9886_v17  ;;  %v12762_v14 = vld [vmem:[#allocation5 + $0xfbc] sm:$0xf]  ;;  %v9186_v17 = vor.u32 %v12506_v22, %v9183_v63 }
 0x23c   :  { %v12418_v28 = vld [vmem:[#allocation5 + $0x4f4] sm:$0xf0]  ;;  %v10207_v24 = vld [vmem:[#allocation5 + $0xff8] sm:$0xf0] }
 0x23d   :  { %v9309_v45 = vld [vmem:[#allocation5 + $0x8b8] sm:$0xf]  ;;  %v8798_v23 = vor.u32 %v12418_v28, %v8797_v61  ;;  %3936 = vmatpush.bf16.msra.mxu0 %v8286_v60  ;;  %v8674_v61 = vor.u32 %v12378_v0, %v8671_v55  ;;  %v9698_v28 = vor.u32 %v12634_v57, %v9695_v58  ;;  %v9119_v60 = vld [vmem:[#allocation5 + $0x778] sm:$0xf0] }
 0x23e   :  { %v12546_v29 = vld [vmem:[#allocation5 + $0x8f4] sm:$0xf0]  ;;  %v9055_v0 = vld [vmem:[#allocation5 + $0x6f8] sm:$0xf0] }
 0x23f   :  { %v9821_v50 = vld [vmem:[#allocation5 + $0xcb8] sm:$0xf]  ;;  %v9310_v27 = vor.u32 %v12546_v29, %v9309_v45  ;;  %3950 = vmatpush.bf16.msra.mxu1 %v8798_v23  ;;  %v12362_v45 = vld [vmem:[#allocation5 + $0x33c] sm:$0xf] }
 0x240   :  { %v12674_v20 = vld [vmem:[#allocation5 + $0xcf4] sm:$0xf0]  ;;  %v8607_v29 = vld [vmem:[#allocation5 + $0x378] sm:$0xf0] }
 0x241   :  { %v8221_v18 = vld [vmem:[#allocation5 + $0x38] sm:$0xf]  ;;  %v9822_v48 = vor.u32 %v12674_v20, %v9821_v50  ;;  %3964 = vmatpush.bf16.msra.mxu2 %v9310_v27  ;;  %v12490_v50 = vld [vmem:[#allocation5 + $0x73c] sm:$0xf]  ;;  %v10210_v20 = vor.u32 %v12762_v14, %v10207_v24 }
 0x242   :  { %v12274_v16 = vld [vmem:[#allocation5 + $0x74] sm:$0xf0]  ;;  %v12746_v23 = vld [vmem:[#allocation5 + $0xf3c] sm:$0xf] }
 0x243   :  { %v8733_v54 = vld [vmem:[#allocation5 + $0x438] sm:$0xf]  ;;  %v8222_v39 = vor.u32 %v12274_v16, %v8221_v18  ;;  %3978 = vmatpush.bf16.msra.mxu3 %v9822_v48  ;;  %v12618_v18 = vld [vmem:[#allocation5 + $0xb3c] sm:$0xf] }
 0x244   :  { %v12402_v44 = vld [vmem:[#allocation5 + $0x474] sm:$0xf0]  ;;  %v9631_v16 = vld [vmem:[#allocation5 + $0xb78] sm:$0xf0] }
 0x245   :  { %v9245_v35 = vld [vmem:[#allocation5 + $0x838] sm:$0xf]  ;;  %v8734_v56 = vor.u32 %v12402_v44, %v8733_v54  ;;  %3937 = vmatpush.bf16.msra.mxu0 %v8222_v39  ;;  %v10143_v27 = vld [vmem:[#allocation5 + $0xf78] sm:$0xf0]  ;;  %v8610_v54 = vor.u32 %v12362_v45, %v8607_v29  ;;  %v9122_v44 = vor.u32 %v12490_v50, %v9119_v60 }
 0x246   :  { %v12530_v46 = vld [vmem:[#allocation5 + $0x874] sm:$0xf0]  ;;  %v12346_v48 = vld [vmem:[#allocation5 + $0x2bc] sm:$0xf] }
 0x247   :  { %v9757_v47 = vld [vmem:[#allocation5 + $0xc38] sm:$0xf]  ;;  %v9246_v53 = vor.u32 %v12530_v46, %v9245_v35  ;;  %3951 = vmatpush.bf16.msra.mxu1 %v8734_v56  ;;  %v9634_v35 = vor.u32 %v12618_v18, %v9631_v16  ;;  %v8543_v46 = vld [vmem:[#allocation5 + $0x2f8] sm:$0xf0] }
 0x248   :  { %v12658_v62 = vld [vmem:[#allocation5 + $0xc74] sm:$0xf0]  ;;  %v12602_v55 = vld [vmem:[#allocation5 + $0xabc] sm:$0xf]  ;;  %3938 = vmatmul.bf16.vlgmr.msra.gmra.mxu0 %v13459_v26  ;;  %v8546_v57 = vor.u32 %v12346_v48, %v8543_v46 }
 0x249   :  { %v9758_v49 = vor.u32 %v12658_v62, %v9757_v47  ;;  %3965 = vmatpush.bf16.msra.mxu2 %v9246_v53  ;;  %3986 = vmatpush.bf16.msrb.mxu0 %v8674_v61  ;;  %v12474_v47 = vld [vmem:[#allocation5 + $0x6bc] sm:$0xf]  ;;  %v10146_v62 = vor.u32 %v12746_v23, %v10143_v27 }
 0x24a   :  { %v9567_v22 = vld [vmem:[#allocation5 + $0xaf8] sm:$0xf0]  ;;  %3952 = vmatmul.bf16.vlgmr.msra.gmra.mxu1 %v13461_v33  ;;  %v9058_v58 = vor.u32 %v12474_v47, %v9055_v0 }
 0x24b   :  { %3979 = vmatpush.bf16.msra.mxu3 %v9758_v49  ;;  %4000 = vmatpush.bf16.msrb.mxu1 %v9186_v17  ;;  %v12730_v39 = vld [vmem:[#allocation5 + $0xebc] sm:$0xf]  ;;  %v9570_v56 = vor.u32 %v12602_v55, %v9567_v22 }
 0x24c   :  { %3966 = vmatmul.bf16.vlgmr.msra.gmra.mxu2 %v13453_v8  ;;  %v10079_v63 = vld [vmem:[#allocation5 + $0xef8] sm:$0xf0] }
 0x24d   :  { %4014 = vmatpush.bf16.msrb.mxu2 %v9698_v28  ;;  %3987 = vmatpush.bf16.msrb.mxu0 %v8610_v54  ;;  %v12330_v53 = vld [vmem:[#allocation5 + $0x23c] sm:$0xf]  ;;  %v10082_v49 = vor.u32 %v12730_v39, %v10079_v63 }
 0x24e   :  { %3980 = vmatmul.bf16.vlgmr.msra.gmra.mxu3 %v13455_v15  ;;  %v8479_v14 = vld [vmem:[#allocation5 + $0x278] sm:$0xf0] }
 0x24f   :  { %4028 = vmatpush.bf16.msrb.mxu3 %v10210_v20  ;;  %4001 = vmatpush.bf16.msrb.mxu1 %v9122_v44  ;;  %v12458_v24 = vld [vmem:[#allocation5 + $0x63c] sm:$0xf]  ;;  %v8482_v50 = vor.u32 %v12330_v53, %v8479_v14 }
 0x250   :  { %v8991_v61 = vld [vmem:[#allocation5 + $0x678] sm:$0xf0] }
 0x251   :  { %4015 = vmatpush.bf16.msrb.mxu2 %v9634_v35  ;;  %v12586_v17 = vld [vmem:[#allocation5 + $0xa3c] sm:$0xf]  ;;  %3988 = vmatpush.bf16.msrb.mxu0 %v8546_v57  ;;  %v8994_v20 = vor.u32 %v12458_v24, %v8991_v61 }
 0x252   :  { %v9503_v28 = vld [vmem:[#allocation5 + $0xa78] sm:$0xf0] }
 0x253   :  { %4029 = vmatpush.bf16.msrb.mxu3 %v10146_v62  ;;  %v12714_v45 = vld [vmem:[#allocation5 + $0xe3c] sm:$0xf]  ;;  %4002 = vmatpush.bf16.msrb.mxu1 %v9058_v58  ;;  %v9506_v60 = vor.u32 %v12586_v17, %v9503_v28 }
 0x254   :  { %v10015_v29 = vld [vmem:[#allocation5 + $0xe78] sm:$0xf0] }
 0x255   :  { %4016 = vmatpush.bf16.msrb.mxu2 %v9570_v56  ;;  %v12314_v18 = vld [vmem:[#allocation5 + $0x1bc] sm:$0xf]  ;;  %v10018_v27 = vor.u32 %v12714_v45, %v10015_v29  ;;  %3989 = vmatpush.bf16.msrb.mxu0 %v8482_v50 }
 0x256   :  { %v8415_v16 = vld [vmem:[#allocation5 + $0x1f8] sm:$0xf0] }
 0x257   :  { %v12442_v23 = vld [vmem:[#allocation5 + $0x5bc] sm:$0xf]  ;;  %4030 = vmatpush.bf16.msrb.mxu3 %v10082_v49  ;;  %v8418_v47 = vor.u32 %v12314_v18, %v8415_v16  ;;  %4003 = vmatpush.bf16.msrb.mxu1 %v8994_v20 }
 0x258   :  { %v8927_v54 = vld [vmem:[#allocation5 + $0x5f8] sm:$0xf0] }
 0x259   :  { %v12570_v44 = vld [vmem:[#allocation5 + $0x9bc] sm:$0xf]  ;;  %4017 = vmatpush.bf16.msrb.mxu2 %v9506_v60  ;;  %v8930_v62 = vor.u32 %v12442_v23, %v8927_v54  ;;  %3990 = vmatpush.bf16.msrb.mxu0 %v8418_v47 }
 0x25a   :  { %v9439_v35 = vld [vmem:[#allocation5 + $0x9f8] sm:$0xf0] }
 0x25b   :  { %v12698_v48 = vld [vmem:[#allocation5 + $0xdbc] sm:$0xf]  ;;  %v9442_v0 = vor.u32 %v12570_v44, %v9439_v35  ;;  %4031 = vmatpush.bf16.msrb.mxu3 %v10018_v27  ;;  %4004 = vmatpush.bf16.msrb.mxu1 %v8930_v62 }
 0x25c   :  { %v9951_v46 = vld [vmem:[#allocation5 + $0xdf8] sm:$0xf0] }
 0x25d   :  { %v12298_v55 = vld [vmem:[#allocation5 + $0x13c] sm:$0xf]  ;;  %v9954_v63 = vor.u32 %v12698_v48, %v9951_v46  ;;  %4018 = vmatpush.bf16.msrb.mxu2 %v9442_v0 }
 0x25e   :  { %v8351_v22 = vld [vmem:[#allocation5 + $0x178] sm:$0xf0] }
 0x25f   :  { %v12426_v39 = vld [vmem:[#allocation5 + $0x53c] sm:$0xf]  ;;  %v8354_v24 = vor.u32 %v12298_v55, %v8351_v22  ;;  %4032 = vmatpush.bf16.msrb.mxu3 %v9954_v63  ;;  %v12801_v63 = vld [vmem:[#allocation7 + $0xec] sm:$0xf0] }
 0x260   :  { %v8863_v57 = vld [vmem:[#allocation5 + $0x578] sm:$0xf0] }
 0x261   :  { %v12554_v58 = vld [vmem:[#allocation5 + $0x93c] sm:$0xf]  ;;  %v8866_v49 = vor.u32 %v12426_v39, %v8863_v57  ;;  %3991 = vmatpush.bf16.msrb.mxu0 %v8354_v24  ;;  %v10325_v39 = vld [vmem:[#allocation7 + $0xe0] sm:$0xf] }
 0x262   :  { %v9375_v56 = vld [vmem:[#allocation5 + $0x978] sm:$0xf0]  ;;  %v10453_v57 = vld [vmem:[#allocation7 + $0x1e0] sm:$0xf] }
 0x263   :  { %v12682_v53 = vld [vmem:[#allocation5 + $0xd3c] sm:$0xf]  ;;  %v9378_v61 = vor.u32 %v12554_v58, %v9375_v56  ;;  %4005 = vmatpush.bf16.msrb.mxu1 %v8866_v49  ;;  %v12833_v56 = vld [vmem:[#allocation7 + $0x1ec] sm:$0xf0] }
 0x264   :  { %v9887_v14 = vld [vmem:[#allocation5 + $0xd78] sm:$0xf0] }
 0x265   :  { %v12282_v17 = vld [vmem:[#allocation5 + $0xbc] sm:$0xf]  ;;  %v9890_v29 = vor.u32 %v12682_v53, %v9887_v14  ;;  %4019 = vmatpush.bf16.msrb.mxu2 %v9378_v61  ;;  %v10581_v53 = vld [vmem:[#allocation7 + $0x2e0] sm:$0xf]  ;;  %v12865_v14 = vld [vmem:[#allocation7 + $0x2ec] sm:$0xf0] }
 0x266   :  { %v8287_v28 = vld [vmem:[#allocation5 + $0xf8] sm:$0xf0]  ;;  %v10709_v61 = vld [vmem:[#allocation7 + $0x3e0] sm:$0xf] }
 0x267   :  { %v12410_v45 = vld [vmem:[#allocation5 + $0x4bc] sm:$0xf]  ;;  %v8290_v23 = vor.u32 %v12282_v17, %v8287_v28  ;;  %4033 = vmatpush.bf16.msrb.mxu3 %v9890_v29  ;;  %v12897_v17 = vld [vmem:[#allocation7 + $0x3ec] sm:$0xf0]  ;;  %v10454_v29 = vor.u32 %v12833_v56, %v10453_v57 }
 0x268   :  { %v8799_v50 = vld [vmem:[#allocation5 + $0x4f8] sm:$0xf0]  ;;  %v12825_v57 = vld [vmem:[#allocation7 + $0x1ac] sm:$0xf0] }
 0x269   :  { %v12538_v20 = vld [vmem:[#allocation5 + $0x8bc] sm:$0xf]  ;;  %v8802_v44 = vor.u32 %v12410_v45, %v8799_v50  ;;  %3992 = vmatpush.bf16.msrb.mxu0 %v8290_v23  ;;  %v10326_v45 = vor.u32 %v12801_v63, %v10325_v39  ;;  %v10582_v50 = vor.u32 %v12865_v14, %v10581_v53  ;;  %v10710_v23 = vor.u32 %v12897_v17, %v10709_v61  ;;  %v10421_v39 = vld [vmem:[#allocation7 + $0x1a0] sm:$0xf]  ;;  %v12857_v56 = vld [vmem:[#allocation7 + $0x2ac] sm:$0xf0]  ;;  %v13614_v53 = vpop.f32.mrf.mxu2 }
 0x26a   :  { %v9311_v60 = vld [vmem:[#allocation5 + $0x8f8] sm:$0xf0]  ;;  %v10677_v14 = vld [vmem:[#allocation7 + $0x3a0] sm:$0xf] }
 0x26b   :  { %v12666_v18 = vld [vmem:[#allocation5 + $0xcbc] sm:$0xf]  ;;  %v9314_v35 = vor.u32 %v12538_v20, %v9311_v60  ;;  %4006 = vmatpush.bf16.msrb.mxu1 %v8802_v44  ;;  %v10309_v20 = vld [vmem:[#allocation7 + $0xc0] sm:$0xf]  ;;  %v12797_v60 = vld [vmem:[#allocation7 + $0xcc] sm:$0xf0] }
 0x26c   :  { %v9823_v16 = vld [vmem:[#allocation5 + $0xcf8] sm:$0xf0]  ;;  %v12861_v44 = vld [vmem:[#allocation7 + $0x2cc] sm:$0xf0] }
 0x26d   :  { %v12266_v27 = vld [vmem:[#allocation5 + $0x3c] sm:$0xf]  ;;  %v9826_v62 = vor.u32 %v12666_v18, %v9823_v16  ;;  %4020 = vmatpush.bf16.msrb.mxu2 %v9314_v35  ;;  %v10437_v18 = vld [vmem:[#allocation7 + $0x1c0] sm:$0xf]  ;;  %v13609_v16 = vpop.f32.mrf.mxu0  ;;  %v13611_v35 = vpop.f32.mrf.mxu1 }
 0x26e   :  { %v8223_v54 = vld [vmem:[#allocation5 + $0x78] sm:$0xf0] }
 0x26f   :  { %v12394_v48 = vld [vmem:[#allocation5 + $0x43c] sm:$0xf]  ;;  %v8226_v58 = vor.u32 %v12266_v27, %v8223_v54  ;;  %4034 = vmatpush.bf16.msrb.mxu3 %v9826_v62  ;;  %v12829_v27 = vld [vmem:[#allocation7 + $0x1cc] sm:$0xf0]  ;;  %v10565_v54 = vld [vmem:[#allocation7 + $0x2c0] sm:$0xf] }
 0x270   :  { %v8735_v46 = vld [vmem:[#allocation5 + $0x478] sm:$0xf0]  ;;  %v10438_v62 = vor.u32 %v12829_v27, %v10437_v18  ;;  %v3172_v18 = vadd.f32 %v13485_v11, %v13483_v10  ;;  %v12885_v27 = vld [vmem:[#allocation7 + $0x38c] sm:$0xf0]  ;;  %v10517_v10 = vld [vmem:[#allocation7 + $0x260] sm:$0xf] }
 0x271   :  { %v12522_v47 = vld [vmem:[#allocation5 + $0x83c] sm:$0xf]  ;;  %v8738_v24 = vor.u32 %v12394_v48, %v8735_v46  ;;  %3993 = vmatpush.bf16.msrb.mxu0 %v8226_v58  ;;  %v10693_v48 = vld [vmem:[#allocation7 + $0x3c0] sm:$0xf]  ;;  %v12893_v46 = vld [vmem:[#allocation7 + $0x3cc] sm:$0xf0] }
 0x272   :  { %v9247_v0 = vld [vmem:[#allocation5 + $0x878] sm:$0xf0]  ;;  %v10694_v63 = vor.u32 %v12893_v46, %v10693_v48  ;;  %v10549_v58 = vld [vmem:[#allocation7 + $0x2a0] sm:$0xf]  ;;  %v12849_v11 = vld [vmem:[#allocation7 + $0x26c] sm:$0xf0] }
 0x273   :  { %v12650_v55 = vld [vmem:[#allocation5 + $0xc3c] sm:$0xf]  ;;  %v9250_v49 = vor.u32 %v12522_v47, %v9247_v0  ;;  %4007 = vmatpush.bf16.msrb.mxu1 %v8738_v24  ;;  %v10310_v47 = vor.u32 %v12797_v60, %v10309_v20  ;;  %v10566_v0 = vor.u32 %v12861_v44, %v10565_v54  ;;  %v12889_v24 = vld [vmem:[#allocation7 + $0x3ac] sm:$0xf0]  ;;  %v10550_v17 = vor.u32 %v12857_v56, %v10549_v58  ;;  %v10533_v20 = vld [vmem:[#allocation7 + $0x280] sm:$0xf] }
 0x274   :  { %v9759_v22 = vld [vmem:[#allocation5 + $0xc78] sm:$0xf0]  ;;  %3994 = vmatmul.bf16.vlgmr.msrb.gmra.mxu0 %v13459_v26  ;;  %v10422_v26 = vor.u32 %v12825_v57, %v10421_v39  ;;  %v12853_v60 = vld [vmem:[#allocation7 + $0x28c] sm:$0xf0]  ;;  %v3228_v54 = vadd.f32 %v13499_v4, %v13497_v2  ;;  %v3186_v39 = vadd.f32 %v13491_v25, %v3172_v18  ;;  %v10645_v57 = vld [vmem:[#allocation7 + $0x360] sm:$0xf] }
 0x275   :  { %v9762_v28 = vor.u32 %v12650_v55, %v9759_v22  ;;  %4021 = vmatpush.bf16.msrb.mxu2 %v9250_v49  ;;  %7162 = vmatpush.bf16.msra.mxu0 %v10326_v45  ;;  %v10293_v55 = vld [vmem:[#allocation7 + $0xa0] sm:$0xf]  ;;  %v12793_v22 = vld [vmem:[#allocation7 + $0xac] sm:$0xf0]  ;;  %v13618_v49 = vpop.f32.mrf.mxu3  ;;  %v10534_v46 = vor.u32 %v12853_v60, %v10533_v20 }
 0x276   :  { %4008 = vmatmul.bf16.vlgmr.msrb.gmra.mxu1 %v13461_v33  ;;  %v10294_v61 = vor.u32 %v12793_v22, %v10293_v55  ;;  %v12789_v45 = vld [vmem:[#allocation7 + $0x8c] sm:$0xf0]  ;;  %v10678_v33 = vor.u32 %v12889_v24, %v10677_v14  ;;  %v3242_v4 = vadd.f32 %v13505_v21, %v3228_v54  ;;  %v3284_v14 = vadd.f32 %v13513_v13, %v13511_v12  ;;  %v10373_v25 = vld [vmem:[#allocation7 + $0x140] sm:$0xf] }
 0x277   :  { %4035 = vmatpush.bf16.msrb.mxu3 %v9762_v28  ;;  %7176 = vmatpush.bf16.msra.mxu1 %v10454_v29  ;;  %v10277_v28 = vld [vmem:[#allocation7 + $0x80] sm:$0xf]  ;;  %v12817_v22 = vld [vmem:[#allocation7 + $0x16c] sm:$0xf0] }
 0x278   :  { %4022 = vmatmul.bf16.vlgmr.msrb.gmra.mxu2 %v13453_v8  ;;  %v10405_v29 = vld [vmem:[#allocation7 + $0x180] sm:$0xf]  ;;  %v12821_v8 = vld [vmem:[#allocation7 + $0x18c] sm:$0xf0]  ;;  %v10278_v44 = vor.u32 %v12789_v45, %v10277_v28  ;;  %v3340_v28 = vadd.f32 %v13527_v37, %v13525_v36  ;;  %v13643_v13 = vadd.f32 %v13507_v30, %v3242_v4 }
 0x279   :  { %7190 = vmatpush.bf16.msra.mxu2 %v10582_v50  ;;  %7163 = vmatpush.bf16.msra.mxu0 %v10310_v47  ;;  %v13621_v50 = vpop.f32.mrf.mxu0  ;;  %v10406_v48 = vor.u32 %v12821_v8, %v10405_v29  ;;  %v10261_v47 = vld [vmem:[#allocation7 + $0x60] sm:$0xf]  ;;  %v12881_v2 = vld [vmem:[#allocation7 + $0x36c] sm:$0xf0]  ;;  %v13640_v8 = vadd.f32 %v13493_v34, %v3186_v39 }
 0x27a   :  { %4036 = vmatmul.bf16.vlgmr.msrb.gmra.mxu3 %v13455_v15  ;;  %v13625_v15 = vpop.f32.mrf.mxu1  ;;  %v10646_v45 = vor.u32 %v12881_v2, %v10645_v57  ;;  %v12813_v21 = vld [vmem:[#allocation7 + $0x14c] sm:$0xf0]  ;;  %v10501_v29 = vld [vmem:[#allocation7 + $0x240] sm:$0xf] }
 0x27b   :  { %7204 = vmatpush.bf16.msra.mxu3 %v10710_v23  ;;  %7177 = vmatpush.bf16.msra.mxu1 %v10438_v62  ;;  %v10661_v23 = vld [vmem:[#allocation7 + $0x380] sm:$0xf]  ;;  %v12785_v62 = vld [vmem:[#allocation7 + $0x6c] sm:$0xf0]  ;;  %v10374_v37 = vor.u32 %v12813_v21, %v10373_v25 }
 0x27c   :  { %v10662_v55 = vor.u32 %v12885_v27, %v10661_v23  ;;  %v10262_v56 = vor.u32 %v12785_v62, %v10261_v47  ;;  %v10629_v20 = vld [vmem:[#allocation7 + $0x340] sm:$0xf]  ;;  %v12877_v12 = vld [vmem:[#allocation7 + $0x34c] sm:$0xf0]  ;;  %v3298_v23 = vadd.f32 %v13519_v31, %v3284_v14  ;;  %v4058_v31 = vmax.f32 %v13640_v8, 0.0 }
 0x27d   :  { %7191 = vmatpush.bf16.msra.mxu2 %v10566_v0  ;;  %7164 = vmatpush.bf16.msra.mxu0 %v10294_v61  ;;  %v10389_v0 = vld [vmem:[#allocation7 + $0x160] sm:$0xf]  ;;  %v13633_v58 = vpop.f32.mrf.mxu3  ;;  %v10518_v61 = vor.u32 %v12849_v11, %v10517_v10  ;;  %v12777_v34 = vld [vmem:[#allocation7 + $0x2c] sm:$0xf0]  ;;  %v10630_v30 = vor.u32 %v12877_v12, %v10629_v20  ;;  %v4043_v10 = vmax.f32 %v13495_v3, 0.0  ;;  %v4059_v11 = vmax.f32 %v13643_v13, 0.0 }
 0x27e   :  { %v10390_v24 = vor.u32 %v12817_v22, %v10389_v0  ;;  %v10229_v54 = vld [vmem:[#allocation7 + $0x20] sm:$0xf]  ;;  %v12841_v62 = vld [vmem:[#allocation7 + $0x22c] sm:$0xf0]  ;;  %v4042_v0 = vmax.f32 %v13481_v42, 0.0 }
 0x27f   :  { %7205 = vmatpush.bf16.msra.mxu3 %v10694_v63  ;;  %7178 = vmatpush.bf16.msra.mxu1 %v10422_v26  ;;  %v13630_v63 = vpop.f32.mrf.mxu2  ;;  %v10245_v26 = vld [vmem:[#allocation7 + $0x40] sm:$0xf]  ;;  %v12873_v22 = vld [vmem:[#allocation7 + $0x32c] sm:$0xf0]  ;;  %v10230_v39 = vor.u32 %v12777_v34, %v10229_v54 }
 0x280   :  { %v10485_v47 = vld [vmem:[#allocation7 + $0x220] sm:$0xf]  ;;  %v12773_v2 = vld [vmem:[#allocation7 + $0xc] sm:$0xf0] }
 0x281   :  { %7192 = vmatpush.bf16.msra.mxu2 %v10550_v17  ;;  %7165 = vmatpush.bf16.msra.mxu0 %v10278_v44  ;;  %v12781_v17 = vld [vmem:[#allocation7 + $0x4c] sm:$0xf0]  ;;  %v13645_v60 = vpop.f32.mrf.mxu0  ;;  %v10357_v44 = vld [vmem:[#allocation7 + $0x120] sm:$0xf]  ;;  %v10486_v14 = vor.u32 %v12841_v62, %v10485_v47 }
 0x282   :  { %v10246_v18 = vor.u32 %v12781_v17, %v10245_v26  ;;  %v13648_v36 = vpop.f32.mrf.mxu1  ;;  %v10213_v57 = vld [vmem:[#allocation7] sm:$0xf]  ;;  %v12869_v21 = vld [vmem:[#allocation7 + $0x30c] sm:$0xf0] }
 0x283   :  { %7206 = vmatpush.bf16.msra.mxu3 %v10678_v33  ;;  %7179 = vmatpush.bf16.msra.mxu1 %v10406_v48  ;;  %v12845_v33 = vld [vmem:[#allocation7 + $0x24c] sm:$0xf0]  ;;  %v3354_v48 = vadd.f32 %v13533_v52, %v3340_v28  ;;  %v3312_v52 = vadd.f32 %v13521_v40, %v3298_v23  ;;  %v10469_v26 = vld [vmem:[#allocation7 + $0x200] sm:$0xf]  ;;  %v10214_v12 = vor.u32 %v12773_v2, %v10213_v57 }
 0x284   :  { %v10502_v27 = vor.u32 %v12845_v33, %v10501_v29  ;;  %v12837_v28 = vld [vmem:[#allocation7 + $0x20c] sm:$0xf0]  ;;  %v10837_v29 = vld [vmem:[#allocation7 + $0x4e0] sm:$0xf] }
 0x285   :  { %7193 = vmatpush.bf16.msra.mxu2 %v10534_v46  ;;  %7166 = vmatpush.bf16.msra.mxu0 %v10262_v56  ;;  %v12809_v46 = vld [vmem:[#allocation7 + $0x12c] sm:$0xf0]  ;;  %v3368_v17 = vadd.f32 %v13535_v59, %v3354_v48  ;;  %v13659_v3 = vpop.f32.mrf.mxu3  ;;  %v10965_v33 = vld [vmem:[#allocation7 + $0x5e0] sm:$0xf]  ;;  %v4060_v59 = vmax.f32 %v3312_v52, 0.0  ;;  %v10470_v34 = vor.u32 %v12837_v28, %v10469_v26  ;;  %v13673_v26 = vpack.c.bf16 %v4058_v31, %v4042_v0 }
 0x286   :  { %v10358_v56 = vor.u32 %v12809_v46, %v10357_v44  ;;  %v12929_v40 = vld [vmem:[#allocation7 + $0x4ec] sm:$0xf0]  ;;  %v11221_v44 = vld [vmem:[#allocation7 + $0x7e0] sm:$0xf] }
 0x287   :  { %7207 = vmatpush.bf16.msra.mxu3 %v10662_v55  ;;  %7180 = vmatpush.bf16.msra.mxu1 %v10390_v24  ;;  %v10613_v55 = vld [vmem:[#allocation7 + $0x320] sm:$0xf]  ;;  %v13656_v4 = vpop.f32.mrf.mxu2  ;;  %v12961_v13 = vld [vmem:[#allocation7 + $0x5ec] sm:$0xf0]  ;;  %v4061_v46 = vmax.f32 %v3368_v17, 0.0  ;;  %v10838_v62 = vor.u32 %v12929_v40, %v10837_v29  ;;  %14086 = vst [vmem:[#allocation27_spill] sm:$0xff] %v13673_v26  ;;  %v13675_v17 = vpack.c.bf16 %v4059_v11, %v4043_v10 }
 0x288   :  { %v10341_v24 = vld [vmem:[#allocation7 + $0x100] sm:$0xf]  ;;  %v10614_v25 = vor.u32 %v12873_v22, %v10613_v55  ;;  %v12993_v23 = vld [vmem:[#allocation7 + $0x6ec] sm:$0xf0]  ;;  %v10966_v55 = vor.u32 %v12961_v13, %v10965_v33 }
 0x289   :  { %7194 = vmatpush.bf16.msra.mxu2 %v10518_v61  ;;  %7167 = vmatpush.bf16.msra.mxu0 %v10246_v18  ;;  %v12805_v61 = vld [vmem:[#allocation7 + $0x10c] sm:$0xf0]  ;;  %v13661_v20 = vpop.f32.mrf.mxu0  ;;  %v11093_v18 = vld [vmem:[#allocation7 + $0x6e0] sm:$0xf]  ;;  %14087 = vst [vmem:[#allocation28_spill] sm:$0xff] %v13675_v17 }
 0x28a   :  { %v10342_v54 = vor.u32 %v12805_v61, %v10341_v24  ;;  %v13025_v48 = vld [vmem:[#allocation7 + $0x7ec] sm:$0xf0]  ;;  %v11094_v22 = vor.u32 %v12993_v23, %v11093_v18  ;;  %v11205_v61 = vld [vmem:[#allocation7 + $0x7c0] sm:$0xf] }
 0x28b   :  { %7208 = vmatpush.bf16.msra.mxu3 %v10646_v45  ;;  %7181 = vmatpush.bf16.msra.mxu1 %v10374_v37  ;;  %v10597_v45 = vld [vmem:[#allocation7 + $0x300] sm:$0xf]  ;;  %v4044_v37 = vmax.f32 %v13509_v1, 0.0  ;;  %v12925_v57 = vld [vmem:[#allocation7 + $0x4cc] sm:$0xf0]  ;;  %v11222_v2 = vor.u32 %v13025_v48, %v11221_v44 }
 0x28c   :  { %v10598_v47 = vor.u32 %v12869_v21, %v10597_v45  ;;  %v10949_v1 = vld [vmem:[#allocation7 + $0x5c0] sm:$0xf]  ;;  %v12957_v52 = vld [vmem:[#allocation7 + $0x5cc] sm:$0xf0] }
 0x28d   :  { %7195 = vmatpush.bf16.msra.mxu2 %v10502_v27  ;;  %7168 = vmatpush.bf16.msra.mxu0 %v10230_v39  ;;  %v13664_v27 = vpop.f32.mrf.mxu1  ;;  %v10821_v39 = vld [vmem:[#allocation7 + $0x4c0] sm:$0xf]  ;;  %v13679_v45 = vpack.c.bf16 %v4060_v59, %v4044_v37  ;;  %v10950_v21 = vor.u32 %v12957_v52, %v10949_v1  ;;  %v12921_v33 = vld [vmem:[#allocation7 + $0x4ac] sm:$0xf0] }
 0x28e   :  { %v10822_v28 = vor.u32 %v12925_v57, %v10821_v39  ;;  %v10805_v40 = vld [vmem:[#allocation7 + $0x4a0] sm:$0xf]  ;;  %v12953_v0 = vld [vmem:[#allocation7 + $0x5ac] sm:$0xf0]  ;;  %v3452_v57 = vadd.f32 %v13555_v9, %v13553_v5 }
 0x28f   :  { %7209 = vmatpush.bf16.msra.mxu3 %v10630_v30  ;;  %7182 = vmatpush.bf16.msra.mxu1 %v10358_v56  ;;  %v4045_v30 = vmax.f32 %v13523_v19, 0.0  ;;  %v11077_v56 = vld [vmem:[#allocation7 + $0x6c0] sm:$0xf]  ;;  %v13667_v24 = vpop.f32.mrf.mxu2  ;;  %v13021_v19 = vld [vmem:[#allocation7 + $0x7cc] sm:$0xf0]  ;;  %14088 = vst [vmem:[#allocation29_spill] sm:$0xff] %v13679_v45  ;;  %v10806_v23 = vor.u32 %v12921_v33, %v10805_v40 }
 0x290   :  { %v10933_v42 = vld [vmem:[#allocation7 + $0x5a0] sm:$0xf]  ;;  %v11206_v8 = vor.u32 %v13021_v19, %v11205_v61  ;;  %v12985_v10 = vld [vmem:[#allocation7 + $0x6ac] sm:$0xf0]  ;;  %v3466_v33 = vadd.f32 %v13561_v38, %v3452_v57 }
 0x291   :  { %7196 = vmatpush.bf16.msra.mxu2 %v10486_v14  ;;  %7169 = vmatpush.bf16.msra.mxu0 %v10214_v12  ;;  %v12989_v14 = vld [vmem:[#allocation7 + $0x6cc] sm:$0xf0]  ;;  %v13681_v12 = vpack.c.bf16 %v4061_v46, %v4045_v30  ;;  %v11061_v31 = vld [vmem:[#allocation7 + $0x6a0] sm:$0xf]  ;;  %v13686_v18 = vpop.f32.mrf.mxu0  ;;  %v10934_v59 = vor.u32 %v12953_v0, %v10933_v42  ;;  %v3508_v0 = vadd.f32 %v13573_v43, %v13571_v41  ;;  %v14094_v43 = vld [vmem:[#allocation13_spill] sm:$0xff] }
 0x292   :  { %v11078_v29 = vor.u32 %v12989_v14, %v11077_v56  ;;  %v11189_v11 = vld [vmem:[#allocation7 + $0x7a0] sm:$0xf]  ;;  %v13017_v13 = vld [vmem:[#allocation7 + $0x7ac] sm:$0xf0] }
 0x293   :  { %7210 = vmatpush.bf16.msra.mxu3 %v10614_v25  ;;  %7183 = vmatpush.bf16.msra.mxu1 %v10342_v54  ;;  %v13677_v25 = vpop.f32.mrf.mxu3  ;;  %14089 = vst [vmem:[#allocation30_spill] sm:$0xff] %v13681_v12  ;;  %v11062_v54 = vor.u32 %v12985_v10, %v11061_v31  ;;  %v12917_v44 = vld [vmem:[#allocation7 + $0x48c] sm:$0xf0]  ;;  %v10917_v48 = vld [vmem:[#allocation7 + $0x580] sm:$0xf]  ;;  %v11190_v30 = vor.u32 %v13017_v13, %v11189_v11 }
 0x294   :  { %7170 = vmatmul.bf16.vlgmr.msra.gmra.mxu0 %v13673_v26  ;;  %v12949_v46 = vld [vmem:[#allocation7 + $0x58c] sm:$0xf0]  ;;  %v10773_v14 = vld [vmem:[#allocation7 + $0x460] sm:$0xf] }
 0x295   :  { %7197 = vmatpush.bf16.msra.mxu2 %v10470_v34  ;;  %7218 = vmatpush.bf16.msrb.mxu0 %v10838_v62  ;;  %v13689_v37 = vpop.f32.mrf.mxu1  ;;  %v10789_v34 = vld [vmem:[#allocation7 + $0x480] sm:$0xf]  ;;  %v12981_v62 = vld [vmem:[#allocation7 + $0x68c] sm:$0xf0]  ;;  %v10918_v52 = vor.u32 %v12949_v46, %v10917_v48 }
 0x296   :  { %7184 = vmatmul.bf16.vlgmr.msra.gmra.mxu1 %v13675_v17  ;;  %v13013_v39 = vld [vmem:[#allocation7 + $0x78c] sm:$0xf0]  ;;  %v10790_v1 = vor.u32 %v12917_v44, %v10789_v34  ;;  %v10901_v19 = vld [vmem:[#allocation7 + $0x560] sm:$0xf]  ;;  %v14093_v34 = vld [vmem:[#allocation23_spill] sm:$0xff] }
 0x297   :  { %7211 = vmatpush.bf16.msra.mxu3 %v10598_v47  ;;  %7232 = vmatpush.bf16.msrb.mxu1 %v10966_v55  ;;  %v11045_v47 = vld [vmem:[#allocation7 + $0x680] sm:$0xf]  ;;  %v3396_v55 = vadd.f32 %v13541_v7, %v13539_v6  ;;  %v12913_v61 = vld [vmem:[#allocation7 + $0x46c] sm:$0xf0] }
 0x298   :  { %7198 = vmatmul.bf16.vlgmr.msra.gmra.mxu2 %v13679_v45  ;;  %v11046_v56 = vor.u32 %v12981_v62, %v11045_v47  ;;  %v12945_v7 = vld [vmem:[#allocation7 + $0x56c] sm:$0xf0]  ;;  %v11157_v9 = vld [vmem:[#allocation7 + $0x760] sm:$0xf] }
 0x299   :  { %7246 = vmatpush.bf16.msrb.mxu2 %v11094_v22  ;;  %7219 = vmatpush.bf16.msrb.mxu0 %v10822_v28  ;;  %v11173_v22 = vld [vmem:[#allocation7 + $0x780] sm:$0xf]  ;;  %v3410_v5 = vadd.f32 %v13547_v32, %v3396_v55  ;;  %v13009_v40 = vld [vmem:[#allocation7 + $0x76c] sm:$0xf0]  ;;  %v13701_v42 = vpop.f32.mrf.mxu0  ;;  %v10902_v10 = vor.u32 %v12945_v7, %v10901_v19 }
 0x29a   :  { %7212 = vmatmul.bf16.vlgmr.msra.gmra.mxu3 %v13681_v12  ;;  %v11174_v6 = vor.u32 %v13013_v39, %v11173_v22  ;;  %v10757_v13 = vld [vmem:[#allocation7 + $0x440] sm:$0xf]  ;;  %v14092_v38 = vld [vmem:[#allocation22_spill] sm:$0xff]  ;;  %v11158_v48 = vor.u32 %v13009_v40, %v11157_v9  ;;  %v14095_v22 = vld [vmem:[#allocation15_spill] sm:$0xff] }
 0x29b   :  { %7260 = vmatpush.bf16.msrb.mxu3 %v11222_v2  ;;  %7233 = vmatpush.bf16.msrb.mxu1 %v10950_v21  ;;  %v13695_v2 = vpop.f32.mrf.mxu2  ;;  %v13697_v28 = vpop.f32.mrf.mxu3  ;;  %v11029_v21 = vld [vmem:[#allocation7 + $0x660] sm:$0xf]  ;;  %v3564_v44 = vadd.f32 %v14093_v34, %v14092_v38  ;;  %v12973_v41 = vld [vmem:[#allocation7 + $0x64c] sm:$0xf0]  ;;  %v13712_v47 = vadd.f32 %v14094_v43, %v3410_v5  ;;  %v13715_v39 = vadd.f32 %v14095_v22, %v3466_v33 }
 0x29c   :  { %14090 = vst [vmem:[#allocation31_spill] sm:$0xff] %v13697_v28  ;;  %v10885_v32 = vld [vmem:[#allocation7 + $0x540] sm:$0xf]  ;;  %v13005_v55 = vld [vmem:[#allocation7 + $0x74c] sm:$0xf0] }
 0x29d   :  { %7247 = vmatpush.bf16.msrb.mxu2 %v11078_v29  ;;  %7220 = vmatpush.bf16.msrb.mxu0 %v10806_v23  ;;  %v12977_v29 = vld [vmem:[#allocation7 + $0x66c] sm:$0xf0]  ;;  %v13705_v31 = vpop.f32.mrf.mxu1  ;;  %v11013_v46 = vld [vmem:[#allocation7 + $0x640] sm:$0xf]  ;;  %v4063_v34 = vmax.f32 %v13715_v39, 0.0 }
 0x29e   :  { %v11030_v11 = vor.u32 %v12977_v29, %v11029_v21  ;;  %v12909_v23 = vld [vmem:[#allocation7 + $0x44c] sm:$0xf0]  ;;  %v11141_v62 = vld [vmem:[#allocation7 + $0x740] sm:$0xf] }
 0x29f   :  { %7261 = vmatpush.bf16.msrb.mxu3 %v11206_v8  ;;  %7234 = vmatpush.bf16.msrb.mxu1 %v10934_v59  ;;  %v10774_v8 = vor.u32 %v12913_v61, %v10773_v14  ;;  %v14091_v59 = vld [vmem:[#allocation19_spill] sm:$0xff]  ;;  %v10758_v57 = vor.u32 %v12909_v23, %v10757_v13  ;;  %v11014_v14 = vor.u32 %v12973_v41, %v11013_v46  ;;  %v10741_v61 = vld [vmem:[#allocation7 + $0x420] sm:$0xf]  ;;  %v12905_v19 = vld [vmem:[#allocation7 + $0x42c] sm:$0xf0] }
 0x2a0   :  { %v14097_v7 = vld [vmem:[#allocation20_spill] sm:$0xff]  ;;  %v11142_v40 = vor.u32 %v13005_v55, %v11141_v62  ;;  %v12937_v33 = vld [vmem:[#allocation7 + $0x52c] sm:$0xf0] }
 0x2a1   :  { %7248 = vmatpush.bf16.msrb.mxu2 %v11062_v54  ;;  %7221 = vmatpush.bf16.msrb.mxu0 %v10790_v1  ;;  %v3562_v54 = vadd.f32 %v14091_v59, %v13579_v51  ;;  %v14096_v1 = vld [vmem:[#allocation17_spill] sm:$0xff]  ;;  %v14098_v29 = vld [vmem:[#allocation24_spill] sm:$0xff]  ;;  %v14101_v59 = vld [vmem:[#allocation14_spill] sm:$0xff] }
 0x2a2   :  { %v3522_v51 = vadd.f32 %v14096_v1, %v3508_v0  ;;  %v3578_v5 = vadd.f32 %v14098_v29, %v3564_v44  ;;  %v12969_v0 = vld [vmem:[#allocation7 + $0x62c] sm:$0xf0]  ;;  %v14100_v13 = vld [vmem:[#allocation12_spill] sm:$0xff]  ;;  %v4047_v38 = vmax.f32 %v14101_v59, 0.0  ;;  %v14103_v1 = vld [vmem:[#allocation21_spill] sm:$0xff]  ;;  %v13731_v59 = vpop.f32.mrf.mxu0 }
 0x2a3   :  { %7262 = vmatpush.bf16.msrb.mxu3 %v11190_v30  ;;  %7235 = vmatpush.bf16.msrb.mxu1 %v10918_v52  ;;  %v12941_v30 = vld [vmem:[#allocation7 + $0x54c] sm:$0xf0]  ;;  %v13718_v52 = vpop.f32.mrf.mxu2  ;;  %v3576_v21 = vadd.f32 %v14097_v7, %v3562_v54  ;;  %v13722_v9 = vpop.f32.mrf.mxu3  ;;  %v10742_v54 = vor.u32 %v12905_v19, %v10741_v61  ;;  %v10725_v44 = vld [vmem:[#allocation7 + $0x400] sm:$0xf]  ;;  %v14104_v29 = vld [vmem:[#allocation25_spill] sm:$0xff] }
 0x2a4   :  { %14099 = vst [vmem:[#allocation19_spill] sm:$0xff] %v13722_v9  ;;  %v14102_v46 = vld [vmem:[#allocation18_spill] sm:$0xff]  ;;  %v10853_v62 = vld [vmem:[#allocation7 + $0x500] sm:$0xf] }
 0x2a5   :  { %7249 = vmatpush.bf16.msrb.mxu2 %v11046_v56  ;;  %7222 = vmatpush.bf16.msrb.mxu0 %v10774_v8  ;;  %v10886_v56 = vor.u32 %v12941_v30, %v10885_v32  ;;  %v10997_v8 = vld [vmem:[#allocation7 + $0x620] sm:$0xf]  ;;  %v13001_v32 = vld [vmem:[#allocation7 + $0x72c] sm:$0xf0]  ;;  %v3590_v7 = vadd.f32 %v14103_v1, %v3576_v21  ;;  %v13733_v23 = vpop.f32.mrf.mxu1 }
 0x2a6   :  { %v12901_v30 = vld [vmem:[#allocation7 + $0x40c] sm:$0xf0]  ;;  %v10998_v43 = vor.u32 %v12969_v0, %v10997_v8  ;;  %v10981_v22 = vld [vmem:[#allocation7 + $0x600] sm:$0xf] }
 0x2a7   :  { %7263 = vmatpush.bf16.msrb.mxu3 %v11174_v6  ;;  %7236 = vmatpush.bf16.msrb.mxu1 %v10902_v10  ;;  %v10869_v6 = vld [vmem:[#allocation7 + $0x520] sm:$0xf]  ;;  %v12933_v55 = vld [vmem:[#allocation7 + $0x50c] sm:$0xf0]  ;;  %v3592_v10 = vadd.f32 %v14104_v29, %v3578_v5  ;;  %v4049_v29 = vmax.f32 %v3590_v7, 0.0  ;;  %v14107_v7 = vmax.f32 %v13712_v47, 0.0 }
 0x2a8   :  { %v10870_v41 = vor.u32 %v12937_v33, %v10869_v6  ;;  %v11109_v61 = vld [vmem:[#allocation7 + $0x700] sm:$0xf]  ;;  %v12997_v19 = vld [vmem:[#allocation7 + $0x70c] sm:$0xf0]  ;;  %v10726_v6 = vor.u32 %v12901_v30, %v10725_v44 }
 0x2a9   :  { %7250 = vmatpush.bf16.msrb.mxu2 %v11030_v11  ;;  %v11125_v11 = vld [vmem:[#allocation7 + $0x720] sm:$0xf]  ;;  %7223 = vmatpush.bf16.msrb.mxu0 %v10758_v57  ;;  %v12965_v57 = vld [vmem:[#allocation7 + $0x60c] sm:$0xf0]  ;;  %v4065_v12 = vmax.f32 %v3592_v10, 0.0  ;;  %v11110_v45 = vor.u32 %v12997_v19, %v11109_v61 }
 0x2aa   :  { %v11126_v39 = vor.u32 %v13001_v32, %v11125_v11  ;;  %v13089_v33 = vld [vmem:[#allocation7 + $0x9ec] sm:$0xf0]  ;;  %v11605_v8 = vld [vmem:[#allocation7 + $0xae0] sm:$0xf]  ;;  %v10982_v11 = vor.u32 %v12965_v57, %v10981_v22  ;;  %v14106_v22 = vmax.f32 %v14100_v13, 0.0  ;;  %v13746_v57 = vpack.c.bf16 %v4063_v34, %v4047_v38  ;;  %v13748_v19 = vpop.f32.mrf.mxu0 }
 0x2ab   :  { %7264 = vmatpush.bf16.msrb.mxu3 %v11158_v48  ;;  %v3536_v48 = vadd.f32 %v14102_v46, %v3522_v51  ;;  %7237 = vmatpush.bf16.msrb.mxu1 %v10886_v56  ;;  %v11349_v51 = vld [vmem:[#allocation7 + $0x8e0] sm:$0xf]  ;;  %v13057_v56 = vld [vmem:[#allocation7 + $0x8ec] sm:$0xf0]  ;;  %v13736_v26 = vpop.f32.mrf.mxu2 }
 0x2ac   :  { %v13121_v0 = vld [vmem:[#allocation7 + $0xaec] sm:$0xf0]  ;;  %v14105_v21 = vld [vmem:[#allocation16_spill] sm:$0xff]  ;;  %v11350_v17 = vor.u32 %v13057_v56, %v11349_v51 }
 0x2ad   :  { %7251 = vmatpush.bf16.msrb.mxu2 %v11014_v14  ;;  %v11477_v14 = vld [vmem:[#allocation7 + $0x9e0] sm:$0xf]  ;;  %7224 = vmatpush.bf16.msrb.mxu0 %v10742_v54  ;;  %v4048_v46 = vmax.f32 %v14105_v21, 0.0  ;;  %v4064_v5 = vmax.f32 %v3536_v48, 0.0  ;;  %v13153_v1 = vld [vmem:[#allocation7 + $0xbec] sm:$0xf0]  ;;  %v11606_v44 = vor.u32 %v13121_v0, %v11605_v8  ;;  %v13738_v21 = vpop.f32.mrf.mxu3  ;;  %v13754_v8 = vpack.c.bf16 %v4065_v12, %v4049_v29 }
 0x2ae   :  { %v11733_v32 = vld [vmem:[#allocation7 + $0xbe0] sm:$0xf]  ;;  %v11478_v54 = vor.u32 %v13089_v33, %v11477_v14  ;;  %v13053_v9 = vld [vmem:[#allocation7 + $0x8cc] sm:$0xf0] }
 0x2af   :  { %7265 = vmatpush.bf16.msrb.mxu3 %v11142_v40  ;;  %7238 = vmatpush.bf16.msrb.mxu1 %v10870_v41  ;;  %v10854_v40 = vor.u32 %v12933_v55, %v10853_v62  ;;  %v11333_v30 = vld [vmem:[#allocation7 + $0x8c0] sm:$0xf]  ;;  %v11734_v48 = vor.u32 %v13153_v1, %v11733_v32  ;;  %v13085_v41 = vld [vmem:[#allocation7 + $0x9cc] sm:$0xf0]  ;;  %v13750_v51 = vpack.c.bf16 %v4064_v5, %v4048_v46 }
 0x2b0   :  { %v11461_v28 = vld [vmem:[#allocation7 + $0x9c0] sm:$0xf]  ;;  %v13117_v62 = vld [vmem:[#allocation7 + $0xacc] sm:$0xf0]  ;;  %v11334_v61 = vor.u32 %v13053_v9, %v11333_v30 }
 0x2b1   :  { %7252 = vmatpush.bf16.msrb.mxu2 %v10998_v43  ;;  %7225 = vmatpush.bf16.msrb.mxu0 %v10726_v6  ;;  %v11589_v43 = vld [vmem:[#allocation7 + $0xac0] sm:$0xf]  ;;  %v13149_v55 = vld [vmem:[#allocation7 + $0xbcc] sm:$0xf0]  ;;  %v11462_v56 = vor.u32 %v13085_v41, %v11461_v28  ;;  %v13752_v6 = vpop.f32.mrf.mxu1 }
 0x2b2   :  { %v11717_v10 = vld [vmem:[#allocation7 + $0xbc0] sm:$0xf]  ;;  %v11590_v14 = vor.u32 %v13117_v62, %v11589_v43  ;;  %v13049_v33 = vld [vmem:[#allocation7 + $0x8ac] sm:$0xf0]  ;;  %v3674_v62 = vadd.f32 %v13625_v15, %v13621_v50 }
 0x2b3   :  { %7266 = vmatpush.bf16.msrb.mxu3 %v11126_v39  ;;  %7239 = vmatpush.bf16.msrb.mxu1 %v10854_v40  ;;  %v13744_v39 = vpack.c.bf16 %v14107_v7, %v14106_v22  ;;  %v11317_v13 = vld [vmem:[#allocation7 + $0x8a0] sm:$0xf]  ;;  %v13113_v38 = vld [vmem:[#allocation7 + $0xaac] sm:$0xf0]  ;;  %v13760_v12 = vpop.f32.mrf.mxu2 }
 0x2b4   :  { %v11445_v47 = vld [vmem:[#allocation7 + $0x9a0] sm:$0xf]  ;;  %v13145_v34 = vld [vmem:[#allocation7 + $0xbac] sm:$0xf0]  ;;  %v11318_v0 = vor.u32 %v13049_v33, %v11317_v13 }
 0x2b5   :  { %7253 = vmatpush.bf16.msrb.mxu2 %v10982_v11  ;;  %7274 = vmatpush.bf16.msra.mxu0 %v11350_v17  ;;  %v11718_v17 = vor.u32 %v13149_v55, %v11717_v10  ;;  %v11573_v9 = vld [vmem:[#allocation7 + $0xaa0] sm:$0xf]  ;;  %v13045_v11 = vld [vmem:[#allocation7 + $0x88c] sm:$0xf0]  ;;  %v13762_v29 = vpop.f32.mrf.mxu3  ;;  %v3676_v10 = vadd.f32 %v13648_v36, %v13645_v60 }
 0x2b6   :  { %7226 = vmatmul.bf16.vlgmr.msrb.gmra.mxu0 %v13744_v39  ;;  %7240 = vmatmul.bf16.vlgmr.msrb.gmra.mxu1 %v13746_v57  ;;  %v11701_v28 = vld [vmem:[#allocation7 + $0xba0] sm:$0xf]  ;;  %v11574_v5 = vor.u32 %v13113_v38, %v11573_v9  ;;  %v13109_v30 = vld [vmem:[#allocation7 + $0xa8c] sm:$0xf0]  ;;  %v3730_v9 = vadd.f32 %v13664_v27, %v13661_v20 }
 0x2b7   :  { %7267 = vmatpush.bf16.msrb.mxu3 %v11110_v45  ;;  %7288 = vmatpush.bf16.msra.mxu1 %v11478_v54  ;;  %v13081_v45 = vld [vmem:[#allocation7 + $0x9ac] sm:$0xf0]  ;;  %v11301_v40 = vld [vmem:[#allocation7 + $0x880] sm:$0xf]  ;;  %v11702_v1 = vor.u32 %v13145_v34, %v11701_v28  ;;  %v3732_v28 = vadd.f32 %v13689_v37, %v13686_v18 }
 0x2b8   :  { %7254 = vmatmul.bf16.vlgmr.msrb.gmra.mxu2 %v13750_v51  ;;  %v11446_v46 = vor.u32 %v13081_v45, %v11445_v47  ;;  %v11429_v32 = vld [vmem:[#allocation7 + $0x980] sm:$0xf]  ;;  %v13077_v54 = vld [vmem:[#allocation7 + $0x98c] sm:$0xf0]  ;;  %v11302_v55 = vor.u32 %v13045_v11, %v11301_v40  ;;  %v3690_v45 = vadd.f32 %v13656_v4, %v3676_v10  ;;  %v3788_v4 = vadd.f32 %v13733_v23, %v13731_v59 }
 0x2b9   :  { %7302 = vmatpush.bf16.msra.mxu2 %v11606_v44  ;;  %7275 = vmatpush.bf16.msra.mxu0 %v11334_v61  ;;  %v11557_v44 = vld [vmem:[#allocation7 + $0xa80] sm:$0xf]  ;;  %v13141_v43 = vld [vmem:[#allocation7 + $0xb8c] sm:$0xf0]  ;;  %v11430_v22 = vor.u32 %v13077_v54, %v11429_v32  ;;  %v13773_v15 = vpop.f32.mrf.mxu1 }
 0x2ba   :  { %7268 = vmatmul.bf16.vlgmr.msrb.gmra.mxu3 %v13754_v8  ;;  %v11685_v41 = vld [vmem:[#allocation7 + $0xb80] sm:$0xf]  ;;  %v11558_v7 = vor.u32 %v13109_v30, %v11557_v44  ;;  %v13105_v47 = vld [vmem:[#allocation7 + $0xa6c] sm:$0xf0]  ;;  %v3746_v44 = vadd.f32 %v13695_v2, %v3732_v28 }
 0x2bb   :  { %7316 = vmatpush.bf16.msra.mxu3 %v11734_v48  ;;  %7289 = vmatpush.bf16.msra.mxu1 %v11462_v56  ;;  %v3620_v48 = vadd.f32 %v13611_v35, %v13609_v16  ;;  %v11285_v61 = vld [vmem:[#allocation7 + $0x860] sm:$0xf]  ;;  %v13041_v56 = vld [vmem:[#allocation7 + $0x86c] sm:$0xf0]  ;;  %v11686_v13 = vor.u32 %v13141_v43, %v11685_v41  ;;  %v13770_v16 = vpop.f32.mrf.mxu0  ;;  %v13788_v37 = vpop.f32.mrf.mxu2 }
 0x2bc   :  { %v13073_v35 = vld [vmem:[#allocation7 + $0x96c] sm:$0xf0]  ;;  %v11541_v33 = vld [vmem:[#allocation7 + $0xa60] sm:$0xf]  ;;  %v11286_v38 = vor.u32 %v13041_v56, %v11285_v61 }
 0x2bd   :  { %7303 = vmatpush.bf16.msra.mxu2 %v11590_v14  ;;  %7276 = vmatpush.bf16.msra.mxu0 %v11318_v0  ;;  %v11413_v14 = vld [vmem:[#allocation7 + $0x960] sm:$0xf]  ;;  %v3634_v50 = vadd.f32 %v13614_v53, %v3620_v48  ;;  %v13137_v36 = vld [vmem:[#allocation7 + $0xb6c] sm:$0xf0]  ;;  %v11542_v53 = vor.u32 %v13105_v47, %v11541_v33  ;;  %v13797_v23 = vpop.f32.mrf.mxu3 }
 0x2be   :  { %v11669_v60 = vld [vmem:[#allocation7 + $0xb60] sm:$0xf]  ;;  %v11414_v34 = vor.u32 %v13073_v35, %v11413_v14  ;;  %v13069_v27 = vld [vmem:[#allocation7 + $0x94c] sm:$0xf0] }
 0x2bf   :  { %7317 = vmatpush.bf16.msra.mxu3 %v11718_v17  ;;  %7290 = vmatpush.bf16.msra.mxu1 %v11446_v46  ;;  %v3688_v17 = vadd.f32 %v13630_v63, %v3674_v62  ;;  %v11269_v0 = vld [vmem:[#allocation7 + $0x840] sm:$0xf]  ;;  %v13037_v46 = vld [vmem:[#allocation7 + $0x84c] sm:$0xf0]  ;;  %v3786_v63 = vadd.f32 %v13705_v31, %v13701_v42  ;;  %v11670_v20 = vor.u32 %v13137_v36, %v11669_v60  ;;  %v14109_v60 = vld [vmem:[#allocation31_spill] sm:$0xff] }
 0x2c0   :  { %v11525_v40 = vld [vmem:[#allocation7 + $0xa40] sm:$0xf]  ;;  %v13101_v11 = vld [vmem:[#allocation7 + $0xa4c] sm:$0xf0]  ;;  %v13786_v18 = vadd.f32 %v13618_v49, %v3634_v50  ;;  %v13794_v42 = vadd.f32 %v13659_v3, %v3690_v45  ;;  %v3744_v31 = vadd.f32 %v13667_v24, %v3730_v9  ;;  %v11270_v59 = vor.u32 %v13037_v46, %v11269_v0 }
 0x2c1   :  { %7304 = vmatpush.bf16.msra.mxu2 %v11574_v5  ;;  %7277 = vmatpush.bf16.msra.mxu0 %v11302_v55  ;;  %v11397_v5 = vld [vmem:[#allocation7 + $0x940] sm:$0xf]  ;;  %v13791_v54 = vadd.f32 %v13633_v58, %v3688_v17  ;;  %v11526_v30 = vor.u32 %v13101_v11, %v11525_v40  ;;  %v13033_v41 = vld [vmem:[#allocation7 + $0x82c] sm:$0xf0]  ;;  %v3800_v58 = vadd.f32 %v13718_v52, %v3786_v63 }
 0x2c2   :  { %v11653_v32 = vld [vmem:[#allocation7 + $0xb40] sm:$0xf]  ;;  %v11398_v49 = vor.u32 %v13069_v27, %v11397_v5  ;;  %v3802_v3 = vadd.f32 %v13736_v26, %v3788_v4  ;;  %v13065_v24 = vld [vmem:[#allocation7 + $0x92c] sm:$0xf0]  ;;  %v4066_v61 = vmax.f32 %v13786_v18, 0.0  ;;  %v4067_v52 = vmax.f32 %v13794_v42, 0.0 }
 0x2c3   :  { %7318 = vmatpush.bf16.msra.mxu3 %v11702_v1  ;;  %7291 = vmatpush.bf16.msra.mxu1 %v11430_v22  ;;  %v13133_v1 = vld [vmem:[#allocation7 + $0xb4c] sm:$0xf0]  ;;  %v11253_v48 = vld [vmem:[#allocation7 + $0x820] sm:$0xf]  ;;  %v13802_v22 = vpop.f32.mrf.mxu0  ;;  %v4051_v35 = vmax.f32 %v13791_v54, 0.0  ;;  %v3758_v26 = vadd.f32 %v13677_v25, %v3744_v31  ;;  %v3760_v36 = vadd.f32 %v14109_v60, %v3746_v44  ;;  %v13814_v40 = vpop.f32.mrf.mxu2 }
 0x2c4   :  { %v11381_v43 = vld [vmem:[#allocation7 + $0x920] sm:$0xf]  ;;  %v11654_v62 = vor.u32 %v13133_v1, %v11653_v32  ;;  %v13097_v55 = vld [vmem:[#allocation7 + $0xa2c] sm:$0xf0]  ;;  %v11254_v33 = vor.u32 %v13033_v41, %v11253_v48  ;;  %v3816_v0 = vadd.f32 %v13738_v21, %v3802_v3 }
 0x2c5   :  { %7305 = vmatpush.bf16.msra.mxu2 %v11558_v7  ;;  %7278 = vmatpush.bf16.msra.mxu0 %v11286_v38  ;;  %v11509_v10 = vld [vmem:[#allocation7 + $0xa20] sm:$0xf]  ;;  %v14108_v7 = vld [vmem:[#allocation26_spill] sm:$0xff]  ;;  %v11382_v17 = vor.u32 %v13065_v24, %v11381_v43  ;;  %v13816_v54 = vpop.f32.mrf.mxu3  ;;  %v4052_v42 = vmax.f32 %v3758_v26, 0.0  ;;  %v4068_v31 = vmax.f32 %v3760_v36, 0.0 }
 0x2c6   :  { %v4050_v2 = vmax.f32 %v14108_v7, 0.0  ;;  %v11637_v56 = vld [vmem:[#allocation7 + $0xb20] sm:$0xf]  ;;  %v13129_v14 = vld [vmem:[#allocation7 + $0xb2c] sm:$0xf0]  ;;  %v11510_v45 = vor.u32 %v13097_v55, %v11509_v10 }
 0x2c7   :  { %7319 = vmatpush.bf16.msra.mxu3 %v11686_v13  ;;  %7292 = vmatpush.bf16.msra.mxu1 %v11414_v34  ;;  %v13806_v13 = vpop.f32.mrf.mxu1  ;;  %v11237_v47 = vld [vmem:[#allocation7 + $0x800] sm:$0xf]  ;;  %v13029_v50 = vld [vmem:[#allocation7 + $0x80c] sm:$0xf0]  ;;  %v14110_v34 = vld [vmem:[#allocation19_spill] sm:$0xff]  ;;  %v11638_v46 = vor.u32 %v13129_v14, %v11637_v56 }
 0x2c8   :  { %v11365_v9 = vld [vmem:[#allocation7 + $0x900] sm:$0xf]  ;;  %v13061_v38 = vld [vmem:[#allocation7 + $0x90c] sm:$0xf0]  ;;  %v11238_v11 = vor.u32 %v13029_v50, %v11237_v47  ;;  %v13820_v26 = vpack.c.bf16 %v4066_v61, %v4050_v2  ;;  %v13826_v50 = vpack.c.bf16 %v4068_v31, %v4052_v42 }
 0x2c9   :  { %7306 = vmatpush.bf16.msra.mxu2 %v11542_v53  ;;  %7279 = vmatpush.bf16.msra.mxu0 %v11270_v59  ;;  %v11493_v28 = vld [vmem:[#allocation7 + $0xa00] sm:$0xf]  ;;  %v3814_v53 = vadd.f32 %v14110_v34, %v3800_v58  ;;  %v13093_v25 = vld [vmem:[#allocation7 + $0xa0c] sm:$0xf0]  ;;  %v11366_v21 = vor.u32 %v13061_v38, %v11365_v9 }
 0x2ca   :  { %v11621_v5 = vld [vmem:[#allocation7 + $0xb00] sm:$0xf]  ;;  %v13125_v63 = vld [vmem:[#allocation7 + $0xb0c] sm:$0xf0]  ;;  %v11494_v59 = vor.u32 %v13093_v25, %v11493_v28 }
 0x2cb   :  { %7320 = vmatpush.bf16.msra.mxu3 %v11670_v20  ;;  %7293 = vmatpush.bf16.msra.mxu1 %v11398_v49  ;;  %v11861_v4 = vld [vmem:[#allocation7 + $0xce0] sm:$0xf]  ;;  %v13185_v20 = vld [vmem:[#allocation7 + $0xcec] sm:$0xf0]  ;;  %v4053_v44 = vmax.f32 %v3814_v53, 0.0  ;;  %v4069_v49 = vmax.f32 %v3816_v0, 0.0  ;;  %v13818_v14 = vpop.f32.mrf.mxu0  ;;  %v13834_v0 = vpop.f32.mrf.mxu2 }
 0x2cc   :  { %v11989_v27 = vld [vmem:[#allocation7 + $0xde0] sm:$0xf]  ;;  %v13217_v18 = vld [vmem:[#allocation7 + $0xdec] sm:$0xf0]  ;;  %v11862_v48 = vor.u32 %v13185_v20, %v11861_v4 }
 0x2cd   :  { %7307 = vmatpush.bf16.msra.mxu2 %v11526_v30  ;;  %7280 = vmatpush.bf16.msra.mxu0 %v11254_v33  ;;  %v12117_v32 = vld [vmem:[#allocation7 + $0xee0] sm:$0xf]  ;;  %v13249_v1 = vld [vmem:[#allocation7 + $0xeec] sm:$0xf0]  ;;  %v11622_v30 = vor.u32 %v13125_v63, %v11621_v5  ;;  %v11990_v58 = vor.u32 %v13217_v18, %v11989_v27  ;;  %v13822_v33 = vpack.c.bf16 %v4067_v52, %v4051_v35  ;;  %v13836_v5 = vpop.f32.mrf.mxu3 }
 0x2ce   :  { %v11845_v41 = vld [vmem:[#allocation7 + $0xcc0] sm:$0xf]  ;;  %v13181_v43 = vld [vmem:[#allocation7 + $0xccc] sm:$0xf0]  ;;  %v12118_v3 = vor.u32 %v13249_v1, %v12117_v32  ;;  %v13828_v9 = vpack.c.bf16 %v4069_v49, %v4053_v44 }
 0x2cf   :  { %7321 = vmatpush.bf16.msra.mxu3 %v11654_v62  ;;  %7294 = vmatpush.bf16.msra.mxu1 %v11382_v17  ;;  %v11973_v62 = vld [vmem:[#allocation7 + $0xdc0] sm:$0xf]  ;;  %v13281_v10 = vld [vmem:[#allocation7 + $0xfec] sm:$0xf0]  ;;  %v13824_v47 = vpop.f32.mrf.mxu1  ;;  %v11846_v60 = vor.u32 %v13181_v43, %v11845_v41 }
 0x2d0   :  { %v12245_v24 = vld [vmem:[#allocation7 + $0xfe0] sm:$0xf]  ;;  %v13213_v55 = vld [vmem:[#allocation7 + $0xdcc] sm:$0xf0] }
 0x2d1   :  { %7308 = vmatpush.bf16.msra.mxu2 %v11510_v45  ;;  %7281 = vmatpush.bf16.msra.mxu0 %v11238_v11  ;;  %v12101_v7 = vld [vmem:[#allocation7 + $0xec0] sm:$0xf]  ;;  %v13245_v56 = vld [vmem:[#allocation7 + $0xecc] sm:$0xf0]  ;;  %v12246_v36 = vor.u32 %v13281_v10, %v12245_v24  ;;  %v11974_v2 = vor.u32 %v13213_v55, %v11973_v62 }
 0x2d2   :  { %v11829_v17 = vld [vmem:[#allocation7 + $0xca0] sm:$0xf]  ;;  %v13177_v45 = vld [vmem:[#allocation7 + $0xcac] sm:$0xf0]  ;;  %v12102_v61 = vor.u32 %v13245_v56, %v12101_v7  ;;  %v3898_v7 = vadd.f32 %v13806_v13, %v13802_v22 }
 0x2d3   :  { %7322 = vmatpush.bf16.msra.mxu3 %v11638_v46  ;;  %7295 = vmatpush.bf16.msra.mxu1 %v11366_v21  ;;  %v11957_v35 = vld [vmem:[#allocation7 + $0xda0] sm:$0xf]  ;;  %v13277_v38 = vld [vmem:[#allocation7 + $0xfcc] sm:$0xf0]  ;;  %v11830_v46 = vor.u32 %v13177_v45, %v11829_v17  ;;  %v3842_v21 = vadd.f32 %v13752_v6, %v13748_v19 }
 0x2d4   :  { %v12229_v52 = vld [vmem:[#allocation7 + $0xfc0] sm:$0xf]  ;;  %7282 = vmatmul.bf16.vlgmr.msra.gmra.mxu0 %v13820_v26  ;;  %v13209_v28 = vld [vmem:[#allocation7 + $0xdac] sm:$0xf0] }
 0x2d5   :  { %7309 = vmatpush.bf16.msra.mxu2 %v11494_v59  ;;  %7330 = vmatpush.bf16.msrb.mxu0 %v11862_v48  ;;  %v12085_v34 = vld [vmem:[#allocation7 + $0xea0] sm:$0xf]  ;;  %v13241_v53 = vld [vmem:[#allocation7 + $0xeac] sm:$0xf0]  ;;  %v12230_v25 = vor.u32 %v13277_v38, %v12229_v52  ;;  %v11958_v20 = vor.u32 %v13209_v28, %v11957_v35  ;;  %v3844_v59 = vadd.f32 %v13773_v15, %v13770_v16  ;;  %v3967_v35 = vpop.f32.mrf.mxu2  ;;  %v3981_v28 = vpop.f32.mrf.mxu3 }
 0x2d6   :  { %7296 = vmatmul.bf16.vlgmr.msra.gmra.mxu1 %v13822_v33  ;;  %v11813_v63 = vld [vmem:[#allocation7 + $0xc80] sm:$0xf]  ;;  %v13173_v4 = vld [vmem:[#allocation7 + $0xc8c] sm:$0xf0]  ;;  %v12086_v27 = vor.u32 %v13241_v53, %v12085_v34  ;;  %v3856_v16 = vadd.f32 %v13760_v12, %v3842_v21 }
 0x2d7   :  { %7323 = vmatpush.bf16.msra.mxu3 %v11622_v30  ;;  %7344 = vmatpush.bf16.msrb.mxu1 %v11990_v58  ;;  %v11941_v11 = vld [vmem:[#allocation7 + $0xd80] sm:$0xf]  ;;  %v13273_v32 = vld [vmem:[#allocation7 + $0xfac] sm:$0xf0]  ;;  %v11814_v44 = vor.u32 %v13173_v4, %v11813_v63  ;;  %v3939_v30 = vpop.f32.mrf.mxu0  ;;  %v3858_v15 = vadd.f32 %v13788_v37, %v3844_v59  ;;  %v3900_v37 = vadd.f32 %v13824_v47, %v13818_v14 }
 0x2d8   :  { %7310 = vmatmul.bf16.vlgmr.msra.gmra.mxu2 %v13826_v50  ;;  %v12213_v18 = vld [vmem:[#allocation7 + $0xfa0] sm:$0xf]  ;;  %v13205_v1 = vld [vmem:[#allocation7 + $0xd8c] sm:$0xf0]  ;;  %v13849_v53 = vadd.f32 %v13762_v29, %v3856_v16 }
 0x2d9   :  { %7358 = vmatpush.bf16.msrb.mxu2 %v12118_v3  ;;  %7331 = vmatpush.bf16.msrb.mxu0 %v11846_v60  ;;  %v12069_v42 = vld [vmem:[#allocation7 + $0xe80] sm:$0xf]  ;;  %v13237_v31 = vld [vmem:[#allocation7 + $0xe8c] sm:$0xf0]  ;;  %v12214_v49 = vor.u32 %v13273_v32, %v12213_v18  ;;  %v11942_v43 = vor.u32 %v13205_v1, %v11941_v11  ;;  %v3953_v3 = vpop.f32.mrf.mxu1 }
 0x2da   :  { %7324 = vmatmul.bf16.vlgmr.msra.gmra.mxu3 %v13828_v9  ;;  %v11797_v48 = vld [vmem:[#allocation7 + $0xc60] sm:$0xf]  ;;  %v13169_v41 = vld [vmem:[#allocation7 + $0xc6c] sm:$0xf0]  ;;  %v12070_v58 = vor.u32 %v13237_v31, %v12069_v42  ;;  %v3954_v45 = vadd.f32 %v3953_v3, %v3939_v30 }
 0x2db   :  { %7372 = vmatpush.bf16.msrb.mxu3 %v12246_v36  ;;  %7345 = vmatpush.bf16.msrb.mxu1 %v11974_v2  ;;  %v11925_v62 = vld [vmem:[#allocation7 + $0xd60] sm:$0xf]  ;;  %v13269_v10 = vld [vmem:[#allocation7 + $0xf8c] sm:$0xf0]  ;;  %v11798_v56 = vor.u32 %v13169_v41, %v11797_v48 }
 0x2dc   :  { %v12197_v24 = vld [vmem:[#allocation7 + $0xf80] sm:$0xf]  ;;  %v13201_v55 = vld [vmem:[#allocation7 + $0xd6c] sm:$0xf0]  ;;  %v3968_v14 = vadd.f32 %v3967_v35, %v3954_v45  ;;  %v10455_v45 = vld [vmem:[#allocation7 + $0x1f0] sm:$0xf0] }
 0x2dd   :  { %7359 = vmatpush.bf16.msrb.mxu2 %v12102_v61  ;;  %7332 = vmatpush.bf16.msrb.mxu0 %v11830_v46  ;;  %v12053_v19 = vld [vmem:[#allocation7 + $0xe60] sm:$0xf]  ;;  %v13233_v6 = vld [vmem:[#allocation7 + $0xe6c] sm:$0xf0]  ;;  %v12198_v60 = vor.u32 %v13269_v10, %v12197_v24  ;;  %v11926_v2 = vor.u32 %v13201_v55, %v11925_v62  ;;  %v13852_v46 = vadd.f32 %v13797_v23, %v3858_v15  ;;  %v3969_v10 = vpop.f32.mrf.mxu2  ;;  %v3983_v15 = vpop.f32.mrf.mxu3 }
 0x2de   :  { %v11781_v36 = vld [vmem:[#allocation7 + $0xc40] sm:$0xf]  ;;  %v13165_v17 = vld [vmem:[#allocation7 + $0xc4c] sm:$0xf0]  ;;  %v12054_v61 = vor.u32 %v13233_v6, %v12053_v19  ;;  %v3914_v23 = vadd.f32 %v13834_v0, %v3900_v37  ;;  %v3982_v62 = vadd.f32 %v3981_v28, %v3968_v14  ;;  %v12827_v14 = vld [vmem:[#allocation7 + $0x1c4] sm:$0xf] }
 0x2df   :  { %7373 = vmatpush.bf16.msrb.mxu3 %v12230_v25  ;;  %7346 = vmatpush.bf16.msrb.mxu1 %v11958_v20  ;;  %v11909_v52 = vld [vmem:[#allocation7 + $0xd40] sm:$0xf]  ;;  %v13265_v12 = vld [vmem:[#allocation7 + $0xf6c] sm:$0xf0]  ;;  %v3912_v25 = vadd.f32 %v13814_v40, %v3898_v7  ;;  %v11782_v63 = vor.u32 %v13165_v17, %v11781_v36  ;;  %v3941_v20 = vpop.f32.mrf.mxu0  ;;  %v10327_v36 = vld [vmem:[#allocation7 + $0xf0] sm:$0xf0] }
 0x2e0   :  { %v12181_v38 = vld [vmem:[#allocation7 + $0xf60] sm:$0xf]  ;;  %v13197_v22 = vld [vmem:[#allocation7 + $0xd4c] sm:$0xf0]  ;;  %v3928_v16 = vadd.f32 %v13836_v5, %v3914_v23  ;;  %v12831_v17 = vld [vmem:[#allocation7 + $0x1e4] sm:$0xf] }
 0x2e1   :  { %7360 = vmatpush.bf16.msrb.mxu2 %v12086_v27  ;;  %7333 = vmatpush.bf16.msrb.mxu0 %v11814_v44  ;;  %v12037_v13 = vld [vmem:[#allocation7 + $0xe40] sm:$0xf]  ;;  %v13229_v34 = vld [vmem:[#allocation7 + $0xe4c] sm:$0xf0]  ;;  %v12182_v4 = vor.u32 %v13265_v12, %v12181_v38  ;;  %v11910_v47 = vor.u32 %v13197_v22, %v11909_v52  ;;  %v3955_v32 = vpop.f32.mrf.mxu1  ;;  %v4054_v44 = vmax.f32 %v13849_v53, 0.0  ;;  %v13859_v30 = vadd.f32 %v13816_v54, %v3912_v25 }
 0x2e2   :  { %v11765_v27 = vld [vmem:[#allocation7 + $0xc20] sm:$0xf]  ;;  %v13161_v11 = vld [vmem:[#allocation7 + $0xc2c] sm:$0xf0]  ;;  %v12038_v18 = vor.u32 %v13229_v34, %v12037_v13  ;;  %v3956_v31 = vadd.f32 %v3955_v32, %v3941_v20  ;;  %v12863_v52 = vld [vmem:[#allocation7 + $0x2e4] sm:$0xf] }
 0x2e3   :  { %7374 = vmatpush.bf16.msrb.mxu3 %v12214_v49  ;;  %7347 = vmatpush.bf16.msrb.mxu1 %v11942_v43  ;;  %v11893_v29 = vld [vmem:[#allocation7 + $0xd20] sm:$0xf]  ;;  %v13261_v42 = vld [vmem:[#allocation7 + $0xf4c] sm:$0xf0]  ;;  %v4070_v49 = vmax.f32 %v13852_v46, 0.0  ;;  %v11766_v48 = vor.u32 %v13161_v11, %v11765_v27  ;;  %v4055_v37 = vmax.f32 %v13859_v30, 0.0 }
 0x2e4   :  { %v12165_v1 = vld [vmem:[#allocation7 + $0xf40] sm:$0xf]  ;;  %v13193_v40 = vld [vmem:[#allocation7 + $0xd2c] sm:$0xf0]  ;;  %v3970_v54 = vadd.f32 %v3969_v10, %v3956_v31  ;;  %v10583_v38 = vld [vmem:[#allocation7 + $0x2f0] sm:$0xf0] }
 0x2e5   :  { %7361 = vmatpush.bf16.msrb.mxu2 %v12070_v58  ;;  %7334 = vmatpush.bf16.msrb.mxu0 %v11798_v56  ;;  %v12021_v21 = vld [vmem:[#allocation7 + $0xe20] sm:$0xf]  ;;  %v13225_v59 = vld [vmem:[#allocation7 + $0xe2c] sm:$0xf0]  ;;  %v12166_v41 = vor.u32 %v13261_v42, %v12165_v1  ;;  %v11894_v0 = vor.u32 %v13193_v40, %v11893_v29  ;;  %v4056_v28 = vmax.f32 %v3982_v62, 0.0  ;;  %v4071_v53 = vmax.f32 %v3928_v16, 0.0 }
 0x2e6   :  { %v11749_v43 = vld [vmem:[#allocation7 + $0xc00] sm:$0xf]  ;;  %v13157_v58 = vld [vmem:[#allocation7 + $0xc0c] sm:$0xf0]  ;;  %v12022_v24 = vor.u32 %v13225_v59, %v12021_v21  ;;  %v12795_v34 = vld [vmem:[#allocation7 + $0xc4] sm:$0xf]  ;;  %v10586_v27 = vor.u32 %v12863_v52, %v10583_v38  ;;  %v13863_v1 = vpack.c.bf16 %v4070_v49, %v4054_v44 }
 0x2e7   :  { %7375 = vmatpush.bf16.msrb.mxu3 %v12198_v60  ;;  %7348 = vmatpush.bf16.msrb.mxu1 %v11926_v2  ;;  %v11877_v3 = vld [vmem:[#allocation7 + $0xd00] sm:$0xf]  ;;  %v13189_v55 = vld [vmem:[#allocation7 + $0xd0c] sm:$0xf0]  ;;  %v12799_v60 = vld [vmem:[#allocation7 + $0xe4] sm:$0xf]  ;;  %v3984_v2 = vadd.f32 %v3983_v15, %v3970_v54  ;;  %v13867_v31 = vpack.c.bf16 %v4071_v53, %v4055_v37 }
 0x2e8   :  { %v12149_v19 = vld [vmem:[#allocation7 + $0xf20] sm:$0xf]  ;;  %v13257_v6 = vld [vmem:[#allocation7 + $0xf2c] sm:$0xf0]  ;;  %v11878_v5 = vor.u32 %v13189_v55, %v11877_v3  ;;  %v10330_v25 = vor.u32 %v12799_v60, %v10327_v36  ;;  %v10711_v20 = vld [vmem:[#allocation7 + $0x3f0] sm:$0xf0] }
 0x2e9   :  { %7362 = vmatpush.bf16.msrb.mxu2 %v12054_v61  ;;  %7335 = vmatpush.bf16.msrb.mxu0 %v11782_v63  ;;  %v12005_v7 = vld [vmem:[#allocation7 + $0xe00] sm:$0xf]  ;;  %v13221_v56 = vld [vmem:[#allocation7 + $0xe0c] sm:$0xf0]  ;;  %v11750_v61 = vor.u32 %v13157_v58, %v11749_v43  ;;  %v12150_v35 = vor.u32 %v13257_v6, %v12149_v19  ;;  %v4072_v46 = vmax.f32 %v3984_v2, 0.0  ;;  %v10458_v63 = vor.u32 %v12831_v17, %v10455_v45 }
 0x2ea   :  { %v12133_v12 = vld [vmem:[#allocation7 + $0xf00] sm:$0xf]  ;;  %v12006_v22 = vor.u32 %v13221_v56, %v12005_v7  ;;  %v13253_v13 = vld [vmem:[#allocation7 + $0xf0c] sm:$0xf0]  ;;  %v10311_v11 = vld [vmem:[#allocation7 + $0xd0] sm:$0xf0] }
 0x2eb   :  { %7376 = vmatpush.bf16.msrb.mxu3 %v12182_v4  ;;  %7349 = vmatpush.bf16.msrb.mxu1 %v11910_v47  ;;  %v12895_v4 = vld [vmem:[#allocation7 + $0x3e4] sm:$0xf]  ;;  %v10439_v47 = vld [vmem:[#allocation7 + $0x1d0] sm:$0xf0]  ;;  %v13865_v42 = vpack.c.bf16 %v4072_v46, %v4056_v28  ;;  %v10314_v40 = vor.u32 %v12795_v34, %v10311_v11 }
 0x2ec   :  { %v12859_v32 = vld [vmem:[#allocation7 + $0x2c4] sm:$0xf]  ;;  %v10567_v29 = vld [vmem:[#allocation7 + $0x2d0] sm:$0xf0]  ;;  %v10714_v23 = vor.u32 %v12895_v4, %v10711_v20  ;;  %v10442_v21 = vor.u32 %v12827_v14, %v10439_v47 }
 0x2ed   :  { %7363 = vmatpush.bf16.msrb.mxu2 %v12038_v18  ;;  %7336 = vmatpush.bf16.msrb.mxu0 %v11766_v48  ;;  %v12134_v18 = vor.u32 %v13253_v13, %v12133_v12  ;;  %v12791_v59 = vld [vmem:[#allocation7 + $0xa4] sm:$0xf]  ;;  %v10695_v48 = vld [vmem:[#allocation7 + $0x3d0] sm:$0xf0] }
 0x2ee   :  { %v12891_v30 = vld [vmem:[#allocation7 + $0x3c4] sm:$0xf]  ;;  %v10295_v44 = vld [vmem:[#allocation7 + $0xb0] sm:$0xf0] }
 0x2ef   :  { %7377 = vmatpush.bf16.msrb.mxu3 %v12166_v41  ;;  %7350 = vmatpush.bf16.msrb.mxu1 %v11894_v0  ;;  %v10570_v41 = vor.u32 %v12859_v32, %v10567_v29  ;;  %v12823_v49 = vld [vmem:[#allocation7 + $0x1a4] sm:$0xf]  ;;  %v10423_v43 = vld [vmem:[#allocation7 + $0x1b0] sm:$0xf0]  ;;  %v10698_v62 = vor.u32 %v12891_v30, %v10695_v48  ;;  %v10298_v0 = vor.u32 %v12791_v59, %v10295_v44 }
 0x2f0   :  { %v12855_v58 = vld [vmem:[#allocation7 + $0x2a4] sm:$0xf]  ;;  %v10551_v3 = vld [vmem:[#allocation7 + $0x2b0] sm:$0xf0] }
 0x2f1   :  { %7364 = vmatpush.bf16.msrb.mxu2 %v12022_v24  ;;  %7337 = vmatpush.bf16.msrb.mxu0 %v11750_v61  ;;  %v10426_v24 = vor.u32 %v12823_v49, %v10423_v43  ;;  %v12787_v10 = vld [vmem:[#allocation7 + $0x84] sm:$0xf]  ;;  %v10679_v19 = vld [vmem:[#allocation7 + $0x3b0] sm:$0xf0]  ;;  %v10554_v6 = vor.u32 %v12855_v58, %v10551_v3  ;;  %v3995_v36 = vpop.f32.mrf.mxu0 }
 0x2f2   :  { %v12887_v55 = vld [vmem:[#allocation7 + $0x3a4] sm:$0xf]  ;;  %v10279_v16 = vld [vmem:[#allocation7 + $0x90] sm:$0xf0] }
 0x2f3   :  { %7378 = vmatpush.bf16.msrb.mxu3 %v12150_v35  ;;  %7351 = vmatpush.bf16.msrb.mxu1 %v11878_v5  ;;  %v12819_v54 = vld [vmem:[#allocation7 + $0x184] sm:$0xf]  ;;  %v10407_v15 = vld [vmem:[#allocation7 + $0x190] sm:$0xf0]  ;;  %v10682_v60 = vor.u32 %v12887_v55, %v10679_v19  ;;  %v4009_v17 = vpop.f32.mrf.mxu1  ;;  %v10282_v45 = vor.u32 %v12787_v10, %v10279_v16 }
 0x2f4   :  { %7338 = vmatmul.bf16.vlgmr.msrb.gmra.mxu0 %v13863_v1  ;;  %v12851_v7 = vld [vmem:[#allocation7 + $0x284] sm:$0xf]  ;;  %v10535_v56 = vld [vmem:[#allocation7 + $0x290] sm:$0xf0]  ;;  %v10410_v2 = vor.u32 %v12819_v54, %v10407_v15  ;;  %v4010_v32 = vadd.f32 %v4009_v17, %v3995_v36 }
 0x2f5   :  { %7365 = vmatpush.bf16.msrb.mxu2 %v12006_v22  ;;  %7386 = vmatpush.bf16.msra.mxu0 %v10330_v25  ;;  %v12783_v61 = vld [vmem:[#allocation7 + $0x64] sm:$0xf]  ;;  %v10663_v52 = vld [vmem:[#allocation7 + $0x390] sm:$0xf0]  ;;  %v10538_v38 = vor.u32 %v12851_v7, %v10535_v56 }
 0x2f6   :  { %7352 = vmatmul.bf16.vlgmr.msrb.gmra.mxu1 %v13867_v31  ;;  %v12883_v35 = vld [vmem:[#allocation7 + $0x384] sm:$0xf]  ;;  %v10263_v12 = vld [vmem:[#allocation7 + $0x70] sm:$0xf0] }
 0x2f7   :  { %7400 = vmatpush.bf16.msra.mxu1 %v10458_v63  ;;  %7379 = vmatpush.bf16.msrb.mxu3 %v12134_v18  ;;  %v12815_v37 = vld [vmem:[#allocation7 + $0x164] sm:$0xf]  ;;  %v10391_v28 = vld [vmem:[#allocation7 + $0x170] sm:$0xf0]  ;;  %v10666_v13 = vor.u32 %v12883_v35, %v10663_v52  ;;  %v10266_v34 = vor.u32 %v12783_v61, %v10263_v12 }
 0x2f8   :  { %7366 = vmatmul.bf16.vlgmr.msrb.gmra.mxu2 %v13865_v42  ;;  %v12847_v5 = vld [vmem:[#allocation7 + $0x264] sm:$0xf]  ;;  %v10519_v22 = vld [vmem:[#allocation7 + $0x270] sm:$0xf0]  ;;  %v10394_v53 = vor.u32 %v12815_v37, %v10391_v28 }
 0x2f9   :  { %7414 = vmatpush.bf16.msra.mxu2 %v10586_v27  ;;  %7387 = vmatpush.bf16.msra.mxu0 %v10314_v40  ;;  %v12779_v46 = vld [vmem:[#allocation7 + $0x44] sm:$0xf]  ;;  %v10647_v63 = vld [vmem:[#allocation7 + $0x370] sm:$0xf0]  ;;  %v10522_v4 = vor.u32 %v12847_v5, %v10519_v22  ;;  %v3997_v58 = vpop.f32.mrf.mxu0 }
 0x2fa   :  { %v12879_v25 = vld [vmem:[#allocation7 + $0x364] sm:$0xf]  ;;  %v10247_v20 = vld [vmem:[#allocation7 + $0x50] sm:$0xf0] }
 0x2fb   :  { %7428 = vmatpush.bf16.msra.mxu3 %v10714_v23  ;;  %7401 = vmatpush.bf16.msra.mxu1 %v10442_v21  ;;  %v12811_v27 = vld [vmem:[#allocation7 + $0x144] sm:$0xf]  ;;  %v10375_v11 = vld [vmem:[#allocation7 + $0x150] sm:$0xf0]  ;;  %v4023_v14 = vpop.f32.mrf.mxu2  ;;  %v10650_v23 = vor.u32 %v12879_v25, %v10647_v63  ;;  %v10250_v40 = vor.u32 %v12779_v46, %v10247_v20  ;;  %v4011_v3 = vpop.f32.mrf.mxu1 }
 0x2fc   :  { %v12843_v47 = vld [vmem:[#allocation7 + $0x244] sm:$0xf]  ;;  %v10503_v18 = vld [vmem:[#allocation7 + $0x250] sm:$0xf0]  ;;  %v10378_v21 = vor.u32 %v12811_v27, %v10375_v11  ;;  %v4012_v56 = vadd.f32 %v4011_v3, %v3997_v58 }
 0x2fd   :  { %7415 = vmatpush.bf16.msra.mxu2 %v10570_v41  ;;  %7388 = vmatpush.bf16.msra.mxu0 %v10298_v0  ;;  %v4037_v29 = vpop.f32.mrf.mxu3  ;;  %v12775_v59 = vld [vmem:[#allocation7 + $0x24] sm:$0xf]  ;;  %v10631_v48 = vld [vmem:[#allocation7 + $0x350] sm:$0xf0]  ;;  %v10506_v41 = vor.u32 %v12843_v47, %v10503_v18 }
 0x2fe   :  { %v12875_v30 = vld [vmem:[#allocation7 + $0x344] sm:$0xf]  ;;  %v10231_v44 = vld [vmem:[#allocation7 + $0x30] sm:$0xf0] }
 0x2ff   :  { %7429 = vmatpush.bf16.msra.mxu3 %v10698_v62  ;;  %7402 = vmatpush.bf16.msra.mxu1 %v10426_v24  ;;  %v12807_v49 = vld [vmem:[#allocation7 + $0x124] sm:$0xf]  ;;  %v10359_v43 = vld [vmem:[#allocation7 + $0x130] sm:$0xf0]  ;;  %v4024_v24 = vadd.f32 %v4023_v14, %v4010_v32  ;;  %v10634_v10 = vor.u32 %v12875_v30, %v10631_v48 }
 0x300   :  { %v12839_v62 = vld [vmem:[#allocation7 + $0x224] sm:$0xf]  ;;  %v10487_v0 = vld [vmem:[#allocation7 + $0x230] sm:$0xf0]  ;;  %v10362_v16 = vor.u32 %v12807_v49, %v10359_v43 }
 0x301   :  { %7416 = vmatpush.bf16.msra.mxu2 %v10554_v6  ;;  %7389 = vmatpush.bf16.msra.mxu0 %v10282_v45  ;;  %v12771_v55 = vld [vmem:[#allocation7 + $0x4] sm:$0xf]  ;;  %v10215_v19 = vld [vmem:[#allocation7 + $0x10] sm:$0xf0]  ;;  %v10234_v6 = vor.u32 %v12775_v59, %v10231_v44 }
 0x302   :  { %v12803_v54 = vld [vmem:[#allocation7 + $0x104] sm:$0xf]  ;;  %v10615_v7 = vld [vmem:[#allocation7 + $0x330] sm:$0xf0] }
 0x303   :  { %7430 = vmatpush.bf16.msra.mxu3 %v10682_v60  ;;  %7403 = vmatpush.bf16.msra.mxu1 %v10410_v2  ;;  %v12871_v15 = vld [vmem:[#allocation7 + $0x324] sm:$0xf]  ;;  %v10490_v60 = vor.u32 %v12839_v62, %v10487_v0  ;;  %v10343_v36 = vld [vmem:[#allocation7 + $0x110] sm:$0xf0]  ;;  %v4025_v2 = vpop.f32.mrf.mxu2  ;;  %v14111_v0 = vld [vmem:[#allocation27_spill] sm:$0xff] }
 0x304   :  { %v12835_v17 = vld [vmem:[#allocation7 + $0x204] sm:$0xf]  ;;  %v10471_v45 = vld [vmem:[#allocation7 + $0x210] sm:$0xf0]  ;;  %v4026_v12 = vadd.f32 %v4025_v2, %v4012_v56  ;;  %v10618_v37 = vor.u32 %v12871_v15, %v10615_v7 }
 0x305   :  { %7417 = vmatpush.bf16.msra.mxu2 %v10538_v38  ;;  %7390 = vmatpush.bf16.msra.mxu0 %v10266_v34  ;;  %v12927_v61 = vld [vmem:[#allocation7 + $0x4e4] sm:$0xf]  ;;  %v10839_v35 = vld [vmem:[#allocation7 + $0x4f0] sm:$0xf0]  ;;  %v4038_v38 = vadd.f32 %v4037_v29, %v4024_v24  ;;  %v10218_v34 = vor.u32 %v12771_v55, %v10215_v19  ;;  %v10474_v25 = vor.u32 %v12835_v17, %v10471_v45 }
 0x306   :  { %v12959_v52 = vld [vmem:[#allocation7 + $0x5e4] sm:$0xf]  ;;  %v10967_v28 = vld [vmem:[#allocation7 + $0x5f0] sm:$0xf0]  ;;  %v10842_v63 = vor.u32 %v12927_v61, %v10839_v35 }
 0x307   :  { %7431 = vmatpush.bf16.msra.mxu3 %v10666_v13  ;;  %7404 = vmatpush.bf16.msra.mxu1 %v10394_v53  ;;  %v12991_v5 = vld [vmem:[#allocation7 + $0x6e4] sm:$0xf]  ;;  %v11095_v22 = vld [vmem:[#allocation7 + $0x6f0] sm:$0xf0]  ;;  %v4039_v13 = vpop.f32.mrf.mxu3  ;;  %v10346_v53 = vor.u32 %v12803_v54, %v10343_v36  ;;  %v10970_v11 = vor.u32 %v12959_v52, %v10967_v28  ;;  %v4057_v29 = vmax.f32 %v4038_v38, 0.0 }
 0x308   :  { %v4040_v46 = vadd.f32 %v4039_v13, %v4026_v12  ;;  %v10599_v20 = vld [vmem:[#allocation7 + $0x310] sm:$0xf0]  ;;  %v12923_v27 = vld [vmem:[#allocation7 + $0x4c4] sm:$0xf]  ;;  %v11098_v14 = vor.u32 %v12991_v5, %v11095_v22 }
 0x309   :  { %7418 = vmatpush.bf16.msra.mxu2 %v10522_v4  ;;  %7391 = vmatpush.bf16.msra.mxu0 %v10250_v40  ;;  %v12867_v4 = vld [vmem:[#allocation7 + $0x304] sm:$0xf]  ;;  %v10823_v47 = vld [vmem:[#allocation7 + $0x4d0] sm:$0xf0] }
 0x30a   :  { %v12955_v18 = vld [vmem:[#allocation7 + $0x5c4] sm:$0xf]  ;;  %v10951_v32 = vld [vmem:[#allocation7 + $0x5d0] sm:$0xf0]  ;;  %v10602_v59 = vor.u32 %v12867_v4, %v10599_v20  ;;  %v10826_v44 = vor.u32 %v12923_v27, %v10823_v47 }
 0x30b   :  { %7432 = vmatpush.bf16.msra.mxu3 %v10650_v23  ;;  %7405 = vmatpush.bf16.msra.mxu1 %v10378_v21  ;;  %v4073_v23 = vmax.f32 %v4040_v46, 0.0  ;;  %v12987_v40 = vld [vmem:[#allocation7 + $0x6c4] sm:$0xf]  ;;  %v11079_v21 = vld [vmem:[#allocation7 + $0x6d0] sm:$0xf0]  ;;  %v10954_v49 = vor.u32 %v12955_v18, %v10951_v32 }
 0x30c   :  { %v13023_v30 = vld [vmem:[#allocation7 + $0x7e4] sm:$0xf]  ;;  %v11223_v48 = vld [vmem:[#allocation7 + $0x7f0] sm:$0xf0]  ;;  %v11082_v43 = vor.u32 %v12987_v40, %v11079_v21 }
 0x30d   :  { %7419 = vmatpush.bf16.msra.mxu2 %v10506_v41  ;;  %7392 = vmatpush.bf16.msra.mxu0 %v10234_v6  ;;  %v13872_v41 = vpack.c.bf16 %v4073_v23, %v4057_v29  ;;  %v12919_v58 = vld [vmem:[#allocation7 + $0x4a4] sm:$0xf]  ;;  %v10807_v3 = vld [vmem:[#allocation7 + $0x4b0] sm:$0xf0] }
 0x30e   :  { %v12951_v62 = vld [vmem:[#allocation7 + $0x5a4] sm:$0xf]  ;;  %v10935_v55 = vld [vmem:[#allocation7 + $0x5b0] sm:$0xf0]  ;;  %v10810_v7 = vor.u32 %v12919_v58, %v10807_v3 }
 0x30f   :  { %7433 = vmatpush.bf16.msra.mxu3 %v10634_v10  ;;  %7406 = vmatpush.bf16.msra.mxu1 %v10362_v16  ;;  %v14112_v24 = vld [vmem:[#allocation28_spill] sm:$0xff]  ;;  %v11226_v10 = vor.u32 %v13023_v30, %v11223_v48  ;;  %v11063_v6 = vld [vmem:[#allocation7 + $0x6b0] sm:$0xf0]  ;;  %v14113_v16 = vld [vmem:[#allocation29_spill] sm:$0xff]  ;;  %v10938_v56 = vor.u32 %v12951_v62, %v10935_v55 }
 0x310   :  { %v12983_v19 = vld [vmem:[#allocation7 + $0x6a4] sm:$0xf]  ;;  %v11207_v15 = vld [vmem:[#allocation7 + $0x7d0] sm:$0xf0]  ;;  %7380 = vmatmul.bf16.vlgmr.msrb.gmra.mxu3 %v13872_v41 }
 0x311   :  { %7420 = vmatpush.bf16.msra.mxu2 %v10490_v60  ;;  %7393 = vmatpush.bf16.msra.mxu0 %v10218_v34  ;;  %v13019_v54 = vld [vmem:[#allocation7 + $0x7c4] sm:$0xf]  ;;  %v11066_v60 = vor.u32 %v12983_v19, %v11063_v6  ;;  %v10791_v17 = vld [vmem:[#allocation7 + $0x490] sm:$0xf0] }
 0x312   :  { %v12915_v36 = vld [vmem:[#allocation7 + $0x484] sm:$0xf]  ;;  %v11210_v2 = vor.u32 %v13019_v54, %v11207_v15  ;;  %v10919_v61 = vld [vmem:[#allocation7 + $0x590] sm:$0xf0] }
 0x313   :  { %7434 = vmatpush.bf16.msra.mxu3 %v10618_v37  ;;  %7407 = vmatpush.bf16.msra.mxu1 %v10346_v53  ;;  %v12947_v45 = vld [vmem:[#allocation7 + $0x584] sm:$0xf]  ;;  %v11047_v52 = vld [vmem:[#allocation7 + $0x690] sm:$0xf0]  ;;  %v7171_v37 = vpop.f32.mrf.mxu0  ;;  %v10794_v28 = vor.u32 %v12915_v36, %v10791_v17 }
 0x314   :  { %7394 = vmatmul.bf16.vlgmr.msra.gmra.mxu0 %v14111_v0  ;;  %v12979_v35 = vld [vmem:[#allocation7 + $0x684] sm:$0xf]  ;;  %v11191_v12 = vld [vmem:[#allocation7 + $0x7b0] sm:$0xf0]  ;;  %v10922_v13 = vor.u32 %v12947_v45, %v10919_v61 }
 0x315   :  { %7421 = vmatpush.bf16.msra.mxu2 %v10474_v25  ;;  %7442 = vmatpush.bf16.msrb.mxu0 %v10842_v63  ;;  %v13015_v38 = vld [vmem:[#allocation7 + $0x7a4] sm:$0xf]  ;;  %v11050_v34 = vor.u32 %v12979_v35, %v11047_v52  ;;  %v10775_v46 = vld [vmem:[#allocation7 + $0x470] sm:$0xf0]  ;;  %v7185_v63 = vpop.f32.mrf.mxu1 }
 0x316   :  { %7408 = vmatmul.bf16.vlgmr.msra.gmra.mxu1 %v14112_v24  ;;  %v13300_v5 = vld [vmem:[#allocation2] sm:$0xff]  ;;  %v11194_v4 = vor.u32 %v13015_v38, %v11191_v12  ;;  %v10903_v20 = vld [vmem:[#allocation7 + $0x570] sm:$0xf0] }
 0x317   :  { %7456 = vmatpush.bf16.msrb.mxu1 %v10970_v11  ;;  %7435 = vmatpush.bf16.msra.mxu3 %v10602_v59  ;;  %v7172_v22 = vadd.f32 %v13300_v5, %v7171_v37  ;;  %v12911_v53 = vld [vmem:[#allocation7 + $0x464] sm:$0xf]  ;;  %v11031_v11 = vld [vmem:[#allocation7 + $0x670] sm:$0xf0] }
 0x318   :  { %7422 = vmatmul.bf16.vlgmr.msra.gmra.mxu2 %v14113_v16  ;;  %v12943_v25 = vld [vmem:[#allocation7 + $0x564] sm:$0xf]  ;;  %v11175_v18 = vld [vmem:[#allocation7 + $0x790] sm:$0xf0]  ;;  %v10778_v32 = vor.u32 %v12911_v53, %v10775_v46 }
 0x319   :  { %7470 = vmatpush.bf16.msrb.mxu2 %v11098_v14  ;;  %7443 = vmatpush.bf16.msrb.mxu0 %v10826_v44  ;;  %v12975_v27 = vld [vmem:[#allocation7 + $0x664] sm:$0xf]  ;;  %v7186_v14 = vadd.f32 %v7185_v63, %v7172_v22  ;;  %v10906_v29 = vor.u32 %v12943_v25, %v10903_v20  ;;  %v10759_v21 = vld [vmem:[#allocation7 + $0x450] sm:$0xf0] }
 0x31a   :  { %v13011_v47 = vld [vmem:[#allocation7 + $0x784] sm:$0xf]  ;;  %v11034_v23 = vor.u32 %v12975_v27, %v11031_v11  ;;  %v10887_v48 = vld [vmem:[#allocation7 + $0x550] sm:$0xf0] }
 0x31b   :  { %7457 = vmatpush.bf16.msrb.mxu1 %v10954_v49  ;;  %7484 = vmatpush.bf16.msrb.mxu3 %v11226_v10  ;;  %v12907_v40 = vld [vmem:[#allocation7 + $0x444] sm:$0xf]  ;;  %v11178_v30 = vor.u32 %v13011_v47, %v11175_v18  ;;  %v11015_v49 = vld [vmem:[#allocation7 + $0x650] sm:$0xf0] }
 0x31c   :  { %v12939_v59 = vld [vmem:[#allocation7 + $0x544] sm:$0xf]  ;;  %v11159_v3 = vld [vmem:[#allocation7 + $0x770] sm:$0xf0]  ;;  %v10762_v10 = vor.u32 %v12907_v40, %v10759_v21 }
 0x31d   :  { %7471 = vmatpush.bf16.msrb.mxu2 %v11082_v43  ;;  %7444 = vmatpush.bf16.msrb.mxu0 %v10810_v7  ;;  %v12971_v44 = vld [vmem:[#allocation7 + $0x644] sm:$0xf]  ;;  %v7199_v43 = vpop.f32.mrf.mxu2  ;;  %v7213_v55 = vpop.f32.mrf.mxu3  ;;  %v10890_v19 = vor.u32 %v12939_v59, %v10887_v48  ;;  %v10743_v15 = vld [vmem:[#allocation7 + $0x430] sm:$0xf0] }
 0x31e   :  { %v13007_v58 = vld [vmem:[#allocation7 + $0x764] sm:$0xf]  ;;  %v7200_v62 = vadd.f32 %v7199_v43, %v7186_v14  ;;  %v11018_v6 = vor.u32 %v12971_v44, %v11015_v49  ;;  %v10871_v36 = vld [vmem:[#allocation7 + $0x530] sm:$0xf0] }
 0x31f   :  { %7458 = vmatpush.bf16.msrb.mxu1 %v10938_v56  ;;  %7485 = vmatpush.bf16.msrb.mxu3 %v11210_v2  ;;  %v12903_v54 = vld [vmem:[#allocation7 + $0x424] sm:$0xf]  ;;  %v10999_v45 = vld [vmem:[#allocation7 + $0x630] sm:$0xf0] }
 0x320   :  { %v12935_v7 = vld [vmem:[#allocation7 + $0x524] sm:$0xf]  ;;  %v13878_v56 = vadd.f32 %v7213_v55, %v7200_v62  ;;  %v11143_v61 = vld [vmem:[#allocation7 + $0x750] sm:$0xf0]  ;;  %v10746_v52 = vor.u32 %v12903_v54, %v10743_v15  ;;  %v13881_v55 = vpop.f32.mrf.mxu0 }
 0x321   :  { %7472 = vmatpush.bf16.msrb.mxu2 %v11066_v60  ;;  %7445 = vmatpush.bf16.msrb.mxu0 %v10794_v28  ;;  %v11162_v60 = vor.u32 %v13007_v58, %v11159_v3  ;;  %v12967_v17 = vld [vmem:[#allocation7 + $0x624] sm:$0xf]  ;;  %v14114_v35 = vld [vmem:[#allocation30_spill] sm:$0xff]  ;;  %v10874_v37 = vor.u32 %v12935_v7, %v10871_v36 }
 0x322   :  { %v13003_v2 = vld [vmem:[#allocation7 + $0x744] sm:$0xf]  ;;  %7436 = vmatmul.bf16.vlgmr.msra.gmra.mxu3 %v14114_v35  ;;  %v10727_v12 = vld [vmem:[#allocation7 + $0x410] sm:$0xf0]  ;;  %v11002_v28 = vor.u32 %v12967_v17, %v10999_v45  ;;  %v13883_v17 = vpop.f32.mrf.mxu1 }
 0x323   :  { %7459 = vmatpush.bf16.msrb.mxu1 %v10922_v13  ;;  %7486 = vmatpush.bf16.msrb.mxu3 %v11194_v4  ;;  %v12899_v38 = vld [vmem:[#allocation7 + $0x404] sm:$0xf]  ;;  %v10855_v22 = vld [vmem:[#allocation7 + $0x510] sm:$0xf0] }
 0x324   :  { %v12931_v5 = vld [vmem:[#allocation7 + $0x504] sm:$0xf]  ;;  %v10983_v53 = vld [vmem:[#allocation7 + $0x610] sm:$0xf0]  ;;  %v10730_v27 = vor.u32 %v12899_v38, %v10727_v12 }
 0x325   :  { %7473 = vmatpush.bf16.msrb.mxu2 %v11050_v34  ;;  %7446 = vmatpush.bf16.msrb.mxu0 %v10778_v32  ;;  %v12963_v13 = vld [vmem:[#allocation7 + $0x604] sm:$0xf]  ;;  %v11146_v34 = vor.u32 %v13003_v2, %v11143_v61  ;;  %v11127_v25 = vld [vmem:[#allocation7 + $0x730] sm:$0xf0]  ;;  %v10858_v18 = vor.u32 %v12931_v5, %v10855_v22 }
 0x326   :  { %v12999_v46 = vld [vmem:[#allocation7 + $0x724] sm:$0xf]  ;;  %v11351_v4 = vld [vmem:[#allocation7 + $0x8f0] sm:$0xf0]  ;;  %v10986_v32 = vor.u32 %v12963_v13, %v10983_v53 }
 0x327   :  { %7460 = vmatpush.bf16.msrb.mxu1 %v10906_v29  ;;  %7487 = vmatpush.bf16.msrb.mxu3 %v11178_v30  ;;  %v13055_v63 = vld [vmem:[#allocation7 + $0x8e4] sm:$0xf]  ;;  %v11479_v11 = vld [vmem:[#allocation7 + $0x9f0] sm:$0xf0]  ;;  %v11130_v29 = vor.u32 %v12999_v46, %v11127_v25 }
 0x328   :  { %v13087_v20 = vld [vmem:[#allocation7 + $0x9e4] sm:$0xf]  ;;  %v11607_v47 = vld [vmem:[#allocation7 + $0xaf0] sm:$0xf0] }
 0x329   :  { %7474 = vmatpush.bf16.msrb.mxu2 %v11034_v23  ;;  %7447 = vmatpush.bf16.msrb.mxu0 %v10762_v10  ;;  %v13119_v14 = vld [vmem:[#allocation7 + $0xae4] sm:$0xf]  ;;  %v11354_v23 = vor.u32 %v13055_v63, %v11351_v4  ;;  %v11111_v21 = vld [vmem:[#allocation7 + $0x710] sm:$0xf0]  ;;  %v11482_v59 = vor.u32 %v13087_v20, %v11479_v11  ;;  %v13888_v4 = vpop.f32.mrf.mxu2 }
 0x32a   :  { %v12995_v40 = vld [vmem:[#allocation7 + $0x704] sm:$0xf]  ;;  %v11610_v30 = vor.u32 %v13119_v14, %v11607_v47  ;;  %v11335_v44 = vld [vmem:[#allocation7 + $0x8d0] sm:$0xf0]  ;;  %v13891_v47 = vpop.f32.mrf.mxu3 }
 0x32b   :  { %7461 = vmatpush.bf16.msrb.mxu1 %v10890_v19  ;;  %7488 = vmatpush.bf16.msrb.mxu3 %v11162_v60  ;;  %v13051_v48 = vld [vmem:[#allocation7 + $0x8c4] sm:$0xf]  ;;  %v11463_v43 = vld [vmem:[#allocation7 + $0x9d0] sm:$0xf0]  ;;  %v11114_v19 = vor.u32 %v12995_v40, %v11111_v21 }
 0x32c   :  { %v13083_v49 = vld [vmem:[#allocation7 + $0x9c4] sm:$0xf]  ;;  %v11591_v3 = vld [vmem:[#allocation7 + $0xad0] sm:$0xf0] }
 0x32d   :  { %7475 = vmatpush.bf16.msrb.mxu2 %v11018_v6  ;;  %7448 = vmatpush.bf16.msrb.mxu0 %v10746_v52  ;;  %v13115_v58 = vld [vmem:[#allocation7 + $0xac4] sm:$0xf]  ;;  %v11735_v10 = vld [vmem:[#allocation7 + $0xbf0] sm:$0xf0]  ;;  %v11338_v6 = vor.u32 %v13051_v48, %v11335_v44  ;;  %v11466_v54 = vor.u32 %v13083_v49, %v11463_v43 }
 0x32e   :  { %v13151_v62 = vld [vmem:[#allocation7 + $0xbe4] sm:$0xf]  ;;  %v11594_v15 = vor.u32 %v13115_v58, %v11591_v3  ;;  %v11319_v60 = vld [vmem:[#allocation7 + $0x8b0] sm:$0xf0] }
 0x32f   :  { %7462 = vmatpush.bf16.msrb.mxu1 %v10874_v37  ;;  %7489 = vmatpush.bf16.msrb.mxu3 %v11146_v34  ;;  %v13047_v7 = vld [vmem:[#allocation7 + $0x8a4] sm:$0xf]  ;;  %v11738_v45 = vor.u32 %v13151_v62, %v11735_v10  ;;  %v11447_v2 = vld [vmem:[#allocation7 + $0x9b0] sm:$0xf0] }
 0x330   :  { %v13079_v36 = vld [vmem:[#allocation7 + $0x9a4] sm:$0xf]  ;;  %v11575_v52 = vld [vmem:[#allocation7 + $0xab0] sm:$0xf0]  ;;  %v11322_v37 = vor.u32 %v13047_v7, %v11319_v60 }
 0x331   :  { %7476 = vmatpush.bf16.msrb.mxu2 %v11002_v28  ;;  %7449 = vmatpush.bf16.msrb.mxu0 %v10730_v27  ;;  %v13111_v61 = vld [vmem:[#allocation7 + $0xaa4] sm:$0xf]  ;;  %v11719_v12 = vld [vmem:[#allocation7 + $0xbd0] sm:$0xf0]  ;;  %v11450_v28 = vor.u32 %v13079_v36, %v11447_v2 }
 0x332   :  { %v13147_v38 = vld [vmem:[#allocation7 + $0xbc4] sm:$0xf]  ;;  %v11578_v5 = vor.u32 %v13111_v61, %v11575_v52  ;;  %v11303_v13 = vld [vmem:[#allocation7 + $0x890] sm:$0xf0] }
 0x333   :  { %7463 = vmatpush.bf16.msrb.mxu1 %v10858_v18  ;;  %7490 = vmatpush.bf16.msrb.mxu3 %v11130_v29  ;;  %v13043_v22 = vld [vmem:[#allocation7 + $0x884] sm:$0xf]  ;;  %v11722_v53 = vor.u32 %v13147_v38, %v11719_v12  ;;  %v11431_v46 = vld [vmem:[#allocation7 + $0x990] sm:$0xf0]  ;;  %v7227_v11 = vpop.f32.mrf.mxu0 }
 0x334   :  { %7450 = vmatmul.bf16.vlgmr.msrb.gmra.mxu0 %v13744_v39  ;;  %v13075_v34 = vld [vmem:[#allocation7 + $0x984] sm:$0xf]  ;;  %v11559_v63 = vld [vmem:[#allocation7 + $0xa90] sm:$0xf0]  ;;  %v11306_v14 = vor.u32 %v13043_v22, %v11303_v13  ;;  %v7228_v18 = vadd.f32 %v7227_v11, %v13878_v56 }
 0x335   :  { %7477 = vmatpush.bf16.msrb.mxu2 %v10986_v32  ;;  %7498 = vmatpush.bf16.msra.mxu0 %v11354_v23  ;;  %v13107_v25 = vld [vmem:[#allocation7 + $0xa84] sm:$0xf]  ;;  %v11703_v27 = vld [vmem:[#allocation7 + $0xbb0] sm:$0xf0]  ;;  %v11434_v32 = vor.u32 %v13075_v34, %v11431_v46 }
 0x336   :  { %7464 = vmatmul.bf16.vlgmr.msrb.gmra.mxu1 %v13746_v57  ;;  %v13143_v20 = vld [vmem:[#allocation7 + $0xba4] sm:$0xf]  ;;  %v11562_v29 = vor.u32 %v13107_v25, %v11559_v63  ;;  %v11287_v40 = vld [vmem:[#allocation7 + $0x870] sm:$0xf0] }
 0x337   :  { %7512 = vmatpush.bf16.msra.mxu1 %v11482_v59  ;;  %7491 = vmatpush.bf16.msrb.mxu3 %v11114_v19  ;;  %v13039_v23 = vld [vmem:[#allocation7 + $0x864] sm:$0xf]  ;;  %v7241_v59 = vpop.f32.mrf.mxu1  ;;  %v11415_v48 = vld [vmem:[#allocation7 + $0x970] sm:$0xf0] }
 0x338   :  { %7478 = vmatmul.bf16.vlgmr.msrb.gmra.mxu2 %v13750_v51  ;;  %v13071_v21 = vld [vmem:[#allocation7 + $0x964] sm:$0xf]  ;;  %v11543_v49 = vld [vmem:[#allocation7 + $0xa70] sm:$0xf0]  ;;  %v7242_v43 = vadd.f32 %v7241_v59, %v7228_v18  ;;  %v11290_v62 = vor.u32 %v13039_v23, %v11287_v40 }
 0x339   :  { %7526 = vmatpush.bf16.msra.mxu2 %v11610_v30  ;;  %7499 = vmatpush.bf16.msra.mxu0 %v11338_v6  ;;  %v11706_v30 = vor.u32 %v13143_v20, %v11703_v27  ;;  %v13103_v44 = vld [vmem:[#allocation7 + $0xa64] sm:$0xf]  ;;  %v11687_v3 = vld [vmem:[#allocation7 + $0xb90] sm:$0xf0]  ;;  %v11418_v10 = vor.u32 %v13071_v21, %v11415_v48 }
 0x33a   :  { %7492 = vmatmul.bf16.vlgmr.msrb.gmra.mxu3 %v13754_v8  ;;  %v13139_v58 = vld [vmem:[#allocation7 + $0xb84] sm:$0xf]  ;;  %v11546_v56 = vor.u32 %v13103_v44, %v11543_v49  ;;  %v11271_v6 = vld [vmem:[#allocation7 + $0x850] sm:$0xf0] }
 0x33b   :  { %7513 = vmatpush.bf16.msra.mxu1 %v11466_v54  ;;  %7540 = vmatpush.bf16.msra.mxu3 %v11738_v45  ;;  %v13035_v19 = vld [vmem:[#allocation7 + $0x844] sm:$0xf]  ;;  %v11399_v7 = vld [vmem:[#allocation7 + $0x950] sm:$0xf0]  ;;  %v7255_v45 = vpop.f32.mrf.mxu2 }
 0x33c   :  { %v13067_v54 = vld [vmem:[#allocation7 + $0x944] sm:$0xf]  ;;  %v11527_v36 = vld [vmem:[#allocation7 + $0xa50] sm:$0xf0]  ;;  %v7256_v52 = vadd.f32 %v7255_v45, %v7242_v43  ;;  %v11274_v38 = vor.u32 %v13035_v19, %v11271_v6 }
 0x33d   :  { %7527 = vmatpush.bf16.msra.mxu2 %v11594_v15  ;;  %7500 = vmatpush.bf16.msra.mxu0 %v11322_v37  ;;  %v11690_v15 = vor.u32 %v13139_v58, %v11687_v3  ;;  %v13099_v60 = vld [vmem:[#allocation7 + $0xa44] sm:$0xf]  ;;  %v11671_v61 = vld [vmem:[#allocation7 + $0xb70] sm:$0xf0]  ;;  %v7269_v12 = vpop.f32.mrf.mxu3  ;;  %v11402_v37 = vor.u32 %v13067_v54, %v11399_v7 }
 0x33e   :  { %v13135_v2 = vld [vmem:[#allocation7 + $0xb64] sm:$0xf]  ;;  %v11255_v22 = vld [vmem:[#allocation7 + $0x830] sm:$0xf0]  ;;  %v13894_v34 = vadd.f32 %v7269_v12, %v7256_v52 }
 0x33f   :  { %7514 = vmatpush.bf16.msra.mxu1 %v11450_v28  ;;  %7541 = vmatpush.bf16.msra.mxu3 %v11722_v53  ;;  %v11530_v28 = vor.u32 %v13099_v60, %v11527_v36  ;;  %v13063_v13 = vld [vmem:[#allocation7 + $0x924] sm:$0xf]  ;;  %v11674_v53 = vor.u32 %v13135_v2, %v11671_v61  ;;  %v11383_v46 = vld [vmem:[#allocation7 + $0x930] sm:$0xf0] }
 0x340   :  { %v13095_v25 = vld [vmem:[#allocation7 + $0xa24] sm:$0xf]  ;;  %v11511_v63 = vld [vmem:[#allocation7 + $0xa30] sm:$0xf0] }
 0x341   :  { %7528 = vmatpush.bf16.msra.mxu2 %v11578_v5  ;;  %7501 = vmatpush.bf16.msra.mxu0 %v11306_v14  ;;  %v13031_v5 = vld [vmem:[#allocation7 + $0x824] sm:$0xf]  ;;  %v11655_v27 = vld [vmem:[#allocation7 + $0xb50] sm:$0xf0] }
 0x342   :  { %v13131_v20 = vld [vmem:[#allocation7 + $0xb44] sm:$0xf]  ;;  %v11258_v11 = vor.u32 %v13031_v5, %v11255_v22  ;;  %v11239_v18 = vld [vmem:[#allocation7 + $0x810] sm:$0xf0]  ;;  %v13896_v22 = vpop.f32.mrf.mxu0 }
 0x343   :  { %7515 = vmatpush.bf16.msra.mxu1 %v11434_v32  ;;  %7542 = vmatpush.bf16.msra.mxu3 %v11706_v30  ;;  %v13027_v14 = vld [vmem:[#allocation7 + $0x804] sm:$0xf]  ;;  %v11386_v32 = vor.u32 %v13063_v13, %v11383_v46  ;;  %v11367_v40 = vld [vmem:[#allocation7 + $0x910] sm:$0xf0]  ;;  %v11658_v59 = vor.u32 %v13131_v20, %v11655_v27 }
 0x344   :  { %v13059_v23 = vld [vmem:[#allocation7 + $0x904] sm:$0xf]  ;;  %v11495_v30 = vld [vmem:[#allocation7 + $0xa10] sm:$0xf0]  ;;  %v11242_v3 = vor.u32 %v13027_v14, %v11239_v18 }
 0x345   :  { %7529 = vmatpush.bf16.msra.mxu2 %v11562_v29  ;;  %7502 = vmatpush.bf16.msra.mxu0 %v11290_v62  ;;  %v11514_v29 = vor.u32 %v13095_v25, %v11511_v63  ;;  %v13091_v21 = vld [vmem:[#allocation7 + $0xa04] sm:$0xf]  ;;  %v11639_v44 = vld [vmem:[#allocation7 + $0xb30] sm:$0xf0]  ;;  %v11370_v19 = vor.u32 %v13059_v23, %v11367_v40 }
 0x346   :  { %v13127_v48 = vld [vmem:[#allocation7 + $0xb24] sm:$0xf]  ;;  %v11863_v43 = vld [vmem:[#allocation7 + $0xcf0] sm:$0xf0]  ;;  %v11498_v6 = vor.u32 %v13091_v21, %v11495_v30 }
 0x347   :  { %7516 = vmatpush.bf16.msra.mxu1 %v11418_v10  ;;  %7543 = vmatpush.bf16.msra.mxu3 %v11690_v15  ;;  %v13183_v49 = vld [vmem:[#allocation7 + $0xce4] sm:$0xf]  ;;  %v11991_v62 = vld [vmem:[#allocation7 + $0xdf0] sm:$0xf0]  ;;  %v11642_v54 = vor.u32 %v13127_v48, %v11639_v44 }
 0x348   :  { %v13215_v58 = vld [vmem:[#allocation7 + $0xde4] sm:$0xf]  ;;  %v11866_v15 = vor.u32 %v13183_v49, %v11863_v43  ;;  %v11623_v60 = vld [vmem:[#allocation7 + $0xb10] sm:$0xf0] }
 0x349   :  { %7530 = vmatpush.bf16.msra.mxu2 %v11546_v56  ;;  %7503 = vmatpush.bf16.msra.mxu0 %v11274_v38  ;;  %v13247_v10 = vld [vmem:[#allocation7 + $0xee4] sm:$0xf]  ;;  %v12119_v56 = vld [vmem:[#allocation7 + $0xef0] sm:$0xf0]  ;;  %v11994_v36 = vor.u32 %v13215_v58, %v11991_v62 }
 0x34a   :  { %v13123_v7 = vld [vmem:[#allocation7 + $0xb04] sm:$0xf]  ;;  %v12122_v45 = vor.u32 %v13247_v10, %v12119_v56  ;;  %v11847_v61 = vld [vmem:[#allocation7 + $0xcd0] sm:$0xf0]  ;;  %v13903_v10 = vpop.f32.mrf.mxu2 }
 0x34b   :  { %7517 = vmatpush.bf16.msra.mxu1 %v11402_v37  ;;  %7544 = vmatpush.bf16.msra.mxu3 %v11674_v53  ;;  %v13179_v2 = vld [vmem:[#allocation7 + $0xcc4] sm:$0xf]  ;;  %v11975_v38 = vld [vmem:[#allocation7 + $0xdd0] sm:$0xf0]  ;;  %v11626_v13 = vor.u32 %v13123_v7, %v11623_v60 }
 0x34c   :  { %v13211_v52 = vld [vmem:[#allocation7 + $0xdc4] sm:$0xf]  ;;  %v12103_v37 = vld [vmem:[#allocation7 + $0xed0] sm:$0xf0]  ;;  %v11850_v53 = vor.u32 %v13179_v2, %v11847_v61 }
 0x34d   :  { %7531 = vmatpush.bf16.msra.mxu2 %v11530_v28  ;;  %7504 = vmatpush.bf16.msra.mxu0 %v11258_v11  ;;  %v13243_v12 = vld [vmem:[#allocation7 + $0xec4] sm:$0xf]  ;;  %v12247_v5 = vld [vmem:[#allocation7 + $0xff0] sm:$0xf0]  ;;  %v11978_v46 = vor.u32 %v13211_v52, %v11975_v38  ;;  %v13898_v11 = vpop.f32.mrf.mxu1 }
 0x34e   :  { %v13279_v28 = vld [vmem:[#allocation7 + $0xfe4] sm:$0xf]  ;;  %v12106_v25 = vor.u32 %v13243_v12, %v12103_v37  ;;  %v11831_v20 = vld [vmem:[#allocation7 + $0xcb0] sm:$0xf0] }
 0x34f   :  { %7518 = vmatpush.bf16.msra.mxu1 %v11386_v32  ;;  %7545 = vmatpush.bf16.msra.mxu3 %v11658_v59  ;;  %v13175_v63 = vld [vmem:[#allocation7 + $0xca4] sm:$0xf]  ;;  %v12250_v14 = vor.u32 %v13279_v28, %v12247_v5  ;;  %v11959_v18 = vld [vmem:[#allocation7 + $0xdb0] sm:$0xf0] }
 0x350   :  { %v13207_v27 = vld [vmem:[#allocation7 + $0xda4] sm:$0xf]  ;;  %v12231_v40 = vld [vmem:[#allocation7 + $0xfd0] sm:$0xf0]  ;;  %v11834_v21 = vor.u32 %v13175_v63, %v11831_v20 }
 0x351   :  { %7532 = vmatpush.bf16.msra.mxu2 %v11514_v29  ;;  %7505 = vmatpush.bf16.msra.mxu0 %v11242_v3  ;;  %v13239_v32 = vld [vmem:[#allocation7 + $0xea4] sm:$0xf]  ;;  %v12087_v29 = vld [vmem:[#allocation7 + $0xeb0] sm:$0xf0]  ;;  %v11962_v59 = vor.u32 %v13207_v27, %v11959_v18 }
 0x352   :  { %v13275_v23 = vld [vmem:[#allocation7 + $0xfc4] sm:$0xf]  ;;  %v12090_v30 = vor.u32 %v13239_v32, %v12087_v29  ;;  %v11815_v44 = vld [vmem:[#allocation7 + $0xc90] sm:$0xf0] }
 0x353   :  { %7519 = vmatpush.bf16.msra.mxu1 %v11370_v19  ;;  %7546 = vmatpush.bf16.msra.mxu3 %v11642_v54  ;;  %v13171_v48 = vld [vmem:[#allocation7 + $0xc84] sm:$0xf]  ;;  %v12234_v43 = vor.u32 %v13275_v23, %v12231_v40  ;;  %v11943_v58 = vld [vmem:[#allocation7 + $0xd90] sm:$0xf0] }
 0x354   :  { %7506 = vmatmul.bf16.vlgmr.msra.gmra.mxu0 %v13820_v26  ;;  %v13203_v49 = vld [vmem:[#allocation7 + $0xd84] sm:$0xf]  ;;  %v12071_v62 = vld [vmem:[#allocation7 + $0xe90] sm:$0xf0]  ;;  %v11818_v54 = vor.u32 %v13171_v48, %v11815_v44 }
 0x355   :  { %7533 = vmatpush.bf16.msra.mxu2 %v11498_v6  ;;  %7554 = vmatpush.bf16.msrb.mxu0 %v11866_v15  ;;  %v13235_v3 = vld [vmem:[#allocation7 + $0xe84] sm:$0xf]  ;;  %v12215_v19 = vld [vmem:[#allocation7 + $0xfb0] sm:$0xf0]  ;;  %v7283_v6 = vpop.f32.mrf.mxu0  ;;  %v13906_v15 = vpop.f32.mrf.mxu3  ;;  %v11946_v60 = vor.u32 %v13203_v49, %v11943_v58 }
 0x356   :  { %7520 = vmatmul.bf16.vlgmr.msra.gmra.mxu1 %v13822_v33  ;;  %v13271_v56 = vld [vmem:[#allocation7 + $0xfa4] sm:$0xf]  ;;  %v7284_v7 = vadd.f32 %v7283_v6, %v13894_v34  ;;  %v11799_v2 = vld [vmem:[#allocation7 + $0xc70] sm:$0xf0]  ;;  %v7297_v52 = vpop.f32.mrf.mxu1 }
 0x357   :  { %7568 = vmatpush.bf16.msrb.mxu1 %v11994_v36  ;;  %7547 = vmatpush.bf16.msra.mxu3 %v11626_v13  ;;  %v12074_v36 = vor.u32 %v13235_v3, %v12071_v62  ;;  %v13199_v61 = vld [vmem:[#allocation7 + $0xd64] sm:$0xf]  ;;  %v12218_v38 = vor.u32 %v13271_v56, %v12215_v19  ;;  %v11927_v12 = vld [vmem:[#allocation7 + $0xd70] sm:$0xf0] }
 0x358   :  { %7534 = vmatmul.bf16.vlgmr.msra.gmra.mxu2 %v13826_v50  ;;  %v13231_v37 = vld [vmem:[#allocation7 + $0xe64] sm:$0xf]  ;;  %v12055_v28 = vld [vmem:[#allocation7 + $0xe70] sm:$0xf0]  ;;  %v7298_v5 = vadd.f32 %v7297_v52, %v7284_v7 }
 0x359   :  { %7582 = vmatpush.bf16.msrb.mxu2 %v12122_v45  ;;  %7555 = vmatpush.bf16.msrb.mxu0 %v11850_v53  ;;  %v13167_v45 = vld [vmem:[#allocation7 + $0xc64] sm:$0xf]  ;;  %v12199_v53 = vld [vmem:[#allocation7 + $0xf90] sm:$0xf0]  ;;  %v12058_v34 = vor.u32 %v13231_v37, %v12055_v28 }
 0x35a   :  { %7548 = vmatmul.bf16.vlgmr.msra.gmra.mxu3 %v13828_v9  ;;  %v13267_v13 = vld [vmem:[#allocation7 + $0xf84] sm:$0xf]  ;;  %v11783_v20 = vld [vmem:[#allocation7 + $0xc50] sm:$0xf0] }
 0x35b   :  { %7569 = vmatpush.bf16.msrb.mxu1 %v11978_v46  ;;  %7596 = vmatpush.bf16.msrb.mxu3 %v12250_v14  ;;  %v11802_v46 = vor.u32 %v13167_v45, %v11799_v2  ;;  %v13163_v63 = vld [vmem:[#allocation7 + $0xc44] sm:$0xf]  ;;  %v12202_v14 = vor.u32 %v13267_v13, %v12199_v53  ;;  %v11911_v18 = vld [vmem:[#allocation7 + $0xd50] sm:$0xf0]  ;;  %v7311_v23 = vpop.f32.mrf.mxu2 }
 0x35c   :  { %v13195_v27 = vld [vmem:[#allocation7 + $0xd44] sm:$0xf]  ;;  %v12039_v29 = vld [vmem:[#allocation7 + $0xe50] sm:$0xf0] }
 0x35d   :  { %7583 = vmatpush.bf16.msrb.mxu2 %v12106_v25  ;;  %7556 = vmatpush.bf16.msrb.mxu0 %v11834_v21  ;;  %v11930_v25 = vor.u32 %v13199_v61, %v11927_v12  ;;  %v13227_v32 = vld [vmem:[#allocation7 + $0xe44] sm:$0xf]  ;;  %v12183_v21 = vld [vmem:[#allocation7 + $0xf70] sm:$0xf0]  ;;  %v7325_v48 = vpop.f32.mrf.mxu3  ;;  %v11914_v44 = vor.u32 %v13195_v27, %v11911_v18  ;;  %v10589_v27 = vld [vmem:[#allocation7 + $0x2e8] sm:$0xf] }
 0x35e   :  { %v13263_v40 = vld [vmem:[#allocation7 + $0xf64] sm:$0xf]  ;;  %v12042_v49 = vor.u32 %v13227_v32, %v12039_v29  ;;  %v11767_v58 = vld [vmem:[#allocation7 + $0xc30] sm:$0xf0] }
 0x35f   :  { %7570 = vmatpush.bf16.msrb.mxu1 %v11962_v59  ;;  %7597 = vmatpush.bf16.msrb.mxu3 %v12234_v43  ;;  %v7312_v59 = vadd.f32 %v7311_v23, %v7298_v5  ;;  %v13159_v43 = vld [vmem:[#allocation7 + $0xc24] sm:$0xf]  ;;  %v12186_v56 = vor.u32 %v13263_v40, %v12183_v21  ;;  %v11895_v19 = vld [vmem:[#allocation7 + $0xd30] sm:$0xf0] }
 0x360   :  { %v13191_v3 = vld [vmem:[#allocation7 + $0xd24] sm:$0xf]  ;;  %v11751_v2 = vld [vmem:[#allocation7 + $0xc10] sm:$0xf0] }
 0x361   :  { %7584 = vmatpush.bf16.msrb.mxu2 %v12090_v30  ;;  %7557 = vmatpush.bf16.msrb.mxu0 %v11818_v54  ;;  %v11786_v30 = vor.u32 %v13163_v63, %v11783_v20  ;;  %v13909_v62 = vadd.f32 %v7325_v48, %v7312_v59  ;;  %v13223_v6 = vld [vmem:[#allocation7 + $0xe24] sm:$0xf]  ;;  %v12023_v54 = vld [vmem:[#allocation7 + $0xe30] sm:$0xf0]  ;;  %v11898_v61 = vor.u32 %v13191_v3, %v11895_v19  ;;  %v12834_v20 = vld [vmem:[#allocation7 + $0x1f4] sm:$0xf0] }
 0x362   :  { %v13259_v7 = vld [vmem:[#allocation7 + $0xf44] sm:$0xf]  ;;  %v12026_v52 = vor.u32 %v13223_v6, %v12023_v54  ;;  %v11879_v12 = vld [vmem:[#allocation7 + $0xd10] sm:$0xf0]  ;;  %v10317_v48 = vld [vmem:[#allocation7 + $0xc8] sm:$0xf] }
 0x363   :  { %7571 = vmatpush.bf16.msrb.mxu1 %v11946_v60  ;;  %7598 = vmatpush.bf16.msrb.mxu3 %v12218_v38  ;;  %v12167_v60 = vld [vmem:[#allocation7 + $0xf50] sm:$0xf0]  ;;  %v13155_v45 = vld [vmem:[#allocation7 + $0xc04] sm:$0xf]  ;;  %v12862_v3 = vld [vmem:[#allocation7 + $0x2d4] sm:$0xf0] }
 0x364   :  { %v13187_v38 = vld [vmem:[#allocation7 + $0xd04] sm:$0xf]  ;;  %v12170_v28 = vor.u32 %v13259_v7, %v12167_v60  ;;  %v12007_v5 = vld [vmem:[#allocation7 + $0xe10] sm:$0xf0]  ;;  %v11754_v63 = vor.u32 %v13155_v45, %v11751_v2  ;;  %v10717_v19 = vld [vmem:[#allocation7 + $0x3e8] sm:$0xf]  ;;  %v13913_v60 = vpop.f32.mrf.mxu1 }
 0x365   :  { %7585 = vmatpush.bf16.msrb.mxu2 %v12074_v36  ;;  %7558 = vmatpush.bf16.msrb.mxu0 %v11802_v46  ;;  %v11770_v36 = vor.u32 %v13159_v43, %v11767_v58  ;;  %v13219_v37 = vld [vmem:[#allocation7 + $0xe04] sm:$0xf]  ;;  %v12151_v53 = vld [vmem:[#allocation7 + $0xf30] sm:$0xf0]  ;;  %v10333_v46 = vld [vmem:[#allocation7 + $0xe8] sm:$0xf]  ;;  %v11882_v18 = vor.u32 %v13187_v38, %v11879_v12 }
 0x366   :  { %v13255_v13 = vld [vmem:[#allocation7 + $0xf24] sm:$0xf]  ;;  %v12010_v32 = vor.u32 %v13219_v37, %v12007_v5  ;;  %v12135_v21 = vld [vmem:[#allocation7 + $0xf10] sm:$0xf0]  ;;  %v12830_v43 = vld [vmem:[#allocation7 + $0x1d4] sm:$0xf0] }
 0x367   :  { %7572 = vmatpush.bf16.msrb.mxu1 %v11930_v25  ;;  %7599 = vmatpush.bf16.msrb.mxu3 %v12202_v14  ;;  %v12802_v25 = vld [vmem:[#allocation7 + $0xf4] sm:$0xf0]  ;;  %v12154_v29 = vor.u32 %v13255_v13, %v12151_v53  ;;  %v13251_v40 = vld [vmem:[#allocation7 + $0xf04] sm:$0xf]  ;;  %v10573_v58 = vld [vmem:[#allocation7 + $0x2c8] sm:$0xf] }
 0x368   :  { %v12866_v14 = vld [vmem:[#allocation7 + $0x2f4] sm:$0xf0]  ;;  %v10334_v23 = vor.u32 %v12802_v25, %v10333_v46  ;;  %v12138_v54 = vor.u32 %v13251_v40, %v12135_v21  ;;  %v10574_v45 = vor.u32 %v12862_v3, %v10573_v58  ;;  %v10301_v2 = vld [vmem:[#allocation7 + $0xa8] sm:$0xf] }
 0x369   :  { %7586 = vmatpush.bf16.msrb.mxu2 %v12058_v34  ;;  %7559 = vmatpush.bf16.msrb.mxu0 %v11786_v30  ;;  %v10461_v34 = vld [vmem:[#allocation7 + $0x1e8] sm:$0xf]  ;;  %v10590_v30 = vor.u32 %v12866_v14, %v10589_v27  ;;  %v12898_v6 = vld [vmem:[#allocation7 + $0x3f4] sm:$0xf0] }
 0x36a   :  { %v10462_v59 = vor.u32 %v12834_v20, %v10461_v34  ;;  %v10718_v38 = vor.u32 %v12898_v6, %v10717_v19  ;;  %v12826_v12 = vld [vmem:[#allocation7 + $0x1b4] sm:$0xf0]  ;;  %v10557_v37 = vld [vmem:[#allocation7 + $0x2a8] sm:$0xf] }
 0x36b   :  { %7573 = vmatpush.bf16.msrb.mxu1 %v11914_v44  ;;  %7600 = vmatpush.bf16.msrb.mxu3 %v12186_v56  ;;  %v12798_v44 = vld [vmem:[#allocation7 + $0xd4] sm:$0xf0]  ;;  %v13911_v56 = vpop.f32.mrf.mxu0  ;;  %v10701_v5 = vld [vmem:[#allocation7 + $0x3c8] sm:$0xf] }
 0x36c   :  { %v10318_v7 = vor.u32 %v12798_v44, %v10317_v48  ;;  %v12894_v13 = vld [vmem:[#allocation7 + $0x3d4] sm:$0xf0]  ;;  %v10285_v34 = vld [vmem:[#allocation7 + $0x88] sm:$0xf] }
 0x36d   :  { %7587 = vmatpush.bf16.msrb.mxu2 %v12042_v49  ;;  %7560 = vmatpush.bf16.msrb.mxu0 %v11770_v36  ;;  %v10445_v49 = vld [vmem:[#allocation7 + $0x1c8] sm:$0xf]  ;;  %v10702_v27 = vor.u32 %v12894_v13, %v10701_v5  ;;  %v12822_v14 = vld [vmem:[#allocation7 + $0x194] sm:$0xf0] }
 0x36e   :  { %v10446_v36 = vor.u32 %v12830_v43, %v10445_v49  ;;  %v10413_v20 = vld [vmem:[#allocation7 + $0x188] sm:$0xf]  ;;  %v12890_v21 = vld [vmem:[#allocation7 + $0x3b4] sm:$0xf0] }
 0x36f   :  { %7574 = vmatpush.bf16.msrb.mxu1 %v11898_v61  ;;  %7601 = vmatpush.bf16.msrb.mxu3 %v12170_v28  ;;  %v12794_v61 = vld [vmem:[#allocation7 + $0xb4] sm:$0xf0]  ;;  %v10685_v40 = vld [vmem:[#allocation7 + $0x3a8] sm:$0xf]  ;;  %v10414_v44 = vor.u32 %v12822_v14, %v10413_v20 }
 0x370   :  { %v12858_v28 = vld [vmem:[#allocation7 + $0x2b4] sm:$0xf0]  ;;  %v10302_v53 = vor.u32 %v12794_v61, %v10301_v2  ;;  %v10269_v43 = vld [vmem:[#allocation7 + $0x68] sm:$0xf]  ;;  %v10686_v6 = vor.u32 %v12890_v21, %v10685_v40 }
 0x371   :  { %7588 = vmatpush.bf16.msrb.mxu2 %v12026_v52  ;;  %7561 = vmatpush.bf16.msrb.mxu0 %v11754_v63  ;;  %v10429_v52 = vld [vmem:[#allocation7 + $0x1a8] sm:$0xf]  ;;  %v10558_v25 = vor.u32 %v12858_v28, %v10557_v37  ;;  %v12790_v63 = vld [vmem:[#allocation7 + $0x94] sm:$0xf0] }
 0x372   :  { %v10430_v46 = vor.u32 %v12826_v12, %v10429_v52  ;;  %v12786_v58 = vld [vmem:[#allocation7 + $0x74] sm:$0xf0]  ;;  %v10397_v3 = vld [vmem:[#allocation7 + $0x168] sm:$0xf] }
 0x373   :  { %7575 = vmatpush.bf16.msrb.mxu1 %v11882_v18  ;;  %7602 = vmatpush.bf16.msrb.mxu3 %v12154_v29  ;;  %v10541_v18 = vld [vmem:[#allocation7 + $0x288] sm:$0xf]  ;;  %v13918_v29 = vpop.f32.mrf.mxu2  ;;  %v7353_v48 = vpop.f32.mrf.mxu1  ;;  %v12886_v2 = vld [vmem:[#allocation7 + $0x394] sm:$0xf0]  ;;  %v10270_v61 = vor.u32 %v12786_v58, %v10269_v43 }
 0x374   :  { %7562 = vmatmul.bf16.vlgmr.msrb.gmra.mxu0 %v13863_v1  ;;  %v12782_v12 = vld [vmem:[#allocation7 + $0x54] sm:$0xf0]  ;;  %v10381_v37 = vld [vmem:[#allocation7 + $0x148] sm:$0xf] }
 0x375   :  { %7589 = vmatpush.bf16.msrb.mxu2 %v12010_v32  ;;  %7610 = vmatpush.bf16.msra.mxu0 %v10334_v23  ;;  %v12854_v32 = vld [vmem:[#allocation7 + $0x294] sm:$0xf0]  ;;  %v7339_v23 = vpop.f32.mrf.mxu0  ;;  %v10509_v13 = vld [vmem:[#allocation7 + $0x248] sm:$0xf] }
 0x376   :  { %7576 = vmatmul.bf16.vlgmr.msrb.gmra.mxu1 %v13867_v31  ;;  %v10542_v49 = vor.u32 %v12854_v32, %v10541_v18  ;;  %v12814_v5 = vld [vmem:[#allocation7 + $0x154] sm:$0xf0]  ;;  %v10237_v18 = vld [vmem:[#allocation7 + $0x28] sm:$0xf] }
 0x377   :  { %7624 = vmatpush.bf16.msra.mxu1 %v10462_v59  ;;  %7603 = vmatpush.bf16.msrb.mxu3 %v12138_v54  ;;  %v7340_v59 = vadd.f32 %v7339_v23, %v13909_v62  ;;  %v12818_v54 = vld [vmem:[#allocation7 + $0x174] sm:$0xf0]  ;;  %v10365_v23 = vld [vmem:[#allocation7 + $0x128] sm:$0xf] }
 0x378   :  { %7590 = vmatmul.bf16.vlgmr.msrb.gmra.mxu2 %v13865_v42  ;;  %v10398_v62 = vor.u32 %v12818_v54, %v10397_v3  ;;  %v12778_v32 = vld [vmem:[#allocation7 + $0x34] sm:$0xf0]  ;;  %v10221_v43 = vld [vmem:[#allocation7 + $0x8] sm:$0xf] }
 0x379   :  { %7638 = vmatpush.bf16.msra.mxu2 %v10590_v30  ;;  %7611 = vmatpush.bf16.msra.mxu0 %v10318_v7  ;;  %v10286_v30 = vor.u32 %v12790_v63, %v10285_v34  ;;  %v7354_v19 = vadd.f32 %v7353_v48, %v7340_v59  ;;  %v10525_v7 = vld [vmem:[#allocation7 + $0x268] sm:$0xf]  ;;  %v12882_v34 = vld [vmem:[#allocation7 + $0x374] sm:$0xf0] }
 0x37a   :  { %7604 = vmatmul.bf16.vlgmr.msrb.gmra.mxu3 %v13872_v41  ;;  %v12810_v21 = vld [vmem:[#allocation7 + $0x134] sm:$0xf0]  ;;  %v10493_v59 = vld [vmem:[#allocation7 + $0x228] sm:$0xf] }
 0x37b   :  { %7625 = vmatpush.bf16.msra.mxu1 %v10446_v36  ;;  %7652 = vmatpush.bf16.msra.mxu3 %v10718_v38  ;;  %v12850_v36 = vld [vmem:[#allocation7 + $0x274] sm:$0xf0]  ;;  %v10253_v38 = vld [vmem:[#allocation7 + $0x48] sm:$0xf]  ;;  %v10366_v3 = vor.u32 %v12810_v21, %v10365_v23 }
 0x37c   :  { %v10526_v52 = vor.u32 %v12850_v36, %v10525_v7  ;;  %v10254_v20 = vor.u32 %v12782_v12, %v10253_v38  ;;  %v10637_v48 = vld [vmem:[#allocation7 + $0x348] sm:$0xf]  ;;  %v12774_v58 = vld [vmem:[#allocation7 + $0x14] sm:$0xf0] }
 0x37d   :  { %7639 = vmatpush.bf16.msra.mxu2 %v10574_v45  ;;  %7612 = vmatpush.bf16.msra.mxu0 %v10302_v53  ;;  %v10669_v45 = vld [vmem:[#allocation7 + $0x388] sm:$0xf]  ;;  %v12846_v53 = vld [vmem:[#allocation7 + $0x254] sm:$0xf0]  ;;  %v10222_v12 = vor.u32 %v12774_v58, %v10221_v43 }
 0x37e   :  { %v10670_v28 = vor.u32 %v12886_v2, %v10669_v45  ;;  %v10510_v14 = vor.u32 %v12846_v53, %v10509_v13  ;;  %v12806_v54 = vld [vmem:[#allocation7 + $0x114] sm:$0xf0]  ;;  %v10477_v7 = vld [vmem:[#allocation7 + $0x208] sm:$0xf] }
 0x37f   :  { %7626 = vmatpush.bf16.msra.mxu1 %v10430_v46  ;;  %7653 = vmatpush.bf16.msra.mxu3 %v10702_v27  ;;  %v7367_v46 = vpop.f32.mrf.mxu2  ;;  %v10382_v27 = vor.u32 %v12814_v5, %v10381_v37  ;;  %v12838_v45 = vld [vmem:[#allocation7 + $0x214] sm:$0xf0]  ;;  %v10621_v2 = vld [vmem:[#allocation7 + $0x328] sm:$0xf] }
 0x380   :  { %v13922_v63 = vadd.f32 %v7367_v46, %v7354_v19  ;;  %v10973_v38 = vld [vmem:[#allocation7 + $0x5e8] sm:$0xf]  ;;  %v12962_v37 = vld [vmem:[#allocation7 + $0x5f4] sm:$0xf0]  ;;  %v10478_v53 = vor.u32 %v12838_v45, %v10477_v7 }
 0x381   :  { %7640 = vmatpush.bf16.msra.mxu2 %v10558_v25  ;;  %7613 = vmatpush.bf16.msra.mxu0 %v10286_v30  ;;  %v10653_v25 = vld [vmem:[#allocation7 + $0x368] sm:$0xf]  ;;  %v12842_v30 = vld [vmem:[#allocation7 + $0x234] sm:$0xf0] }
 0x382   :  { %v10654_v40 = vor.u32 %v12882_v34, %v10653_v25  ;;  %v10494_v19 = vor.u32 %v12842_v30, %v10493_v59  ;;  %v12994_v5 = vld [vmem:[#allocation7 + $0x6f4] sm:$0xf0]  ;;  %v10605_v34 = vld [vmem:[#allocation7 + $0x308] sm:$0xf]  ;;  %v13924_v30 = vpop.f32.mrf.mxu0 }
 0x383   :  { %7627 = vmatpush.bf16.msra.mxu1 %v10414_v44  ;;  %7654 = vmatpush.bf16.msra.mxu3 %v10686_v6  ;;  %v12878_v44 = vld [vmem:[#allocation7 + $0x354] sm:$0xf0]  ;;  %v10349_v6 = vld [vmem:[#allocation7 + $0x108] sm:$0xf] }
 0x384   :  { %v10638_v36 = vor.u32 %v12878_v44, %v10637_v48  ;;  %v10350_v13 = vor.u32 %v12806_v54, %v10349_v6  ;;  %v10957_v23 = vld [vmem:[#allocation7 + $0x5c8] sm:$0xf]  ;;  %v12990_v59 = vld [vmem:[#allocation7 + $0x6d4] sm:$0xf0]  ;;  %v13926_v48 = vpop.f32.mrf.mxu1 }
 0x385   :  { %7641 = vmatpush.bf16.msra.mxu2 %v10542_v49  ;;  %7614 = vmatpush.bf16.msra.mxu0 %v10270_v61  ;;  %v10238_v49 = vor.u32 %v12778_v32, %v10237_v18  ;;  %v12874_v61 = vld [vmem:[#allocation7 + $0x334] sm:$0xf0]  ;;  %v10829_v18 = vld [vmem:[#allocation7 + $0x4c8] sm:$0xf] }
 0x386   :  { %v10622_v46 = vor.u32 %v12874_v61, %v10621_v2  ;;  %v12926_v32 = vld [vmem:[#allocation7 + $0x4d4] sm:$0xf0]  ;;  %v11085_v21 = vld [vmem:[#allocation7 + $0x6c8] sm:$0xf] }
 0x387   :  { %7628 = vmatpush.bf16.msra.mxu1 %v10398_v62  ;;  %7655 = vmatpush.bf16.msra.mxu3 %v10670_v28  ;;  %v10845_v62 = vld [vmem:[#allocation7 + $0x4e8] sm:$0xf]  ;;  %v10830_v58 = vor.u32 %v12926_v32, %v10829_v18  ;;  %v12922_v54 = vld [vmem:[#allocation7 + $0x4b4] sm:$0xf0] }
 0x388   :  { %v11101_v28 = vld [vmem:[#allocation7 + $0x6e8] sm:$0xf]  ;;  %v12954_v45 = vld [vmem:[#allocation7 + $0x5b4] sm:$0xf0] }
 0x389   :  { %7642 = vmatpush.bf16.msra.mxu2 %v10526_v52  ;;  %7615 = vmatpush.bf16.msra.mxu0 %v10254_v20  ;;  %v12930_v52 = vld [vmem:[#allocation7 + $0x4f4] sm:$0xf0]  ;;  %v11229_v44 = vld [vmem:[#allocation7 + $0x7e8] sm:$0xf] }
 0x38a   :  { %v10846_v25 = vor.u32 %v12930_v52, %v10845_v62  ;;  %v12870_v20 = vld [vmem:[#allocation7 + $0x314] sm:$0xf0]  ;;  %v10813_v6 = vld [vmem:[#allocation7 + $0x4a8] sm:$0xf] }
 0x38b   :  { %7629 = vmatpush.bf16.msra.mxu1 %v10382_v27  ;;  %7656 = vmatpush.bf16.msra.mxu3 %v10654_v40  ;;  %v10974_v27 = vor.u32 %v12962_v37, %v10973_v38  ;;  %v12958_v40 = vld [vmem:[#allocation7 + $0x5d4] sm:$0xf0]  ;;  %v10606_v43 = vor.u32 %v12870_v20, %v10605_v34  ;;  %v10941_v7 = vld [vmem:[#allocation7 + $0x5a8] sm:$0xf]  ;;  %v10814_v38 = vor.u32 %v12922_v54, %v10813_v6 }
 0x38c   :  { %v11069_v2 = vld [vmem:[#allocation7 + $0x6a8] sm:$0xf]  ;;  %v12986_v61 = vld [vmem:[#allocation7 + $0x6b4] sm:$0xf0] }
 0x38d   :  { %7643 = vmatpush.bf16.msra.mxu2 %v10510_v14  ;;  %7616 = vmatpush.bf16.msra.mxu0 %v10238_v49  ;;  %v11102_v14 = vor.u32 %v12994_v5, %v11101_v28  ;;  %v13026_v49 = vld [vmem:[#allocation7 + $0x7f4] sm:$0xf0]  ;;  %v11213_v62 = vld [vmem:[#allocation7 + $0x7c8] sm:$0xf]  ;;  %v11070_v37 = vor.u32 %v12986_v61, %v11069_v2 }
 0x38e   :  { %v13022_v52 = vld [vmem:[#allocation7 + $0x7d4] sm:$0xf0]  ;;  %v10797_v28 = vld [vmem:[#allocation7 + $0x488] sm:$0xf] }
 0x38f   :  { %7630 = vmatpush.bf16.msra.mxu1 %v10366_v3  ;;  %7657 = vmatpush.bf16.msra.mxu3 %v10638_v36  ;;  %v10958_v3 = vor.u32 %v12958_v40, %v10957_v23  ;;  %v11230_v36 = vor.u32 %v13026_v49, %v11229_v44  ;;  %v12918_v5 = vld [vmem:[#allocation7 + $0x494] sm:$0xf0]  ;;  %v11053_v34 = vld [vmem:[#allocation7 + $0x688] sm:$0xf]  ;;  %v13934_v23 = vpop.f32.mrf.mxu3 }
 0x390   :  { %v12982_v20 = vld [vmem:[#allocation7 + $0x694] sm:$0xf0]  ;;  %v11197_v18 = vld [vmem:[#allocation7 + $0x7a8] sm:$0xf] }
 0x391   :  { %7644 = vmatpush.bf16.msra.mxu2 %v10494_v19  ;;  %7617 = vmatpush.bf16.msra.mxu0 %v10222_v12  ;;  %v11086_v19 = vor.u32 %v12990_v59, %v11085_v21  ;;  %v10942_v12 = vor.u32 %v12954_v45, %v10941_v7  ;;  %v13018_v32 = vld [vmem:[#allocation7 + $0x7b4] sm:$0xf0]  ;;  %v13301_v40 = vld [vmem:[#allocation2 + $0x8] sm:$0xff]  ;;  %v10798_v59 = vor.u32 %v12918_v5, %v10797_v28 }
 0x392   :  { %v11054_v49 = vor.u32 %v12982_v20, %v11053_v34  ;;  %v11198_v6 = vor.u32 %v13018_v32, %v11197_v18  ;;  %v12946_v54 = vld [vmem:[#allocation7 + $0x574] sm:$0xf0]  ;;  %v11037_v7 = vld [vmem:[#allocation7 + $0x668] sm:$0xf] }
 0x393   :  { %7631 = vmatpush.bf16.msra.mxu1 %v10350_v13  ;;  %7658 = vmatpush.bf16.msra.mxu3 %v10622_v46  ;;  %v10925_v13 = vld [vmem:[#allocation7 + $0x588] sm:$0xf]  ;;  %v11214_v46 = vor.u32 %v13022_v52, %v11213_v62  ;;  %v13014_v2 = vld [vmem:[#allocation7 + $0x794] sm:$0xf0] }
 0x394   :  { %7618 = vmatmul.bf16.vlgmr.msra.gmra.mxu0 %v14111_v0  ;;  %v11181_v45 = vld [vmem:[#allocation7 + $0x788] sm:$0xf] }
 0x395   :  { %7645 = vmatpush.bf16.msra.mxu2 %v10478_v53  ;;  %7666 = vmatpush.bf16.msrb.mxu0 %v10846_v25  ;;  %v13931_v53 = vpop.f32.mrf.mxu2  ;;  %v12950_v25 = vld [vmem:[#allocation7 + $0x594] sm:$0xf0]  ;;  %v11182_v5 = vor.u32 %v13014_v2, %v11181_v45  ;;  %v13302_v18 = vld [vmem:[#allocation2 + $0x28] sm:$0xff] }
 0x396   :  { %7632 = vmatmul.bf16.vlgmr.msra.gmra.mxu1 %v14112_v24  ;;  %14115 = vst [vmem:[#allocation22_spill] sm:$0xff] %v13931_v53  ;;  %v10926_v44 = vor.u32 %v12950_v25, %v10925_v13  ;;  %v12942_v13 = vld [vmem:[#allocation7 + $0x554] sm:$0xf0]  ;;  %v11149_v2 = vld [vmem:[#allocation7 + $0x748] sm:$0xf] }
 0x397   :  { %7680 = vmatpush.bf16.msrb.mxu1 %v10974_v27  ;;  %7659 = vmatpush.bf16.msra.mxu3 %v10606_v43  ;;  %v7395_v27 = vpop.f32.mrf.mxu0  ;;  %v10781_v43 = vld [vmem:[#allocation7 + $0x468] sm:$0xf]  ;;  %v12974_v25 = vld [vmem:[#allocation7 + $0x654] sm:$0xf0] }
 0x398   :  { %7646 = vmatmul.bf16.vlgmr.msra.gmra.mxu2 %v14113_v16  ;;  %v7396_v21 = vadd.f32 %v13301_v40, %v7395_v27  ;;  %v11165_v27 = vld [vmem:[#allocation7 + $0x768] sm:$0xf]  ;;  %v7381_v40 = vpop.f32.mrf.mxu3  ;;  %v12970_v45 = vld [vmem:[#allocation7 + $0x634] sm:$0xf0] }
 0x399   :  { %7694 = vmatpush.bf16.msrb.mxu2 %v11102_v14  ;;  %7667 = vmatpush.bf16.msrb.mxu0 %v10830_v58  ;;  %v7409_v14 = vpop.f32.mrf.mxu1  ;;  %v12914_v58 = vld [vmem:[#allocation7 + $0x474] sm:$0xf0]  ;;  %v12109_v53 = vld [vmem:[#allocation7 + $0xec8] sm:$0xf] }
 0x39a   :  { %7660 = vmatmul.bf16.vlgmr.msra.gmra.mxu3 %v14114_v35  ;;  %v10782_v61 = vor.u32 %v12914_v58, %v10781_v43  ;;  %v10749_v58 = vld [vmem:[#allocation7 + $0x428] sm:$0xf] }
 0x39b   :  { %7681 = vmatpush.bf16.msrb.mxu1 %v10958_v3  ;;  %7708 = vmatpush.bf16.msrb.mxu3 %v11230_v36  ;;  %v10909_v3 = vld [vmem:[#allocation7 + $0x568] sm:$0xf]  ;;  %v12978_v36 = vld [vmem:[#allocation7 + $0x674] sm:$0xf0] }
 0x39c   :  { %v10910_v62 = vor.u32 %v12946_v54, %v10909_v3  ;;  %v11038_v52 = vor.u32 %v12978_v36, %v11037_v7  ;;  %v12906_v3 = vld [vmem:[#allocation7 + $0x434] sm:$0xf0]  ;;  %v11005_v36 = vld [vmem:[#allocation7 + $0x628] sm:$0xf] }
 0x39d   :  { %7695 = vmatpush.bf16.msrb.mxu2 %v11086_v19  ;;  %7668 = vmatpush.bf16.msrb.mxu0 %v10814_v38  ;;  %v7410_v19 = vadd.f32 %v7409_v14, %v7396_v21  ;;  %v10765_v38 = vld [vmem:[#allocation7 + $0x448] sm:$0xf]  ;;  %v7423_v28 = vpop.f32.mrf.mxu2  ;;  %v13010_v14 = vld [vmem:[#allocation7 + $0x774] sm:$0xf0] }
 0x39e   :  { %v11166_v54 = vor.u32 %v13010_v14, %v11165_v27  ;;  %v12938_v7 = vld [vmem:[#allocation7 + $0x534] sm:$0xf0] }
 0x39f   :  { %7682 = vmatpush.bf16.msrb.mxu1 %v10942_v12  ;;  %7709 = vmatpush.bf16.msrb.mxu3 %v11214_v46  ;;  %v12910_v12 = vld [vmem:[#allocation7 + $0x454] sm:$0xf0]  ;;  %v11021_v46 = vld [vmem:[#allocation7 + $0x648] sm:$0xf]  ;;  %v13936_v34 = vadd.f32 %v7423_v28, %v7410_v19  ;;  %v7397_v20 = vpop.f32.mrf.mxu0 }
 0x3a0   :  { %v7398_v32 = vadd.f32 %v13302_v18, %v7397_v20  ;;  %v10766_v21 = vor.u32 %v12910_v12, %v10765_v38  ;;  %v11022_v43 = vor.u32 %v12974_v25, %v11021_v46  ;;  %v10877_v19 = vld [vmem:[#allocation7 + $0x528] sm:$0xf]  ;;  %v12902_v38 = vld [vmem:[#allocation7 + $0x414] sm:$0xf0]  ;;  %v11006_v12 = vor.u32 %v12970_v45, %v11005_v36 }
 0x3a1   :  { %7696 = vmatpush.bf16.msrb.mxu2 %v11070_v37  ;;  %7669 = vmatpush.bf16.msrb.mxu0 %v10798_v59  ;;  %v10893_v37 = vld [vmem:[#allocation7 + $0x548] sm:$0xf]  ;;  %v7411_v59 = vpop.f32.mrf.mxu1  ;;  %v12934_v28 = vld [vmem:[#allocation7 + $0x514] sm:$0xf0] }
 0x3a2   :  { %v12966_v25 = vld [vmem:[#allocation7 + $0x614] sm:$0xf0]  ;;  %v11133_v20 = vld [vmem:[#allocation7 + $0x728] sm:$0xf] }
 0x3a3   :  { %7683 = vmatpush.bf16.msrb.mxu1 %v10926_v44  ;;  %7710 = vmatpush.bf16.msrb.mxu3 %v11198_v6  ;;  %v13939_v44 = vadd.f32 %v7381_v40, %v13922_v63  ;;  %v7412_v6 = vadd.f32 %v7411_v59, %v7398_v32  ;;  %v10878_v63 = vor.u32 %v12938_v7, %v10877_v19  ;;  %v13002_v27 = vld [vmem:[#allocation7 + $0x734] sm:$0xf0]  ;;  %v11357_v18 = vld [vmem:[#allocation7 + $0x8e8] sm:$0xf] }
 0x3a4   :  { %v13058_v32 = vld [vmem:[#allocation7 + $0x8f4] sm:$0xf0]  ;;  %v11485_v40 = vld [vmem:[#allocation7 + $0x9e8] sm:$0xf] }
 0x3a5   :  { %7697 = vmatpush.bf16.msrb.mxu2 %v11054_v49  ;;  %7670 = vmatpush.bf16.msrb.mxu0 %v10782_v61  ;;  %v10894_v49 = vor.u32 %v12942_v13, %v10893_v37  ;;  %v13006_v61 = vld [vmem:[#allocation7 + $0x754] sm:$0xf0]  ;;  %v10861_v37 = vld [vmem:[#allocation7 + $0x508] sm:$0xf]  ;;  %v11358_v7 = vor.u32 %v13058_v32, %v11357_v18 }
 0x3a6   :  { %v10989_v13 = vld [vmem:[#allocation7 + $0x608] sm:$0xf]  ;;  %v11150_v46 = vor.u32 %v13006_v61, %v11149_v2 }
 0x3a7   :  { %7684 = vmatpush.bf16.msrb.mxu1 %v10910_v62  ;;  %7711 = vmatpush.bf16.msrb.mxu3 %v11182_v5  ;;  %v10750_v62 = vor.u32 %v12906_v3, %v10749_v58  ;;  %v7425_v5 = vpop.f32.mrf.mxu2  ;;  %v13122_v58 = vld [vmem:[#allocation7 + $0xaf4] sm:$0xf0]  ;;  %v10862_v3 = vor.u32 %v12934_v28, %v10861_v37  ;;  %v10990_v19 = vor.u32 %v12966_v25, %v10989_v13  ;;  %v11117_v36 = vld [vmem:[#allocation7 + $0x708] sm:$0xf] }
 0x3a8   :  { %v13941_v14 = vadd.f32 %v7425_v5, %v7412_v6  ;;  %v12998_v6 = vld [vmem:[#allocation7 + $0x714] sm:$0xf0]  ;;  %v11341_v61 = vld [vmem:[#allocation7 + $0x8c8] sm:$0xf] }
 0x3a9   :  { %7698 = vmatpush.bf16.msrb.mxu2 %v11038_v52  ;;  %7671 = vmatpush.bf16.msrb.mxu0 %v10766_v21  ;;  %v10733_v52 = vld [vmem:[#allocation7 + $0x408] sm:$0xf]  ;;  %v13943_v21 = vpop.f32.mrf.mxu3  ;;  %v13054_v5 = vld [vmem:[#allocation7 + $0x8d4] sm:$0xf0]  ;;  %v11118_v37 = vor.u32 %v12998_v6, %v11117_v36 }
 0x3aa   :  { %14116 = vst [vmem:[#allocation23_spill] sm:$0xff] %v13943_v21  ;;  %v10734_v59 = vor.u32 %v12902_v38, %v10733_v52  ;;  %v13086_v21 = vld [vmem:[#allocation7 + $0x9d4] sm:$0xf0]  ;;  %v11597_v52 = vld [vmem:[#allocation7 + $0xac8] sm:$0xf]  ;;  %v11342_v28 = vor.u32 %v13054_v5, %v11341_v61 }
 0x3ab   :  { %7685 = vmatpush.bf16.msrb.mxu1 %v10894_v49  ;;  %7712 = vmatpush.bf16.msrb.mxu3 %v11166_v54  ;;  %v13090_v49 = vld [vmem:[#allocation7 + $0x9f4] sm:$0xf0]  ;;  %v11134_v54 = vor.u32 %v13002_v27, %v11133_v20  ;;  %v11325_v25 = vld [vmem:[#allocation7 + $0x8a8] sm:$0xf] }
 0x3ac   :  { %v11486_v45 = vor.u32 %v13090_v49, %v11485_v40  ;;  %v13118_v38 = vld [vmem:[#allocation7 + $0xad4] sm:$0xf0]  ;;  %v11453_v27 = vld [vmem:[#allocation7 + $0x9a8] sm:$0xf] }
 0x3ad   :  { %7699 = vmatpush.bf16.msrb.mxu2 %v11022_v43  ;;  %7672 = vmatpush.bf16.msrb.mxu0 %v10750_v62  ;;  %v11613_v43 = vld [vmem:[#allocation7 + $0xae8] sm:$0xf]  ;;  %v13050_v20 = vld [vmem:[#allocation7 + $0x8b4] sm:$0xf0] }
 0x3ae   :  { %v11614_v2 = vor.u32 %v13122_v58, %v11613_v43  ;;  %v11469_v62 = vld [vmem:[#allocation7 + $0x9c8] sm:$0xf]  ;;  %v13082_v40 = vld [vmem:[#allocation7 + $0x9b4] sm:$0xf0] }
 0x3af   :  { %7686 = vmatpush.bf16.msrb.mxu1 %v10878_v63  ;;  %7713 = vmatpush.bf16.msrb.mxu3 %v11150_v46  ;;  %v11741_v63 = vld [vmem:[#allocation7 + $0xbe8] sm:$0xf]  ;;  %v11470_v13 = vor.u32 %v13086_v21, %v11469_v62  ;;  %v11598_v46 = vor.u32 %v13118_v38, %v11597_v52  ;;  %v13114_v49 = vld [vmem:[#allocation7 + $0xab4] sm:$0xf0]  ;;  %v11326_v21 = vor.u32 %v13050_v20, %v11325_v25 }
 0x3b0   :  { %v11725_v58 = vld [vmem:[#allocation7 + $0xbc8] sm:$0xf]  ;;  %v13046_v36 = vld [vmem:[#allocation7 + $0x894] sm:$0xf0] }
 0x3b1   :  { %7700 = vmatpush.bf16.msrb.mxu2 %v11006_v12  ;;  %7673 = vmatpush.bf16.msrb.mxu0 %v10734_v59  ;;  %v13154_v12 = vld [vmem:[#allocation7 + $0xbf4] sm:$0xf0]  ;;  %v7437_v32 = vpop.f32.mrf.mxu3  ;;  %v11581_v59 = vld [vmem:[#allocation7 + $0xaa8] sm:$0xf] }
 0x3b2   :  { %v11742_v18 = vor.u32 %v13154_v12, %v11741_v63  ;;  %v7438_v43 = vadd.f32 %v7437_v32, %v13936_v34  ;;  %v11437_v6 = vld [vmem:[#allocation7 + $0x988] sm:$0xf]  ;;  %v13110_v5 = vld [vmem:[#allocation7 + $0xa94] sm:$0xf0]  ;;  %v7451_v34 = vpop.f32.mrf.mxu0 }
 0x3b3   :  { %7687 = vmatpush.bf16.msrb.mxu1 %v10862_v3  ;;  %7714 = vmatpush.bf16.msrb.mxu3 %v11134_v54  ;;  %v13150_v3 = vld [vmem:[#allocation7 + $0xbd4] sm:$0xf0]  ;;  %v11582_v54 = vor.u32 %v13114_v49, %v11581_v59  ;;  %v11565_v61 = vld [vmem:[#allocation7 + $0xa88] sm:$0xf]  ;;  %v7465_v62 = vpop.f32.mrf.mxu1 }
 0x3b4   :  { %7674 = vmatmul.bf16.vlgmr.msrb.gmra.mxu0 %v13744_v39  ;;  %v11709_v52 = vld [vmem:[#allocation7 + $0xba8] sm:$0xf]  ;;  %v13146_v38 = vld [vmem:[#allocation7 + $0xbb4] sm:$0xf0]  ;;  %v7452_v63 = vadd.f32 %v7451_v34, %v7438_v43 }
 0x3b5   :  { %7701 = vmatpush.bf16.msrb.mxu2 %v10990_v19  ;;  %7722 = vmatpush.bf16.msra.mxu0 %v11358_v7  ;;  %v11454_v19 = vor.u32 %v13082_v40, %v11453_v27  ;;  %v11309_v7 = vld [vmem:[#allocation7 + $0x888] sm:$0xf]  ;;  %v11710_v27 = vor.u32 %v13146_v38, %v11709_v52  ;;  %v13074_v32 = vld [vmem:[#allocation7 + $0x974] sm:$0xf0] }
 0x3b6   :  { %7688 = vmatmul.bf16.vlgmr.msrb.gmra.mxu1 %v13746_v57  ;;  %v11310_v12 = vor.u32 %v13046_v36, %v11309_v7  ;;  %v11421_v25 = vld [vmem:[#allocation7 + $0x968] sm:$0xf]  ;;  %v7466_v20 = vadd.f32 %v7465_v62, %v7452_v63  ;;  %v13106_v59 = vld [vmem:[#allocation7 + $0xa74] sm:$0xf0] }
 0x3b7   :  { %7736 = vmatpush.bf16.msra.mxu1 %v11486_v45  ;;  %7715 = vmatpush.bf16.msrb.mxu3 %v11118_v37  ;;  %v11726_v45 = vor.u32 %v13150_v3, %v11725_v58  ;;  %v11549_v40 = vld [vmem:[#allocation7 + $0xa68] sm:$0xf]  ;;  %v13142_v3 = vld [vmem:[#allocation7 + $0xb94] sm:$0xf0] }
 0x3b8   :  { %7702 = vmatmul.bf16.vlgmr.msrb.gmra.mxu2 %v13750_v51  ;;  %v11693_v58 = vld [vmem:[#allocation7 + $0xb88] sm:$0xf]  ;;  %v13038_v7 = vld [vmem:[#allocation7 + $0x854] sm:$0xf0] }
 0x3b9   :  { %7750 = vmatpush.bf16.msra.mxu2 %v11614_v2  ;;  %7723 = vmatpush.bf16.msra.mxu0 %v11342_v28  ;;  %v13078_v2 = vld [vmem:[#allocation7 + $0x994] sm:$0xf0]  ;;  %v11566_v28 = vor.u32 %v13110_v5, %v11565_v61  ;;  %v11405_v36 = vld [vmem:[#allocation7 + $0x948] sm:$0xf] }
 0x3ba   :  { %7716 = vmatmul.bf16.vlgmr.msrb.gmra.mxu3 %v13754_v8  ;;  %v11438_v37 = vor.u32 %v13078_v2, %v11437_v6  ;;  %v13070_v2 = vld [vmem:[#allocation7 + $0x954] sm:$0xf0]  ;;  %v11533_v61 = vld [vmem:[#allocation7 + $0xa48] sm:$0xf]  ;;  %v7453_v62 = vpop.f32.mrf.mxu0 }
 0x3bb   :  { %7737 = vmatpush.bf16.msra.mxu1 %v11470_v13  ;;  %7764 = vmatpush.bf16.msra.mxu3 %v11742_v18  ;;  %v11293_v13 = vld [vmem:[#allocation7 + $0x868] sm:$0xf]  ;;  %v7439_v18 = vpop.f32.mrf.mxu3  ;;  %v7479_v6 = vpop.f32.mrf.mxu2  ;;  %v13102_v5 = vld [vmem:[#allocation7 + $0xa54] sm:$0xf0] }
 0x3bc   :  { %v7440_v49 = vadd.f32 %v7439_v18, %v13941_v14  ;;  %v7480_v34 = vadd.f32 %v7479_v6, %v7466_v20  ;;  %v11677_v14 = vld [vmem:[#allocation7 + $0xb68] sm:$0xf]  ;;  %v13138_v52 = vld [vmem:[#allocation7 + $0xb74] sm:$0xf0] }
 0x3bd   :  { %7751 = vmatpush.bf16.msra.mxu2 %v11598_v46  ;;  %7724 = vmatpush.bf16.msra.mxu0 %v11326_v21  ;;  %v13042_v46 = vld [vmem:[#allocation7 + $0x874] sm:$0xf0]  ;;  %v11422_v21 = vor.u32 %v13074_v32, %v11421_v25  ;;  %v11389_v25 = vld [vmem:[#allocation7 + $0x928] sm:$0xf]  ;;  %v11678_v18 = vor.u32 %v13138_v52, %v11677_v14 }
 0x3be   :  { %v11294_v43 = vor.u32 %v13042_v46, %v11293_v13  ;;  %v7454_v38 = vadd.f32 %v7453_v62, %v7440_v49  ;;  %v11261_v13 = vld [vmem:[#allocation7 + $0x828] sm:$0xf]  ;;  %v13034_v46 = vld [vmem:[#allocation7 + $0x834] sm:$0xf0] }
 0x3bf   :  { %7738 = vmatpush.bf16.msra.mxu1 %v11454_v19  ;;  %7765 = vmatpush.bf16.msra.mxu3 %v11726_v45  ;;  %v11550_v19 = vor.u32 %v13106_v59, %v11549_v40  ;;  %v11694_v45 = vor.u32 %v13142_v3, %v11693_v58  ;;  %v13066_v40 = vld [vmem:[#allocation7 + $0x934] sm:$0xf0]  ;;  %v11517_v20 = vld [vmem:[#allocation7 + $0xa28] sm:$0xf] }
 0x3c0   :  { %v13098_v59 = vld [vmem:[#allocation7 + $0xa34] sm:$0xf0]  ;;  %v11661_v3 = vld [vmem:[#allocation7 + $0xb48] sm:$0xf] }
 0x3c1   :  { %7752 = vmatpush.bf16.msra.mxu2 %v11582_v54  ;;  %7725 = vmatpush.bf16.msra.mxu0 %v11310_v12  ;;  %v11277_v54 = vld [vmem:[#allocation7 + $0x848] sm:$0xf]  ;;  %v7467_v12 = vpop.f32.mrf.mxu1  ;;  %v13134_v49 = vld [vmem:[#allocation7 + $0xb54] sm:$0xf0] }
 0x3c2   :  { %v11278_v63 = vor.u32 %v13038_v7, %v11277_v54  ;;  %v11390_v54 = vor.u32 %v13066_v40, %v11389_v25  ;;  %v11518_v7 = vor.u32 %v13098_v59, %v11517_v20  ;;  %v13062_v6 = vld [vmem:[#allocation7 + $0x914] sm:$0xf0]  ;;  %v11645_v62 = vld [vmem:[#allocation7 + $0xb28] sm:$0xf] }
 0x3c3   :  { %7739 = vmatpush.bf16.msra.mxu1 %v11438_v37  ;;  %7766 = vmatpush.bf16.msra.mxu3 %v11710_v27  ;;  %v11406_v37 = vor.u32 %v13070_v2, %v11405_v36  ;;  %v7468_v27 = vadd.f32 %v7467_v12, %v7454_v38  ;;  %v7493_v32 = vpop.f32.mrf.mxu3  ;;  %v11373_v36 = vld [vmem:[#allocation7 + $0x908] sm:$0xf]  ;;  %v7481_v2 = vpop.f32.mrf.mxu2  ;;  %v13186_v38 = vld [vmem:[#allocation7 + $0xcf4] sm:$0xf0] }
 0x3c4   :  { %v13951_v58 = vadd.f32 %v7493_v32, %v7480_v34  ;;  %v13130_v34 = vld [vmem:[#allocation7 + $0xb34] sm:$0xf0]  ;;  %v11869_v52 = vld [vmem:[#allocation7 + $0xce8] sm:$0xf] }
 0x3c5   :  { %7753 = vmatpush.bf16.msra.mxu2 %v11566_v28  ;;  %7726 = vmatpush.bf16.msra.mxu0 %v11294_v43  ;;  %v11534_v28 = vor.u32 %v13102_v5, %v11533_v61  ;;  %v11262_v43 = vor.u32 %v13034_v46, %v11261_v13  ;;  %v11662_v61 = vor.u32 %v13134_v49, %v11661_v3  ;;  %v13094_v5 = vld [vmem:[#allocation7 + $0xa14] sm:$0xf0]  ;;  %v11629_v20 = vld [vmem:[#allocation7 + $0xb08] sm:$0xf] }
 0x3c6   :  { %v7482_v14 = vadd.f32 %v7481_v2, %v7468_v27  ;;  %v13218_v13 = vld [vmem:[#allocation7 + $0xdf4] sm:$0xf0]  ;;  %v11374_v46 = vor.u32 %v13062_v6, %v11373_v36  ;;  %v11870_v32 = vor.u32 %v13186_v38, %v11869_v52  ;;  %v11853_v2 = vld [vmem:[#allocation7 + $0xcc8] sm:$0xf] }
 0x3c7   :  { %7740 = vmatpush.bf16.msra.mxu1 %v11422_v21  ;;  %7767 = vmatpush.bf16.msra.mxu3 %v11694_v45  ;;  %v11245_v21 = vld [vmem:[#allocation7 + $0x808] sm:$0xf]  ;;  %v13126_v59 = vld [vmem:[#allocation7 + $0xb14] sm:$0xf0] }
 0x3c8   :  { %v11501_v45 = vld [vmem:[#allocation7 + $0xa08] sm:$0xf]  ;;  %v13282_v36 = vld [vmem:[#allocation7 + $0xff4] sm:$0xf0]  ;;  %v11630_v6 = vor.u32 %v13126_v59, %v11629_v20 }
 0x3c9   :  { %7754 = vmatpush.bf16.msra.mxu2 %v11550_v19  ;;  %7727 = vmatpush.bf16.msra.mxu0 %v11278_v63  ;;  %v13030_v19 = vld [vmem:[#allocation7 + $0x814] sm:$0xf0]  ;;  %v11997_v63 = vld [vmem:[#allocation7 + $0xde8] sm:$0xf]  ;;  %v11502_v25 = vor.u32 %v13094_v5, %v11501_v45 }
 0x3ca   :  { %v11246_v12 = vor.u32 %v13030_v19, %v11245_v21  ;;  %v11998_v3 = vor.u32 %v13218_v13, %v11997_v63  ;;  %v11981_v21 = vld [vmem:[#allocation7 + $0xdc8] sm:$0xf]  ;;  %v13214_v19 = vld [vmem:[#allocation7 + $0xdd4] sm:$0xf0] }
 0x3cb   :  { %7741 = vmatpush.bf16.msra.mxu1 %v11406_v37  ;;  %7768 = vmatpush.bf16.msra.mxu3 %v11678_v18  ;;  %v12125_v37 = vld [vmem:[#allocation7 + $0xee8] sm:$0xf]  ;;  %v11646_v18 = vor.u32 %v13130_v34, %v11645_v62  ;;  %v7495_v40 = vpop.f32.mrf.mxu3  ;;  %v13178_v34 = vld [vmem:[#allocation7 + $0xcb4] sm:$0xf0] }
 0x3cc   :  { %v13953_v49 = vadd.f32 %v7495_v40, %v7482_v14  ;;  %v11837_v62 = vld [vmem:[#allocation7 + $0xca8] sm:$0xf]  ;;  %v13210_v38 = vld [vmem:[#allocation7 + $0xdb4] sm:$0xf0] }
 0x3cd   :  { %7755 = vmatpush.bf16.msra.mxu2 %v11534_v28  ;;  %7728 = vmatpush.bf16.msra.mxu0 %v11262_v43  ;;  %v13250_v28 = vld [vmem:[#allocation7 + $0xef4] sm:$0xf0]  ;;  %v11965_v14 = vld [vmem:[#allocation7 + $0xda8] sm:$0xf] }
 0x3ce   :  { %v12126_v27 = vor.u32 %v13250_v28, %v12125_v37  ;;  %v13182_v43 = vld [vmem:[#allocation7 + $0xcd4] sm:$0xf0]  ;;  %v12093_v63 = vld [vmem:[#allocation7 + $0xea8] sm:$0xf]  ;;  %v11838_v28 = vor.u32 %v13178_v34, %v11837_v62 }
 0x3cf   :  { %7742 = vmatpush.bf16.msra.mxu1 %v11390_v54  ;;  %7769 = vmatpush.bf16.msra.mxu3 %v11662_v61  ;;  %v13246_v54 = vld [vmem:[#allocation7 + $0xed4] sm:$0xf0]  ;;  %v11854_v45 = vor.u32 %v13182_v43, %v11853_v2  ;;  %v11982_v61 = vor.u32 %v13214_v19, %v11981_v21  ;;  %v12237_v13 = vld [vmem:[#allocation7 + $0xfc8] sm:$0xf] }
 0x3d0   :  { %v12110_v5 = vor.u32 %v13246_v54, %v12109_v53  ;;  %v13278_v37 = vld [vmem:[#allocation7 + $0xfd4] sm:$0xf0]  ;;  %v11966_v53 = vor.u32 %v13210_v38, %v11965_v14  ;;  %v12077_v59 = vld [vmem:[#allocation7 + $0xe88] sm:$0xf] }
 0x3d1   :  { %7756 = vmatpush.bf16.msra.mxu2 %v11518_v7  ;;  %7729 = vmatpush.bf16.msra.mxu0 %v11246_v12  ;;  %v12253_v7 = vld [vmem:[#allocation7 + $0xfe8] sm:$0xf]  ;;  %v13242_v12 = vld [vmem:[#allocation7 + $0xeb4] sm:$0xf0]  ;;  %v12238_v40 = vor.u32 %v13278_v37, %v12237_v13 }
 0x3d2   :  { %v12254_v52 = vor.u32 %v13282_v36, %v12253_v7  ;;  %v13206_v20 = vld [vmem:[#allocation7 + $0xd94] sm:$0xf0]  ;;  %v12221_v43 = vld [vmem:[#allocation7 + $0xfa8] sm:$0xf] }
 0x3d3   :  { %7743 = vmatpush.bf16.msra.mxu1 %v11374_v46  ;;  %7770 = vmatpush.bf16.msra.mxu3 %v11646_v18  ;;  %v12094_v46 = vor.u32 %v13242_v12, %v12093_v63  ;;  %v13174_v18 = vld [vmem:[#allocation7 + $0xc94] sm:$0xf0]  ;;  %v7521_v2 = vpop.f32.mrf.mxu1  ;;  %v12061_v14 = vld [vmem:[#allocation7 + $0xe68] sm:$0xf] }
 0x3d4   :  { %7730 = vmatmul.bf16.vlgmr.msra.gmra.mxu0 %v13820_v26  ;;  %v13274_v21 = vld [vmem:[#allocation7 + $0xfb4] sm:$0xf0]  ;;  %v12205_v38 = vld [vmem:[#allocation7 + $0xf88] sm:$0xf] }
 0x3d5   :  { %7757 = vmatpush.bf16.msra.mxu2 %v11502_v25  ;;  %7778 = vmatpush.bf16.msrb.mxu0 %v11870_v32  ;;  %v11821_v25 = vld [vmem:[#allocation7 + $0xc88] sm:$0xf]  ;;  %v12222_v62 = vor.u32 %v13274_v21, %v12221_v43  ;;  %v13202_v34 = vld [vmem:[#allocation7 + $0xd74] sm:$0xf0] }
 0x3d6   :  { %7744 = vmatmul.bf16.vlgmr.msra.gmra.mxu1 %v13822_v33  ;;  %v11949_v32 = vld [vmem:[#allocation7 + $0xd88] sm:$0xf]  ;;  %v11822_v54 = vor.u32 %v13174_v18, %v11821_v25  ;;  %v13270_v63 = vld [vmem:[#allocation7 + $0xf94] sm:$0xf0] }
 0x3d7   :  { %7792 = vmatpush.bf16.msrb.mxu1 %v11998_v3  ;;  %7771 = vmatpush.bf16.msra.mxu3 %v11630_v6  ;;  %v13238_v3 = vld [vmem:[#allocation7 + $0xe94] sm:$0xf0]  ;;  %v11950_v7 = vor.u32 %v13206_v20, %v11949_v32  ;;  %v11805_v6 = vld [vmem:[#allocation7 + $0xc68] sm:$0xf]  ;;  %v12206_v25 = vor.u32 %v13270_v63, %v12205_v38 }
 0x3d8   :  { %7758 = vmatmul.bf16.vlgmr.msra.gmra.mxu2 %v13826_v50  ;;  %v12078_v36 = vor.u32 %v13238_v3, %v12077_v59  ;;  %v11789_v37 = vld [vmem:[#allocation7 + $0xc48] sm:$0xf]  ;;  %v13198_v18 = vld [vmem:[#allocation7 + $0xd54] sm:$0xf0] }
 0x3d9   :  { %7806 = vmatpush.bf16.msrb.mxu2 %v12126_v27  ;;  %7779 = vmatpush.bf16.msrb.mxu0 %v11854_v45  ;;  %v7507_v27 = vpop.f32.mrf.mxu0  ;;  %v13170_v45 = vld [vmem:[#allocation7 + $0xc74] sm:$0xf0]  ;;  %v12045_v32 = vld [vmem:[#allocation7 + $0xe48] sm:$0xf] }
 0x3da   :  { %7772 = vmatmul.bf16.vlgmr.msra.gmra.mxu3 %v13828_v9  ;;  %v7508_v19 = vadd.f32 %v7507_v27, %v13951_v58  ;;  %v11806_v12 = vor.u32 %v13170_v45, %v11805_v6  ;;  %v12189_v3 = vld [vmem:[#allocation7 + $0xf68] sm:$0xf]  ;;  %v13266_v27 = vld [vmem:[#allocation7 + $0xf74] sm:$0xf0] }
 0x3db   :  { %7793 = vmatpush.bf16.msrb.mxu1 %v11982_v61  ;;  %7820 = vmatpush.bf16.msrb.mxu3 %v12254_v52  ;;  %v11933_v61 = vld [vmem:[#allocation7 + $0xd68] sm:$0xf]  ;;  %v13234_v52 = vld [vmem:[#allocation7 + $0xe74] sm:$0xf0]  ;;  %v7523_v21 = vpop.f32.mrf.mxu1 }
 0x3dc   :  { %v11934_v58 = vor.u32 %v13202_v34, %v11933_v61  ;;  %v12062_v13 = vor.u32 %v13234_v52, %v12061_v14  ;;  %v11901_v6 = vld [vmem:[#allocation7 + $0xd28] sm:$0xf]  ;;  %v12190_v61 = vor.u32 %v13266_v27, %v12189_v3  ;;  %v13226_v14 = vld [vmem:[#allocation7 + $0xe34] sm:$0xf0]  ;;  %v12800_v3 = vld [vmem:[#allocation7 + $0xec] sm:$0xf] }
 0x3dd   :  { %7807 = vmatpush.bf16.msrb.mxu2 %v12110_v5  ;;  %7780 = vmatpush.bf16.msrb.mxu0 %v11838_v28  ;;  %v7522_v5 = vadd.f32 %v7521_v2, %v7508_v19  ;;  %v13166_v28 = vld [vmem:[#allocation7 + $0xc54] sm:$0xf0]  ;;  %v12029_v34 = vld [vmem:[#allocation7 + $0xe28] sm:$0xf]  ;;  %v10335_v27 = vld [vmem:[#allocation7 + $0xf8] sm:$0xf0] }
 0x3de   :  { %v11790_v43 = vor.u32 %v13166_v28, %v11789_v37  ;;  %v12173_v38 = vld [vmem:[#allocation7 + $0xf48] sm:$0xf]  ;;  %v12030_v37 = vor.u32 %v13226_v14, %v12029_v34  ;;  %v13254_v34 = vld [vmem:[#allocation7 + $0xf14] sm:$0xf0] }
 0x3df   :  { %7794 = vmatpush.bf16.msrb.mxu1 %v11966_v53  ;;  %7821 = vmatpush.bf16.msrb.mxu3 %v12238_v40  ;;  %v11917_v53 = vld [vmem:[#allocation7 + $0xd48] sm:$0xf]  ;;  %v13230_v40 = vld [vmem:[#allocation7 + $0xe54] sm:$0xf0] }
 0x3e0   :  { %v11918_v19 = vor.u32 %v13198_v18, %v11917_v53  ;;  %v11885_v28 = vld [vmem:[#allocation7 + $0xd08] sm:$0xf]  ;;  %v13190_v53 = vld [vmem:[#allocation7 + $0xd14] sm:$0xf0] }
 0x3e1   :  { %7808 = vmatpush.bf16.msrb.mxu2 %v12094_v46  ;;  %7781 = vmatpush.bf16.msrb.mxu0 %v11822_v54  ;;  %v7535_v46 = vpop.f32.mrf.mxu2  ;;  %v7509_v59 = vpop.f32.mrf.mxu0  ;;  %v12046_v54 = vor.u32 %v13230_v40, %v12045_v32  ;;  %v13222_v32 = vld [vmem:[#allocation7 + $0xe14] sm:$0xf0]  ;;  %v12157_v40 = vld [vmem:[#allocation7 + $0xf28] sm:$0xf] }
 0x3e2   :  { %v7536_v20 = vadd.f32 %v7535_v46, %v7522_v5  ;;  %v7510_v2 = vadd.f32 %v7509_v59, %v13953_v49  ;;  %v13194_v5 = vld [vmem:[#allocation7 + $0xd34] sm:$0xf0]  ;;  %v12013_v46 = vld [vmem:[#allocation7 + $0xe08] sm:$0xf] }
 0x3e3   :  { %7795 = vmatpush.bf16.msrb.mxu1 %v11950_v7  ;;  %7822 = vmatpush.bf16.msrb.mxu3 %v12222_v62  ;;  %v11773_v7 = vld [vmem:[#allocation7 + $0xc28] sm:$0xf]  ;;  %v7549_v62 = vpop.f32.mrf.mxu3  ;;  %v13262_v49 = vld [vmem:[#allocation7 + $0xf54] sm:$0xf0] }
 0x3e4   :  { %v7524_v45 = vadd.f32 %v7523_v21, %v7510_v2  ;;  %v13961_v52 = vadd.f32 %v7549_v62, %v7536_v20  ;;  %v12174_v18 = vor.u32 %v13262_v49, %v12173_v38  ;;  %v13258_v20 = vld [vmem:[#allocation7 + $0xf34] sm:$0xf0]  ;;  %v12832_v2 = vld [vmem:[#allocation7 + $0x1ec] sm:$0xf]  ;;  %v10463_v21 = vld [vmem:[#allocation7 + $0x1f8] sm:$0xf0] }
 0x3e5   :  { %7809 = vmatpush.bf16.msrb.mxu2 %v12078_v36  ;;  %7782 = vmatpush.bf16.msrb.mxu0 %v11806_v12  ;;  %v13162_v36 = vld [vmem:[#allocation7 + $0xc34] sm:$0xf0]  ;;  %v11757_v12 = vld [vmem:[#allocation7 + $0xc08] sm:$0xf]  ;;  %v10466_v14 = vor.u32 %v12832_v2, %v10463_v21  ;;  %v12796_v49 = vld [vmem:[#allocation7 + $0xcc] sm:$0xf] }
 0x3e6   :  { %v11774_v63 = vor.u32 %v13162_v36, %v11773_v7  ;;  %v11886_v7 = vor.u32 %v13190_v53, %v11885_v28  ;;  %v12014_v36 = vor.u32 %v13222_v32, %v12013_v46  ;;  %v10719_v28 = vld [vmem:[#allocation7 + $0x3f8] sm:$0xf0]  ;;  %v12856_v2 = vld [vmem:[#allocation7 + $0x2ac] sm:$0xf] }
 0x3e7   :  { %7796 = vmatpush.bf16.msrb.mxu1 %v11934_v58  ;;  %7823 = vmatpush.bf16.msrb.mxu3 %v12206_v25  ;;  %v13158_v58 = vld [vmem:[#allocation7 + $0xc14] sm:$0xf0]  ;;  %v12892_v21 = vld [vmem:[#allocation7 + $0x3cc] sm:$0xf] }
 0x3e9   :  { %7810 = vmatpush.bf16.msrb.mxu2 %v12062_v13  ;;  %7783 = vmatpush.bf16.msrb.mxu0 %v11790_v43  ;;  %v11902_v13 = vor.u32 %v13194_v5, %v11901_v6  ;;  %v7537_v25 = vpop.f32.mrf.mxu2  ;;  %v11758_v43 = vor.u32 %v13158_v58, %v11757_v12  ;;  %v12158_v6 = vor.u32 %v13258_v20, %v12157_v40  ;;  %v12141_v5 = vld [vmem:[#allocation7 + $0xf08] sm:$0xf]  ;;  %v12828_v12 = vld [vmem:[#allocation7 + $0x1cc] sm:$0xf]  ;;  %v10447_v58 = vld [vmem:[#allocation7 + $0x1d8] sm:$0xf0] }
 0x3ea   :  { %v7538_v59 = vadd.f32 %v7537_v25, %v7524_v45  ;;  %v12860_v25 = vld [vmem:[#allocation7 + $0x2cc] sm:$0xf]  ;;  %v12142_v53 = vor.u32 %v13254_v34, %v12141_v5  ;;  %v10303_v20 = vld [vmem:[#allocation7 + $0xb8] sm:$0xf0] }
 0x3eb   :  { %7797 = vmatpush.bf16.msrb.mxu1 %v11918_v19  ;;  %7824 = vmatpush.bf16.msrb.mxu3 %v12190_v61  ;;  %v12864_v19 = vld [vmem:[#allocation7 + $0x2ec] sm:$0xf]  ;;  %v10338_v61 = vor.u32 %v12800_v3, %v10335_v27  ;;  %v7551_v62 = vpop.f32.mrf.mxu3  ;;  %v10431_v27 = vld [vmem:[#allocation7 + $0x1b8] sm:$0xf0] }
 0x3ec   :  { %v13963_v38 = vadd.f32 %v7551_v62, %v7538_v59  ;;  %v12792_v40 = vld [vmem:[#allocation7 + $0xac] sm:$0xf]  ;;  %v10415_v34 = vld [vmem:[#allocation7 + $0x198] sm:$0xf0] }
 0x3ed   :  { %7811 = vmatpush.bf16.msrb.mxu2 %v12046_v54  ;;  %7784 = vmatpush.bf16.msrb.mxu0 %v11774_v63  ;;  %v10591_v54 = vld [vmem:[#allocation7 + $0x2f8] sm:$0xf0]  ;;  %v12824_v59 = vld [vmem:[#allocation7 + $0x1ac] sm:$0xf] }
 0x3ee   :  { %v10594_v45 = vor.u32 %v12864_v19, %v10591_v54  ;;  %v10319_v63 = vld [vmem:[#allocation7 + $0xd8] sm:$0xf0]  ;;  %v10306_v54 = vor.u32 %v12792_v40, %v10303_v20  ;;  %v12820_v62 = vld [vmem:[#allocation7 + $0x18c] sm:$0xf] }
 0x3ef   :  { %7798 = vmatpush.bf16.msrb.mxu1 %v11902_v13  ;;  %7825 = vmatpush.bf16.msrb.mxu3 %v12174_v18  ;;  %v10575_v13 = vld [vmem:[#allocation7 + $0x2d8] sm:$0xf0]  ;;  %v10322_v46 = vor.u32 %v12796_v49, %v10319_v63  ;;  %v10450_v18 = vor.u32 %v12828_v12, %v10447_v58  ;;  %v12888_v12 = vld [vmem:[#allocation7 + $0x3ac] sm:$0xf] }
 0x3f0   :  { %v10578_v32 = vor.u32 %v12860_v25, %v10575_v13  ;;  %v10703_v19 = vld [vmem:[#allocation7 + $0x3d8] sm:$0xf0] }
 0x3f1   :  { %7812 = vmatpush.bf16.msrb.mxu2 %v12030_v37  ;;  %7785 = vmatpush.bf16.msrb.mxu0 %v11758_v43  ;;  %v12896_v37 = vld [vmem:[#allocation7 + $0x3ec] sm:$0xf]  ;;  %v10559_v43 = vld [vmem:[#allocation7 + $0x2b8] sm:$0xf0]  ;;  %v10706_v5 = vor.u32 %v12892_v21, %v10703_v19  ;;  %v7563_v49 = vpop.f32.mrf.mxu0 }
 0x3f2   :  { %v10722_v3 = vor.u32 %v12896_v37, %v10719_v28  ;;  %v10687_v58 = vld [vmem:[#allocation7 + $0x3b8] sm:$0xf0]  ;;  %v7564_v25 = vadd.f32 %v7563_v49, %v13961_v52  ;;  %v10418_v37 = vor.u32 %v12820_v62, %v10415_v34  ;;  %v12780_v19 = vld [vmem:[#allocation7 + $0x4c] sm:$0xf] }
 0x3f3   :  { %7799 = vmatpush.bf16.msrb.mxu1 %v11886_v7  ;;  %7826 = vmatpush.bf16.msrb.mxu3 %v12158_v6  ;;  %v10434_v7 = vor.u32 %v12824_v59, %v10431_v27  ;;  %v12788_v6 = vld [vmem:[#allocation7 + $0x8c] sm:$0xf]  ;;  %v7577_v63 = vpop.f32.mrf.mxu1  ;;  %v10690_v40 = vor.u32 %v12888_v12, %v10687_v58  ;;  %v10399_v20 = vld [vmem:[#allocation7 + $0x178] sm:$0xf0] }
 0x3f4   :  { %7786 = vmatmul.bf16.vlgmr.msrb.gmra.mxu0 %v13863_v1  ;;  %v12848_v59 = vld [vmem:[#allocation7 + $0x26c] sm:$0xf]  ;;  %v10655_v49 = vld [vmem:[#allocation7 + $0x378] sm:$0xf0] }
 0x3f5   :  { %7813 = vmatpush.bf16.msrb.mxu2 %v12014_v36  ;;  %7834 = vmatpush.bf16.msra.mxu0 %v10338_v61  ;;  %v10562_v36 = vor.u32 %v12856_v2, %v10559_v43  ;;  %v10287_v61 = vld [vmem:[#allocation7 + $0x98] sm:$0xf0]  ;;  %v12884_v27 = vld [vmem:[#allocation7 + $0x38c] sm:$0xf] }
 0x3f6   :  { %7800 = vmatmul.bf16.vlgmr.msrb.gmra.mxu1 %v13867_v31  ;;  %v10290_v13 = vor.u32 %v12788_v6, %v10287_v61  ;;  %v10671_v2 = vld [vmem:[#allocation7 + $0x398] sm:$0xf0]  ;;  %v12844_v62 = vld [vmem:[#allocation7 + $0x24c] sm:$0xf] }
 0x3f7   :  { %7848 = vmatpush.bf16.msra.mxu1 %v10466_v14  ;;  %7827 = vmatpush.bf16.msrb.mxu3 %v12142_v53  ;;  %v12852_v14 = vld [vmem:[#allocation7 + $0x28c] sm:$0xf]  ;;  %v10674_v6 = vor.u32 %v12884_v27, %v10671_v2  ;;  %v10383_v61 = vld [vmem:[#allocation7 + $0x158] sm:$0xf0] }
 0x3f8   :  { %7814 = vmatmul.bf16.vlgmr.msrb.gmra.mxu2 %v13865_v42  ;;  %v12784_v53 = vld [vmem:[#allocation7 + $0x6c] sm:$0xf] }
 0x3f9   :  { %7862 = vmatpush.bf16.msra.mxu2 %v10594_v45  ;;  %7835 = vmatpush.bf16.msra.mxu0 %v10322_v46  ;;  %v10543_v45 = vld [vmem:[#allocation7 + $0x298] sm:$0xf0]  ;;  %v12876_v27 = vld [vmem:[#allocation7 + $0x34c] sm:$0xf] }
 0x3fa   :  { %7828 = vmatmul.bf16.vlgmr.msrb.gmra.mxu3 %v13872_v41  ;;  %v10546_v28 = vor.u32 %v12852_v14, %v10543_v45  ;;  %v10271_v46 = vld [vmem:[#allocation7 + $0x78] sm:$0xf0]  ;;  %v7565_v14 = vpop.f32.mrf.mxu0  ;;  %v12880_v45 = vld [vmem:[#allocation7 + $0x36c] sm:$0xf] }
 0x3fb   :  { %7849 = vmatpush.bf16.msra.mxu1 %v10450_v18  ;;  %7876 = vmatpush.bf16.msra.mxu3 %v10722_v3  ;;  %v12816_v18 = vld [vmem:[#allocation7 + $0x16c] sm:$0xf]  ;;  %v10527_v3 = vld [vmem:[#allocation7 + $0x278] sm:$0xf0]  ;;  %v10274_v43 = vor.u32 %v12784_v53, %v10271_v46  ;;  %v7579_v58 = vpop.f32.mrf.mxu1 }
 0x3fc   :  { %v10402_v52 = vor.u32 %v12816_v18, %v10399_v20  ;;  %v10530_v21 = vor.u32 %v12848_v59, %v10527_v3  ;;  %v12808_v53 = vld [vmem:[#allocation7 + $0x12c] sm:$0xf]  ;;  %v10658_v18 = vor.u32 %v12880_v45, %v10655_v49  ;;  %v10495_v59 = vld [vmem:[#allocation7 + $0x238] sm:$0xf0] }
 0x3fd   :  { %7863 = vmatpush.bf16.msra.mxu2 %v10578_v32  ;;  %7836 = vmatpush.bf16.msra.mxu0 %v10306_v54  ;;  %v7578_v32 = vadd.f32 %v7577_v63, %v7564_v25  ;;  %v10255_v54 = vld [vmem:[#allocation7 + $0x58] sm:$0xf0]  ;;  %v7566_v63 = vadd.f32 %v7565_v14, %v13963_v38  ;;  %v12840_v20 = vld [vmem:[#allocation7 + $0x22c] sm:$0xf] }
 0x3fe   :  { %v10258_v12 = vor.u32 %v12780_v19, %v10255_v54  ;;  %v10639_v38 = vld [vmem:[#allocation7 + $0x358] sm:$0xf0]  ;;  %v10498_v19 = vor.u32 %v12840_v20, %v10495_v59  ;;  %v12804_v54 = vld [vmem:[#allocation7 + $0x10c] sm:$0xf] }
 0x3ff   :  { %7850 = vmatpush.bf16.msra.mxu1 %v10434_v7  ;;  %7877 = vmatpush.bf16.msra.mxu3 %v10706_v5  ;;  %v12812_v7 = vld [vmem:[#allocation7 + $0x14c] sm:$0xf]  ;;  %v10511_v5 = vld [vmem:[#allocation7 + $0x258] sm:$0xf0]  ;;  %v7580_v46 = vadd.f32 %v7579_v58, %v7566_v63 }
 0x400   :  { %v10386_v25 = vor.u32 %v12812_v7, %v10383_v61  ;;  %v10351_v7 = vld [vmem:[#allocation7 + $0x118] sm:$0xf0]  ;;  %v10642_v61 = vor.u32 %v12876_v27, %v10639_v38  ;;  %v12928_v45 = vld [vmem:[#allocation7 + $0x4ec] sm:$0xf] }
 0x401   :  { %7864 = vmatpush.bf16.msra.mxu2 %v10562_v36  ;;  %7837 = vmatpush.bf16.msra.mxu0 %v10290_v13  ;;  %v7591_v36 = vpop.f32.mrf.mxu2  ;;  %v10514_v13 = vor.u32 %v12844_v62, %v10511_v5  ;;  %v10479_v62 = vld [vmem:[#allocation7 + $0x218] sm:$0xf0]  ;;  %v12872_v5 = vld [vmem:[#allocation7 + $0x32c] sm:$0xf] }
 0x402   :  { %v7592_v34 = vadd.f32 %v7591_v36, %v7578_v32  ;;  %v10367_v32 = vld [vmem:[#allocation7 + $0x138] sm:$0xf0]  ;;  %v12836_v36 = vld [vmem:[#allocation7 + $0x20c] sm:$0xf] }
 0x403   :  { %7851 = vmatpush.bf16.msra.mxu1 %v10418_v37  ;;  %7878 = vmatpush.bf16.msra.mxu3 %v10690_v40  ;;  %v12776_v37 = vld [vmem:[#allocation7 + $0x2c] sm:$0xf]  ;;  %v7605_v40 = vpop.f32.mrf.mxu3  ;;  %v10847_v49 = vld [vmem:[#allocation7 + $0x4f8] sm:$0xf0] }
 0x404   :  { %v13971_v3 = vadd.f32 %v7605_v40, %v7592_v34  ;;  %v10623_v34 = vld [vmem:[#allocation7 + $0x338] sm:$0xf0]  ;;  %v12960_v63 = vld [vmem:[#allocation7 + $0x5ec] sm:$0xf] }
 0x405   :  { %7865 = vmatpush.bf16.msra.mxu2 %v10546_v28  ;;  %7838 = vmatpush.bf16.msra.mxu0 %v10274_v43  ;;  %v10239_v28 = vld [vmem:[#allocation7 + $0x38] sm:$0xf0]  ;;  %v12772_v43 = vld [vmem:[#allocation7 + $0xc] sm:$0xf] }
 0x406   :  { %v10242_v2 = vor.u32 %v12776_v37, %v10239_v28  ;;  %v10975_v58 = vld [vmem:[#allocation7 + $0x5f8] sm:$0xf0]  ;;  %v10354_v37 = vor.u32 %v12804_v54, %v10351_v7  ;;  %v10482_v28 = vor.u32 %v12836_v36, %v10479_v62  ;;  %v12924_v38 = vld [vmem:[#allocation7 + $0x4cc] sm:$0xf] }
 0x407   :  { %7852 = vmatpush.bf16.msra.mxu1 %v10402_v52  ;;  %7879 = vmatpush.bf16.msra.mxu3 %v10674_v6  ;;  %v10223_v52 = vld [vmem:[#allocation7 + $0x18] sm:$0xf0]  ;;  %v10978_v59 = vor.u32 %v12960_v63, %v10975_v58  ;;  %v12984_v63 = vld [vmem:[#allocation7 + $0x6ac] sm:$0xf] }
 0x408   :  { %v10607_v20 = vld [vmem:[#allocation7 + $0x318] sm:$0xf0]  ;;  %v13020_v58 = vld [vmem:[#allocation7 + $0x7cc] sm:$0xf] }
 0x409   :  { %7866 = vmatpush.bf16.msra.mxu2 %v10530_v21  ;;  %7839 = vmatpush.bf16.msra.mxu0 %v10258_v12  ;;  %v10370_v21 = vor.u32 %v12808_v53, %v10367_v32  ;;  %v7593_v6 = vpop.f32.mrf.mxu2  ;;  %v10226_v12 = vor.u32 %v12772_v43, %v10223_v52  ;;  %v10626_v53 = vor.u32 %v12872_v5, %v10623_v34  ;;  %v12868_v32 = vld [vmem:[#allocation7 + $0x30c] sm:$0xf]  ;;  %v10959_v52 = vld [vmem:[#allocation7 + $0x5d8] sm:$0xf0] }
 0x40a   :  { %v7594_v14 = vadd.f32 %v7593_v6, %v7580_v46  ;;  %v12956_v43 = vld [vmem:[#allocation7 + $0x5cc] sm:$0xf]  ;;  %v11231_v54 = vld [vmem:[#allocation7 + $0x7f8] sm:$0xf0]  ;;  %v10610_v7 = vor.u32 %v12868_v32, %v10607_v20 }
 0x40b   :  { %7853 = vmatpush.bf16.msra.mxu1 %v10386_v25  ;;  %7880 = vmatpush.bf16.msra.mxu3 %v10658_v18  ;;  %v12992_v25 = vld [vmem:[#allocation7 + $0x6ec] sm:$0xf]  ;;  %v10850_v18 = vor.u32 %v12928_v45, %v10847_v49  ;;  %v7607_v40 = vpop.f32.mrf.mxu3  ;;  %v10815_v34 = vld [vmem:[#allocation7 + $0x4b8] sm:$0xf0] }
 0x40c   :  { %v13973_v27 = vadd.f32 %v7607_v40, %v7594_v14  ;;  %v12988_v6 = vld [vmem:[#allocation7 + $0x6cc] sm:$0xf]  ;;  %v10943_v49 = vld [vmem:[#allocation7 + $0x5b8] sm:$0xf0] }
 0x40d   :  { %7867 = vmatpush.bf16.msra.mxu2 %v10514_v13  ;;  %7840 = vmatpush.bf16.msra.mxu0 %v10242_v2  ;;  %v11103_v13 = vld [vmem:[#allocation7 + $0x6f8] sm:$0xf0]  ;;  %v12920_v5 = vld [vmem:[#allocation7 + $0x4ac] sm:$0xf] }
 0x40e   :  { %v11106_v46 = vor.u32 %v12992_v25, %v11103_v13  ;;  %v10831_v2 = vld [vmem:[#allocation7 + $0x4d8] sm:$0xf0]  ;;  %v12952_v14 = vld [vmem:[#allocation7 + $0x5ac] sm:$0xf]  ;;  %v10818_v13 = vor.u32 %v12920_v5, %v10815_v34 }
 0x40f   :  { %7854 = vmatpush.bf16.msra.mxu1 %v10370_v21  ;;  %7881 = vmatpush.bf16.msra.mxu3 %v10642_v61  ;;  %v11087_v21 = vld [vmem:[#allocation7 + $0x6d8] sm:$0xf0]  ;;  %v10834_v36 = vor.u32 %v12924_v38, %v10831_v2  ;;  %v10962_v61 = vor.u32 %v12956_v43, %v10959_v52  ;;  %v12980_v32 = vld [vmem:[#allocation7 + $0x68c] sm:$0xf]  ;;  %v13303_v2 = vld [vmem:[#allocation2 + $0x10] sm:$0xff] }
 0x410   :  { %v11090_v62 = vor.u32 %v12988_v6, %v11087_v21  ;;  %v11215_v25 = vld [vmem:[#allocation7 + $0x7d8] sm:$0xf0]  ;;  %v13012_v34 = vld [vmem:[#allocation7 + $0x78c] sm:$0xf] }
 0x411   :  { %7868 = vmatpush.bf16.msra.mxu2 %v10498_v19  ;;  %7841 = vmatpush.bf16.msra.mxu0 %v10226_v12  ;;  %v13024_v19 = vld [vmem:[#allocation7 + $0x7ec] sm:$0xf]  ;;  %v11071_v12 = vld [vmem:[#allocation7 + $0x6b8] sm:$0xf0] }
 0x412   :  { %v11234_v45 = vor.u32 %v13024_v19, %v11231_v54  ;;  %v10927_v40 = vld [vmem:[#allocation7 + $0x598] sm:$0xf0]  ;;  %v12912_v19 = vld [vmem:[#allocation7 + $0x46c] sm:$0xf] }
 0x413   :  { %7855 = vmatpush.bf16.msra.mxu1 %v10354_v37  ;;  %7882 = vmatpush.bf16.msra.mxu3 %v10626_v53  ;;  %v10946_v37 = vor.u32 %v12952_v14, %v10943_v49  ;;  %v12916_v53 = vld [vmem:[#allocation7 + $0x48c] sm:$0xf]  ;;  %v11055_v20 = vld [vmem:[#allocation7 + $0x698] sm:$0xf0] }
 0x414   :  { %7842 = vmatmul.bf16.vlgmr.msra.gmra.mxu0 %v14111_v0  ;;  %v12948_v0 = vld [vmem:[#allocation7 + $0x58c] sm:$0xf]  ;;  %v11199_v38 = vld [vmem:[#allocation7 + $0x7b8] sm:$0xf0]  ;;  %v11058_v21 = vor.u32 %v12980_v32, %v11055_v20  ;;  %v13304_v20 = vld [vmem:[#allocation2 + $0x30] sm:$0xff] }
 0x415   :  { %7869 = vmatpush.bf16.msra.mxu2 %v10482_v28  ;;  %7890 = vmatpush.bf16.msrb.mxu0 %v10850_v18  ;;  %v11074_v28 = vor.u32 %v12984_v63, %v11071_v12  ;;  %v10799_v18 = vld [vmem:[#allocation7 + $0x498] sm:$0xf0]  ;;  %v10930_v6 = vor.u32 %v12948_v0, %v10927_v40  ;;  %v12908_v12 = vld [vmem:[#allocation7 + $0x44c] sm:$0xf] }
 0x416   :  { %7856 = vmatmul.bf16.vlgmr.msra.gmra.mxu1 %v14112_v24  ;;  %v11218_v24 = vor.u32 %v13020_v58, %v11215_v25  ;;  %v10802_v52 = vor.u32 %v12916_v53, %v10799_v18  ;;  %v10783_v54 = vld [vmem:[#allocation7 + $0x478] sm:$0xf0]  ;;  %v12940_v25 = vld [vmem:[#allocation7 + $0x54c] sm:$0xf] }
 0x417   :  { %7904 = vmatpush.bf16.msrb.mxu1 %v10978_v59  ;;  %7883 = vmatpush.bf16.msra.mxu3 %v10610_v7  ;;  %v7633_v59 = vpop.f32.mrf.mxu1  ;;  %v12944_v7 = vld [vmem:[#allocation7 + $0x56c] sm:$0xf]  ;;  %v11039_v5 = vld [vmem:[#allocation7 + $0x678] sm:$0xf0] }
 0x418   :  { %7870 = vmatmul.bf16.vlgmr.msra.gmra.mxu2 %v14113_v16  ;;  %v7619_v16 = vpop.f32.mrf.mxu0  ;;  %v11183_v14 = vld [vmem:[#allocation7 + $0x798] sm:$0xf0]  ;;  %v12972_v53 = vld [vmem:[#allocation7 + $0x64c] sm:$0xf] }
 0x419   :  { %7918 = vmatpush.bf16.msrb.mxu2 %v11106_v46  ;;  %7891 = vmatpush.bf16.msrb.mxu0 %v10834_v36  ;;  %v13016_v46 = vld [vmem:[#allocation7 + $0x7ac] sm:$0xf]  ;;  %v7620_v43 = vadd.f32 %v13303_v2, %v7619_v16  ;;  %v10767_v58 = vld [vmem:[#allocation7 + $0x458] sm:$0xf0] }
 0x41a   :  { %7884 = vmatmul.bf16.vlgmr.msra.gmra.mxu3 %v14114_v35  ;;  %v12976_v35 = vld [vmem:[#allocation7 + $0x66c] sm:$0xf]  ;;  %v11023_v18 = vld [vmem:[#allocation7 + $0x658] sm:$0xf0] }
 0x41b   :  { %7905 = vmatpush.bf16.msrb.mxu1 %v10962_v61  ;;  %7932 = vmatpush.bf16.msrb.mxu3 %v11234_v45  ;;  %v7634_v36 = vadd.f32 %v7633_v59, %v7620_v43  ;;  %v11202_v61 = vor.u32 %v13016_v46, %v11199_v38  ;;  %v10786_v45 = vor.u32 %v12912_v19, %v10783_v54  ;;  %v13008_v40 = vld [vmem:[#allocation7 + $0x76c] sm:$0xf]  ;;  %v11167_v32 = vld [vmem:[#allocation7 + $0x778] sm:$0xf0] }
 0x41c   :  { %v11042_v63 = vor.u32 %v12976_v35, %v11039_v5  ;;  %v10770_v59 = vor.u32 %v12908_v12, %v10767_v58  ;;  %v11026_v2 = vor.u32 %v12972_v53, %v11023_v18  ;;  %v12904_v43 = vld [vmem:[#allocation7 + $0x42c] sm:$0xf]  ;;  %v11170_v19 = vor.u32 %v13008_v40, %v11167_v32  ;;  %v11151_v5 = vld [vmem:[#allocation7 + $0x758] sm:$0xf0] }
 0x41d   :  { %7919 = vmatpush.bf16.msrb.mxu2 %v11090_v62  ;;  %7892 = vmatpush.bf16.msrb.mxu0 %v10818_v13  ;;  %v10911_v62 = vld [vmem:[#allocation7 + $0x578] sm:$0xf0]  ;;  %v7647_v13 = vpop.f32.mrf.mxu2  ;;  %v7661_v54 = vpop.f32.mrf.mxu3  ;;  %v13004_v35 = vld [vmem:[#allocation7 + $0x74c] sm:$0xf] }
 0x41e   :  { %v10914_v49 = vor.u32 %v12944_v7, %v10911_v62  ;;  %v7648_v0 = vadd.f32 %v7647_v13, %v7634_v36  ;;  %v10879_v7 = vld [vmem:[#allocation7 + $0x538] sm:$0xf0]  ;;  %v12968_v36 = vld [vmem:[#allocation7 + $0x62c] sm:$0xf] }
 0x41f   :  { %7906 = vmatpush.bf16.msrb.mxu1 %v10946_v37  ;;  %7933 = vmatpush.bf16.msrb.mxu3 %v11218_v24  ;;  %v11186_v37 = vor.u32 %v13012_v34, %v11183_v14  ;;  %v7635_v46 = vpop.f32.mrf.mxu1  ;;  %v12900_v14 = vld [vmem:[#allocation7 + $0x40c] sm:$0xf]  ;;  %v10863_v58 = vld [vmem:[#allocation7 + $0x518] sm:$0xf0] }
 0x420   :  { %v7621_v24 = vpop.f32.mrf.mxu0  ;;  %v13979_v62 = vadd.f32 %v7661_v54, %v7648_v0  ;;  %v12932_v12 = vld [vmem:[#allocation7 + $0x50c] sm:$0xf]  ;;  %v11135_v18 = vld [vmem:[#allocation7 + $0x738] sm:$0xf0] }
 0x421   :  { %7920 = vmatpush.bf16.msrb.mxu2 %v11074_v28  ;;  %7893 = vmatpush.bf16.msrb.mxu0 %v10802_v52  ;;  %v10895_v28 = vld [vmem:[#allocation7 + $0x558] sm:$0xf0]  ;;  %v7622_v16 = vadd.f32 %v13304_v20, %v7621_v24  ;;  %v13000_v53 = vld [vmem:[#allocation7 + $0x72c] sm:$0xf] }
 0x422   :  { %v10898_v38 = vor.u32 %v12940_v25, %v10895_v28  ;;  %v10751_v52 = vld [vmem:[#allocation7 + $0x438] sm:$0xf0]  ;;  %v12964_v25 = vld [vmem:[#allocation7 + $0x60c] sm:$0xf] }
 0x423   :  { %7907 = vmatpush.bf16.msrb.mxu1 %v10930_v6  ;;  %7934 = vmatpush.bf16.msrb.mxu3 %v11202_v61  ;;  %v12936_v6 = vld [vmem:[#allocation7 + $0x52c] sm:$0xf]  ;;  %v11007_v61 = vld [vmem:[#allocation7 + $0x638] sm:$0xf0]  ;;  %v10754_v34 = vor.u32 %v12904_v43, %v10751_v52  ;;  %v11138_v43 = vor.u32 %v13000_v53, %v11135_v18 }
 0x424   :  { %v10991_v28 = vld [vmem:[#allocation7 + $0x618] sm:$0xf0]  ;;  %v13056_v24 = vld [vmem:[#allocation7 + $0x8ec] sm:$0xf] }
 0x425   :  { %7921 = vmatpush.bf16.msrb.mxu2 %v11058_v21  ;;  %7894 = vmatpush.bf16.msrb.mxu0 %v10786_v45  ;;  %v7636_v21 = vadd.f32 %v7635_v46, %v7622_v16  ;;  %v10735_v45 = vld [vmem:[#allocation7 + $0x418] sm:$0xf0]  ;;  %v7649_v13 = vpop.f32.mrf.mxu2  ;;  %v13088_v32 = vld [vmem:[#allocation7 + $0x9ec] sm:$0xf] }
 0x426   :  { %v11359_v40 = vld [vmem:[#allocation7 + $0x8f8] sm:$0xf0]  ;;  %v10738_v20 = vor.u32 %v12900_v14, %v10735_v45  ;;  %v13116_v14 = vld [vmem:[#allocation7 + $0xacc] sm:$0xf] }
 0x427   :  { %7908 = vmatpush.bf16.msrb.mxu1 %v10914_v49  ;;  %7935 = vmatpush.bf16.msrb.mxu3 %v11186_v37  ;;  %v10882_v49 = vor.u32 %v12936_v6, %v10879_v7  ;;  %v11154_v37 = vor.u32 %v13004_v35, %v11151_v5  ;;  %v7650_v0 = vadd.f32 %v7649_v13, %v7636_v21  ;;  %v11487_v16 = vld [vmem:[#allocation7 + $0x9f8] sm:$0xf0]  ;;  %v7663_v6 = vpop.f32.mrf.mxu3  ;;  %v13084_v5 = vld [vmem:[#allocation7 + $0x9cc] sm:$0xf] }
 0x428   :  { %v11615_v46 = vld [vmem:[#allocation7 + $0xaf8] sm:$0xf0]  ;;  %v11362_v52 = vor.u32 %v13056_v24, %v11359_v40  ;;  %v11490_v7 = vor.u32 %v13088_v32, %v11487_v16  ;;  %v13080_v53 = vld [vmem:[#allocation7 + $0x9ac] sm:$0xf] }
 0x429   :  { %7922 = vmatpush.bf16.msrb.mxu2 %v11042_v63  ;;  %7895 = vmatpush.bf16.msrb.mxu0 %v10770_v59  ;;  %v11010_v63 = vor.u32 %v12968_v36, %v11007_v61  ;;  %v13120_v59 = vld [vmem:[#allocation7 + $0xaec] sm:$0xf]  ;;  %v11119_v54 = vld [vmem:[#allocation7 + $0x718] sm:$0xf0]  ;;  %v13981_v36 = vadd.f32 %v7663_v6, %v7650_v0 }
 0x42a   :  { %v11618_v21 = vor.u32 %v13120_v59, %v11615_v46  ;;  %v13052_v61 = vld [vmem:[#allocation7 + $0x8cc] sm:$0xf]  ;;  %v11343_v35 = vld [vmem:[#allocation7 + $0x8d8] sm:$0xf0] }
 0x42b   :  { %7909 = vmatpush.bf16.msrb.mxu1 %v10898_v38  ;;  %7936 = vmatpush.bf16.msrb.mxu3 %v11170_v19  ;;  %v10866_v38 = vor.u32 %v12932_v12, %v10863_v58  ;;  %v12996_v19 = vld [vmem:[#allocation7 + $0x70c] sm:$0xf]  ;;  %v11599_v45 = vld [vmem:[#allocation7 + $0xad8] sm:$0xf0]  ;;  %v11346_v58 = vor.u32 %v13052_v61, %v11343_v35 }
 0x42c   :  { %v11122_v12 = vor.u32 %v12996_v19, %v11119_v54  ;;  %v11602_v13 = vor.u32 %v13116_v14, %v11599_v45  ;;  %v11455_v0 = vld [vmem:[#allocation7 + $0x9b8] sm:$0xf0]  ;;  %v13112_v24 = vld [vmem:[#allocation7 + $0xaac] sm:$0xf] }
 0x42d   :  { %7923 = vmatpush.bf16.msrb.mxu2 %v11026_v2  ;;  %7896 = vmatpush.bf16.msrb.mxu0 %v10754_v34  ;;  %v10994_v2 = vor.u32 %v12964_v25, %v10991_v28  ;;  %v11471_v34 = vld [vmem:[#allocation7 + $0x9d8] sm:$0xf0]  ;;  %v13148_v32 = vld [vmem:[#allocation7 + $0xbcc] sm:$0xf]  ;;  %v11458_v59 = vor.u32 %v13080_v53, %v11455_v0 }
 0x42e   :  { %v11474_v25 = vor.u32 %v13084_v5, %v11471_v34  ;;  %v11327_v28 = vld [vmem:[#allocation7 + $0x8b8] sm:$0xf0]  ;;  %v13144_v54 = vld [vmem:[#allocation7 + $0xbac] sm:$0xf] }
 0x42f   :  { %7910 = vmatpush.bf16.msrb.mxu1 %v10882_v49  ;;  %7937 = vmatpush.bf16.msrb.mxu3 %v11154_v37  ;;  %v13152_v49 = vld [vmem:[#allocation7 + $0xbec] sm:$0xf]  ;;  %v11583_v40 = vld [vmem:[#allocation7 + $0xab8] sm:$0xf0] }
 0x430   :  { %v13048_v37 = vld [vmem:[#allocation7 + $0x8ac] sm:$0xf]  ;;  %v11586_v46 = vor.u32 %v13112_v24, %v11583_v40  ;;  %v11567_v6 = vld [vmem:[#allocation7 + $0xa98] sm:$0xf0] }
 0x431   :  { %7924 = vmatpush.bf16.msrb.mxu2 %v11010_v63  ;;  %7897 = vmatpush.bf16.msrb.mxu0 %v10738_v20  ;;  %v11743_v63 = vld [vmem:[#allocation7 + $0xbf8] sm:$0xf0]  ;;  %v11330_v16 = vor.u32 %v13048_v37, %v11327_v28  ;;  %v13040_v34 = vld [vmem:[#allocation7 + $0x86c] sm:$0xf] }
 0x432   :  { %v11746_v18 = vor.u32 %v13152_v49, %v11743_v63  ;;  %v11727_v20 = vld [vmem:[#allocation7 + $0xbd8] sm:$0xf0]  ;;  %v13072_v45 = vld [vmem:[#allocation7 + $0x96c] sm:$0xf] }
 0x433   :  { %7911 = vmatpush.bf16.msrb.mxu1 %v10866_v38  ;;  %7938 = vmatpush.bf16.msrb.mxu3 %v11138_v43  ;;  %v13044_v38 = vld [vmem:[#allocation7 + $0x88c] sm:$0xf]  ;;  %v11439_v43 = vld [vmem:[#allocation7 + $0x998] sm:$0xf0]  ;;  %v7689_v19 = vpop.f32.mrf.mxu1 }
 0x434   :  { %7898 = vmatmul.bf16.vlgmr.msrb.gmra.mxu0 %v13744_v39  ;;  %v13076_v39 = vld [vmem:[#allocation7 + $0x98c] sm:$0xf]  ;;  %v11295_v14 = vld [vmem:[#allocation7 + $0x878] sm:$0xf0] }
 0x435   :  { %7925 = vmatpush.bf16.msrb.mxu2 %v10994_v2  ;;  %7946 = vmatpush.bf16.msra.mxu0 %v11362_v52  ;;  %v11311_v2 = vld [vmem:[#allocation7 + $0x898] sm:$0xf0]  ;;  %v13108_v52 = vld [vmem:[#allocation7 + $0xa8c] sm:$0xf]  ;;  %v11442_v35 = vor.u32 %v13076_v39, %v11439_v43  ;;  %v11298_v37 = vor.u32 %v13040_v34, %v11295_v14 }
 0x436   :  { %7912 = vmatmul.bf16.vlgmr.msrb.gmra.mxu1 %v13746_v57  ;;  %v11730_v57 = vor.u32 %v13148_v32, %v11727_v20  ;;  %v11314_v61 = vor.u32 %v13044_v38, %v11311_v2  ;;  %v11570_v5 = vor.u32 %v13108_v52, %v11567_v6  ;;  %v13036_v53 = vld [vmem:[#allocation7 + $0x84c] sm:$0xf]  ;;  %v11407_v32 = vld [vmem:[#allocation7 + $0x958] sm:$0xf0] }
 0x437   :  { %7960 = vmatpush.bf16.msra.mxu1 %v11490_v7  ;;  %7939 = vmatpush.bf16.msrb.mxu3 %v11122_v12  ;;  %v11711_v7 = vld [vmem:[#allocation7 + $0xbb8] sm:$0xf0]  ;;  %v13068_v0 = vld [vmem:[#allocation7 + $0x94c] sm:$0xf] }
 0x438   :  { %7926 = vmatmul.bf16.vlgmr.msrb.gmra.mxu2 %v13750_v51  ;;  %v7675_v51 = vpop.f32.mrf.mxu0  ;;  %v11714_v63 = vor.u32 %v13144_v54, %v11711_v7  ;;  %v11423_v12 = vld [vmem:[#allocation7 + $0x978] sm:$0xf0]  ;;  %v13100_v20 = vld [vmem:[#allocation7 + $0xa4c] sm:$0xf]  ;;  %v11410_v52 = vor.u32 %v13068_v0, %v11407_v32 }
 0x439   :  { %7974 = vmatpush.bf16.msra.mxu2 %v11618_v21  ;;  %7947 = vmatpush.bf16.msra.mxu0 %v11346_v58  ;;  %v7676_v21 = vadd.f32 %v7675_v51, %v13979_v62  ;;  %v11551_v58 = vld [vmem:[#allocation7 + $0xa78] sm:$0xf0]  ;;  %v11426_v62 = vor.u32 %v13072_v45, %v11423_v12  ;;  %v13136_v38 = vld [vmem:[#allocation7 + $0xb6c] sm:$0xf] }
 0x43a   :  { %7940 = vmatmul.bf16.vlgmr.msrb.gmra.mxu3 %v13754_v8  ;;  %v13104_v8 = vld [vmem:[#allocation7 + $0xa6c] sm:$0xf]  ;;  %v11679_v2 = vld [vmem:[#allocation7 + $0xb78] sm:$0xf0] }
 0x43b   :  { %7961 = vmatpush.bf16.msra.mxu1 %v11474_v25  ;;  %7988 = vmatpush.bf16.msra.mxu3 %v11746_v18  ;;  %v7690_v49 = vadd.f32 %v7689_v19, %v7676_v21  ;;  %v13140_v25 = vld [vmem:[#allocation7 + $0xb8c] sm:$0xf]  ;;  %v11554_v28 = vor.u32 %v13104_v8, %v11551_v58  ;;  %v11279_v18 = vld [vmem:[#allocation7 + $0x858] sm:$0xf0]  ;;  %v7703_v24 = vpop.f32.mrf.mxu2  ;;  %v7691_v43 = vpop.f32.mrf.mxu1  ;;  %v11682_v21 = vor.u32 %v13136_v38, %v11679_v2 }
 0x43c   :  { %v13032_v51 = vld [vmem:[#allocation7 + $0x82c] sm:$0xf]  ;;  %v11263_v19 = vld [vmem:[#allocation7 + $0x838] sm:$0xf0] }
 0x43d   :  { %7975 = vmatpush.bf16.msra.mxu2 %v11602_v13  ;;  %7948 = vmatpush.bf16.msra.mxu0 %v11330_v16  ;;  %v11695_v13 = vld [vmem:[#allocation7 + $0xb98] sm:$0xf0]  ;;  %v13064_v54 = vld [vmem:[#allocation7 + $0x92c] sm:$0xf] }
 0x43e   :  { %v11698_v40 = vor.u32 %v13140_v25, %v11695_v13  ;;  %v11535_v16 = vld [vmem:[#allocation7 + $0xa58] sm:$0xf0]  ;;  %v13132_v45 = vld [vmem:[#allocation7 + $0xb4c] sm:$0xf] }
 0x43f   :  { %7962 = vmatpush.bf16.msra.mxu1 %v11458_v59  ;;  %7989 = vmatpush.bf16.msra.mxu3 %v11730_v57  ;;  %v7704_v59 = vadd.f32 %v7703_v24, %v7690_v49  ;;  %v11282_v57 = vor.u32 %v13036_v53, %v11279_v18  ;;  %v11538_v6 = vor.u32 %v13100_v20, %v11535_v16  ;;  %v11519_v34 = vld [vmem:[#allocation7 + $0xa38] sm:$0xf0]  ;;  %v13060_v25 = vld [vmem:[#allocation7 + $0x90c] sm:$0xf] }
 0x440   :  { %v11266_v49 = vor.u32 %v13032_v51, %v11263_v19  ;;  %v11247_v12 = vld [vmem:[#allocation7 + $0x818] sm:$0xf0]  ;;  %v13128_v18 = vld [vmem:[#allocation7 + $0xb2c] sm:$0xf] }
 0x441   :  { %7976 = vmatpush.bf16.msra.mxu2 %v11586_v46  ;;  %7949 = vmatpush.bf16.msra.mxu0 %v11314_v61  ;;  %v7677_v46 = vpop.f32.mrf.mxu0  ;;  %v7717_v61 = vpop.f32.mrf.mxu3  ;;  %v11375_v13 = vld [vmem:[#allocation7 + $0x918] sm:$0xf0]  ;;  %v13216_v20 = vld [vmem:[#allocation7 + $0xdec] sm:$0xf] }
 0x442   :  { %v7678_v39 = vadd.f32 %v7677_v46, %v13981_v36  ;;  %v13989_v14 = vadd.f32 %v7717_v61, %v7704_v59  ;;  %v11663_v36 = vld [vmem:[#allocation7 + $0xb58] sm:$0xf0]  ;;  %v13248_v46 = vld [vmem:[#allocation7 + $0xeec] sm:$0xf]  ;;  %v11378_v2 = vor.u32 %v13060_v25, %v11375_v13 }
 0x443   :  { %7963 = vmatpush.bf16.msra.mxu1 %v11442_v35  ;;  %7990 = vmatpush.bf16.msra.mxu3 %v11714_v63  ;;  %v11391_v35 = vld [vmem:[#allocation7 + $0x938] sm:$0xf0]  ;;  %v13028_v63 = vld [vmem:[#allocation7 + $0x80c] sm:$0xf] }
 0x444   :  { %v7692_v7 = vadd.f32 %v7691_v43, %v7678_v39  ;;  %v11394_v8 = vor.u32 %v13064_v54, %v11391_v35  ;;  %v11503_v53 = vld [vmem:[#allocation7 + $0xa18] sm:$0xf0]  ;;  %v11250_v16 = vor.u32 %v13028_v63, %v11247_v12  ;;  %v13212_v35 = vld [vmem:[#allocation7 + $0xdcc] sm:$0xf] }
 0x445   :  { %7977 = vmatpush.bf16.msra.mxu2 %v11570_v5  ;;  %7950 = vmatpush.bf16.msra.mxu0 %v11298_v37  ;;  %v13096_v5 = vld [vmem:[#allocation7 + $0xa2c] sm:$0xf]  ;;  %v11647_v0 = vld [vmem:[#allocation7 + $0xb38] sm:$0xf0] }
 0x446   :  { %v11522_v58 = vor.u32 %v13096_v5, %v11519_v34  ;;  %v13092_v37 = vld [vmem:[#allocation7 + $0xa0c] sm:$0xf]  ;;  %v11871_v32 = vld [vmem:[#allocation7 + $0xcf8] sm:$0xf0] }
 0x447   :  { %7964 = vmatpush.bf16.msra.mxu1 %v11426_v62  ;;  %7991 = vmatpush.bf16.msra.mxu3 %v11698_v40  ;;  %v7705_v62 = vpop.f32.mrf.mxu2  ;;  %v13184_v40 = vld [vmem:[#allocation7 + $0xcec] sm:$0xf]  ;;  %v11999_v59 = vld [vmem:[#allocation7 + $0xdf8] sm:$0xf0]  ;;  %v11506_v39 = vor.u32 %v13092_v37, %v11503_v53 }
 0x448   :  { %v7706_v24 = vadd.f32 %v7705_v62, %v7692_v7  ;;  %v12127_v38 = vld [vmem:[#allocation7 + $0xef8] sm:$0xf0]  ;;  %v11874_v43 = vor.u32 %v13184_v40, %v11871_v32  ;;  %v12002_v19 = vor.u32 %v13216_v20, %v11999_v59  ;;  %v13244_v34 = vld [vmem:[#allocation7 + $0xecc] sm:$0xf] }
 0x449   :  { %7978 = vmatpush.bf16.msra.mxu2 %v11554_v28  ;;  %7951 = vmatpush.bf16.msra.mxu0 %v11282_v57  ;;  %v11666_v28 = vor.u32 %v13132_v45, %v11663_v36  ;;  %v11650_v57 = vor.u32 %v13128_v18, %v11647_v0  ;;  %v11631_v51 = vld [vmem:[#allocation7 + $0xb18] sm:$0xf0]  ;;  %v12130_v54 = vor.u32 %v13248_v46, %v12127_v38  ;;  %v13280_v36 = vld [vmem:[#allocation7 + $0xfec] sm:$0xf] }
 0x44a   :  { %v11855_v61 = vld [vmem:[#allocation7 + $0xcd8] sm:$0xf0]  ;;  %v13176_v25 = vld [vmem:[#allocation7 + $0xcac] sm:$0xf] }
 0x44b   :  { %7965 = vmatpush.bf16.msra.mxu1 %v11410_v52  ;;  %7992 = vmatpush.bf16.msra.mxu3 %v11682_v21  ;;  %v7719_v52 = vpop.f32.mrf.mxu3  ;;  %v13180_v21 = vld [vmem:[#allocation7 + $0xccc] sm:$0xf]  ;;  %v11983_v5 = vld [vmem:[#allocation7 + $0xdd8] sm:$0xf0] }
 0x44c   :  { %v13991_v7 = vadd.f32 %v7719_v52, %v7706_v24  ;;  %v12111_v45 = vld [vmem:[#allocation7 + $0xed8] sm:$0xf0]  ;;  %v11858_v12 = vor.u32 %v13180_v21, %v11855_v61  ;;  %v13208_v37 = vld [vmem:[#allocation7 + $0xdac] sm:$0xf] }
 0x44d   :  { %7979 = vmatpush.bf16.msra.mxu2 %v11538_v6  ;;  %7952 = vmatpush.bf16.msra.mxu0 %v11266_v49  ;;  %v13124_v6 = vld [vmem:[#allocation7 + $0xb0c] sm:$0xf]  ;;  %v12255_v49 = vld [vmem:[#allocation7 + $0xff8] sm:$0xf0] }
 0x44e   :  { %v11634_v63 = vor.u32 %v13124_v6, %v11631_v51  ;;  %v11839_v13 = vld [vmem:[#allocation7 + $0xcb8] sm:$0xf0]  ;;  %v12258_v62 = vor.u32 %v13280_v36, %v12255_v49  ;;  %v13240_v53 = vld [vmem:[#allocation7 + $0xeac] sm:$0xf] }
 0x44f   :  { %7966 = vmatpush.bf16.msra.mxu1 %v11394_v8  ;;  %7993 = vmatpush.bf16.msra.mxu3 %v11666_v28  ;;  %v11986_v8 = vor.u32 %v13212_v35, %v11983_v5  ;;  %v11967_v28 = vld [vmem:[#allocation7 + $0xdb8] sm:$0xf0]  ;;  %v13276_v0 = vld [vmem:[#allocation7 + $0xfcc] sm:$0xf]  ;;  %v11842_v40 = vor.u32 %v13176_v25, %v11839_v13 }
 0x450   :  { %v12095_v18 = vld [vmem:[#allocation7 + $0xeb8] sm:$0xf0]  ;;  %v11970_v32 = vor.u32 %v13208_v37, %v11967_v28  ;;  %v13236_v38 = vld [vmem:[#allocation7 + $0xe8c] sm:$0xf] }
 0x451   :  { %7980 = vmatpush.bf16.msra.mxu2 %v11522_v58  ;;  %7953 = vmatpush.bf16.msra.mxu0 %v11250_v16  ;;  %v12114_v58 = vor.u32 %v13244_v34, %v12111_v45  ;;  %v12239_v24 = vld [vmem:[#allocation7 + $0xfd8] sm:$0xf0]  ;;  %v12098_v20 = vor.u32 %v13240_v53, %v12095_v18  ;;  %v13172_v16 = vld [vmem:[#allocation7 + $0xc8c] sm:$0xf] }
 0x452   :  { %v11823_v59 = vld [vmem:[#allocation7 + $0xc98] sm:$0xf0]  ;;  %v13200_v61 = vld [vmem:[#allocation7 + $0xd6c] sm:$0xf] }
 0x453   :  { %7967 = vmatpush.bf16.msra.mxu1 %v11378_v2  ;;  %7994 = vmatpush.bf16.msra.mxu3 %v11650_v57  ;;  %v11951_v46 = vld [vmem:[#allocation7 + $0xd98] sm:$0xf0]  ;;  %v13272_v57 = vld [vmem:[#allocation7 + $0xfac] sm:$0xf]  ;;  %v11826_v6 = vor.u32 %v13172_v16, %v11823_v59 }
 0x454   :  { %7954 = vmatmul.bf16.vlgmr.msra.gmra.mxu0 %v13820_v26  ;;  %v13204_v26 = vld [vmem:[#allocation7 + $0xd8c] sm:$0xf]  ;;  %v12079_v2 = vld [vmem:[#allocation7 + $0xe98] sm:$0xf0] }
 0x455   :  { %7981 = vmatpush.bf16.msra.mxu2 %v11506_v39  ;;  %8002 = vmatpush.bf16.msrb.mxu0 %v11874_v43  ;;  %v7745_v39 = vpop.f32.mrf.mxu1  ;;  %v12223_v43 = vld [vmem:[#allocation7 + $0xfb8] sm:$0xf0]  ;;  %v11954_v51 = vor.u32 %v13204_v26, %v11951_v46  ;;  %v13268_v36 = vld [vmem:[#allocation7 + $0xf8c] sm:$0xf] }
 0x456   :  { %7968 = vmatmul.bf16.vlgmr.msra.gmra.mxu1 %v13822_v33  ;;  %v12242_v33 = vor.u32 %v13276_v0, %v12239_v24  ;;  %v11807_v21 = vld [vmem:[#allocation7 + $0xc78] sm:$0xf0]  ;;  %v12226_v5 = vor.u32 %v13272_v57, %v12223_v43  ;;  %v13196_v25 = vld [vmem:[#allocation7 + $0xd4c] sm:$0xf] }
 0x457   :  { %8016 = vmatpush.bf16.msrb.mxu1 %v12002_v19  ;;  %7995 = vmatpush.bf16.msra.mxu3 %v11634_v63  ;;  %v12082_v19 = vor.u32 %v13236_v38, %v12079_v2  ;;  %v11935_v34 = vld [vmem:[#allocation7 + $0xd78] sm:$0xf0]  ;;  %v13228_v28 = vld [vmem:[#allocation7 + $0xe4c] sm:$0xf] }
 0x458   :  { %7982 = vmatmul.bf16.vlgmr.msra.gmra.mxu2 %v13826_v50  ;;  %v7731_v50 = vpop.f32.mrf.mxu0  ;;  %v12063_v45 = vld [vmem:[#allocation7 + $0xe78] sm:$0xf0]  ;;  %v13264_v24 = vld [vmem:[#allocation7 + $0xf6c] sm:$0xf] }
 0x459   :  { %8030 = vmatpush.bf16.msrb.mxu2 %v12130_v54  ;;  %8003 = vmatpush.bf16.msrb.mxu0 %v11858_v12  ;;  %v7732_v52 = vadd.f32 %v7731_v50, %v13989_v14  ;;  %v13168_v54 = vld [vmem:[#allocation7 + $0xc6c] sm:$0xf]  ;;  %v12207_v49 = vld [vmem:[#allocation7 + $0xf98] sm:$0xf0]  ;;  %v11938_v14 = vor.u32 %v13200_v61, %v11935_v34 }
 0x45a   :  { %7996 = vmatmul.bf16.vlgmr.msra.gmra.mxu3 %v13828_v9  ;;  %v13232_v9 = vld [vmem:[#allocation7 + $0xe6c] sm:$0xf]  ;;  %v11810_v63 = vor.u32 %v13168_v54, %v11807_v21  ;;  %v12210_v37 = vor.u32 %v13268_v36, %v12207_v49  ;;  %v12047_v53 = vld [vmem:[#allocation7 + $0xe58] sm:$0xf0] }
 0x45b   :  { %8017 = vmatpush.bf16.msrb.mxu1 %v11986_v8  ;;  %8044 = vmatpush.bf16.msrb.mxu3 %v12258_v62  ;;  %v7746_v35 = vadd.f32 %v7745_v39, %v7732_v52  ;;  %v12066_v12 = vor.u32 %v13232_v9, %v12063_v45  ;;  %v13164_v8 = vld [vmem:[#allocation7 + $0xc4c] sm:$0xf]  ;;  %v7759_v13 = vpop.f32.mrf.mxu2  ;;  %v11919_v62 = vld [vmem:[#allocation7 + $0xd58] sm:$0xf0]  ;;  %v12050_v26 = vor.u32 %v13228_v28, %v12047_v53 }
 0x45c   :  { %v11922_v59 = vor.u32 %v13196_v25, %v11919_v62  ;;  %v11775_v46 = vld [vmem:[#allocation7 + $0xc38] sm:$0xf0]  ;;  %v13192_v38 = vld [vmem:[#allocation7 + $0xd2c] sm:$0xf] }
 0x45d   :  { %8031 = vmatpush.bf16.msrb.mxu2 %v12114_v58  ;;  %8004 = vmatpush.bf16.msrb.mxu0 %v11842_v40  ;;  %v11791_v58 = vld [vmem:[#allocation7 + $0xc58] sm:$0xf0]  ;;  %v7760_v18 = vadd.f32 %v7759_v13, %v7746_v35  ;;  %v7747_v16 = vpop.f32.mrf.mxu1  ;;  %v7773_v39 = vpop.f32.mrf.mxu3  ;;  %v13224_v43 = vld [vmem:[#allocation7 + $0xe2c] sm:$0xf] }
 0x45e   :  { %v12191_v40 = vld [vmem:[#allocation7 + $0xf78] sm:$0xf0]  ;;  %v13156_v61 = vld [vmem:[#allocation7 + $0xc0c] sm:$0xf] }
 0x45f   :  { %8018 = vmatpush.bf16.msrb.mxu1 %v11970_v32  ;;  %8045 = vmatpush.bf16.msrb.mxu3 %v12242_v33  ;;  %v13160_v33 = vld [vmem:[#allocation7 + $0xc2c] sm:$0xf]  ;;  %v12194_v50 = vor.u32 %v13264_v24, %v12191_v40  ;;  %v11903_v57 = vld [vmem:[#allocation7 + $0xd38] sm:$0xf0] }
 0x460   :  { %v7733_v0 = vpop.f32.mrf.mxu0  ;;  %v12031_v52 = vld [vmem:[#allocation7 + $0xe38] sm:$0xf0]  ;;  %v11906_v54 = vor.u32 %v13192_v38, %v11903_v57  ;;  %v13220_v36 = vld [vmem:[#allocation7 + $0xe0c] sm:$0xf] }
 0x461   :  { %8032 = vmatpush.bf16.msrb.mxu2 %v12098_v20  ;;  %8005 = vmatpush.bf16.msrb.mxu0 %v11826_v6  ;;  %v7734_v32 = vadd.f32 %v7733_v0, %v13991_v7  ;;  %v11794_v20 = vor.u32 %v13164_v8, %v11791_v58  ;;  %v13999_v6 = vadd.f32 %v7773_v39, %v7760_v18  ;;  %v12175_v7 = vld [vmem:[#allocation7 + $0xf58] sm:$0xf0]  ;;  %v13252_v28 = vld [vmem:[#allocation7 + $0xf0c] sm:$0xf] }
 0x462   :  { %v12034_v21 = vor.u32 %v13224_v43, %v12031_v52  ;;  %v11759_v35 = vld [vmem:[#allocation7 + $0xc18] sm:$0xf0]  ;;  %v13305_v43 = vld [vmem:[#allocation2 + $0x20] sm:$0xff] }
 0x463   :  { %8019 = vmatpush.bf16.msrb.mxu1 %v11954_v51  ;;  %8046 = vmatpush.bf16.msrb.mxu3 %v12226_v5  ;;  %v7748_v2 = vadd.f32 %v7747_v16, %v7734_v32  ;;  %v13260_v51 = vld [vmem:[#allocation7 + $0xf4c] sm:$0xf]  ;;  %v7761_v34 = vpop.f32.mrf.mxu2  ;;  %v11887_v45 = vld [vmem:[#allocation7 + $0xd18] sm:$0xf0]  ;;  %v11762_v8 = vor.u32 %v13156_v61, %v11759_v35  ;;  %v7174_v52 = vadd.f32 %v13305_v43, %v13881_v55 }
 0x464   :  { %v13188_v5 = vld [vmem:[#allocation7 + $0xd0c] sm:$0xf]  ;;  %v12178_v9 = vor.u32 %v13260_v51, %v12175_v7  ;;  %v12015_v49 = vld [vmem:[#allocation7 + $0xe18] sm:$0xf0] }
 0x465   :  { %8033 = vmatpush.bf16.msrb.mxu2 %v12082_v19  ;;  %8006 = vmatpush.bf16.msrb.mxu0 %v11810_v63  ;;  %v11778_v19 = vor.u32 %v13160_v33, %v11775_v46  ;;  %v7762_v63 = vadd.f32 %v7761_v34, %v7748_v2  ;;  %v11890_v58 = vor.u32 %v13188_v5, %v11887_v45  ;;  %v12143_v53 = vld [vmem:[#allocation7 + $0xf18] sm:$0xf0] }
 0x466   :  { %v12018_v25 = vor.u32 %v13220_v36, %v12015_v49  ;;  %v12146_v18 = vor.u32 %v13252_v28, %v12143_v53  ;;  %v13306_v7 = vld [vmem:[#allocation2 + $0x18] sm:$0xff] }
 0x467   :  { %8020 = vmatpush.bf16.msrb.mxu1 %v11938_v14  ;;  %8047 = vmatpush.bf16.msrb.mxu3 %v12210_v37  ;;  %v13256_v14 = vld [vmem:[#allocation7 + $0xf2c] sm:$0xf]  ;;  %v7775_v37 = vpop.f32.mrf.mxu3  ;;  %v13307_v49 = vld [vmem:[#allocation2 + $0x38] sm:$0xff] }
 0x468   :  { %v14001_v62 = vadd.f32 %v7775_v37, %v7762_v63 }
 0x469   :  { %8034 = vmatpush.bf16.msrb.mxu2 %v12066_v12  ;;  %8007 = vmatpush.bf16.msrb.mxu0 %v11794_v20  ;;  %v12159_v12 = vld [vmem:[#allocation7 + $0xf38] sm:$0xf0] }
 0x46a   :  { %v12162_v13 = vor.u32 %v13256_v14, %v12159_v12 }
 0x46b   :  { %8021 = vmatpush.bf16.msrb.mxu1 %v11922_v59  ;;  %8048 = vmatpush.bf16.msrb.mxu3 %v12194_v50 }
 0x46d   :  { %8035 = vmatpush.bf16.msrb.mxu2 %v12050_v26  ;;  %8008 = vmatpush.bf16.msrb.mxu0 %v11778_v19 }
 0x46f   :  { %8022 = vmatpush.bf16.msrb.mxu1 %v11906_v54  ;;  %8049 = vmatpush.bf16.msrb.mxu3 %v12178_v9  ;;  %v7188_v54 = vadd.f32 %v13883_v17, %v7174_v52 }
 0x471   :  { %8036 = vmatpush.bf16.msrb.mxu2 %v12034_v21  ;;  %8009 = vmatpush.bf16.msrb.mxu0 %v11762_v8  ;;  %v7787_v0 = vpop.f32.mrf.mxu0  ;;  %v7202_v61 = vadd.f32 %v13888_v4, %v7188_v54 }
 0x473   :  { %8023 = vmatpush.bf16.msrb.mxu1 %v11890_v58  ;;  %8050 = vmatpush.bf16.msrb.mxu3 %v12162_v13  ;;  %v14007_v24 = vpop.f32.mrf.mxu1  ;;  %v7216_v45 = vadd.f32 %v13891_v47, %v7202_v61 }
 0x474   :  { %8010 = vmatmul.bf16.vlgmr.msrb.gmra.mxu0 %v13863_v1 }
 0x475   :  { %8037 = vmatpush.bf16.msrb.mxu2 %v12018_v25  ;;  %v7230_v55 = vadd.f32 %v13896_v22, %v7216_v45 }
 0x476   :  { %8024 = vmatmul.bf16.vlgmr.msrb.gmra.mxu1 %v13867_v31 }
 0x477   :  { %8051 = vmatpush.bf16.msrb.mxu3 %v12146_v18  ;;  %v7244_v17 = vadd.f32 %v13898_v11, %v7230_v55 }
 0x478   :  { %8038 = vmatmul.bf16.vlgmr.msrb.gmra.mxu2 %v13865_v42 }
 0x479   :  { %v14011_v32 = vpop.f32.mrf.mxu0  ;;  %v7258_v28 = vadd.f32 %v13903_v10, %v7244_v17  ;;  %v7788_v10 = vadd.f32 %v7787_v0, %v13999_v6  ;;  %v14118_v17 = vld [vmem:[#allocation23_spill] sm:$0xff] }
 0x47a   :  { %8052 = vmatmul.bf16.vlgmr.msrb.gmra.mxu3 %v13872_v41  ;;  %v7790_v6 = vadd.f32 %v14011_v32, %v14001_v62 }
 0x47b   :  { %v14009_v40 = vpop.f32.mrf.mxu2  ;;  %v14015_v16 = vpop.f32.mrf.mxu1  ;;  %v7802_v54 = vadd.f32 %v14007_v24, %v7788_v10  ;;  %v8058_v24 = vadd.f32 %v13971_v3, %v13939_v44 }
 0x47d   :  { %v14013_v20 = vpop.f32.mrf.mxu3 }
 0x483   :  { %v14017_v59 = vpop.f32.mrf.mxu2 }
 0x485   :  { %v14019_v31 = vpop.f32.mrf.mxu3 }
 0x491   :  { %v7843_v1 = vpop.f32.mrf.mxu0 }
 0x492   :  { %v7844_v19 = vadd.f32 %v13306_v7, %v7843_v1 }
 0x493   :  { %v7857_v42 = vpop.f32.mrf.mxu1 }
 0x494   :  { %v7858_v35 = vadd.f32 %v7857_v42, %v7844_v19 }
 0x499   :  { %v7845_v33 = vpop.f32.mrf.mxu0 }
 0x49a   :  { %v7846_v63 = vadd.f32 %v13307_v49, %v7845_v33 }
 0x49b   :  { %v7871_v26 = vpop.f32.mrf.mxu2  ;;  %v7859_v46 = vpop.f32.mrf.mxu1 }
 0x49c   :  { %v7872_v34 = vadd.f32 %v7871_v26, %v7858_v35  ;;  %v7860_v58 = vadd.f32 %v7859_v46, %v7846_v63  ;;  %v7272_v26 = vadd.f32 %v13906_v15, %v7258_v28  ;;  %v7816_v35 = vadd.f32 %v14009_v40, %v7802_v54 }
 0x49d   :  { %v7885_v41 = vpop.f32.mrf.mxu3  ;;  %v7804_v63 = vadd.f32 %v14015_v16, %v7790_v6 }
 0x49e   :  { %v7886_v14 = vadd.f32 %v7885_v41, %v7872_v34  ;;  %v7286_v41 = vadd.f32 %v13911_v56, %v7272_v26 }
 0x49f   :  { %v7818_v32 = vadd.f32 %v14017_v59, %v7804_v63 }
 0x4a3   :  { %v7873_v38 = vpop.f32.mrf.mxu2 }
 0x4a4   :  { %v7874_v13 = vadd.f32 %v7873_v38, %v7860_v58 }
 0x4a5   :  { %v7887_v50 = vpop.f32.mrf.mxu3 }
 0x4a6   :  { %v7888_v53 = vadd.f32 %v7887_v50, %v7874_v13  ;;  %v7832_v13 = vadd.f32 %v14019_v31, %v7818_v32 }
 0x4b1   :  { %v7899_v2 = vpop.f32.mrf.mxu0 }
 0x4b2   :  { %v7900_v12 = vadd.f32 %v7899_v2, %v7886_v14 }
 0x4b3   :  { %v7913_v39 = vpop.f32.mrf.mxu1 }
 0x4b4   :  { %v7914_v4 = vadd.f32 %v7913_v39, %v7900_v12  ;;  %v7300_v39 = vadd.f32 %v13913_v60, %v7286_v41  ;;  %v14117_v12 = vld [vmem:[#allocation22_spill] sm:$0xff] }
 0x4b9   :  { %v7901_v51 = vpop.f32.mrf.mxu0 }
 0x4ba   :  { %v7902_v1 = vadd.f32 %v7901_v51, %v7888_v53  ;;  %v7314_v51 = vadd.f32 %v13918_v29, %v7300_v39  ;;  %v7830_v29 = vadd.f32 %v14013_v20, %v7816_v35 }
 0x4bb   :  { %v7927_v57 = vpop.f32.mrf.mxu2  ;;  %v7915_v5 = vpop.f32.mrf.mxu1 }
 0x4bc   :  { %v7928_v18 = vadd.f32 %v7927_v57, %v7914_v4  ;;  %v7916_v46 = vadd.f32 %v7915_v5, %v7902_v1  ;;  %v8059_v55 = vadd.f32 %v8058_v24, %v7830_v29 }
 0x4bd   :  { %v7941_v21 = vpop.f32.mrf.mxu3 }
 0x4be   :  { %v7942_v42 = vadd.f32 %v7941_v21, %v7928_v18  ;;  %v7328_v21 = vadd.f32 %v13934_v23, %v7314_v51 }
 0x4c0   :  { %v7342_v34 = vadd.f32 %v13924_v30, %v7328_v21 }
 0x4c2   :  { %v7356_v49 = vadd.f32 %v13926_v48, %v7342_v34 }
 0x4c3   :  { %v7929_v9 = vpop.f32.mrf.mxu2 }
 0x4c4   :  { %v7930_v11 = vadd.f32 %v7929_v9, %v7916_v46  ;;  %v7370_v62 = vadd.f32 %v14117_v12, %v7356_v49 }
 0x4c5   :  { %v7943_v8 = vpop.f32.mrf.mxu3 }
 0x4c6   :  { %v7944_v50 = vadd.f32 %v7943_v8, %v7930_v11 }
 0x4d1   :  { %v7955_v36 = vpop.f32.mrf.mxu0 }
 0x4d2   :  { %v7956_v22 = vadd.f32 %v7955_v36, %v7942_v42 }
 0x4d3   :  { %v7969_v25 = vpop.f32.mrf.mxu1 }
 0x4d4   :  { %v7970_v43 = vadd.f32 %v7969_v25, %v7956_v22  ;;  %v7384_v25 = vadd.f32 %v14118_v17, %v7370_v62 }
 0x4d6   :  { %v8063_v48 = vadd.f32 %v13973_v27, %v7384_v25 }
 0x4d8   :  { %v8064_v28 = vadd.f32 %v8063_v48, %v7832_v13 }
 0x4d9   :  { %v7957_v47 = vpop.f32.mrf.mxu0 }
 0x4da   :  { %v7958_v7 = vadd.f32 %v7957_v47, %v7944_v50  ;;  %v13419_v47 = vmov 512.0  }
 0x4db   :  { %v7983_v37 = vpop.f32.mrf.mxu2  ;;  %v7971_v2 = vpop.f32.mrf.mxu1  ;;  %13294 = vrcp.f32 %v13419_v47 }
 0x4dc   :  { %v7984_v57 = vadd.f32 %v7983_v37, %v7970_v43  ;;  %v7972_v5 = vadd.f32 %v7971_v2, %v7958_v7 }
 0x4dd   :  { %v7997_v33 = vpop.f32.mrf.mxu3 }
 0x4de   :  { %v7998_v15 = vadd.f32 %v7997_v33, %v7984_v57 }
 0x4e1   :  { %v13295_v59 = vpop.eup %13294 }
 0x4e2   :  { %v8069_v1 = vmul.f32 512.0, %v13295_v59  ;;  %vm8073_vm0 = vweird.f32 %v13295_v59 }
 0x4e3   :  { %v7985_v38 = vpop.f32.mrf.mxu2 }
 0x4e4   :  { %v7986_v0 = vadd.f32 %v7985_v38, %v7972_v5  ;;  %v8070_v42 = vsub.f32 1.0, %v8069_v1 }
 0x4e5   :  { %v7999_v19 = vpop.f32.mrf.mxu3 }
 0x4e6   :  { %v8000_v36 = vadd.f32 %v7999_v19, %v7986_v0  ;;  %v8071_v26 = vmul.f32 %v13295_v59, %v8070_v42 }
 0x4e8   :  { %v8072_v33 = vadd.f32 %v13295_v59, %v8071_v26 }
 0x4ea   :  { %v8074_v22 = vsel %vm8073_vm0, %v13295_v59, %v8072_v33 }
 0x4f1   :  { %v8011_v52 = vpop.f32.mrf.mxu0 }
 0x4f2   :  { %v8012_v56 = vadd.f32 %v8011_v52, %v7998_v15 }
 0x4f3   :  { %v8025_v61 = vpop.f32.mrf.mxu1 }
 0x4f4   :  { %v8026_v9 = vadd.f32 %v8025_v61, %v8012_v56 }
 0x4f9   :  { %v8013_v45 = vpop.f32.mrf.mxu0 }
 0x4fa   :  { %v8014_v14 = vadd.f32 %v8013_v45, %v8000_v36 }
 0x4fb   :  { %v8039_v60 = vpop.f32.mrf.mxu2  ;;  %v8027_v8 = vpop.f32.mrf.mxu1 }
 0x4fc   :  { %v8040_v23 = vadd.f32 %v8039_v60, %v8026_v9  ;;  %v8028_v4 = vadd.f32 %v8027_v8, %v8014_v14 }
 0x4fd   :  { %v8053_v40 = vpop.f32.mrf.mxu3 }
 0x4fe   :  { %v8054_v30 = vadd.f32 %v8053_v40, %v8040_v23 }
 0x500   :  { %v8060_v20 = vadd.f32 %v8059_v55, %v8054_v30 }
 0x502   :  { %8061 = vadd.xlane.f32.xlu0 %v8060_v20 }
 0x503   :  { %v8041_v58 = vpop.f32.mrf.mxu2 }
 0x504   :  { %v8042_v37 = vadd.f32 %v8041_v58, %v8028_v4 }
 0x505   :  { %v8055_v16 = vpop.f32.mrf.mxu3 }
 0x506   :  { %v8056_v53 = vadd.f32 %v8055_v16, %v8042_v37 }
 0x508   :  { %v8065_v18 = vadd.f32 %v8064_v28, %v8056_v53 }
 0x50a   :  { %8066 = vadd.xlane.f32.xlu0 %v8065_v18 }
 0x575   :  { %v8062_v31 = vpop.xlane.xlu0 %8061 }
 0x576   :  { %v8075_v41 = vmul.f32 %v8074_v22, %v8062_v31 }
 0x578   :  { %v8077_v46 = vsub.f32 %v13939_v44, %v8075_v41  ;;  %v8078_v2 = vsub.f32 %v13971_v3, %v8075_v41  ;;  %v8079_v11 = vsub.f32 %v7830_v29, %v8075_v41  ;;  %v8080_v43 = vsub.f32 %v8054_v30, %v8075_v41 }
 0x57a   :  { %v8085_v38 = vmul.f32 %v8077_v46, %v8077_v46  ;;  %v8086_v39 = vmul.f32 %v8078_v2, %v8078_v2  ;;  %v8087_v52 = vmul.f32 %v8079_v11, %v8079_v11  ;;  %v8088_v51 = vmul.f32 %v8080_v43, %v8080_v43 }
 0x57c   :  { %v8093_v10 = vadd.f32 %v8086_v39, %v8085_v38 }
 0x57d   :  { %v8067_v50 = vpop.xlane.xlu0 %8066 }
 0x57e   :  { %v8076_v57 = vmul.f32 %v8074_v22, %v8067_v50  ;;  %v8094_v7 = vadd.f32 %v8093_v10, %v8087_v52 }
 0x580   :  { %v8081_v15 = vsub.f32 %v7384_v25, %v8076_v57  ;;  %v8082_v19 = vsub.f32 %v13973_v27, %v8076_v57  ;;  %v8095_v54 = vadd.f32 %v8094_v7, %v8088_v51  ;;  %v8083_v56 = vsub.f32 %v7832_v13, %v8076_v57 }
 0x581   :  { %v8084_v21 = vsub.f32 %v8056_v53, %v8076_v57 }
 0x582   :  { %8096 = vadd.xlane.f32.xlu1 %v8095_v54  ;;  %v8089_v44 = vmul.f32 %v8081_v15, %v8081_v15  ;;  %v8090_v61 = vmul.f32 %v8082_v19, %v8082_v19  ;;  %v8091_v3 = vmul.f32 %v8083_v56, %v8083_v56 }
 0x583   :  { %v8092_v5 = vmul.f32 %v8084_v21, %v8084_v21 }
 0x584   :  { %v8098_v35 = vadd.f32 %v8090_v61, %v8089_v44 }
 0x586   :  { %v8099_v60 = vadd.f32 %v8098_v35, %v8091_v3 }
 0x588   :  { %v8100_v34 = vadd.f32 %v8099_v60, %v8092_v5 }
 0x58a   :  { %8101 = vadd.xlane.f32.xlu1 %v8100_v34 }
 0x5f5   :  { %v8097_v6 = vpop.xlane.xlu1 %8096 }
 0x5f6   :  { %v8103_v29 = vmul.f32 %v8097_v6, %v8074_v22 }
 0x5f8   :  { %v8105_v0 = vadd.f32 1e-05, %v8103_v29 }
 0x5fa   :  { %13296 = vrsqrt.f32 %v8105_v0  ;;  %vm8113_vm2 = vweird.f32 %v8105_v0 }
 0x5fd   :  { %v8102_v9 = vpop.xlane.xlu1 %8101 }
 0x5fe   :  { %v8104_v45 = vmul.f32 %v8102_v9, %v8074_v22 }
 0x600   :  { %v13297_v24 = vpop.eup %13296  ;;  %v8106_v27 = vadd.f32 1e-05, %v8104_v45 }
 0x601   :  { %v8108_v36 = vmul.f32 %v13297_v24, %v8105_v0  ;;  %vm8114_vm1 = vweird.f32 %v13297_v24 }
 0x602   :  { %13298 = vrsqrt.f32 %v8106_v27  ;;  %vm8115_vm3 = vmor %vm8113_vm2, %vm8114_vm1  ;;  %vm8123_vm5 = vweird.f32 %v8106_v27 }
 0x603   :  { %v8109_v23 = vmul.f32 %v13297_v24, %v8108_v36 }
 0x605   :  { %v8110_v49 = vmul.f32 0.5, %v8109_v23 }
 0x607   :  { %v8111_v40 = vsub.f32 1.5, %v8110_v49 }
 0x608   :  { %v13299_v63 = vpop.eup %13298 }
 0x609   :  { %v8112_v14 = vmul.f32 %v13297_v24, %v8111_v40  ;;  %v8118_v30 = vmul.f32 %v13299_v63, %v8106_v27  ;;  %vm8124_vm4 = vweird.f32 %v13299_v63 }
 0x60a   :  { %vm8125_vm6 = vmor %vm8123_vm5, %vm8124_vm4 }
 0x60b   :  { %v8116_v55 = vsel %vm8115_vm3, %v13297_v24, %v8112_v14  ;;  %v8119_v12 = vmul.f32 %v13299_v63, %v8118_v30 }
 0x60c   :  { %v8127_v62 = vmul.f32 %v8116_v55, %v8077_v46  ;;  %v8128_v32 = vmul.f32 %v8116_v55, %v8078_v2  ;;  %v8129_v20 = vmul.f32 %v8116_v55, %v8079_v11  ;;  %v8130_v8 = vmul.f32 %v8116_v55, %v8080_v43 }
 0x60d   :  { %v8120_v58 = vmul.f32 0.5, %v8119_v12 }
 0x60e   :  { %8135 = vst [vmem:[#allocation8] sm:$0xff] %v8127_v62 }
 0x60f   :  { %8136 = vst [vmem:[#allocation8 + $0x8] sm:$0xff] %v8128_v32  ;;  %v8121_v17 = vsub.f32 1.5, %v8120_v58 }
 0x610   :  { %8137 = vst [vmem:[#allocation8 + $0x10] sm:$0xff] %v8129_v20 }
 0x611   :  { %8138 = vst [vmem:[#allocation8 + $0x18] sm:$0xff] %v8130_v8  ;;  %v8122_v25 = vmul.f32 %v13299_v63, %v8121_v17 }
 0x613   :  { %v8126_v13 = vsel %vm8125_vm6, %v13299_v63, %v8122_v25 }
 0x614   :  { %v8131_v4 = vmul.f32 %v8126_v13, %v8081_v15  ;;  %v8132_v48 = vmul.f32 %v8126_v13, %v8082_v19  ;;  %v8133_v37 = vmul.f32 %v8126_v13, %v8083_v56  ;;  %v8134_v16 = vmul.f32 %v8126_v13, %v8084_v21 }
 0x616   :  { %8139 = vst [vmem:[#allocation8 + $0x20] sm:$0xff] %v8131_v4 }
 0x617   :  { %8140 = vst [vmem:[#allocation8 + $0x28] sm:$0xff] %v8132_v48 }
 0x618   :  { %8141 = vst [vmem:[#allocation8 + $0x30] sm:$0xff] %v8133_v37 }
 0x619   :  { %8142 = vst [vmem:[#allocation8 + $0x38] sm:$0xff] %v8134_v16 }
 0x61a   :  { %8155 = dma.vmem_to_hbm [thread:$0]  %s8148_s4, 1024, %s8150_s7, [#allocation4], %s13414_s24, %s13414_s24, %s13415_s25  }
 0x61b   :  { %13408 = dma.done.wait [#allocation4], 1024  }
 0x61c   :  { %13409 = vsyncadd [#allocation4], 4294966272 }
 0x61d   :  { %8160 = vsyncpa [#allocation3], 1 }
 0x61e   :  { %8161 = vsyncpa [#allocation6], 1 }
 0x61f   :  { %8162 = vsyncpa [#allocation4], 1 }

</bundles_post_ra>
